<compile_context>
chip_gen: v7x
topology: tpu7x:2x2x1
jax: 0.10.0
libtpu: 0.0.40
codegen_flags: <defaults>
</compile_context>

<pallas_src>
import functools

import numpy as np
import jax
import jax.numpy as jnp
from jax import lax
from jax.experimental import pallas as pl
from jax.experimental.pallas import tpu as pltpu

# MXU input dtype.  float32 preserves the PyTorch module's numerics; on v6e/v7x
# set to jnp.bfloat16 (accumulation stays f32 via preferred_element_type) to halve
# HBM/VMEM traffic of the 3136-row FC weight.  Kept f32 here so the strict
# correctness check below holds on every generation.
MXU_DTYPE = jnp.float32

_TAPS_2X2 = tuple((dh, dw) for dh in range(2) for dw in range(2))
_TAPS_3X3 = tuple((dh, dw) for dh in range(3) for dw in range(3))


# ----------------------------- Pallas kernels ------------------------------

def _conv_taps_kernel(x_ref, w_ref, b_ref, o_ref, *, out_h, out_w, taps):
    """One image per grid step.  For every output row, gather the receptive-field
    patch in-register from the VMEM-resident input (unit-stride slices only,
    lane-concatenated to the full contraction K), run one MXU GEMM and fuse
    bias + ReLU.  No im2col buffer ever touches HBM."""
    bias = b_ref[...]                                            # (1, OC) f32
    for oh in range(out_h):
        parts = [x_ref[0, oh + dh, pl.ds(dw, out_w), :] for dh, dw in taps]
        patch = jnp.concatenate(parts, axis=-1).astype(MXU_DTYPE)  # (OW, K)
        acc = jnp.dot(patch, w_ref[...], preferred_element_type=jnp.float32)
        o_ref[0, oh, :, :] = jnp.maximum(acc + bias, 0.0)


def _conv_relu(x, w_packed, bias, *, out_h, out_w, out_c, taps):
    """x: (B, H', W', Cin*taps) channels-last; w_packed: (K, OC); bias: (1, OC)."""
    B = x.shape[0]
    kernel = functools.partial(_conv_taps_kernel, out_h=out_h, out_w=out_w, taps=taps)
    return pl.pallas_call(
        kernel,
        out_shape=jax.ShapeDtypeStruct((B, out_h, out_w, out_c), jnp.float32),
        grid=(B,),
        in_specs=[
            pl.BlockSpec((1,) + x.shape[1:], lambda b: (b, 0, 0, 0)),
            pl.BlockSpec(w_packed.shape, lambda b: (0, 0)),   # resident across grid
            pl.BlockSpec(bias.shape, lambda b: (0, 0)),
        ],
        out_specs=pl.BlockSpec((1, out_h, out_w, out_c), lambda b: (b, 0, 0, 0)),
        compiler_params=pltpu.CompilerParams(dimension_semantics=("parallel",)),
    )(x, w_packed, bias)


def _fc_head_kernel(feat_ref, wh_ref, bh_ref, w2_ref, b2_ref, o_ref,
                    *, num_actions, quantiles):
    """Fused dueling head: merged adv1|val1 GEMM, block-diagonal adv2|val2 GEMM,
    and the dueling combine, all on VMEM-resident data in one launch."""
    aq = num_actions * quantiles
    h = jnp.dot(feat_ref[...].astype(MXU_DTYPE), wh_ref[...],
                preferred_element_type=jnp.float32)
    h = jnp.maximum(h + bh_ref[...], 0.0)                        # (B, 2*hidden)
    z = jnp.dot(h.astype(MXU_DTYPE), w2_ref[...],
                preferred_element_type=jnp.float32) + b2_ref[...]  # (B, A*Q + Q)
    adv = z[:, :aq]
    val = z[:, aq:aq + quantiles]
    mean = adv[:, 0:quantiles]
    for a in range(1, num_actions):
        mean = mean + adv[:, a * quantiles:(a + 1) * quantiles]
    mean = mean * (1.0 / num_actions)
    corr = val - mean                                            # (B, Q)
    o_ref[...] = adv + jnp.concatenate([corr] * num_actions, axis=-1)


def _fc_head(feat, wh, bh, w2c, b2c, *, num_actions, quantiles):
    B = feat.shape[0]
    aq = num_actions * quantiles
    kernel = functools.partial(_fc_head_kernel,
                               num_actions=num_actions, quantiles=quantiles)
    return pl.pallas_call(
        kernel,
        out_shape=jax.ShapeDtypeStruct((B, aq), jnp.float32),
        grid=(1,),
        in_specs=[pl.BlockSpec(feat.shape, lambda i: (0, 0)),
                  pl.BlockSpec(wh.shape, lambda i: (0, 0)),
                  pl.BlockSpec(bh.shape, lambda i: (0, 0)),
                  pl.BlockSpec(w2c.shape, lambda i: (0, 0)),
                  pl.BlockSpec(b2c.shape, lambda i: (0, 0))],
        out_specs=pl.BlockSpec((B, aq), lambda i: (0, 0)),
        compiler_params=pltpu.CompilerParams(dimension_semantics=("arbitrary",)),
    )(feat, wh, bh, w2c, b2c)


# --------------------------- one-time weight prep ---------------------------

def prepare_params(params):
    """Static weight repacking (done once, off the hot path):
       * conv weights -> (K, OC) GEMM matrices whose K order matches the
         in-kernel patch gather (superpixel order for the strided convs),
       * adv1/val1 merged + row-permuted to NHWC-flat feature order,
       * adv2/val2 as one block-diagonal matrix."""
    w1, b1 = params["conv1"]            # (32, 4, 8, 8)
    w2, b2 = params["conv2"]            # (64, 32, 4, 4)
    w3, b3 = params["conv3"]            # (64, 64, 3, 3)

    # conv1: stride 4, kernel 8 -> 2x2 taps over 4x4 superpixels (K = 4*64 = 256)
    w1p = w1.reshape(32, 4, 2, 4, 2, 4).transpose(2, 4, 1, 3, 5, 0).reshape(256, 32)
    # conv2: stride 2, kernel 4 -> 2x2 taps over 2x2 superpixels (K = 4*128 = 512)
    w2p = w2.reshape(64, 32, 2, 2, 2, 2).transpose(2, 4, 1, 3, 5, 0).reshape(512, 64)
    # conv3: stride 1, kernel 3 -> 3x3 taps, K ordered (i, j, c) = 576
    w3p = w3.transpose(2, 3, 1, 0).reshape(576, 64)

    def nhwc_rows(w):  # (3136, N) rows in torch (c,h,w) order -> (h,w,c) order
        return w.reshape(64, 7, 7, -1).transpose(1, 2, 0, 3).reshape(7 * 7 * 64, -1)

    wa1, ba1 = params["adv1"]
    wv1, bv1 = params["val1"]
    wa2, ba2 = params["adv2"]
    wv2, bv2 = params["val2"]
    hidden = wa2.shape[0]
    aq = wa2.shape[1]
    q = wv2.shape[1]

    wh = jnp.concatenate([nhwc_rows(wa1), nhwc_rows(wv1)], axis=1)   # (3136, 2*hidden)
    bh = jnp.concatenate([ba1, bv1]).reshape(1, 2 * hidden)

    w2c = jnp.zeros((2 * hidden, aq + q), jnp.float32)
    w2c = w2c.at[:hidden, :aq].set(wa2).at[hidden:, aq:].set(wv2)    # block-diagonal
    b2c = jnp.concatenate([ba2, bv2]).reshape(1, aq + q)

    return dict(
        w1=w1p.astype(MXU_DTYPE), b1=b1.reshape(1, 32).astype(jnp.float32),
        w2=w2p.astype(MXU_DTYPE), b2=b2.reshape(1, 64).astype(jnp.float32),
        w3=w3p.astype(MXU_DTYPE), b3=b3.reshape(1, 64).astype(jnp.float32),
        wh=wh.astype(MXU_DTYPE), bh=bh.astype(jnp.float32),
        w2c=w2c.astype(MXU_DTYPE), b2c=b2c.astype(jnp.float32),
    )


# ------------------------------ forward pass --------------------------------

def quantile_cnn_forward(prep, x, num_actions, quantiles):
    B = x.shape[0]
    # stride-4 space-to-depth: bijective relayout of the ~220 KB input (not an
    # expanded im2col) so every in-kernel patch slice is unit-stride.
    xs1 = x.reshape(B, 4, 21, 4, 21, 4).transpose(0, 2, 4, 1, 3, 5).reshape(B, 21, 21, 64)
    y1 = _conv_relu(xs1, prep["w1"], prep["b1"],
                    out_h=20, out_w=20, out_c=32, taps=_TAPS_2X2)    # (B,20,20,32)
    # stride-2 space-to-depth of the ~100 KB conv1 output (channels-last kept).
    xs2 = y1.reshape(B, 10, 2, 10, 2, 32).transpose(0, 1, 3, 5, 2, 4).reshape(B, 10, 10, 128)
    y2 = _conv_relu(xs2, prep["w2"], prep["b2"],
                    out_h=9, out_w=9, out_c=64, taps=_TAPS_2X2)      # (B,9,9,64)
    # conv3 has stride 1: window gather is fully in-kernel, no relayout needed.
    y3 = _conv_relu(y2, prep["w3"], prep["b3"],
                    out_h=7, out_w=7, out_c=64, taps=_TAPS_3X3)      # (B,7,7,64)
    feat = y3.reshape(B, 7 * 7 * 64)   # NHWC-flat (free); FC weights row-permuted to match.
    out = _fc_head(feat, prep["wh"], prep["bh"], prep["w2c"], prep["b2c"],
                   num_actions=num_actions, quantiles=quantiles)     # (B, A*Q)
    return out.reshape(B, num_actions, quantiles)


# ------------------------------ model / params ------------------------------

def init_params(key, hidden_size, num_actions, quantiles):
    def lin(k, fan_in, fan_out):
        k1, k2 = jax.random.split(k)
        bound = 1.0 / np.sqrt(fan_in)
        w = jax.random.uniform(k1, (fan_in, fan_out), jnp.float32, -bound, bound)
        b = jax.random.uniform(k2, (fan_out,), jnp.float32, -bound, bound)
        return w, b

    def conv(k, oc, ic, ks):
        k1, k2 = jax.random.split(k)
        fan_in = ic * ks * ks
        bound = 1.0 / np.sqrt(fan_in)
        w = jax.random.uniform(k1, (oc, ic, ks, ks), jnp.float32, -bound, bound)
        b = jax.random.uniform(k2, (oc,), jnp.float32, -bound, bound)
        return w, b

    keys = jax.random.split(key, 7)
    return dict(
        conv1=conv(keys[0], 32, 4, 8),
        conv2=conv(keys[1], 64, 32, 4),
        conv3=conv(keys[2], 64, 64, 3),
        adv1=lin(keys[3], 7 * 7 * 64, hidden_size),
        adv2=lin(keys[4], hidden_size, num_actions * quantiles),
        val1=lin(keys[5], 7 * 7 * 64, hidden_size),
        val2=lin(keys[6], hidden_size, quantiles),
    )


# --------------------------- pure-JAX reference -----------------------------

def reference_forward(params, x, num_actions, quantiles):
    def conv(z, w, b, s):
        y = lax.conv_general_dilated(
            z, w, (s, s), "VALID",
            dimension_numbers=("NCHW", "OIHW", "NCHW"),
            precision=lax.Precision.HIGHEST)
        return jnp.maximum(y + b[None, :, None, None], 0.0)

    dot = functools.partial(jnp.dot, precision=lax.Precision.HIGHEST)
    y = conv(x, *params["conv1"], 4)
    y = conv(y, *params["conv2"], 2)
    y = conv(y, *params["conv3"], 1)
    feat = y.reshape(x.shape[0], -1)
    h_a = jnp.maximum(dot(feat, params["adv1"][0]) + params["adv1"][1], 0.0)
    adv = dot(h_a, params["adv2"][0]) + params["adv2"][1]
    h_v = jnp.maximum(dot(feat, params["val1"][0]) + params["val1"][1], 0.0)
    val = dot(h_v, params["val2"][0]) + params["val2"][1]
    adv = adv.reshape(-1, num_actions, quantiles)
    val = val.reshape(-1, 1, quantiles)
    return val + adv - adv.mean(axis=1, keepdims=True)


# ----------------------------------- main -----------------------------------

if __name__ == "__main__":
    batch = 2
    hidden_size = 32
    num_actions = 6
    quantiles = 8

    key = jax.random.PRNGKey(0)
    kx, kp = jax.random.split(key)
    # 84x84 input is required: the flatten size is hard-coded to 7*7*64 = 3136.
    x = jax.random.uniform(kx, (batch, 4, 84, 84), jnp.float32)
    params = init_params(kp, hidden_size, num_actions, quantiles)
    prep = prepare_params(params)   # static weight repacking, off the hot path

    fwd = jax.jit(functools.partial(quantile_cnn_forward,
                                    num_actions=num_actions, quantiles=quantiles))
    out = jax.block_until_ready(fwd(prep, x))
    assert out.shape == (batch, num_actions, quantiles), out.shape

    ref = jax.block_until_ready(reference_forward(params, x, num_actions, quantiles))
    if not np.allclose(np.asarray(out), np.asarray(ref), rtol=2e-2, atol=2e-2):
        raise AssertionError("Pallas output does not match JAX reference")

    print("KERNEL_OK")
</pallas_src>

<mosaic_0001>
module attributes {stable_mosaic.version = 11 : i64} {
  func.func @_conv_taps_kernel(%arg0: i32, %arg1: memref<1x21x21x64xf32, #tpu.memory_space<vmem>>, %arg2: memref<256x32xf32, #tpu.memory_space<vmem>>, %arg3: memref<1x32xf32, #tpu.memory_space<vmem>>, %arg4: memref<1x20x20x32xf32, #tpu.memory_space<vmem>>) attributes {dimension_semantics = [#tpu.dimension_semantics<parallel>], iteration_bounds = array<i64: 2>, scalar_prefetch = 0 : i64, scratch_operands = 0 : i64, tpu.core_type = #tpu.core_type<tc>, window_params = [{transform_indices = @transform_0, window_bounds = array<i64: 1, 21, 21, 64>}, {pipeline_mode = #tpu.pipeline_mode<synchronous>, transform_indices = @transform_1, window_bounds = array<i64: 256, 32>}, {pipeline_mode = #tpu.pipeline_mode<synchronous>, transform_indices = @transform_2, window_bounds = array<i64: 1, 32>}, {transform_indices = @transform_3, window_bounds = array<i64: 1, 20, 20, 32>}]} {
    %c0 = arith.constant 0 : index
    %c0_0 = arith.constant 0 : index
    %0 = vector.load %arg3[%c0, %c0_0] : memref<1x32xf32, #tpu.memory_space<vmem>>, vector<1x32xf32>
    %c0_1 = arith.constant 0 : index
    %c0_2 = arith.constant 0 : index
    %c0_3 = arith.constant 0 : index
    %c0_4 = arith.constant 0 : index
    %1 = vector.load %arg1[%c0_1, %c0_2, %c0_3, %c0_4] : memref<1x21x21x64xf32, #tpu.memory_space<vmem>>, vector<1x1x20x64xf32>
    %2 = vector.shape_cast %1 : vector<1x1x20x64xf32> to vector<20x64xf32>
    %c0_5 = arith.constant 0 : index
    %c0_6 = arith.constant 0 : index
    %c1 = arith.constant 1 : index
    %c0_7 = arith.constant 0 : index
    %3 = vector.load %arg1[%c0_5, %c0_6, %c1, %c0_7] : memref<1x21x21x64xf32, #tpu.memory_space<vmem>>, vector<1x1x20x64xf32>
    %4 = vector.shape_cast %3 : vector<1x1x20x64xf32> to vector<20x64xf32>
    %c0_8 = arith.constant 0 : index
    %c1_9 = arith.constant 1 : index
    %c0_10 = arith.constant 0 : index
    %c0_11 = arith.constant 0 : index
    %5 = vector.load %arg1[%c0_8, %c1_9, %c0_10, %c0_11] : memref<1x21x21x64xf32, #tpu.memory_space<vmem>>, vector<1x1x20x64xf32>
    %6 = vector.shape_cast %5 : vector<1x1x20x64xf32> to vector<20x64xf32>
    %c0_12 = arith.constant 0 : index
    %c1_13 = arith.constant 1 : index
    %c1_14 = arith.constant 1 : index
    %c0_15 = arith.constant 0 : index
    %7 = vector.load %arg1[%c0_12, %c1_13, %c1_14, %c0_15] : memref<1x21x21x64xf32, #tpu.memory_space<vmem>>, vector<1x1x20x64xf32>
    %8 = vector.shape_cast %7 : vector<1x1x20x64xf32> to vector<20x64xf32>
    %9 = tpu.concatenate %2, %4, %6, %8 in 1 : vector<20x64xf32>, vector<20x64xf32>, vector<20x64xf32>, vector<20x64xf32> -> vector<20x256xf32>
    %c0_16 = arith.constant 0 : index
    %c0_17 = arith.constant 0 : index
    %10 = vector.load %arg2[%c0_16, %c0_17] : memref<256x32xf32, #tpu.memory_space<vmem>>, vector<256x32xf32>
    %cst = arith.constant dense<0.000000e+00> : vector<20x32xf32>
    %11 = tpu.matmul %9, %10, %cst {dimension_numbers = #tpu.dot_dimension_numbers<[1], [0], [0], [1], [0, 0, 1, 1], [], []>} : vector<20x256xf32>, vector<256x32xf32>, vector<20x32xf32> -> vector<20x32xf32>
    %12 = vector.broadcast %0 : vector<1x32xf32> to vector<20x32xf32>
    %13 = arith.addf %11, %12 : vector<20x32xf32>
    %cst_18 = arith.constant 0.000000e+00 : f32
    %14 = vector.broadcast %cst_18 : f32 to vector<20x32xf32>
    %15 = arith.maximumf %13, %14 : vector<20x32xf32>
    %c0_19 = arith.constant 0 : index
    %c0_20 = arith.constant 0 : index
    %c0_21 = arith.constant 0 : index
    %c0_22 = arith.constant 0 : index
    %16 = vector.load %arg4[%c0_19, %c0_20, %c0_21, %c0_22] : memref<1x20x20x32xf32, #tpu.memory_space<vmem>>, vector<1x1x20x32xf32>
    %17 = vector.shape_cast %16 : vector<1x1x20x32xf32> to vector<20x32xf32>
    %18 = vector.shape_cast %15 : vector<20x32xf32> to vector<1x1x20x32xf32>
    tpu.vector_store %arg4[%c0_19, %c0_20, %c0_21, %c0_22], %18 {strides = array<i32>} : memref<1x20x20x32xf32, #tpu.memory_space<vmem>>, vector<1x1x20x32xf32>,
    %c0_23 = arith.constant 0 : index
    %c1_24 = arith.constant 1 : index
    %c0_25 = arith.constant 0 : index
    %c0_26 = arith.constant 0 : index
    %19 = vector.load %arg1[%c0_23, %c1_24, %c0_25, %c0_26] : memref<1x21x21x64xf32, #tpu.memory_space<vmem>>, vector<1x1x20x64xf32>
    %20 = vector.shape_cast %19 : vector<1x1x20x64xf32> to vector<20x64xf32>
    %c0_27 = arith.constant 0 : index
    %c1_28 = arith.constant 1 : index
    %c1_29 = arith.constant 1 : index
    %c0_30 = arith.constant 0 : index
    %21 = vector.load %arg1[%c0_27, %c1_28, %c1_29, %c0_30] : memref<1x21x21x64xf32, #tpu.memory_space<vmem>>, vector<1x1x20x64xf32>
    %22 = vector.shape_cast %21 : vector<1x1x20x64xf32> to vector<20x64xf32>
    %c0_31 = arith.constant 0 : index
    %c2 = arith.constant 2 : index
    %c0_32 = arith.constant 0 : index
    %c0_33 = arith.constant 0 : index
    %23 = vector.load %arg1[%c0_31, %c2, %c0_32, %c0_33] : memref<1x21x21x64xf32, #tpu.memory_space<vmem>>, vector<1x1x20x64xf32>
    %24 = vector.shape_cast %23 : vector<1x1x20x64xf32> to vector<20x64xf32>
    %c0_34 = arith.constant 0 : index
    %c2_35 = arith.constant 2 : index
    %c1_36 = arith.constant 1 : index
    %c0_37 = arith.constant 0 : index
    %25 = vector.load %arg1[%c0_34, %c2_35, %c1_36, %c0_37] : memref<1x21x21x64xf32, #tpu.memory_space<vmem>>, vector<1x1x20x64xf32>
    %26 = vector.shape_cast %25 : vector<1x1x20x64xf32> to vector<20x64xf32>
    %27 = tpu.concatenate %20, %22, %24, %26 in 1 : vector<20x64xf32>, vector<20x64xf32>, vector<20x64xf32>, vector<20x64xf32> -> vector<20x256xf32>
    %c0_38 = arith.constant 0 : index
    %c0_39 = arith.constant 0 : index
    %28 = vector.load %arg2[%c0_38, %c0_39] : memref<256x32xf32, #tpu.memory_space<vmem>>, vector<256x32xf32>
    %cst_40 = arith.constant dense<0.000000e+00> : vector<20x32xf32>
    %29 = tpu.matmul %27, %28, %cst_40 {dimension_numbers = #tpu.dot_dimension_numbers<[1], [0], [0], [1], [0, 0, 1, 1], [], []>} : vector<20x256xf32>, vector<256x32xf32>, vector<20x32xf32> -> vector<20x32xf32>
    %30 = vector.broadcast %0 : vector<1x32xf32> to vector<20x32xf32>
    %31 = arith.addf %29, %30 : vector<20x32xf32>
    %cst_41 = arith.constant 0.000000e+00 : f32
    %32 = vector.broadcast %cst_41 : f32 to vector<20x32xf32>
    %33 = arith.maximumf %31, %32 : vector<20x32xf32>
    %c0_42 = arith.constant 0 : index
    %c1_43 = arith.constant 1 : index
    %c0_44 = arith.constant 0 : index
    %c0_45 = arith.constant 0 : index
    %34 = vector.load %arg4[%c0_42, %c1_43, %c0_44, %c0_45] : memref<1x20x20x32xf32, #tpu.memory_space<vmem>>, vector<1x1x20x32xf32>
    %35 = vector.shape_cast %34 : vector<1x1x20x32xf32> to vector<20x32xf32>
    %36 = vector.shape_cast %33 : vector<20x32xf32> to vector<1x1x20x32xf32>
    tpu.vector_store %arg4[%c0_42, %c1_43, %c0_44, %c0_45], %36 {strides = array<i32>} : memref<1x20x20x32xf32, #tpu.memory_space<vmem>>, vector<1x1x20x32xf32>,
    %c0_46 = arith.constant 0 : index
    %c2_47 = arith.constant 2 : index
    %c0_48 = arith.constant 0 : index
    %c0_49 = arith.constant 0 : index
    %37 = vector.load %arg1[%c0_46, %c2_47, %c0_48, %c0_49] : memref<1x21x21x64xf32, #tpu.memory_space<vmem>>, vector<1x1x20x64xf32>
    %38 = vector.shape_cast %37 : vector<1x1x20x64xf32> to vector<20x64xf32>
    %c0_50 = arith.constant 0 : index
    %c2_51 = arith.constant 2 : index
    %c1_52 = arith.constant 1 : index
    %c0_53 = arith.constant 0 : index
    %39 = vector.load %arg1[%c0_50, %c2_51, %c1_52, %c0_53] : memref<1x21x21x64xf32, #tpu.memory_space<vmem>>, vector<1x1x20x64xf32>
    %40 = vector.shape_cast %39 : vector<1x1x20x64xf32> to vector<20x64xf32>
    %c0_54 = arith.constant 0 : index
    %c3 = arith.constant 3 : index
    %c0_55 = arith.constant 0 : index
    %c0_56 = arith.constant 0 : index
    %41 = vector.load %arg1[%c0_54, %c3, %c0_55, %c0_56] : memref<1x21x21x64xf32, #tpu.memory_space<vmem>>, vector<1x1x20x64xf32>
    %42 = vector.shape_cast %41 : vector<1x1x20x64xf32> to vector<20x64xf32>
    %c0_57 = arith.constant 0 : index
    %c3_58 = arith.constant 3 : index
    %c1_59 = arith.constant 1 : index
    %c0_60 = arith.constant 0 : index
    %43 = vector.load %arg1[%c0_57, %c3_58, %c1_59, %c0_60] : memref<1x21x21x64xf32, #tpu.memory_space<vmem>>, vector<1x1x20x64xf32>
    %44 = vector.shape_cast %43 : vector<1x1x20x64xf32> to vector<20x64xf32>
    %45 = tpu.concatenate %38, %40, %42, %44 in 1 : vector<20x64xf32>, vector<20x64xf32>, vector<20x64xf32>, vector<20x64xf32> -> vector<20x256xf32>
    %c0_61 = arith.constant 0 : index
    %c0_62 = arith.constant 0 : index
    %46 = vector.load %arg2[%c0_61, %c0_62] : memref<256x32xf32, #tpu.memory_space<vmem>>, vector<256x32xf32>
    %cst_63 = arith.constant dense<0.000000e+00> : vector<20x32xf32>
    %47 = tpu.matmul %45, %46, %cst_63 {dimension_numbers = #tpu.dot_dimension_numbers<[1], [0], [0], [1], [0, 0, 1, 1], [], []>} : vector<20x256xf32>, vector<256x32xf32>, vector<20x32xf32> -> vector<20x32xf32>
    %48 = vector.broadcast %0 : vector<1x32xf32> to vector<20x32xf32>
    %49 = arith.addf %47, %48 : vector<20x32xf32>
    %cst_64 = arith.constant 0.000000e+00 : f32
    %50 = vector.broadcast %cst_64 : f32 to vector<20x32xf32>
    %51 = arith.maximumf %49, %50 : vector<20x32xf32>
    %c0_65 = arith.constant 0 : index
    %c2_66 = arith.constant 2 : index
    %c0_67 = arith.constant 0 : index
    %c0_68 = arith.constant 0 : index
    %52 = vector.load %arg4[%c0_65, %c2_66, %c0_67, %c0_68] : memref<1x20x20x32xf32, #tpu.memory_space<vmem>>, vector<1x1x20x32xf32>
    %53 = vector.shape_cast %52 : vector<1x1x20x32xf32> to vector<20x32xf32>
    %54 = vector.shape_cast %51 : vector<20x32xf32> to vector<1x1x20x32xf32>
    tpu.vector_store %arg4[%c0_65, %c2_66, %c0_67, %c0_68], %54 {strides = array<i32>} : memref<1x20x20x32xf32, #tpu.memory_space<vmem>>, vector<1x1x20x32xf32>,
    %c0_69 = arith.constant 0 : index
    %c3_70 = arith.constant 3 : index
    %c0_71 = arith.constant 0 : index
    %c0_72 = arith.constant 0 : index
    %55 = vector.load %arg1[%c0_69, %c3_70, %c0_71, %c0_72] : memref<1x21x21x64xf32, #tpu.memory_space<vmem>>, vector<1x1x20x64xf32>
    %56 = vector.shape_cast %55 : vector<1x1x20x64xf32> to vector<20x64xf32>
    %c0_73 = arith.constant 0 : index
    %c3_74 = arith.constant 3 : index
    %c1_75 = arith.constant 1 : index
    %c0_76 = arith.constant 0 : index
    %57 = vector.load %arg1[%c0_73, %c3_74, %c1_75, %c0_76] : memref<1x21x21x64xf32, #tpu.memory_space<vmem>>, vector<1x1x20x64xf32>
    %58 = vector.shape_cast %57 : vector<1x1x20x64xf32> to vector<20x64xf32>
    %c0_77 = arith.constant 0 : index
    %c4 = arith.constant 4 : index
    %c0_78 = arith.constant 0 : index
    %c0_79 = arith.constant 0 : index
    %59 = vector.load %arg1[%c0_77, %c4, %c0_78, %c0_79] : memref<1x21x21x64xf32, #tpu.memory_space<vmem>>, vector<1x1x20x64xf32>
    %60 = vector.shape_cast %59 : vector<1x1x20x64xf32> to vector<20x64xf32>
    %c0_80 = arith.constant 0 : index
    %c4_81 = arith.constant 4 : index
    %c1_82 = arith.constant 1 : index
    %c0_83 = arith.constant 0 : index
    %61 = vector.load %arg1[%c0_80, %c4_81, %c1_82, %c0_83] : memref<1x21x21x64xf32, #tpu.memory_space<vmem>>, vector<1x1x20x64xf32>
    %62 = vector.shape_cast %61 : vector<1x1x20x64xf32> to vector<20x64xf32>
    %63 = tpu.concatenate %56, %58, %60, %62 in 1 : vector<20x64xf32>, vector<20x64xf32>, vector<20x64xf32>, vector<20x64xf32> -> vector<20x256xf32>
    %c0_84 = arith.constant 0 : index
    %c0_85 = arith.constant 0 : index
    %64 = vector.load %arg2[%c0_84, %c0_85] : memref<256x32xf32, #tpu.memory_space<vmem>>, vector<256x32xf32>
    %cst_86 = arith.constant dense<0.000000e+00> : vector<20x32xf32>
    %65 = tpu.matmul %63, %64, %cst_86 {dimension_numbers = #tpu.dot_dimension_numbers<[1], [0], [0], [1], [0, 0, 1, 1], [], []>} : vector<20x256xf32>, vector<256x32xf32>, vector<20x32xf32> -> vector<20x32xf32>
    %66 = vector.broadcast %0 : vector<1x32xf32> to vector<20x32xf32>
    %67 = arith.addf %65, %66 : vector<20x32xf32>
    %cst_87 = arith.constant 0.000000e+00 : f32
    %68 = vector.broadcast %cst_87 : f32 to vector<20x32xf32>
    %69 = arith.maximumf %67, %68 : vector<20x32xf32>
    %c0_88 = arith.constant 0 : index
    %c3_89 = arith.constant 3 : index
    %c0_90 = arith.constant 0 : index
    %c0_91 = arith.constant 0 : index
    %70 = vector.load %arg4[%c0_88, %c3_89, %c0_90, %c0_91] : memref<1x20x20x32xf32, #tpu.memory_space<vmem>>, vector<1x1x20x32xf32>
    %71 = vector.shape_cast %70 : vector<1x1x20x32xf32> to vector<20x32xf32>
    %72 = vector.shape_cast %69 : vector<20x32xf32> to vector<1x1x20x32xf32>
    tpu.vector_store %arg4[%c0_88, %c3_89, %c0_90, %c0_91], %72 {strides = array<i32>} : memref<1x20x20x32xf32, #tpu.memory_space<vmem>>, vector<1x1x20x32xf32>,
    %c0_92 = arith.constant 0 : index
    %c4_93 = arith.constant 4 : index
    %c0_94 = arith.constant 0 : index
    %c0_95 = arith.constant 0 : index
    %73 = vector.load %arg1[%c0_92, %c4_93, %c0_94, %c0_95] : memref<1x21x21x64xf32, #tpu.memory_space<vmem>>, vector<1x1x20x64xf32>
    %74 = vector.shape_cast %73 : vector<1x1x20x64xf32> to vector<20x64xf32>
    %c0_96 = arith.constant 0 : index
    %c4_97 = arith.constant 4 : index
    %c1_98 = arith.constant 1 : index
    %c0_99 = arith.constant 0 : index
    %75 = vector.load %arg1[%c0_96, %c4_97, %c1_98, %c0_99] : memref<1x21x21x64xf32, #tpu.memory_space<vmem>>, vector<1x1x20x64xf32>
    %76 = vector.shape_cast %75 : vector<1x1x20x64xf32> to vector<20x64xf32>
    %c0_100 = arith.constant 0 : index
    %c5 = arith.constant 5 : index
    %c0_101 = arith.constant 0 : index
    %c0_102 = arith.constant 0 : index
    %77 = vector.load %arg1[%c0_100, %c5, %c0_101, %c0_102] : memref<1x21x21x64xf32, #tpu.memory_space<vmem>>, vector<1x1x20x64xf32>
    %78 = vector.shape_cast %77 : vector<1x1x20x64xf32> to vector<20x64xf32>
    %c0_103 = arith.constant 0 : index
    %c5_104 = arith.constant 5 : index
    %c1_105 = arith.constant 1 : index
    %c0_106 = arith.constant 0 : index
    %79 = vector.load %arg1[%c0_103, %c5_104, %c1_105, %c0_106] : memref<1x21x21x64xf32, #tpu.memory_space<vmem>>, vector<1x1x20x64xf32>
    %80 = vector.shape_cast %79 : vector<1x1x20x64xf32> to vector<20x64xf32>
    %81 = tpu.concatenate %74, %76, %78, %80 in 1 : vector<20x64xf32>, vector<20x64xf32>, vector<20x64xf32>, vector<20x64xf32> -> vector<20x256xf32>
    %c0_107 = arith.constant 0 : index
    %c0_108 = arith.constant 0 : index
    %82 = vector.load %arg2[%c0_107, %c0_108] : memref<256x32xf32, #tpu.memory_space<vmem>>, vector<256x32xf32>
    %cst_109 = arith.constant dense<0.000000e+00> : vector<20x32xf32>
    %83 = tpu.matmul %81, %82, %cst_109 {dimension_numbers = #tpu.dot_dimension_numbers<[1], [0], [0], [1], [0, 0, 1, 1], [], []>} : vector<20x256xf32>, vector<256x32xf32>, vector<20x32xf32> -> vector<20x32xf32>
    %84 = vector.broadcast %0 : vector<1x32xf32> to vector<20x32xf32>
    %85 = arith.addf %83, %84 : vector<20x32xf32>
    %cst_110 = arith.constant 0.000000e+00 : f32
    %86 = vector.broadcast %cst_110 : f32 to vector<20x32xf32>
    %87 = arith.maximumf %85, %86 : vector<20x32xf32>
    %c0_111 = arith.constant 0 : index
    %c4_112 = arith.constant 4 : index
    %c0_113 = arith.constant 0 : index
    %c0_114 = arith.constant 0 : index
    %88 = vector.load %arg4[%c0_111, %c4_112, %c0_113, %c0_114] : memref<1x20x20x32xf32, #tpu.memory_space<vmem>>, vector<1x1x20x32xf32>
    %89 = vector.shape_cast %88 : vector<1x1x20x32xf32> to vector<20x32xf32>
    %90 = vector.shape_cast %87 : vector<20x32xf32> to vector<1x1x20x32xf32>
    tpu.vector_store %arg4[%c0_111, %c4_112, %c0_113, %c0_114], %90 {strides = array<i32>} : memref<1x20x20x32xf32, #tpu.memory_space<vmem>>, vector<1x1x20x32xf32>,
    %c0_115 = arith.constant 0 : index
    %c5_116 = arith.constant 5 : index
    %c0_117 = arith.constant 0 : index
    %c0_118 = arith.constant 0 : index
    %91 = vector.load %arg1[%c0_115, %c5_116, %c0_117, %c0_118] : memref<1x21x21x64xf32, #tpu.memory_space<vmem>>, vector<1x1x20x64xf32>
    %92 = vector.shape_cast %91 : vector<1x1x20x64xf32> to vector<20x64xf32>
    %c0_119 = arith.constant 0 : index
    %c5_120 = arith.constant 5 : index
    %c1_121 = arith.constant 1 : index
    %c0_122 = arith.constant 0 : index
    %93 = vector.load %arg1[%c0_119, %c5_120, %c1_121, %c0_122] : memref<1x21x21x64xf32, #tpu.memory_space<vmem>>, vector<1x1x20x64xf32>
    %94 = vector.shape_cast %93 : vector<1x1x20x64xf32> to vector<20x64xf32>
    %c0_123 = arith.constant 0 : index
    %c6 = arith.constant 6 : index
    %c0_124 = arith.constant 0 : index
    %c0_125 = arith.constant 0 : index
    %95 = vector.load %arg1[%c0_123, %c6, %c0_124, %c0_125] : memref<1x21x21x64xf32, #tpu.memory_space<vmem>>, vector<1x1x20x64xf32>
    %96 = vector.shape_cast %95 : vector<1x1x20x64xf32> to vector<20x64xf32>
    %c0_126 = arith.constant 0 : index
    %c6_127 = arith.constant 6 : index
    %c1_128 = arith.constant 1 : index
    %c0_129 = arith.constant 0 : index
    %97 = vector.load %arg1[%c0_126, %c6_127, %c1_128, %c0_129] : memref<1x21x21x64xf32, #tpu.memory_space<vmem>>, vector<1x1x20x64xf32>
    %98 = vector.shape_cast %97 : vector<1x1x20x64xf32> to vector<20x64xf32>
    %99 = tpu.concatenate %92, %94, %96, %98 in 1 : vector<20x64xf32>, vector<20x64xf32>, vector<20x64xf32>, vector<20x64xf32> -> vector<20x256xf32>
    %c0_130 = arith.constant 0 : index
    %c0_131 = arith.constant 0 : index
    %100 = vector.load %arg2[%c0_130, %c0_131] : memref<256x32xf32, #tpu.memory_space<vmem>>, vector<256x32xf32>
    %cst_132 = arith.constant dense<0.000000e+00> : vector<20x32xf32>
    %101 = tpu.matmul %99, %100, %cst_132 {dimension_numbers = #tpu.dot_dimension_numbers<[1], [0], [0], [1], [0, 0, 1, 1], [], []>} : vector<20x256xf32>, vector<256x32xf32>, vector<20x32xf32> -> vector<20x32xf32>
    %102 = vector.broadcast %0 : vector<1x32xf32> to vector<20x32xf32>
    %103 = arith.addf %101, %102 : vector<20x32xf32>
    %cst_133 = arith.constant 0.000000e+00 : f32
    %104 = vector.broadcast %cst_133 : f32 to vector<20x32xf32>
    %105 = arith.maximumf %103, %104 : vector<20x32xf32>
    %c0_134 = arith.constant 0 : index
    %c5_135 = arith.constant 5 : index
    %c0_136 = arith.constant 0 : index
    %c0_137 = arith.constant 0 : index
    %106 = vector.load %arg4[%c0_134, %c5_135, %c0_136, %c0_137] : memref<1x20x20x32xf32, #tpu.memory_space<vmem>>, vector<1x1x20x32xf32>
    %107 = vector.shape_cast %106 : vector<1x1x20x32xf32> to vector<20x32xf32>
    %108 = vector.shape_cast %105 : vector<20x32xf32> to vector<1x1x20x32xf32>
    tpu.vector_store %arg4[%c0_134, %c5_135, %c0_136, %c0_137], %108 {strides = array<i32>} : memref<1x20x20x32xf32, #tpu.memory_space<vmem>>, vector<1x1x20x32xf32>,
    %c0_138 = arith.constant 0 : index
    %c6_139 = arith.constant 6 : index
    %c0_140 = arith.constant 0 : index
    %c0_141 = arith.constant 0 : index
    %109 = vector.load %arg1[%c0_138, %c6_139, %c0_140, %c0_141] : memref<1x21x21x64xf32, #tpu.memory_space<vmem>>, vector<1x1x20x64xf32>
    %110 = vector.shape_cast %109 : vector<1x1x20x64xf32> to vector<20x64xf32>
    %c0_142 = arith.constant 0 : index
    %c6_143 = arith.constant 6 : index
    %c1_144 = arith.constant 1 : index
    %c0_145 = arith.constant 0 : index
    %111 = vector.load %arg1[%c0_142, %c6_143, %c1_144, %c0_145] : memref<1x21x21x64xf32, #tpu.memory_space<vmem>>, vector<1x1x20x64xf32>
    %112 = vector.shape_cast %111 : vector<1x1x20x64xf32> to vector<20x64xf32>
    %c0_146 = arith.constant 0 : index
    %c7 = arith.constant 7 : index
    %c0_147 = arith.constant 0 : index
    %c0_148 = arith.constant 0 : index
    %113 = vector.load %arg1[%c0_146, %c7, %c0_147, %c0_148] : memref<1x21x21x64xf32, #tpu.memory_space<vmem>>, vector<1x1x20x64xf32>
    %114 = vector.shape_cast %113 : vector<1x1x20x64xf32> to vector<20x64xf32>
    %c0_149 = arith.constant 0 : index
    %c7_150 = arith.constant 7 : index
    %c1_151 = arith.constant 1 : index
    %c0_152 = arith.constant 0 : index
    %115 = vector.load %arg1[%c0_149, %c7_150, %c1_151, %c0_152] : memref<1x21x21x64xf32, #tpu.memory_space<vmem>>, vector<1x1x20x64xf32>
    %116 = vector.shape_cast %115 : vector<1x1x20x64xf32> to vector<20x64xf32>
    %117 = tpu.concatenate %110, %112, %114, %116 in 1 : vector<20x64xf32>, vector<20x64xf32>, vector<20x64xf32>, vector<20x64xf32> -> vector<20x256xf32>
    %c0_153 = arith.constant 0 : index
    %c0_154 = arith.constant 0 : index
    %118 = vector.load %arg2[%c0_153, %c0_154] : memref<256x32xf32, #tpu.memory_space<vmem>>, vector<256x32xf32>
    %cst_155 = arith.constant dense<0.000000e+00> : vector<20x32xf32>
    %119 = tpu.matmul %117, %118, %cst_155 {dimension_numbers = #tpu.dot_dimension_numbers<[1], [0], [0], [1], [0, 0, 1, 1], [], []>} : vector<20x256xf32>, vector<256x32xf32>, vector<20x32xf32> -> vector<20x32xf32>
    %120 = vector.broadcast %0 : vector<1x32xf32> to vector<20x32xf32>
    %121 = arith.addf %119, %120 : vector<20x32xf32>
    %cst_156 = arith.constant 0.000000e+00 : f32
    %122 = vector.broadcast %cst_156 : f32 to vector<20x32xf32>
    %123 = arith.maximumf %121, %122 : vector<20x32xf32>
    %c0_157 = arith.constant 0 : index
    %c6_158 = arith.constant 6 : index
    %c0_159 = arith.constant 0 : index
    %c0_160 = arith.constant 0 : index
    %124 = vector.load %arg4[%c0_157, %c6_158, %c0_159, %c0_160] : memref<1x20x20x32xf32, #tpu.memory_space<vmem>>, vector<1x1x20x32xf32>
    %125 = vector.shape_cast %124 : vector<1x1x20x32xf32> to vector<20x32xf32>
    %126 = vector.shape_cast %123 : vector<20x32xf32> to vector<1x1x20x32xf32>
    tpu.vector_store %arg4[%c0_157, %c6_158, %c0_159, %c0_160], %126 {strides = array<i32>} : memref<1x20x20x32xf32, #tpu.memory_space<vmem>>, vector<1x1x20x32xf32>,
    %c0_161 = arith.constant 0 : index
    %c7_162 = arith.constant 7 : index
    %c0_163 = arith.constant 0 : index
    %c0_164 = arith.constant 0 : index
    %127 = vector.load %arg1[%c0_161, %c7_162, %c0_163, %c0_164] : memref<1x21x21x64xf32, #tpu.memory_space<vmem>>, vector<1x1x20x64xf32>
    %128 = vector.shape_cast %127 : vector<1x1x20x64xf32> to vector<20x64xf32>
    %c0_165 = arith.constant 0 : index
    %c7_166 = arith.constant 7 : index
    %c1_167 = arith.constant 1 : index
    %c0_168 = arith.constant 0 : index
    %129 = vector.load %arg1[%c0_165, %c7_166, %c1_167, %c0_168] : memref<1x21x21x64xf32, #tpu.memory_space<vmem>>, vector<1x1x20x64xf32>
    %130 = vector.shape_cast %129 : vector<1x1x20x64xf32> to vector<20x64xf32>
    %c0_169 = arith.constant 0 : index
    %c8 = arith.constant 8 : index
    %c0_170 = arith.constant 0 : index
    %c0_171 = arith.constant 0 : index
    %131 = vector.load %arg1[%c0_169, %c8, %c0_170, %c0_171] : memref<1x21x21x64xf32, #tpu.memory_space<vmem>>, vector<1x1x20x64xf32>
    %132 = vector.shape_cast %131 : vector<1x1x20x64xf32> to vector<20x64xf32>
    %c0_172 = arith.constant 0 : index
    %c8_173 = arith.constant 8 : index
    %c1_174 = arith.constant 1 : index
    %c0_175 = arith.constant 0 : index
    %133 = vector.load %arg1[%c0_172, %c8_173, %c1_174, %c0_175] : memref<1x21x21x64xf32, #tpu.memory_space<vmem>>, vector<1x1x20x64xf32>
    %134 = vector.shape_cast %133 : vector<1x1x20x64xf32> to vector<20x64xf32>
    %135 = tpu.concatenate %128, %130, %132, %134 in 1 : vector<20x64xf32>, vector<20x64xf32>, vector<20x64xf32>, vector<20x64xf32> -> vector<20x256xf32>
    %c0_176 = arith.constant 0 : index
    %c0_177 = arith.constant 0 : index
    %136 = vector.load %arg2[%c0_176, %c0_177] : memref<256x32xf32, #tpu.memory_space<vmem>>, vector<256x32xf32>
    %cst_178 = arith.constant dense<0.000000e+00> : vector<20x32xf32>
    %137 = tpu.matmul %135, %136, %cst_178 {dimension_numbers = #tpu.dot_dimension_numbers<[1], [0], [0], [1], [0, 0, 1, 1], [], []>} : vector<20x256xf32>, vector<256x32xf32>, vector<20x32xf32> -> vector<20x32xf32>
    %138 = vector.broadcast %0 : vector<1x32xf32> to vector<20x32xf32>
    %139 = arith.addf %137, %138 : vector<20x32xf32>
    %cst_179 = arith.constant 0.000000e+00 : f32
    %140 = vector.broadcast %cst_179 : f32 to vector<20x32xf32>
    %141 = arith.maximumf %139, %140 : vector<20x32xf32>
    %c0_180 = arith.constant 0 : index
    %c7_181 = arith.constant 7 : index
    %c0_182 = arith.constant 0 : index
    %c0_183 = arith.constant 0 : index
    %142 = vector.load %arg4[%c0_180, %c7_181, %c0_182, %c0_183] : memref<1x20x20x32xf32, #tpu.memory_space<vmem>>, vector<1x1x20x32xf32>
    %143 = vector.shape_cast %142 : vector<1x1x20x32xf32> to vector<20x32xf32>
    %144 = vector.shape_cast %141 : vector<20x32xf32> to vector<1x1x20x32xf32>
    tpu.vector_store %arg4[%c0_180, %c7_181, %c0_182, %c0_183], %144 {strides = array<i32>} : memref<1x20x20x32xf32, #tpu.memory_space<vmem>>, vector<1x1x20x32xf32>,
    %c0_184 = arith.constant 0 : index
    %c8_185 = arith.constant 8 : index
    %c0_186 = arith.constant 0 : index
    %c0_187 = arith.constant 0 : index
    %145 = vector.load %arg1[%c0_184, %c8_185, %c0_186, %c0_187] : memref<1x21x21x64xf32, #tpu.memory_space<vmem>>, vector<1x1x20x64xf32>
    %146 = vector.shape_cast %145 : vector<1x1x20x64xf32> to vector<20x64xf32>
    %c0_188 = arith.constant 0 : index
    %c8_189 = arith.constant 8 : index
    %c1_190 = arith.constant 1 : index
    %c0_191 = arith.constant 0 : index
    %147 = vector.load %arg1[%c0_188, %c8_189, %c1_190, %c0_191] : memref<1x21x21x64xf32, #tpu.memory_space<vmem>>, vector<1x1x20x64xf32>
    %148 = vector.shape_cast %147 : vector<1x1x20x64xf32> to vector<20x64xf32>
    %c0_192 = arith.constant 0 : index
    %c9 = arith.constant 9 : index
    %c0_193 = arith.constant 0 : index
    %c0_194 = arith.constant 0 : index
    %149 = vector.load %arg1[%c0_192, %c9, %c0_193, %c0_194] : memref<1x21x21x64xf32, #tpu.memory_space<vmem>>, vector<1x1x20x64xf32>
    %150 = vector.shape_cast %149 : vector<1x1x20x64xf32> to vector<20x64xf32>
    %c0_195 = arith.constant 0 : index
    %c9_196 = arith.constant 9 : index
    %c1_197 = arith.constant 1 : index
    %c0_198 = arith.constant 0 : index
    %151 = vector.load %arg1[%c0_195, %c9_196, %c1_197, %c0_198] : memref<1x21x21x64xf32, #tpu.memory_space<vmem>>, vector<1x1x20x64xf32>
    %152 = vector.shape_cast %151 : vector<1x1x20x64xf32> to vector<20x64xf32>
    %153 = tpu.concatenate %146, %148, %150, %152 in 1 : vector<20x64xf32>, vector<20x64xf32>, vector<20x64xf32>, vector<20x64xf32> -> vector<20x256xf32>
    %c0_199 = arith.constant 0 : index
    %c0_200 = arith.constant 0 : index
    %154 = vector.load %arg2[%c0_199, %c0_200] : memref<256x32xf32, #tpu.memory_space<vmem>>, vector<256x32xf32>
    %cst_201 = arith.constant dense<0.000000e+00> : vector<20x32xf32>
    %155 = tpu.matmul %153, %154, %cst_201 {dimension_numbers = #tpu.dot_dimension_numbers<[1], [0], [0], [1], [0, 0, 1, 1], [], []>} : vector<20x256xf32>, vector<256x32xf32>, vector<20x32xf32> -> vector<20x32xf32>
    %156 = vector.broadcast %0 : vector<1x32xf32> to vector<20x32xf32>
    %157 = arith.addf %155, %156 : vector<20x32xf32>
    %cst_202 = arith.constant 0.000000e+00 : f32
    %158 = vector.broadcast %cst_202 : f32 to vector<20x32xf32>
    %159 = arith.maximumf %157, %158 : vector<20x32xf32>
    %c0_203 = arith.constant 0 : index
    %c8_204 = arith.constant 8 : index
    %c0_205 = arith.constant 0 : index
    %c0_206 = arith.constant 0 : index
    %160 = vector.load %arg4[%c0_203, %c8_204, %c0_205, %c0_206] : memref<1x20x20x32xf32, #tpu.memory_space<vmem>>, vector<1x1x20x32xf32>
    %161 = vector.shape_cast %160 : vector<1x1x20x32xf32> to vector<20x32xf32>
    %162 = vector.shape_cast %159 : vector<20x32xf32> to vector<1x1x20x32xf32>
    tpu.vector_store %arg4[%c0_203, %c8_204, %c0_205, %c0_206], %162 {strides = array<i32>} : memref<1x20x20x32xf32, #tpu.memory_space<vmem>>, vector<1x1x20x32xf32>,
    %c0_207 = arith.constant 0 : index
    %c9_208 = arith.constant 9 : index
    %c0_209 = arith.constant 0 : index
    %c0_210 = arith.constant 0 : index
    %163 = vector.load %arg1[%c0_207, %c9_208, %c0_209, %c0_210] : memref<1x21x21x64xf32, #tpu.memory_space<vmem>>, vector<1x1x20x64xf32>
    %164 = vector.shape_cast %163 : vector<1x1x20x64xf32> to vector<20x64xf32>
    %c0_211 = arith.constant 0 : index
    %c9_212 = arith.constant 9 : index
    %c1_213 = arith.constant 1 : index
    %c0_214 = arith.constant 0 : index
    %165 = vector.load %arg1[%c0_211, %c9_212, %c1_213, %c0_214] : memref<1x21x21x64xf32, #tpu.memory_space<vmem>>, vector<1x1x20x64xf32>
    %166 = vector.shape_cast %165 : vector<1x1x20x64xf32> to vector<20x64xf32>
    %c0_215 = arith.constant 0 : index
    %c10 = arith.constant 10 : index
    %c0_216 = arith.constant 0 : index
    %c0_217 = arith.constant 0 : index
    %167 = vector.load %arg1[%c0_215, %c10, %c0_216, %c0_217] : memref<1x21x21x64xf32, #tpu.memory_space<vmem>>, vector<1x1x20x64xf32>
    %168 = vector.shape_cast %167 : vector<1x1x20x64xf32> to vector<20x64xf32>
    %c0_218 = arith.constant 0 : index
    %c10_219 = arith.constant 10 : index
    %c1_220 = arith.constant 1 : index
    %c0_221 = arith.constant 0 : index
    %169 = vector.load %arg1[%c0_218, %c10_219, %c1_220, %c0_221] : memref<1x21x21x64xf32, #tpu.memory_space<vmem>>, vector<1x1x20x64xf32>
    %170 = vector.shape_cast %169 : vector<1x1x20x64xf32> to vector<20x64xf32>
    %171 = tpu.concatenate %164, %166, %168, %170 in 1 : vector<20x64xf32>, vector<20x64xf32>, vector<20x64xf32>, vector<20x64xf32> -> vector<20x256xf32>
    %c0_222 = arith.constant 0 : index
    %c0_223 = arith.constant 0 : index
    %172 = vector.load %arg2[%c0_222, %c0_223] : memref<256x32xf32, #tpu.memory_space<vmem>>, vector<256x32xf32>
    %cst_224 = arith.constant dense<0.000000e+00> : vector<20x32xf32>
    %173 = tpu.matmul %171, %172, %cst_224 {dimension_numbers = #tpu.dot_dimension_numbers<[1], [0], [0], [1], [0, 0, 1, 1], [], []>} : vector<20x256xf32>, vector<256x32xf32>, vector<20x32xf32> -> vector<20x32xf32>
    %174 = vector.broadcast %0 : vector<1x32xf32> to vector<20x32xf32>
    %175 = arith.addf %173, %174 : vector<20x32xf32>
    %cst_225 = arith.constant 0.000000e+00 : f32
    %176 = vector.broadcast %cst_225 : f32 to vector<20x32xf32>
    %177 = arith.maximumf %175, %176 : vector<20x32xf32>
    %c0_226 = arith.constant 0 : index
    %c9_227 = arith.constant 9 : index
    %c0_228 = arith.constant 0 : index
    %c0_229 = arith.constant 0 : index
    %178 = vector.load %arg4[%c0_226, %c9_227, %c0_228, %c0_229] : memref<1x20x20x32xf32, #tpu.memory_space<vmem>>, vector<1x1x20x32xf32>
    %179 = vector.shape_cast %178 : vector<1x1x20x32xf32> to vector<20x32xf32>
    %180 = vector.shape_cast %177 : vector<20x32xf32> to vector<1x1x20x32xf32>
    tpu.vector_store %arg4[%c0_226, %c9_227, %c0_228, %c0_229], %180 {strides = array<i32>} : memref<1x20x20x32xf32, #tpu.memory_space<vmem>>, vector<1x1x20x32xf32>,
    %c0_230 = arith.constant 0 : index
    %c10_231 = arith.constant 10 : index
    %c0_232 = arith.constant 0 : index
    %c0_233 = arith.constant 0 : index
    %181 = vector.load %arg1[%c0_230, %c10_231, %c0_232, %c0_233] : memref<1x21x21x64xf32, #tpu.memory_space<vmem>>, vector<1x1x20x64xf32>
    %182 = vector.shape_cast %181 : vector<1x1x20x64xf32> to vector<20x64xf32>
    %c0_234 = arith.constant 0 : index
    %c10_235 = arith.constant 10 : index
    %c1_236 = arith.constant 1 : index
    %c0_237 = arith.constant 0 : index
    %183 = vector.load %arg1[%c0_234, %c10_235, %c1_236, %c0_237] : memref<1x21x21x64xf32, #tpu.memory_space<vmem>>, vector<1x1x20x64xf32>
    %184 = vector.shape_cast %183 : vector<1x1x20x64xf32> to vector<20x64xf32>
    %c0_238 = arith.constant 0 : index
    %c11 = arith.constant 11 : index
    %c0_239 = arith.constant 0 : index
    %c0_240 = arith.constant 0 : index
    %185 = vector.load %arg1[%c0_238, %c11, %c0_239, %c0_240] : memref<1x21x21x64xf32, #tpu.memory_space<vmem>>, vector<1x1x20x64xf32>
    %186 = vector.shape_cast %185 : vector<1x1x20x64xf32> to vector<20x64xf32>
    %c0_241 = arith.constant 0 : index
    %c11_242 = arith.constant 11 : index
    %c1_243 = arith.constant 1 : index
    %c0_244 = arith.constant 0 : index
    %187 = vector.load %arg1[%c0_241, %c11_242, %c1_243, %c0_244] : memref<1x21x21x64xf32, #tpu.memory_space<vmem>>, vector<1x1x20x64xf32>
    %188 = vector.shape_cast %187 : vector<1x1x20x64xf32> to vector<20x64xf32>
    %189 = tpu.concatenate %182, %184, %186, %188 in 1 : vector<20x64xf32>, vector<20x64xf32>, vector<20x64xf32>, vector<20x64xf32> -> vector<20x256xf32>
    %c0_245 = arith.constant 0 : index
    %c0_246 = arith.constant 0 : index
    %190 = vector.load %arg2[%c0_245, %c0_246] : memref<256x32xf32, #tpu.memory_space<vmem>>, vector<256x32xf32>
    %cst_247 = arith.constant dense<0.000000e+00> : vector<20x32xf32>
    %191 = tpu.matmul %189, %190, %cst_247 {dimension_numbers = #tpu.dot_dimension_numbers<[1], [0], [0], [1], [0, 0, 1, 1], [], []>} : vector<20x256xf32>, vector<256x32xf32>, vector<20x32xf32> -> vector<20x32xf32>
    %192 = vector.broadcast %0 : vector<1x32xf32> to vector<20x32xf32>
    %193 = arith.addf %191, %192 : vector<20x32xf32>
    %cst_248 = arith.constant 0.000000e+00 : f32
    %194 = vector.broadcast %cst_248 : f32 to vector<20x32xf32>
    %195 = arith.maximumf %193, %194 : vector<20x32xf32>
    %c0_249 = arith.constant 0 : index
    %c10_250 = arith.constant 10 : index
    %c0_251 = arith.constant 0 : index
    %c0_252 = arith.constant 0 : index
    %196 = vector.load %arg4[%c0_249, %c10_250, %c0_251, %c0_252] : memref<1x20x20x32xf32, #tpu.memory_space<vmem>>, vector<1x1x20x32xf32>
    %197 = vector.shape_cast %196 : vector<1x1x20x32xf32> to vector<20x32xf32>
    %198 = vector.shape_cast %195 : vector<20x32xf32> to vector<1x1x20x32xf32>
    tpu.vector_store %arg4[%c0_249, %c10_250, %c0_251, %c0_252], %198 {strides = array<i32>} : memref<1x20x20x32xf32, #tpu.memory_space<vmem>>, vector<1x1x20x32xf32>,
    %c0_253 = arith.constant 0 : index
    %c11_254 = arith.constant 11 : index
    %c0_255 = arith.constant 0 : index
    %c0_256 = arith.constant 0 : index
    %199 = vector.load %arg1[%c0_253, %c11_254, %c0_255, %c0_256] : memref<1x21x21x64xf32, #tpu.memory_space<vmem>>, vector<1x1x20x64xf32>
    %200 = vector.shape_cast %199 : vector<1x1x20x64xf32> to vector<20x64xf32>
    %c0_257 = arith.constant 0 : index
    %c11_258 = arith.constant 11 : index
    %c1_259 = arith.constant 1 : index
    %c0_260 = arith.constant 0 : index
    %201 = vector.load %arg1[%c0_257, %c11_258, %c1_259, %c0_260] : memref<1x21x21x64xf32, #tpu.memory_space<vmem>>, vector<1x1x20x64xf32>
    %202 = vector.shape_cast %201 : vector<1x1x20x64xf32> to vector<20x64xf32>
    %c0_261 = arith.constant 0 : index
    %c12 = arith.constant 12 : index
    %c0_262 = arith.constant 0 : index
    %c0_263 = arith.constant 0 : index
    %203 = vector.load %arg1[%c0_261, %c12, %c0_262, %c0_263] : memref<1x21x21x64xf32, #tpu.memory_space<vmem>>, vector<1x1x20x64xf32>
    %204 = vector.shape_cast %203 : vector<1x1x20x64xf32> to vector<20x64xf32>
    %c0_264 = arith.constant 0 : index
    %c12_265 = arith.constant 12 : index
    %c1_266 = arith.constant 1 : index
    %c0_267 = arith.constant 0 : index
    %205 = vector.load %arg1[%c0_264, %c12_265, %c1_266, %c0_267] : memref<1x21x21x64xf32, #tpu.memory_space<vmem>>, vector<1x1x20x64xf32>
    %206 = vector.shape_cast %205 : vector<1x1x20x64xf32> to vector<20x64xf32>
    %207 = tpu.concatenate %200, %202, %204, %206 in 1 : vector<20x64xf32>, vector<20x64xf32>, vector<20x64xf32>, vector<20x64xf32> -> vector<20x256xf32>
    %c0_268 = arith.constant 0 : index
    %c0_269 = arith.constant 0 : index
    %208 = vector.load %arg2[%c0_268, %c0_269] : memref<256x32xf32, #tpu.memory_space<vmem>>, vector<256x32xf32>
    %cst_270 = arith.constant dense<0.000000e+00> : vector<20x32xf32>
    %209 = tpu.matmul %207, %208, %cst_270 {dimension_numbers = #tpu.dot_dimension_numbers<[1], [0], [0], [1], [0, 0, 1, 1], [], []>} : vector<20x256xf32>, vector<256x32xf32>, vector<20x32xf32> -> vector<20x32xf32>
    %210 = vector.broadcast %0 : vector<1x32xf32> to vector<20x32xf32>
    %211 = arith.addf %209, %210 : vector<20x32xf32>
    %cst_271 = arith.constant 0.000000e+00 : f32
    %212 = vector.broadcast %cst_271 : f32 to vector<20x32xf32>
    %213 = arith.maximumf %211, %212 : vector<20x32xf32>
    %c0_272 = arith.constant 0 : index
    %c11_273 = arith.constant 11 : index
    %c0_274 = arith.constant 0 : index
    %c0_275 = arith.constant 0 : index
    %214 = vector.load %arg4[%c0_272, %c11_273, %c0_274, %c0_275] : memref<1x20x20x32xf32, #tpu.memory_space<vmem>>, vector<1x1x20x32xf32>
    %215 = vector.shape_cast %214 : vector<1x1x20x32xf32> to vector<20x32xf32>
    %216 = vector.shape_cast %213 : vector<20x32xf32> to vector<1x1x20x32xf32>
    tpu.vector_store %arg4[%c0_272, %c11_273, %c0_274, %c0_275], %216 {strides = array<i32>} : memref<1x20x20x32xf32, #tpu.memory_space<vmem>>, vector<1x1x20x32xf32>,
    %c0_276 = arith.constant 0 : index
    %c12_277 = arith.constant 12 : index
    %c0_278 = arith.constant 0 : index
    %c0_279 = arith.constant 0 : index
    %217 = vector.load %arg1[%c0_276, %c12_277, %c0_278, %c0_279] : memref<1x21x21x64xf32, #tpu.memory_space<vmem>>, vector<1x1x20x64xf32>
    %218 = vector.shape_cast %217 : vector<1x1x20x64xf32> to vector<20x64xf32>
    %c0_280 = arith.constant 0 : index
    %c12_281 = arith.constant 12 : index
    %c1_282 = arith.constant 1 : index
    %c0_283 = arith.constant 0 : index
    %219 = vector.load %arg1[%c0_280, %c12_281, %c1_282, %c0_283] : memref<1x21x21x64xf32, #tpu.memory_space<vmem>>, vector<1x1x20x64xf32>
    %220 = vector.shape_cast %219 : vector<1x1x20x64xf32> to vector<20x64xf32>
    %c0_284 = arith.constant 0 : index
    %c13 = arith.constant 13 : index
    %c0_285 = arith.constant 0 : index
    %c0_286 = arith.constant 0 : index
    %221 = vector.load %arg1[%c0_284, %c13, %c0_285, %c0_286] : memref<1x21x21x64xf32, #tpu.memory_space<vmem>>, vector<1x1x20x64xf32>
    %222 = vector.shape_cast %221 : vector<1x1x20x64xf32> to vector<20x64xf32>
    %c0_287 = arith.constant 0 : index
    %c13_288 = arith.constant 13 : index
    %c1_289 = arith.constant 1 : index
    %c0_290 = arith.constant 0 : index
    %223 = vector.load %arg1[%c0_287, %c13_288, %c1_289, %c0_290] : memref<1x21x21x64xf32, #tpu.memory_space<vmem>>, vector<1x1x20x64xf32>
    %224 = vector.shape_cast %223 : vector<1x1x20x64xf32> to vector<20x64xf32>
    %225 = tpu.concatenate %218, %220, %222, %224 in 1 : vector<20x64xf32>, vector<20x64xf32>, vector<20x64xf32>, vector<20x64xf32> -> vector<20x256xf32>
    %c0_291 = arith.constant 0 : index
    %c0_292 = arith.constant 0 : index
    %226 = vector.load %arg2[%c0_291, %c0_292] : memref<256x32xf32, #tpu.memory_space<vmem>>, vector<256x32xf32>
    %cst_293 = arith.constant dense<0.000000e+00> : vector<20x32xf32>
    %227 = tpu.matmul %225, %226, %cst_293 {dimension_numbers = #tpu.dot_dimension_numbers<[1], [0], [0], [1], [0, 0, 1, 1], [], []>} : vector<20x256xf32>, vector<256x32xf32>, vector<20x32xf32> -> vector<20x32xf32>
    %228 = vector.broadcast %0 : vector<1x32xf32> to vector<20x32xf32>
    %229 = arith.addf %227, %228 : vector<20x32xf32>
    %cst_294 = arith.constant 0.000000e+00 : f32
    %230 = vector.broadcast %cst_294 : f32 to vector<20x32xf32>
    %231 = arith.maximumf %229, %230 : vector<20x32xf32>
    %c0_295 = arith.constant 0 : index
    %c12_296 = arith.constant 12 : index
    %c0_297 = arith.constant 0 : index
    %c0_298 = arith.constant 0 : index
    %232 = vector.load %arg4[%c0_295, %c12_296, %c0_297, %c0_298] : memref<1x20x20x32xf32, #tpu.memory_space<vmem>>, vector<1x1x20x32xf32>
    %233 = vector.shape_cast %232 : vector<1x1x20x32xf32> to vector<20x32xf32>
    %234 = vector.shape_cast %231 : vector<20x32xf32> to vector<1x1x20x32xf32>
    tpu.vector_store %arg4[%c0_295, %c12_296, %c0_297, %c0_298], %234 {strides = array<i32>} : memref<1x20x20x32xf32, #tpu.memory_space<vmem>>, vector<1x1x20x32xf32>,
    %c0_299 = arith.constant 0 : index
    %c13_300 = arith.constant 13 : index
    %c0_301 = arith.constant 0 : index
    %c0_302 = arith.constant 0 : index
    %235 = vector.load %arg1[%c0_299, %c13_300, %c0_301, %c0_302] : memref<1x21x21x64xf32, #tpu.memory_space<vmem>>, vector<1x1x20x64xf32>
    %236 = vector.shape_cast %235 : vector<1x1x20x64xf32> to vector<20x64xf32>
    %c0_303 = arith.constant 0 : index
    %c13_304 = arith.constant 13 : index
    %c1_305 = arith.constant 1 : index
    %c0_306 = arith.constant 0 : index
    %237 = vector.load %arg1[%c0_303, %c13_304, %c1_305, %c0_306] : memref<1x21x21x64xf32, #tpu.memory_space<vmem>>, vector<1x1x20x64xf32>
    %238 = vector.shape_cast %237 : vector<1x1x20x64xf32> to vector<20x64xf32>
    %c0_307 = arith.constant 0 : index
    %c14 = arith.constant 14 : index
    %c0_308 = arith.constant 0 : index
    %c0_309 = arith.constant 0 : index
    %239 = vector.load %arg1[%c0_307, %c14, %c0_308, %c0_309] : memref<1x21x21x64xf32, #tpu.memory_space<vmem>>, vector<1x1x20x64xf32>
    %240 = vector.shape_cast %239 : vector<1x1x20x64xf32> to vector<20x64xf32>
    %c0_310 = arith.constant 0 : index
    %c14_311 = arith.constant 14 : index
    %c1_312 = arith.constant 1 : index
    %c0_313 = arith.constant 0 : index
    %241 = vector.load %arg1[%c0_310, %c14_311, %c1_312, %c0_313] : memref<1x21x21x64xf32, #tpu.memory_space<vmem>>, vector<1x1x20x64xf32>
    %242 = vector.shape_cast %241 : vector<1x1x20x64xf32> to vector<20x64xf32>
    %243 = tpu.concatenate %236, %238, %240, %242 in 1 : vector<20x64xf32>, vector<20x64xf32>, vector<20x64xf32>, vector<20x64xf32> -> vector<20x256xf32>
    %c0_314 = arith.constant 0 : index
    %c0_315 = arith.constant 0 : index
    %244 = vector.load %arg2[%c0_314, %c0_315] : memref<256x32xf32, #tpu.memory_space<vmem>>, vector<256x32xf32>
    %cst_316 = arith.constant dense<0.000000e+00> : vector<20x32xf32>
    %245 = tpu.matmul %243, %244, %cst_316 {dimension_numbers = #tpu.dot_dimension_numbers<[1], [0], [0], [1], [0, 0, 1, 1], [], []>} : vector<20x256xf32>, vector<256x32xf32>, vector<20x32xf32> -> vector<20x32xf32>
    %246 = vector.broadcast %0 : vector<1x32xf32> to vector<20x32xf32>
    %247 = arith.addf %245, %246 : vector<20x32xf32>
    %cst_317 = arith.constant 0.000000e+00 : f32
    %248 = vector.broadcast %cst_317 : f32 to vector<20x32xf32>
    %249 = arith.maximumf %247, %248 : vector<20x32xf32>
    %c0_318 = arith.constant 0 : index
    %c13_319 = arith.constant 13 : index
    %c0_320 = arith.constant 0 : index
    %c0_321 = arith.constant 0 : index
    %250 = vector.load %arg4[%c0_318, %c13_319, %c0_320, %c0_321] : memref<1x20x20x32xf32, #tpu.memory_space<vmem>>, vector<1x1x20x32xf32>
    %251 = vector.shape_cast %250 : vector<1x1x20x32xf32> to vector<20x32xf32>
    %252 = vector.shape_cast %249 : vector<20x32xf32> to vector<1x1x20x32xf32>
    tpu.vector_store %arg4[%c0_318, %c13_319, %c0_320, %c0_321], %252 {strides = array<i32>} : memref<1x20x20x32xf32, #tpu.memory_space<vmem>>, vector<1x1x20x32xf32>,
    %c0_322 = arith.constant 0 : index
    %c14_323 = arith.constant 14 : index
    %c0_324 = arith.constant 0 : index
    %c0_325 = arith.constant 0 : index
    %253 = vector.load %arg1[%c0_322, %c14_323, %c0_324, %c0_325] : memref<1x21x21x64xf32, #tpu.memory_space<vmem>>, vector<1x1x20x64xf32>
    %254 = vector.shape_cast %253 : vector<1x1x20x64xf32> to vector<20x64xf32>
    %c0_326 = arith.constant 0 : index
    %c14_327 = arith.constant 14 : index
    %c1_328 = arith.constant 1 : index
    %c0_329 = arith.constant 0 : index
    %255 = vector.load %arg1[%c0_326, %c14_327, %c1_328, %c0_329] : memref<1x21x21x64xf32, #tpu.memory_space<vmem>>, vector<1x1x20x64xf32>
    %256 = vector.shape_cast %255 : vector<1x1x20x64xf32> to vector<20x64xf32>
    %c0_330 = arith.constant 0 : index
    %c15 = arith.constant 15 : index
    %c0_331 = arith.constant 0 : index
    %c0_332 = arith.constant 0 : index
    %257 = vector.load %arg1[%c0_330, %c15, %c0_331, %c0_332] : memref<1x21x21x64xf32, #tpu.memory_space<vmem>>, vector<1x1x20x64xf32>
    %258 = vector.shape_cast %257 : vector<1x1x20x64xf32> to vector<20x64xf32>
    %c0_333 = arith.constant 0 : index
    %c15_334 = arith.constant 15 : index
    %c1_335 = arith.constant 1 : index
    %c0_336 = arith.constant 0 : index
    %259 = vector.load %arg1[%c0_333, %c15_334, %c1_335, %c0_336] : memref<1x21x21x64xf32, #tpu.memory_space<vmem>>, vector<1x1x20x64xf32>
    %260 = vector.shape_cast %259 : vector<1x1x20x64xf32> to vector<20x64xf32>
    %261 = tpu.concatenate %254, %256, %258, %260 in 1 : vector<20x64xf32>, vector<20x64xf32>, vector<20x64xf32>, vector<20x64xf32> -> vector<20x256xf32>
    %c0_337 = arith.constant 0 : index
    %c0_338 = arith.constant 0 : index
    %262 = vector.load %arg2[%c0_337, %c0_338] : memref<256x32xf32, #tpu.memory_space<vmem>>, vector<256x32xf32>
    %cst_339 = arith.constant dense<0.000000e+00> : vector<20x32xf32>
    %263 = tpu.matmul %261, %262, %cst_339 {dimension_numbers = #tpu.dot_dimension_numbers<[1], [0], [0], [1], [0, 0, 1, 1], [], []>} : vector<20x256xf32>, vector<256x32xf32>, vector<20x32xf32> -> vector<20x32xf32>
    %264 = vector.broadcast %0 : vector<1x32xf32> to vector<20x32xf32>
    %265 = arith.addf %263, %264 : vector<20x32xf32>
    %cst_340 = arith.constant 0.000000e+00 : f32
    %266 = vector.broadcast %cst_340 : f32 to vector<20x32xf32>
    %267 = arith.maximumf %265, %266 : vector<20x32xf32>
    %c0_341 = arith.constant 0 : index
    %c14_342 = arith.constant 14 : index
    %c0_343 = arith.constant 0 : index
    %c0_344 = arith.constant 0 : index
    %268 = vector.load %arg4[%c0_341, %c14_342, %c0_343, %c0_344] : memref<1x20x20x32xf32, #tpu.memory_space<vmem>>, vector<1x1x20x32xf32>
    %269 = vector.shape_cast %268 : vector<1x1x20x32xf32> to vector<20x32xf32>
    %270 = vector.shape_cast %267 : vector<20x32xf32> to vector<1x1x20x32xf32>
    tpu.vector_store %arg4[%c0_341, %c14_342, %c0_343, %c0_344], %270 {strides = array<i32>} : memref<1x20x20x32xf32, #tpu.memory_space<vmem>>, vector<1x1x20x32xf32>,
    %c0_345 = arith.constant 0 : index
    %c15_346 = arith.constant 15 : index
    %c0_347 = arith.constant 0 : index
    %c0_348 = arith.constant 0 : index
    %271 = vector.load %arg1[%c0_345, %c15_346, %c0_347, %c0_348] : memref<1x21x21x64xf32, #tpu.memory_space<vmem>>, vector<1x1x20x64xf32>
    %272 = vector.shape_cast %271 : vector<1x1x20x64xf32> to vector<20x64xf32>
    %c0_349 = arith.constant 0 : index
    %c15_350 = arith.constant 15 : index
    %c1_351 = arith.constant 1 : index
    %c0_352 = arith.constant 0 : index
    %273 = vector.load %arg1[%c0_349, %c15_350, %c1_351, %c0_352] : memref<1x21x21x64xf32, #tpu.memory_space<vmem>>, vector<1x1x20x64xf32>
    %274 = vector.shape_cast %273 : vector<1x1x20x64xf32> to vector<20x64xf32>
    %c0_353 = arith.constant 0 : index
    %c16 = arith.constant 16 : index
    %c0_354 = arith.constant 0 : index
    %c0_355 = arith.constant 0 : index
    %275 = vector.load %arg1[%c0_353, %c16, %c0_354, %c0_355] : memref<1x21x21x64xf32, #tpu.memory_space<vmem>>, vector<1x1x20x64xf32>
    %276 = vector.shape_cast %275 : vector<1x1x20x64xf32> to vector<20x64xf32>
    %c0_356 = arith.constant 0 : index
    %c16_357 = arith.constant 16 : index
    %c1_358 = arith.constant 1 : index
    %c0_359 = arith.constant 0 : index
    %277 = vector.load %arg1[%c0_356, %c16_357, %c1_358, %c0_359] : memref<1x21x21x64xf32, #tpu.memory_space<vmem>>, vector<1x1x20x64xf32>
    %278 = vector.shape_cast %277 : vector<1x1x20x64xf32> to vector<20x64xf32>
    %279 = tpu.concatenate %272, %274, %276, %278 in 1 : vector<20x64xf32>, vector<20x64xf32>, vector<20x64xf32>, vector<20x64xf32> -> vector<20x256xf32>
    %c0_360 = arith.constant 0 : index
    %c0_361 = arith.constant 0 : index
    %280 = vector.load %arg2[%c0_360, %c0_361] : memref<256x32xf32, #tpu.memory_space<vmem>>, vector<256x32xf32>
    %cst_362 = arith.constant dense<0.000000e+00> : vector<20x32xf32>
    %281 = tpu.matmul %279, %280, %cst_362 {dimension_numbers = #tpu.dot_dimension_numbers<[1], [0], [0], [1], [0, 0, 1, 1], [], []>} : vector<20x256xf32>, vector<256x32xf32>, vector<20x32xf32> -> vector<20x32xf32>
    %282 = vector.broadcast %0 : vector<1x32xf32> to vector<20x32xf32>
    %283 = arith.addf %281, %282 : vector<20x32xf32>
    %cst_363 = arith.constant 0.000000e+00 : f32
    %284 = vector.broadcast %cst_363 : f32 to vector<20x32xf32>
    %285 = arith.maximumf %283, %284 : vector<20x32xf32>
    %c0_364 = arith.constant 0 : index
    %c15_365 = arith.constant 15 : index
    %c0_366 = arith.constant 0 : index
    %c0_367 = arith.constant 0 : index
    %286 = vector.load %arg4[%c0_364, %c15_365, %c0_366, %c0_367] : memref<1x20x20x32xf32, #tpu.memory_space<vmem>>, vector<1x1x20x32xf32>
    %287 = vector.shape_cast %286 : vector<1x1x20x32xf32> to vector<20x32xf32>
    %288 = vector.shape_cast %285 : vector<20x32xf32> to vector<1x1x20x32xf32>
    tpu.vector_store %arg4[%c0_364, %c15_365, %c0_366, %c0_367], %288 {strides = array<i32>} : memref<1x20x20x32xf32, #tpu.memory_space<vmem>>, vector<1x1x20x32xf32>,
    %c0_368 = arith.constant 0 : index
    %c16_369 = arith.constant 16 : index
    %c0_370 = arith.constant 0 : index
    %c0_371 = arith.constant 0 : index
    %289 = vector.load %arg1[%c0_368, %c16_369, %c0_370, %c0_371] : memref<1x21x21x64xf32, #tpu.memory_space<vmem>>, vector<1x1x20x64xf32>
    %290 = vector.shape_cast %289 : vector<1x1x20x64xf32> to vector<20x64xf32>
    %c0_372 = arith.constant 0 : index
    %c16_373 = arith.constant 16 : index
    %c1_374 = arith.constant 1 : index
    %c0_375 = arith.constant 0 : index
    %291 = vector.load %arg1[%c0_372, %c16_373, %c1_374, %c0_375] : memref<1x21x21x64xf32, #tpu.memory_space<vmem>>, vector<1x1x20x64xf32>
    %292 = vector.shape_cast %291 : vector<1x1x20x64xf32> to vector<20x64xf32>
    %c0_376 = arith.constant 0 : index
    %c17 = arith.constant 17 : index
    %c0_377 = arith.constant 0 : index
    %c0_378 = arith.constant 0 : index
    %293 = vector.load %arg1[%c0_376, %c17, %c0_377, %c0_378] : memref<1x21x21x64xf32, #tpu.memory_space<vmem>>, vector<1x1x20x64xf32>
    %294 = vector.shape_cast %293 : vector<1x1x20x64xf32> to vector<20x64xf32>
    %c0_379 = arith.constant 0 : index
    %c17_380 = arith.constant 17 : index
    %c1_381 = arith.constant 1 : index
    %c0_382 = arith.constant 0 : index
    %295 = vector.load %arg1[%c0_379, %c17_380, %c1_381, %c0_382] : memref<1x21x21x64xf32, #tpu.memory_space<vmem>>, vector<1x1x20x64xf32>
    %296 = vector.shape_cast %295 : vector<1x1x20x64xf32> to vector<20x64xf32>
    %297 = tpu.concatenate %290, %292, %294, %296 in 1 : vector<20x64xf32>, vector<20x64xf32>, vector<20x64xf32>, vector<20x64xf32> -> vector<20x256xf32>
    %c0_383 = arith.constant 0 : index
    %c0_384 = arith.constant 0 : index
    %298 = vector.load %arg2[%c0_383, %c0_384] : memref<256x32xf32, #tpu.memory_space<vmem>>, vector<256x32xf32>
    %cst_385 = arith.constant dense<0.000000e+00> : vector<20x32xf32>
    %299 = tpu.matmul %297, %298, %cst_385 {dimension_numbers = #tpu.dot_dimension_numbers<[1], [0], [0], [1], [0, 0, 1, 1], [], []>} : vector<20x256xf32>, vector<256x32xf32>, vector<20x32xf32> -> vector<20x32xf32>
    %300 = vector.broadcast %0 : vector<1x32xf32> to vector<20x32xf32>
    %301 = arith.addf %299, %300 : vector<20x32xf32>
    %cst_386 = arith.constant 0.000000e+00 : f32
    %302 = vector.broadcast %cst_386 : f32 to vector<20x32xf32>
    %303 = arith.maximumf %301, %302 : vector<20x32xf32>
    %c0_387 = arith.constant 0 : index
    %c16_388 = arith.constant 16 : index
    %c0_389 = arith.constant 0 : index
    %c0_390 = arith.constant 0 : index
    %304 = vector.load %arg4[%c0_387, %c16_388, %c0_389, %c0_390] : memref<1x20x20x32xf32, #tpu.memory_space<vmem>>, vector<1x1x20x32xf32>
    %305 = vector.shape_cast %304 : vector<1x1x20x32xf32> to vector<20x32xf32>
    %306 = vector.shape_cast %303 : vector<20x32xf32> to vector<1x1x20x32xf32>
    tpu.vector_store %arg4[%c0_387, %c16_388, %c0_389, %c0_390], %306 {strides = array<i32>} : memref<1x20x20x32xf32, #tpu.memory_space<vmem>>, vector<1x1x20x32xf32>,
    %c0_391 = arith.constant 0 : index
    %c17_392 = arith.constant 17 : index
    %c0_393 = arith.constant 0 : index
    %c0_394 = arith.constant 0 : index
    %307 = vector.load %arg1[%c0_391, %c17_392, %c0_393, %c0_394] : memref<1x21x21x64xf32, #tpu.memory_space<vmem>>, vector<1x1x20x64xf32>
    %308 = vector.shape_cast %307 : vector<1x1x20x64xf32> to vector<20x64xf32>
    %c0_395 = arith.constant 0 : index
    %c17_396 = arith.constant 17 : index
    %c1_397 = arith.constant 1 : index
    %c0_398 = arith.constant 0 : index
    %309 = vector.load %arg1[%c0_395, %c17_396, %c1_397, %c0_398] : memref<1x21x21x64xf32, #tpu.memory_space<vmem>>, vector<1x1x20x64xf32>
    %310 = vector.shape_cast %309 : vector<1x1x20x64xf32> to vector<20x64xf32>
    %c0_399 = arith.constant 0 : index
    %c18 = arith.constant 18 : index
    %c0_400 = arith.constant 0 : index
    %c0_401 = arith.constant 0 : index
    %311 = vector.load %arg1[%c0_399, %c18, %c0_400, %c0_401] : memref<1x21x21x64xf32, #tpu.memory_space<vmem>>, vector<1x1x20x64xf32>
    %312 = vector.shape_cast %311 : vector<1x1x20x64xf32> to vector<20x64xf32>
    %c0_402 = arith.constant 0 : index
    %c18_403 = arith.constant 18 : index
    %c1_404 = arith.constant 1 : index
    %c0_405 = arith.constant 0 : index
    %313 = vector.load %arg1[%c0_402, %c18_403, %c1_404, %c0_405] : memref<1x21x21x64xf32, #tpu.memory_space<vmem>>, vector<1x1x20x64xf32>
    %314 = vector.shape_cast %313 : vector<1x1x20x64xf32> to vector<20x64xf32>
    %315 = tpu.concatenate %308, %310, %312, %314 in 1 : vector<20x64xf32>, vector<20x64xf32>, vector<20x64xf32>, vector<20x64xf32> -> vector<20x256xf32>
    %c0_406 = arith.constant 0 : index
    %c0_407 = arith.constant 0 : index
    %316 = vector.load %arg2[%c0_406, %c0_407] : memref<256x32xf32, #tpu.memory_space<vmem>>, vector<256x32xf32>
    %cst_408 = arith.constant dense<0.000000e+00> : vector<20x32xf32>
    %317 = tpu.matmul %315, %316, %cst_408 {dimension_numbers = #tpu.dot_dimension_numbers<[1], [0], [0], [1], [0, 0, 1, 1], [], []>} : vector<20x256xf32>, vector<256x32xf32>, vector<20x32xf32> -> vector<20x32xf32>
    %318 = vector.broadcast %0 : vector<1x32xf32> to vector<20x32xf32>
    %319 = arith.addf %317, %318 : vector<20x32xf32>
    %cst_409 = arith.constant 0.000000e+00 : f32
    %320 = vector.broadcast %cst_409 : f32 to vector<20x32xf32>
    %321 = arith.maximumf %319, %320 : vector<20x32xf32>
    %c0_410 = arith.constant 0 : index
    %c17_411 = arith.constant 17 : index
    %c0_412 = arith.constant 0 : index
    %c0_413 = arith.constant 0 : index
    %322 = vector.load %arg4[%c0_410, %c17_411, %c0_412, %c0_413] : memref<1x20x20x32xf32, #tpu.memory_space<vmem>>, vector<1x1x20x32xf32>
    %323 = vector.shape_cast %322 : vector<1x1x20x32xf32> to vector<20x32xf32>
    %324 = vector.shape_cast %321 : vector<20x32xf32> to vector<1x1x20x32xf32>
    tpu.vector_store %arg4[%c0_410, %c17_411, %c0_412, %c0_413], %324 {strides = array<i32>} : memref<1x20x20x32xf32, #tpu.memory_space<vmem>>, vector<1x1x20x32xf32>,
    %c0_414 = arith.constant 0 : index
    %c18_415 = arith.constant 18 : index
    %c0_416 = arith.constant 0 : index
    %c0_417 = arith.constant 0 : index
    %325 = vector.load %arg1[%c0_414, %c18_415, %c0_416, %c0_417] : memref<1x21x21x64xf32, #tpu.memory_space<vmem>>, vector<1x1x20x64xf32>
    %326 = vector.shape_cast %325 : vector<1x1x20x64xf32> to vector<20x64xf32>
    %c0_418 = arith.constant 0 : index
    %c18_419 = arith.constant 18 : index
    %c1_420 = arith.constant 1 : index
    %c0_421 = arith.constant 0 : index
    %327 = vector.load %arg1[%c0_418, %c18_419, %c1_420, %c0_421] : memref<1x21x21x64xf32, #tpu.memory_space<vmem>>, vector<1x1x20x64xf32>
    %328 = vector.shape_cast %327 : vector<1x1x20x64xf32> to vector<20x64xf32>
    %c0_422 = arith.constant 0 : index
    %c19 = arith.constant 19 : index
    %c0_423 = arith.constant 0 : index
    %c0_424 = arith.constant 0 : index
    %329 = vector.load %arg1[%c0_422, %c19, %c0_423, %c0_424] : memref<1x21x21x64xf32, #tpu.memory_space<vmem>>, vector<1x1x20x64xf32>
    %330 = vector.shape_cast %329 : vector<1x1x20x64xf32> to vector<20x64xf32>
    %c0_425 = arith.constant 0 : index
    %c19_426 = arith.constant 19 : index
    %c1_427 = arith.constant 1 : index
    %c0_428 = arith.constant 0 : index
    %331 = vector.load %arg1[%c0_425, %c19_426, %c1_427, %c0_428] : memref<1x21x21x64xf32, #tpu.memory_space<vmem>>, vector<1x1x20x64xf32>
    %332 = vector.shape_cast %331 : vector<1x1x20x64xf32> to vector<20x64xf32>
    %333 = tpu.concatenate %326, %328, %330, %332 in 1 : vector<20x64xf32>, vector<20x64xf32>, vector<20x64xf32>, vector<20x64xf32> -> vector<20x256xf32>
    %c0_429 = arith.constant 0 : index
    %c0_430 = arith.constant 0 : index
    %334 = vector.load %arg2[%c0_429, %c0_430] : memref<256x32xf32, #tpu.memory_space<vmem>>, vector<256x32xf32>
    %cst_431 = arith.constant dense<0.000000e+00> : vector<20x32xf32>
    %335 = tpu.matmul %333, %334, %cst_431 {dimension_numbers = #tpu.dot_dimension_numbers<[1], [0], [0], [1], [0, 0, 1, 1], [], []>} : vector<20x256xf32>, vector<256x32xf32>, vector<20x32xf32> -> vector<20x32xf32>
    %336 = vector.broadcast %0 : vector<1x32xf32> to vector<20x32xf32>
    %337 = arith.addf %335, %336 : vector<20x32xf32>
    %cst_432 = arith.constant 0.000000e+00 : f32
    %338 = vector.broadcast %cst_432 : f32 to vector<20x32xf32>
    %339 = arith.maximumf %337, %338 : vector<20x32xf32>
    %c0_433 = arith.constant 0 : index
    %c18_434 = arith.constant 18 : index
    %c0_435 = arith.constant 0 : index
    %c0_436 = arith.constant 0 : index
    %340 = vector.load %arg4[%c0_433, %c18_434, %c0_435, %c0_436] : memref<1x20x20x32xf32, #tpu.memory_space<vmem>>, vector<1x1x20x32xf32>
    %341 = vector.shape_cast %340 : vector<1x1x20x32xf32> to vector<20x32xf32>
    %342 = vector.shape_cast %339 : vector<20x32xf32> to vector<1x1x20x32xf32>
    tpu.vector_store %arg4[%c0_433, %c18_434, %c0_435, %c0_436], %342 {strides = array<i32>} : memref<1x20x20x32xf32, #tpu.memory_space<vmem>>, vector<1x1x20x32xf32>,
    %c0_437 = arith.constant 0 : index
    %c19_438 = arith.constant 19 : index
    %c0_439 = arith.constant 0 : index
    %c0_440 = arith.constant 0 : index
    %343 = vector.load %arg1[%c0_437, %c19_438, %c0_439, %c0_440] : memref<1x21x21x64xf32, #tpu.memory_space<vmem>>, vector<1x1x20x64xf32>
    %344 = vector.shape_cast %343 : vector<1x1x20x64xf32> to vector<20x64xf32>
    %c0_441 = arith.constant 0 : index
    %c19_442 = arith.constant 19 : index
    %c1_443 = arith.constant 1 : index
    %c0_444 = arith.constant 0 : index
    %345 = vector.load %arg1[%c0_441, %c19_442, %c1_443, %c0_444] : memref<1x21x21x64xf32, #tpu.memory_space<vmem>>, vector<1x1x20x64xf32>
    %346 = vector.shape_cast %345 : vector<1x1x20x64xf32> to vector<20x64xf32>
    %c0_445 = arith.constant 0 : index
    %c20 = arith.constant 20 : index
    %c0_446 = arith.constant 0 : index
    %c0_447 = arith.constant 0 : index
    %347 = vector.load %arg1[%c0_445, %c20, %c0_446, %c0_447] : memref<1x21x21x64xf32, #tpu.memory_space<vmem>>, vector<1x1x20x64xf32>
    %348 = vector.shape_cast %347 : vector<1x1x20x64xf32> to vector<20x64xf32>
    %c0_448 = arith.constant 0 : index
    %c20_449 = arith.constant 20 : index
    %c1_450 = arith.constant 1 : index
    %c0_451 = arith.constant 0 : index
    %349 = vector.load %arg1[%c0_448, %c20_449, %c1_450, %c0_451] : memref<1x21x21x64xf32, #tpu.memory_space<vmem>>, vector<1x1x20x64xf32>
    %350 = vector.shape_cast %349 : vector<1x1x20x64xf32> to vector<20x64xf32>
    %351 = tpu.concatenate %344, %346, %348, %350 in 1 : vector<20x64xf32>, vector<20x64xf32>, vector<20x64xf32>, vector<20x64xf32> -> vector<20x256xf32>
    %c0_452 = arith.constant 0 : index
    %c0_453 = arith.constant 0 : index
    %352 = vector.load %arg2[%c0_452, %c0_453] : memref<256x32xf32, #tpu.memory_space<vmem>>, vector<256x32xf32>
    %cst_454 = arith.constant dense<0.000000e+00> : vector<20x32xf32>
    %353 = tpu.matmul %351, %352, %cst_454 {dimension_numbers = #tpu.dot_dimension_numbers<[1], [0], [0], [1], [0, 0, 1, 1], [], []>} : vector<20x256xf32>, vector<256x32xf32>, vector<20x32xf32> -> vector<20x32xf32>
    %354 = vector.broadcast %0 : vector<1x32xf32> to vector<20x32xf32>
    %355 = arith.addf %353, %354 : vector<20x32xf32>
    %cst_455 = arith.constant 0.000000e+00 : f32
    %356 = vector.broadcast %cst_455 : f32 to vector<20x32xf32>
    %357 = arith.maximumf %355, %356 : vector<20x32xf32>
    %c0_456 = arith.constant 0 : index
    %c19_457 = arith.constant 19 : index
    %c0_458 = arith.constant 0 : index
    %c0_459 = arith.constant 0 : index
    %358 = vector.load %arg4[%c0_456, %c19_457, %c0_458, %c0_459] : memref<1x20x20x32xf32, #tpu.memory_space<vmem>>, vector<1x1x20x32xf32>
    %359 = vector.shape_cast %358 : vector<1x1x20x32xf32> to vector<20x32xf32>
    %360 = vector.shape_cast %357 : vector<20x32xf32> to vector<1x1x20x32xf32>
    tpu.vector_store %arg4[%c0_456, %c19_457, %c0_458, %c0_459], %360 {strides = array<i32>} : memref<1x20x20x32xf32, #tpu.memory_space<vmem>>, vector<1x1x20x32xf32>,
    return
  }
  func.func @transform_0(%arg0: i32) -> (i32, i32, i32, i32) {
    %c0_i32 = arith.constant 0 : i32
    %c0_i32_0 = arith.constant 0 : i32
    %c0_i32_1 = arith.constant 0 : i32
    %c0_i32_2 = arith.constant 0 : i32
    return %arg0, %c0_i32, %c0_i32_0, %c0_i32_1 : i32, i32, i32, i32
  }
  func.func @transform_1(%arg0: i32) -> (i32, i32) {
    %c0_i32 = arith.constant 0 : i32
    %c0_i32_0 = arith.constant 0 : i32
    %c0_i32_1 = arith.constant 0 : i32
    return %c0_i32, %c0_i32_0 : i32, i32
  }
  func.func @transform_2(%arg0: i32) -> (i32, i32) {
    %c0_i32 = arith.constant 0 : i32
    %c0_i32_0 = arith.constant 0 : i32
    %c0_i32_1 = arith.constant 0 : i32
    return %c0_i32, %c0_i32_0 : i32, i32
  }
  func.func @transform_3(%arg0: i32) -> (i32, i32, i32, i32) {
    %c0_i32 = arith.constant 0 : i32
    %c0_i32_0 = arith.constant 0 : i32
    %c0_i32_1 = arith.constant 0 : i32
    %c0_i32_2 = arith.constant 0 : i32
    return %arg0, %c0_i32, %c0_i32_0, %c0_i32_1 : i32, i32, i32, i32
  }
}

module attributes {stable_mosaic.version = 11 : i64} {
  func.func @_conv_taps_kernel(%arg0: i32, %arg1: memref<1x10x10x128xf32, #tpu.memory_space<vmem>>, %arg2: memref<512x64xf32, #tpu.memory_space<vmem>>, %arg3: memref<1x64xf32, #tpu.memory_space<vmem>>, %arg4: memref<1x9x9x64xf32, #tpu.memory_space<vmem>>) attributes {dimension_semantics = [#tpu.dimension_semantics<parallel>], iteration_bounds = array<i64: 2>, scalar_prefetch = 0 : i64, scratch_operands = 0 : i64, tpu.core_type = #tpu.core_type<tc>, window_params = [{transform_indices = @transform_0, window_bounds = array<i64: 1, 10, 10, 128>}, {pipeline_mode = #tpu.pipeline_mode<synchronous>, transform_indices = @transform_1, window_bounds = array<i64: 512, 64>}, {pipeline_mode = #tpu.pipeline_mode<synchronous>, transform_indices = @transform_2, window_bounds = array<i64: 1, 64>}, {transform_indices = @transform_3, window_bounds = array<i64: 1, 9, 9, 64>}]} {
    %c0 = arith.constant 0 : index
    %c0_0 = arith.constant 0 : index
    %0 = vector.load %arg3[%c0, %c0_0] : memref<1x64xf32, #tpu.memory_space<vmem>>, vector<1x64xf32>
    %c0_1 = arith.constant 0 : index
    %c0_2 = arith.constant 0 : index
    %c0_3 = arith.constant 0 : index
    %c0_4 = arith.constant 0 : index
    %1 = vector.load %arg1[%c0_1, %c0_2, %c0_3, %c0_4] : memref<1x10x10x128xf32, #tpu.memory_space<vmem>>, vector<1x1x9x128xf32>
    %2 = vector.shape_cast %1 : vector<1x1x9x128xf32> to vector<9x128xf32>
    %c0_5 = arith.constant 0 : index
    %c0_6 = arith.constant 0 : index
    %c1 = arith.constant 1 : index
    %c0_7 = arith.constant 0 : index
    %3 = vector.load %arg1[%c0_5, %c0_6, %c1, %c0_7] : memref<1x10x10x128xf32, #tpu.memory_space<vmem>>, vector<1x1x9x128xf32>
    %4 = vector.shape_cast %3 : vector<1x1x9x128xf32> to vector<9x128xf32>
    %c0_8 = arith.constant 0 : index
    %c1_9 = arith.constant 1 : index
    %c0_10 = arith.constant 0 : index
    %c0_11 = arith.constant 0 : index
    %5 = vector.load %arg1[%c0_8, %c1_9, %c0_10, %c0_11] : memref<1x10x10x128xf32, #tpu.memory_space<vmem>>, vector<1x1x9x128xf32>
    %6 = vector.shape_cast %5 : vector<1x1x9x128xf32> to vector<9x128xf32>
    %c0_12 = arith.constant 0 : index
    %c1_13 = arith.constant 1 : index
    %c1_14 = arith.constant 1 : index
    %c0_15 = arith.constant 0 : index
    %7 = vector.load %arg1[%c0_12, %c1_13, %c1_14, %c0_15] : memref<1x10x10x128xf32, #tpu.memory_space<vmem>>, vector<1x1x9x128xf32>
    %8 = vector.shape_cast %7 : vector<1x1x9x128xf32> to vector<9x128xf32>
    %9 = tpu.concatenate %2, %4, %6, %8 in 1 : vector<9x128xf32>, vector<9x128xf32>, vector<9x128xf32>, vector<9x128xf32> -> vector<9x512xf32>
    %c0_16 = arith.constant 0 : index
    %c0_17 = arith.constant 0 : index
    %10 = vector.load %arg2[%c0_16, %c0_17] : memref<512x64xf32, #tpu.memory_space<vmem>>, vector<512x64xf32>
    %cst = arith.constant dense<0.000000e+00> : vector<9x64xf32>
    %11 = tpu.matmul %9, %10, %cst {dimension_numbers = #tpu.dot_dimension_numbers<[1], [0], [0], [1], [0, 0, 1, 1], [], []>} : vector<9x512xf32>, vector<512x64xf32>, vector<9x64xf32> -> vector<9x64xf32>
    %12 = vector.broadcast %0 : vector<1x64xf32> to vector<9x64xf32>
    %13 = arith.addf %11, %12 : vector<9x64xf32>
    %cst_18 = arith.constant 0.000000e+00 : f32
    %14 = vector.broadcast %cst_18 : f32 to vector<9x64xf32>
    %15 = arith.maximumf %13, %14 : vector<9x64xf32>
    %c0_19 = arith.constant 0 : index
    %c0_20 = arith.constant 0 : index
    %c0_21 = arith.constant 0 : index
    %c0_22 = arith.constant 0 : index
    %16 = vector.load %arg4[%c0_19, %c0_20, %c0_21, %c0_22] : memref<1x9x9x64xf32, #tpu.memory_space<vmem>>, vector<1x1x9x64xf32>
    %17 = vector.shape_cast %16 : vector<1x1x9x64xf32> to vector<9x64xf32>
    %18 = vector.shape_cast %15 : vector<9x64xf32> to vector<1x1x9x64xf32>
    tpu.vector_store %arg4[%c0_19, %c0_20, %c0_21, %c0_22], %18 {strides = array<i32>} : memref<1x9x9x64xf32, #tpu.memory_space<vmem>>, vector<1x1x9x64xf32>,
    %c0_23 = arith.constant 0 : index
    %c1_24 = arith.constant 1 : index
    %c0_25 = arith.constant 0 : index
    %c0_26 = arith.constant 0 : index
    %19 = vector.load %arg1[%c0_23, %c1_24, %c0_25, %c0_26] : memref<1x10x10x128xf32, #tpu.memory_space<vmem>>, vector<1x1x9x128xf32>
    %20 = vector.shape_cast %19 : vector<1x1x9x128xf32> to vector<9x128xf32>
    %c0_27 = arith.constant 0 : index
    %c1_28 = arith.constant 1 : index
    %c1_29 = arith.constant 1 : index
    %c0_30 = arith.constant 0 : index
    %21 = vector.load %arg1[%c0_27, %c1_28, %c1_29, %c0_30] : memref<1x10x10x128xf32, #tpu.memory_space<vmem>>, vector<1x1x9x128xf32>
    %22 = vector.shape_cast %21 : vector<1x1x9x128xf32> to vector<9x128xf32>
    %c0_31 = arith.constant 0 : index
    %c2 = arith.constant 2 : index
    %c0_32 = arith.constant 0 : index
    %c0_33 = arith.constant 0 : index
    %23 = vector.load %arg1[%c0_31, %c2, %c0_32, %c0_33] : memref<1x10x10x128xf32, #tpu.memory_space<vmem>>, vector<1x1x9x128xf32>
    %24 = vector.shape_cast %23 : vector<1x1x9x128xf32> to vector<9x128xf32>
    %c0_34 = arith.constant 0 : index
    %c2_35 = arith.constant 2 : index
    %c1_36 = arith.constant 1 : index
    %c0_37 = arith.constant 0 : index
    %25 = vector.load %arg1[%c0_34, %c2_35, %c1_36, %c0_37] : memref<1x10x10x128xf32, #tpu.memory_space<vmem>>, vector<1x1x9x128xf32>
    %26 = vector.shape_cast %25 : vector<1x1x9x128xf32> to vector<9x128xf32>
    %27 = tpu.concatenate %20, %22, %24, %26 in 1 : vector<9x128xf32>, vector<9x128xf32>, vector<9x128xf32>, vector<9x128xf32> -> vector<9x512xf32>
    %c0_38 = arith.constant 0 : index
    %c0_39 = arith.constant 0 : index
    %28 = vector.load %arg2[%c0_38, %c0_39] : memref<512x64xf32, #tpu.memory_space<vmem>>, vector<512x64xf32>
    %cst_40 = arith.constant dense<0.000000e+00> : vector<9x64xf32>
    %29 = tpu.matmul %27, %28, %cst_40 {dimension_numbers = #tpu.dot_dimension_numbers<[1], [0], [0], [1], [0, 0, 1, 1], [], []>} : vector<9x512xf32>, vector<512x64xf32>, vector<9x64xf32> -> vector<9x64xf32>
    %30 = vector.broadcast %0 : vector<1x64xf32> to vector<9x64xf32>
    %31 = arith.addf %29, %30 : vector<9x64xf32>
    %cst_41 = arith.constant 0.000000e+00 : f32
    %32 = vector.broadcast %cst_41 : f32 to vector<9x64xf32>
    %33 = arith.maximumf %31, %32 : vector<9x64xf32>
    %c0_42 = arith.constant 0 : index
    %c1_43 = arith.constant 1 : index
    %c0_44 = arith.constant 0 : index
    %c0_45 = arith.constant 0 : index
    %34 = vector.load %arg4[%c0_42, %c1_43, %c0_44, %c0_45] : memref<1x9x9x64xf32, #tpu.memory_space<vmem>>, vector<1x1x9x64xf32>
    %35 = vector.shape_cast %34 : vector<1x1x9x64xf32> to vector<9x64xf32>
    %36 = vector.shape_cast %33 : vector<9x64xf32> to vector<1x1x9x64xf32>
    tpu.vector_store %arg4[%c0_42, %c1_43, %c0_44, %c0_45], %36 {strides = array<i32>} : memref<1x9x9x64xf32, #tpu.memory_space<vmem>>, vector<1x1x9x64xf32>,
    %c0_46 = arith.constant 0 : index
    %c2_47 = arith.constant 2 : index
    %c0_48 = arith.constant 0 : index
    %c0_49 = arith.constant 0 : index
    %37 = vector.load %arg1[%c0_46, %c2_47, %c0_48, %c0_49] : memref<1x10x10x128xf32, #tpu.memory_space<vmem>>, vector<1x1x9x128xf32>
    %38 = vector.shape_cast %37 : vector<1x1x9x128xf32> to vector<9x128xf32>
    %c0_50 = arith.constant 0 : index
    %c2_51 = arith.constant 2 : index
    %c1_52 = arith.constant 1 : index
    %c0_53 = arith.constant 0 : index
    %39 = vector.load %arg1[%c0_50, %c2_51, %c1_52, %c0_53] : memref<1x10x10x128xf32, #tpu.memory_space<vmem>>, vector<1x1x9x128xf32>
    %40 = vector.shape_cast %39 : vector<1x1x9x128xf32> to vector<9x128xf32>
    %c0_54 = arith.constant 0 : index
    %c3 = arith.constant 3 : index
    %c0_55 = arith.constant 0 : index
    %c0_56 = arith.constant 0 : index
    %41 = vector.load %arg1[%c0_54, %c3, %c0_55, %c0_56] : memref<1x10x10x128xf32, #tpu.memory_space<vmem>>, vector<1x1x9x128xf32>
    %42 = vector.shape_cast %41 : vector<1x1x9x128xf32> to vector<9x128xf32>
    %c0_57 = arith.constant 0 : index
    %c3_58 = arith.constant 3 : index
    %c1_59 = arith.constant 1 : index
    %c0_60 = arith.constant 0 : index
    %43 = vector.load %arg1[%c0_57, %c3_58, %c1_59, %c0_60] : memref<1x10x10x128xf32, #tpu.memory_space<vmem>>, vector<1x1x9x128xf32>
    %44 = vector.shape_cast %43 : vector<1x1x9x128xf32> to vector<9x128xf32>
    %45 = tpu.concatenate %38, %40, %42, %44 in 1 : vector<9x128xf32>, vector<9x128xf32>, vector<9x128xf32>, vector<9x128xf32> -> vector<9x512xf32>
    %c0_61 = arith.constant 0 : index
    %c0_62 = arith.constant 0 : index
    %46 = vector.load %arg2[%c0_61, %c0_62] : memref<512x64xf32, #tpu.memory_space<vmem>>, vector<512x64xf32>
    %cst_63 = arith.constant dense<0.000000e+00> : vector<9x64xf32>
    %47 = tpu.matmul %45, %46, %cst_63 {dimension_numbers = #tpu.dot_dimension_numbers<[1], [0], [0], [1], [0, 0, 1, 1], [], []>} : vector<9x512xf32>, vector<512x64xf32>, vector<9x64xf32> -> vector<9x64xf32>
    %48 = vector.broadcast %0 : vector<1x64xf32> to vector<9x64xf32>
    %49 = arith.addf %47, %48 : vector<9x64xf32>
    %cst_64 = arith.constant 0.000000e+00 : f32
    %50 = vector.broadcast %cst_64 : f32 to vector<9x64xf32>
    %51 = arith.maximumf %49, %50 : vector<9x64xf32>
    %c0_65 = arith.constant 0 : index
    %c2_66 = arith.constant 2 : index
    %c0_67 = arith.constant 0 : index
    %c0_68 = arith.constant 0 : index
    %52 = vector.load %arg4[%c0_65, %c2_66, %c0_67, %c0_68] : memref<1x9x9x64xf32, #tpu.memory_space<vmem>>, vector<1x1x9x64xf32>
    %53 = vector.shape_cast %52 : vector<1x1x9x64xf32> to vector<9x64xf32>
    %54 = vector.shape_cast %51 : vector<9x64xf32> to vector<1x1x9x64xf32>
    tpu.vector_store %arg4[%c0_65, %c2_66, %c0_67, %c0_68], %54 {strides = array<i32>} : memref<1x9x9x64xf32, #tpu.memory_space<vmem>>, vector<1x1x9x64xf32>,
    %c0_69 = arith.constant 0 : index
    %c3_70 = arith.constant 3 : index
    %c0_71 = arith.constant 0 : index
    %c0_72 = arith.constant 0 : index
    %55 = vector.load %arg1[%c0_69, %c3_70, %c0_71, %c0_72] : memref<1x10x10x128xf32, #tpu.memory_space<vmem>>, vector<1x1x9x128xf32>
    %56 = vector.shape_cast %55 : vector<1x1x9x128xf32> to vector<9x128xf32>
    %c0_73 = arith.constant 0 : index
    %c3_74 = arith.constant 3 : index
    %c1_75 = arith.constant 1 : index
    %c0_76 = arith.constant 0 : index
    %57 = vector.load %arg1[%c0_73, %c3_74, %c1_75, %c0_76] : memref<1x10x10x128xf32, #tpu.memory_space<vmem>>, vector<1x1x9x128xf32>
    %58 = vector.shape_cast %57 : vector<1x1x9x128xf32> to vector<9x128xf32>
    %c0_77 = arith.constant 0 : index
    %c4 = arith.constant 4 : index
    %c0_78 = arith.constant 0 : index
    %c0_79 = arith.constant 0 : index
    %59 = vector.load %arg1[%c0_77, %c4, %c0_78, %c0_79] : memref<1x10x10x128xf32, #tpu.memory_space<vmem>>, vector<1x1x9x128xf32>
    %60 = vector.shape_cast %59 : vector<1x1x9x128xf32> to vector<9x128xf32>
    %c0_80 = arith.constant 0 : index
    %c4_81 = arith.constant 4 : index
    %c1_82 = arith.constant 1 : index
    %c0_83 = arith.constant 0 : index
    %61 = vector.load %arg1[%c0_80, %c4_81, %c1_82, %c0_83] : memref<1x10x10x128xf32, #tpu.memory_space<vmem>>, vector<1x1x9x128xf32>
    %62 = vector.shape_cast %61 : vector<1x1x9x128xf32> to vector<9x128xf32>
    %63 = tpu.concatenate %56, %58, %60, %62 in 1 : vector<9x128xf32>, vector<9x128xf32>, vector<9x128xf32>, vector<9x128xf32> -> vector<9x512xf32>
    %c0_84 = arith.constant 0 : index
    %c0_85 = arith.constant 0 : index
    %64 = vector.load %arg2[%c0_84, %c0_85] : memref<512x64xf32, #tpu.memory_space<vmem>>, vector<512x64xf32>
    %cst_86 = arith.constant dense<0.000000e+00> : vector<9x64xf32>
    %65 = tpu.matmul %63, %64, %cst_86 {dimension_numbers = #tpu.dot_dimension_numbers<[1], [0], [0], [1], [0, 0, 1, 1], [], []>} : vector<9x512xf32>, vector<512x64xf32>, vector<9x64xf32> -> vector<9x64xf32>
    %66 = vector.broadcast %0 : vector<1x64xf32> to vector<9x64xf32>
    %67 = arith.addf %65, %66 : vector<9x64xf32>
    %cst_87 = arith.constant 0.000000e+00 : f32
    %68 = vector.broadcast %cst_87 : f32 to vector<9x64xf32>
    %69 = arith.maximumf %67, %68 : vector<9x64xf32>
    %c0_88 = arith.constant 0 : index
    %c3_89 = arith.constant 3 : index
    %c0_90 = arith.constant 0 : index
    %c0_91 = arith.constant 0 : index
    %70 = vector.load %arg4[%c0_88, %c3_89, %c0_90, %c0_91] : memref<1x9x9x64xf32, #tpu.memory_space<vmem>>, vector<1x1x9x64xf32>
    %71 = vector.shape_cast %70 : vector<1x1x9x64xf32> to vector<9x64xf32>
    %72 = vector.shape_cast %69 : vector<9x64xf32> to vector<1x1x9x64xf32>
    tpu.vector_store %arg4[%c0_88, %c3_89, %c0_90, %c0_91], %72 {strides = array<i32>} : memref<1x9x9x64xf32, #tpu.memory_space<vmem>>, vector<1x1x9x64xf32>,
    %c0_92 = arith.constant 0 : index
    %c4_93 = arith.constant 4 : index
    %c0_94 = arith.constant 0 : index
    %c0_95 = arith.constant 0 : index
    %73 = vector.load %arg1[%c0_92, %c4_93, %c0_94, %c0_95] : memref<1x10x10x128xf32, #tpu.memory_space<vmem>>, vector<1x1x9x128xf32>
    %74 = vector.shape_cast %73 : vector<1x1x9x128xf32> to vector<9x128xf32>
    %c0_96 = arith.constant 0 : index
    %c4_97 = arith.constant 4 : index
    %c1_98 = arith.constant 1 : index
    %c0_99 = arith.constant 0 : index
    %75 = vector.load %arg1[%c0_96, %c4_97, %c1_98, %c0_99] : memref<1x10x10x128xf32, #tpu.memory_space<vmem>>, vector<1x1x9x128xf32>
    %76 = vector.shape_cast %75 : vector<1x1x9x128xf32> to vector<9x128xf32>
    %c0_100 = arith.constant 0 : index
    %c5 = arith.constant 5 : index
    %c0_101 = arith.constant 0 : index
    %c0_102 = arith.constant 0 : index
    %77 = vector.load %arg1[%c0_100, %c5, %c0_101, %c0_102] : memref<1x10x10x128xf32, #tpu.memory_space<vmem>>, vector<1x1x9x128xf32>
    %78 = vector.shape_cast %77 : vector<1x1x9x128xf32> to vector<9x128xf32>
    %c0_103 = arith.constant 0 : index
    %c5_104 = arith.constant 5 : index
    %c1_105 = arith.constant 1 : index
    %c0_106 = arith.constant 0 : index
    %79 = vector.load %arg1[%c0_103, %c5_104, %c1_105, %c0_106] : memref<1x10x10x128xf32, #tpu.memory_space<vmem>>, vector<1x1x9x128xf32>
    %80 = vector.shape_cast %79 : vector<1x1x9x128xf32> to vector<9x128xf32>
    %81 = tpu.concatenate %74, %76, %78, %80 in 1 : vector<9x128xf32>, vector<9x128xf32>, vector<9x128xf32>, vector<9x128xf32> -> vector<9x512xf32>
    %c0_107 = arith.constant 0 : index
    %c0_108 = arith.constant 0 : index
    %82 = vector.load %arg2[%c0_107, %c0_108] : memref<512x64xf32, #tpu.memory_space<vmem>>, vector<512x64xf32>
    %cst_109 = arith.constant dense<0.000000e+00> : vector<9x64xf32>
    %83 = tpu.matmul %81, %82, %cst_109 {dimension_numbers = #tpu.dot_dimension_numbers<[1], [0], [0], [1], [0, 0, 1, 1], [], []>} : vector<9x512xf32>, vector<512x64xf32>, vector<9x64xf32> -> vector<9x64xf32>
    %84 = vector.broadcast %0 : vector<1x64xf32> to vector<9x64xf32>
    %85 = arith.addf %83, %84 : vector<9x64xf32>
    %cst_110 = arith.constant 0.000000e+00 : f32
    %86 = vector.broadcast %cst_110 : f32 to vector<9x64xf32>
    %87 = arith.maximumf %85, %86 : vector<9x64xf32>
    %c0_111 = arith.constant 0 : index
    %c4_112 = arith.constant 4 : index
    %c0_113 = arith.constant 0 : index
    %c0_114 = arith.constant 0 : index
    %88 = vector.load %arg4[%c0_111, %c4_112, %c0_113, %c0_114] : memref<1x9x9x64xf32, #tpu.memory_space<vmem>>, vector<1x1x9x64xf32>
    %89 = vector.shape_cast %88 : vector<1x1x9x64xf32> to vector<9x64xf32>
    %90 = vector.shape_cast %87 : vector<9x64xf32> to vector<1x1x9x64xf32>
    tpu.vector_store %arg4[%c0_111, %c4_112, %c0_113, %c0_114], %90 {strides = array<i32>} : memref<1x9x9x64xf32, #tpu.memory_space<vmem>>, vector<1x1x9x64xf32>,
    %c0_115 = arith.constant 0 : index
    %c5_116 = arith.constant 5 : index
    %c0_117 = arith.constant 0 : index
    %c0_118 = arith.constant 0 : index
    %91 = vector.load %arg1[%c0_115, %c5_116, %c0_117, %c0_118] : memref<1x10x10x128xf32, #tpu.memory_space<vmem>>, vector<1x1x9x128xf32>
    %92 = vector.shape_cast %91 : vector<1x1x9x128xf32> to vector<9x128xf32>
    %c0_119 = arith.constant 0 : index
    %c5_120 = arith.constant 5 : index
    %c1_121 = arith.constant 1 : index
    %c0_122 = arith.constant 0 : index
    %93 = vector.load %arg1[%c0_119, %c5_120, %c1_121, %c0_122] : memref<1x10x10x128xf32, #tpu.memory_space<vmem>>, vector<1x1x9x128xf32>
    %94 = vector.shape_cast %93 : vector<1x1x9x128xf32> to vector<9x128xf32>
    %c0_123 = arith.constant 0 : index
    %c6 = arith.constant 6 : index
    %c0_124 = arith.constant 0 : index
    %c0_125 = arith.constant 0 : index
    %95 = vector.load %arg1[%c0_123, %c6, %c0_124, %c0_125] : memref<1x10x10x128xf32, #tpu.memory_space<vmem>>, vector<1x1x9x128xf32>
    %96 = vector.shape_cast %95 : vector<1x1x9x128xf32> to vector<9x128xf32>
    %c0_126 = arith.constant 0 : index
    %c6_127 = arith.constant 6 : index
    %c1_128 = arith.constant 1 : index
    %c0_129 = arith.constant 0 : index
    %97 = vector.load %arg1[%c0_126, %c6_127, %c1_128, %c0_129] : memref<1x10x10x128xf32, #tpu.memory_space<vmem>>, vector<1x1x9x128xf32>
    %98 = vector.shape_cast %97 : vector<1x1x9x128xf32> to vector<9x128xf32>
    %99 = tpu.concatenate %92, %94, %96, %98 in 1 : vector<9x128xf32>, vector<9x128xf32>, vector<9x128xf32>, vector<9x128xf32> -> vector<9x512xf32>
    %c0_130 = arith.constant 0 : index
    %c0_131 = arith.constant 0 : index
    %100 = vector.load %arg2[%c0_130, %c0_131] : memref<512x64xf32, #tpu.memory_space<vmem>>, vector<512x64xf32>
    %cst_132 = arith.constant dense<0.000000e+00> : vector<9x64xf32>
    %101 = tpu.matmul %99, %100, %cst_132 {dimension_numbers = #tpu.dot_dimension_numbers<[1], [0], [0], [1], [0, 0, 1, 1], [], []>} : vector<9x512xf32>, vector<512x64xf32>, vector<9x64xf32> -> vector<9x64xf32>
    %102 = vector.broadcast %0 : vector<1x64xf32> to vector<9x64xf32>
    %103 = arith.addf %101, %102 : vector<9x64xf32>
    %cst_133 = arith.constant 0.000000e+00 : f32
    %104 = vector.broadcast %cst_133 : f32 to vector<9x64xf32>
    %105 = arith.maximumf %103, %104 : vector<9x64xf32>
    %c0_134 = arith.constant 0 : index
    %c5_135 = arith.constant 5 : index
    %c0_136 = arith.constant 0 : index
    %c0_137 = arith.constant 0 : index
    %106 = vector.load %arg4[%c0_134, %c5_135, %c0_136, %c0_137] : memref<1x9x9x64xf32, #tpu.memory_space<vmem>>, vector<1x1x9x64xf32>
    %107 = vector.shape_cast %106 : vector<1x1x9x64xf32> to vector<9x64xf32>
    %108 = vector.shape_cast %105 : vector<9x64xf32> to vector<1x1x9x64xf32>
    tpu.vector_store %arg4[%c0_134, %c5_135, %c0_136, %c0_137], %108 {strides = array<i32>} : memref<1x9x9x64xf32, #tpu.memory_space<vmem>>, vector<1x1x9x64xf32>,
    %c0_138 = arith.constant 0 : index
    %c6_139 = arith.constant 6 : index
    %c0_140 = arith.constant 0 : index
    %c0_141 = arith.constant 0 : index
    %109 = vector.load %arg1[%c0_138, %c6_139, %c0_140, %c0_141] : memref<1x10x10x128xf32, #tpu.memory_space<vmem>>, vector<1x1x9x128xf32>
    %110 = vector.shape_cast %109 : vector<1x1x9x128xf32> to vector<9x128xf32>
    %c0_142 = arith.constant 0 : index
    %c6_143 = arith.constant 6 : index
    %c1_144 = arith.constant 1 : index
    %c0_145 = arith.constant 0 : index
    %111 = vector.load %arg1[%c0_142, %c6_143, %c1_144, %c0_145] : memref<1x10x10x128xf32, #tpu.memory_space<vmem>>, vector<1x1x9x128xf32>
    %112 = vector.shape_cast %111 : vector<1x1x9x128xf32> to vector<9x128xf32>
    %c0_146 = arith.constant 0 : index
    %c7 = arith.constant 7 : index
    %c0_147 = arith.constant 0 : index
    %c0_148 = arith.constant 0 : index
    %113 = vector.load %arg1[%c0_146, %c7, %c0_147, %c0_148] : memref<1x10x10x128xf32, #tpu.memory_space<vmem>>, vector<1x1x9x128xf32>
    %114 = vector.shape_cast %113 : vector<1x1x9x128xf32> to vector<9x128xf32>
    %c0_149 = arith.constant 0 : index
    %c7_150 = arith.constant 7 : index
    %c1_151 = arith.constant 1 : index
    %c0_152 = arith.constant 0 : index
    %115 = vector.load %arg1[%c0_149, %c7_150, %c1_151, %c0_152] : memref<1x10x10x128xf32, #tpu.memory_space<vmem>>, vector<1x1x9x128xf32>
    %116 = vector.shape_cast %115 : vector<1x1x9x128xf32> to vector<9x128xf32>
    %117 = tpu.concatenate %110, %112, %114, %116 in 1 : vector<9x128xf32>, vector<9x128xf32>, vector<9x128xf32>, vector<9x128xf32> -> vector<9x512xf32>
    %c0_153 = arith.constant 0 : index
    %c0_154 = arith.constant 0 : index
    %118 = vector.load %arg2[%c0_153, %c0_154] : memref<512x64xf32, #tpu.memory_space<vmem>>, vector<512x64xf32>
    %cst_155 = arith.constant dense<0.000000e+00> : vector<9x64xf32>
    %119 = tpu.matmul %117, %118, %cst_155 {dimension_numbers = #tpu.dot_dimension_numbers<[1], [0], [0], [1], [0, 0, 1, 1], [], []>} : vector<9x512xf32>, vector<512x64xf32>, vector<9x64xf32> -> vector<9x64xf32>
    %120 = vector.broadcast %0 : vector<1x64xf32> to vector<9x64xf32>
    %121 = arith.addf %119, %120 : vector<9x64xf32>
    %cst_156 = arith.constant 0.000000e+00 : f32
    %122 = vector.broadcast %cst_156 : f32 to vector<9x64xf32>
    %123 = arith.maximumf %121, %122 : vector<9x64xf32>
    %c0_157 = arith.constant 0 : index
    %c6_158 = arith.constant 6 : index
    %c0_159 = arith.constant 0 : index
    %c0_160 = arith.constant 0 : index
    %124 = vector.load %arg4[%c0_157, %c6_158, %c0_159, %c0_160] : memref<1x9x9x64xf32, #tpu.memory_space<vmem>>, vector<1x1x9x64xf32>
    %125 = vector.shape_cast %124 : vector<1x1x9x64xf32> to vector<9x64xf32>
    %126 = vector.shape_cast %123 : vector<9x64xf32> to vector<1x1x9x64xf32>
    tpu.vector_store %arg4[%c0_157, %c6_158, %c0_159, %c0_160], %126 {strides = array<i32>} : memref<1x9x9x64xf32, #tpu.memory_space<vmem>>, vector<1x1x9x64xf32>,
    %c0_161 = arith.constant 0 : index
    %c7_162 = arith.constant 7 : index
    %c0_163 = arith.constant 0 : index
    %c0_164 = arith.constant 0 : index
    %127 = vector.load %arg1[%c0_161, %c7_162, %c0_163, %c0_164] : memref<1x10x10x128xf32, #tpu.memory_space<vmem>>, vector<1x1x9x128xf32>
    %128 = vector.shape_cast %127 : vector<1x1x9x128xf32> to vector<9x128xf32>
    %c0_165 = arith.constant 0 : index
    %c7_166 = arith.constant 7 : index
    %c1_167 = arith.constant 1 : index
    %c0_168 = arith.constant 0 : index
    %129 = vector.load %arg1[%c0_165, %c7_166, %c1_167, %c0_168] : memref<1x10x10x128xf32, #tpu.memory_space<vmem>>, vector<1x1x9x128xf32>
    %130 = vector.shape_cast %129 : vector<1x1x9x128xf32> to vector<9x128xf32>
    %c0_169 = arith.constant 0 : index
    %c8 = arith.constant 8 : index
    %c0_170 = arith.constant 0 : index
    %c0_171 = arith.constant 0 : index
    %131 = vector.load %arg1[%c0_169, %c8, %c0_170, %c0_171] : memref<1x10x10x128xf32, #tpu.memory_space<vmem>>, vector<1x1x9x128xf32>
    %132 = vector.shape_cast %131 : vector<1x1x9x128xf32> to vector<9x128xf32>
    %c0_172 = arith.constant 0 : index
    %c8_173 = arith.constant 8 : index
    %c1_174 = arith.constant 1 : index
    %c0_175 = arith.constant 0 : index
    %133 = vector.load %arg1[%c0_172, %c8_173, %c1_174, %c0_175] : memref<1x10x10x128xf32, #tpu.memory_space<vmem>>, vector<1x1x9x128xf32>
    %134 = vector.shape_cast %133 : vector<1x1x9x128xf32> to vector<9x128xf32>
    %135 = tpu.concatenate %128, %130, %132, %134 in 1 : vector<9x128xf32>, vector<9x128xf32>, vector<9x128xf32>, vector<9x128xf32> -> vector<9x512xf32>
    %c0_176 = arith.constant 0 : index
    %c0_177 = arith.constant 0 : index
    %136 = vector.load %arg2[%c0_176, %c0_177] : memref<512x64xf32, #tpu.memory_space<vmem>>, vector<512x64xf32>
    %cst_178 = arith.constant dense<0.000000e+00> : vector<9x64xf32>
    %137 = tpu.matmul %135, %136, %cst_178 {dimension_numbers = #tpu.dot_dimension_numbers<[1], [0], [0], [1], [0, 0, 1, 1], [], []>} : vector<9x512xf32>, vector<512x64xf32>, vector<9x64xf32> -> vector<9x64xf32>
    %138 = vector.broadcast %0 : vector<1x64xf32> to vector<9x64xf32>
    %139 = arith.addf %137, %138 : vector<9x64xf32>
    %cst_179 = arith.constant 0.000000e+00 : f32
    %140 = vector.broadcast %cst_179 : f32 to vector<9x64xf32>
    %141 = arith.maximumf %139, %140 : vector<9x64xf32>
    %c0_180 = arith.constant 0 : index
    %c7_181 = arith.constant 7 : index
    %c0_182 = arith.constant 0 : index
    %c0_183 = arith.constant 0 : index
    %142 = vector.load %arg4[%c0_180, %c7_181, %c0_182, %c0_183] : memref<1x9x9x64xf32, #tpu.memory_space<vmem>>, vector<1x1x9x64xf32>
    %143 = vector.shape_cast %142 : vector<1x1x9x64xf32> to vector<9x64xf32>
    %144 = vector.shape_cast %141 : vector<9x64xf32> to vector<1x1x9x64xf32>
    tpu.vector_store %arg4[%c0_180, %c7_181, %c0_182, %c0_183], %144 {strides = array<i32>} : memref<1x9x9x64xf32, #tpu.memory_space<vmem>>, vector<1x1x9x64xf32>,
    %c0_184 = arith.constant 0 : index
    %c8_185 = arith.constant 8 : index
    %c0_186 = arith.constant 0 : index
    %c0_187 = arith.constant 0 : index
    %145 = vector.load %arg1[%c0_184, %c8_185, %c0_186, %c0_187] : memref<1x10x10x128xf32, #tpu.memory_space<vmem>>, vector<1x1x9x128xf32>
    %146 = vector.shape_cast %145 : vector<1x1x9x128xf32> to vector<9x128xf32>
    %c0_188 = arith.constant 0 : index
    %c8_189 = arith.constant 8 : index
    %c1_190 = arith.constant 1 : index
    %c0_191 = arith.constant 0 : index
    %147 = vector.load %arg1[%c0_188, %c8_189, %c1_190, %c0_191] : memref<1x10x10x128xf32, #tpu.memory_space<vmem>>, vector<1x1x9x128xf32>
    %148 = vector.shape_cast %147 : vector<1x1x9x128xf32> to vector<9x128xf32>
    %c0_192 = arith.constant 0 : index
    %c9 = arith.constant 9 : index
    %c0_193 = arith.constant 0 : index
    %c0_194 = arith.constant 0 : index
    %149 = vector.load %arg1[%c0_192, %c9, %c0_193, %c0_194] : memref<1x10x10x128xf32, #tpu.memory_space<vmem>>, vector<1x1x9x128xf32>
    %150 = vector.shape_cast %149 : vector<1x1x9x128xf32> to vector<9x128xf32>
    %c0_195 = arith.constant 0 : index
    %c9_196 = arith.constant 9 : index
    %c1_197 = arith.constant 1 : index
    %c0_198 = arith.constant 0 : index
    %151 = vector.load %arg1[%c0_195, %c9_196, %c1_197, %c0_198] : memref<1x10x10x128xf32, #tpu.memory_space<vmem>>, vector<1x1x9x128xf32>
    %152 = vector.shape_cast %151 : vector<1x1x9x128xf32> to vector<9x128xf32>
    %153 = tpu.concatenate %146, %148, %150, %152 in 1 : vector<9x128xf32>, vector<9x128xf32>, vector<9x128xf32>, vector<9x128xf32> -> vector<9x512xf32>
    %c0_199 = arith.constant 0 : index
    %c0_200 = arith.constant 0 : index
    %154 = vector.load %arg2[%c0_199, %c0_200] : memref<512x64xf32, #tpu.memory_space<vmem>>, vector<512x64xf32>
    %cst_201 = arith.constant dense<0.000000e+00> : vector<9x64xf32>
    %155 = tpu.matmul %153, %154, %cst_201 {dimension_numbers = #tpu.dot_dimension_numbers<[1], [0], [0], [1], [0, 0, 1, 1], [], []>} : vector<9x512xf32>, vector<512x64xf32>, vector<9x64xf32> -> vector<9x64xf32>
    %156 = vector.broadcast %0 : vector<1x64xf32> to vector<9x64xf32>
    %157 = arith.addf %155, %156 : vector<9x64xf32>
    %cst_202 = arith.constant 0.000000e+00 : f32
    %158 = vector.broadcast %cst_202 : f32 to vector<9x64xf32>
    %159 = arith.maximumf %157, %158 : vector<9x64xf32>
    %c0_203 = arith.constant 0 : index
    %c8_204 = arith.constant 8 : index
    %c0_205 = arith.constant 0 : index
    %c0_206 = arith.constant 0 : index
    %160 = vector.load %arg4[%c0_203, %c8_204, %c0_205, %c0_206] : memref<1x9x9x64xf32, #tpu.memory_space<vmem>>, vector<1x1x9x64xf32>
    %161 = vector.shape_cast %160 : vector<1x1x9x64xf32> to vector<9x64xf32>
    %162 = vector.shape_cast %159 : vector<9x64xf32> to vector<1x1x9x64xf32>
    tpu.vector_store %arg4[%c0_203, %c8_204, %c0_205, %c0_206], %162 {strides = array<i32>} : memref<1x9x9x64xf32, #tpu.memory_space<vmem>>, vector<1x1x9x64xf32>,
    return
  }
  func.func @transform_0(%arg0: i32) -> (i32, i32, i32, i32) {
    %c0_i32 = arith.constant 0 : i32
    %c0_i32_0 = arith.constant 0 : i32
    %c0_i32_1 = arith.constant 0 : i32
    %c0_i32_2 = arith.constant 0 : i32
    return %arg0, %c0_i32, %c0_i32_0, %c0_i32_1 : i32, i32, i32, i32
  }
  func.func @transform_1(%arg0: i32) -> (i32, i32) {
    %c0_i32 = arith.constant 0 : i32
    %c0_i32_0 = arith.constant 0 : i32
    %c0_i32_1 = arith.constant 0 : i32
    return %c0_i32, %c0_i32_0 : i32, i32
  }
  func.func @transform_2(%arg0: i32) -> (i32, i32) {
    %c0_i32 = arith.constant 0 : i32
    %c0_i32_0 = arith.constant 0 : i32
    %c0_i32_1 = arith.constant 0 : i32
    return %c0_i32, %c0_i32_0 : i32, i32
  }
  func.func @transform_3(%arg0: i32) -> (i32, i32, i32, i32) {
    %c0_i32 = arith.constant 0 : i32
    %c0_i32_0 = arith.constant 0 : i32
    %c0_i32_1 = arith.constant 0 : i32
    %c0_i32_2 = arith.constant 0 : i32
    return %arg0, %c0_i32, %c0_i32_0, %c0_i32_1 : i32, i32, i32, i32
  }
}

module attributes {stable_mosaic.version = 11 : i64} {
  func.func @_conv_taps_kernel(%arg0: i32, %arg1: memref<1x9x9x64xf32, #tpu.memory_space<vmem>>, %arg2: memref<576x64xf32, #tpu.memory_space<vmem>>, %arg3: memref<1x64xf32, #tpu.memory_space<vmem>>, %arg4: memref<1x7x7x64xf32, #tpu.memory_space<vmem>>) attributes {dimension_semantics = [#tpu.dimension_semantics<parallel>], iteration_bounds = array<i64: 2>, scalar_prefetch = 0 : i64, scratch_operands = 0 : i64, tpu.core_type = #tpu.core_type<tc>, window_params = [{transform_indices = @transform_0, window_bounds = array<i64: 1, 9, 9, 64>}, {pipeline_mode = #tpu.pipeline_mode<synchronous>, transform_indices = @transform_1, window_bounds = array<i64: 576, 64>}, {pipeline_mode = #tpu.pipeline_mode<synchronous>, transform_indices = @transform_2, window_bounds = array<i64: 1, 64>}, {transform_indices = @transform_3, window_bounds = array<i64: 1, 7, 7, 64>}]} {
    %c0 = arith.constant 0 : index
    %c0_0 = arith.constant 0 : index
    %0 = vector.load %arg3[%c0, %c0_0] : memref<1x64xf32, #tpu.memory_space<vmem>>, vector<1x64xf32>
    %c0_1 = arith.constant 0 : index
    %c0_2 = arith.constant 0 : index
    %c0_3 = arith.constant 0 : index
    %c0_4 = arith.constant 0 : index
    %1 = vector.load %arg1[%c0_1, %c0_2, %c0_3, %c0_4] : memref<1x9x9x64xf32, #tpu.memory_space<vmem>>, vector<1x1x7x64xf32>
    %2 = vector.shape_cast %1 : vector<1x1x7x64xf32> to vector<7x64xf32>
    %c0_5 = arith.constant 0 : index
    %c0_6 = arith.constant 0 : index
    %c1 = arith.constant 1 : index
    %c0_7 = arith.constant 0 : index
    %3 = vector.load %arg1[%c0_5, %c0_6, %c1, %c0_7] : memref<1x9x9x64xf32, #tpu.memory_space<vmem>>, vector<1x1x7x64xf32>
    %4 = vector.shape_cast %3 : vector<1x1x7x64xf32> to vector<7x64xf32>
    %c0_8 = arith.constant 0 : index
    %c0_9 = arith.constant 0 : index
    %c2 = arith.constant 2 : index
    %c0_10 = arith.constant 0 : index
    %5 = vector.load %arg1[%c0_8, %c0_9, %c2, %c0_10] : memref<1x9x9x64xf32, #tpu.memory_space<vmem>>, vector<1x1x7x64xf32>
    %6 = vector.shape_cast %5 : vector<1x1x7x64xf32> to vector<7x64xf32>
    %c0_11 = arith.constant 0 : index
    %c1_12 = arith.constant 1 : index
    %c0_13 = arith.constant 0 : index
    %c0_14 = arith.constant 0 : index
    %7 = vector.load %arg1[%c0_11, %c1_12, %c0_13, %c0_14] : memref<1x9x9x64xf32, #tpu.memory_space<vmem>>, vector<1x1x7x64xf32>
    %8 = vector.shape_cast %7 : vector<1x1x7x64xf32> to vector<7x64xf32>
    %c0_15 = arith.constant 0 : index
    %c1_16 = arith.constant 1 : index
    %c1_17 = arith.constant 1 : index
    %c0_18 = arith.constant 0 : index
    %9 = vector.load %arg1[%c0_15, %c1_16, %c1_17, %c0_18] : memref<1x9x9x64xf32, #tpu.memory_space<vmem>>, vector<1x1x7x64xf32>
    %10 = vector.shape_cast %9 : vector<1x1x7x64xf32> to vector<7x64xf32>
    %c0_19 = arith.constant 0 : index
    %c1_20 = arith.constant 1 : index
    %c2_21 = arith.constant 2 : index
    %c0_22 = arith.constant 0 : index
    %11 = vector.load %arg1[%c0_19, %c1_20, %c2_21, %c0_22] : memref<1x9x9x64xf32, #tpu.memory_space<vmem>>, vector<1x1x7x64xf32>
    %12 = vector.shape_cast %11 : vector<1x1x7x64xf32> to vector<7x64xf32>
    %c0_23 = arith.constant 0 : index
    %c2_24 = arith.constant 2 : index
    %c0_25 = arith.constant 0 : index
    %c0_26 = arith.constant 0 : index
    %13 = vector.load %arg1[%c0_23, %c2_24, %c0_25, %c0_26] : memref<1x9x9x64xf32, #tpu.memory_space<vmem>>, vector<1x1x7x64xf32>
    %14 = vector.shape_cast %13 : vector<1x1x7x64xf32> to vector<7x64xf32>
    %c0_27 = arith.constant 0 : index
    %c2_28 = arith.constant 2 : index
    %c1_29 = arith.constant 1 : index
    %c0_30 = arith.constant 0 : index
    %15 = vector.load %arg1[%c0_27, %c2_28, %c1_29, %c0_30] : memref<1x9x9x64xf32, #tpu.memory_space<vmem>>, vector<1x1x7x64xf32>
    %16 = vector.shape_cast %15 : vector<1x1x7x64xf32> to vector<7x64xf32>
    %c0_31 = arith.constant 0 : index
    %c2_32 = arith.constant 2 : index
    %c2_33 = arith.constant 2 : index
    %c0_34 = arith.constant 0 : index
    %17 = vector.load %arg1[%c0_31, %c2_32, %c2_33, %c0_34] : memref<1x9x9x64xf32, #tpu.memory_space<vmem>>, vector<1x1x7x64xf32>
    %18 = vector.shape_cast %17 : vector<1x1x7x64xf32> to vector<7x64xf32>
    %19 = tpu.concatenate %2, %4, %6, %8, %10, %12, %14, %16, %18 in 1 : vector<7x64xf32>, vector<7x64xf32>, vector<7x64xf32>, vector<7x64xf32>, vector<7x64xf32>, vector<7x64xf32>, vector<7x64xf32>, vector<7x64xf32>, vector<7x64xf32> -> vector<7x576xf32>
    %c0_35 = arith.constant 0 : index
    %c0_36 = arith.constant 0 : index
    %20 = vector.load %arg2[%c0_35, %c0_36] : memref<576x64xf32, #tpu.memory_space<vmem>>, vector<576x64xf32>
    %cst = arith.constant dense<0.000000e+00> : vector<7x64xf32>
    %21 = tpu.matmul %19, %20, %cst {dimension_numbers = #tpu.dot_dimension_numbers<[1], [0], [0], [1], [0, 0, 1, 1], [], []>} : vector<7x576xf32>, vector<576x64xf32>, vector<7x64xf32> -> vector<7x64xf32>
    %22 = vector.broadcast %0 : vector<1x64xf32> to vector<7x64xf32>
    %23 = arith.addf %21, %22 : vector<7x64xf32>
    %cst_37 = arith.constant 0.000000e+00 : f32
    %24 = vector.broadcast %cst_37 : f32 to vector<7x64xf32>
    %25 = arith.maximumf %23, %24 : vector<7x64xf32>
    %c0_38 = arith.constant 0 : index
    %c0_39 = arith.constant 0 : index
    %c0_40 = arith.constant 0 : index
    %c0_41 = arith.constant 0 : index
    %26 = vector.load %arg4[%c0_38, %c0_39, %c0_40, %c0_41] : memref<1x7x7x64xf32, #tpu.memory_space<vmem>>, vector<1x1x7x64xf32>
    %27 = vector.shape_cast %26 : vector<1x1x7x64xf32> to vector<7x64xf32>
    %28 = vector.shape_cast %25 : vector<7x64xf32> to vector<1x1x7x64xf32>
    tpu.vector_store %arg4[%c0_38, %c0_39, %c0_40, %c0_41], %28 {strides = array<i32>} : memref<1x7x7x64xf32, #tpu.memory_space<vmem>>, vector<1x1x7x64xf32>,
    %c0_42 = arith.constant 0 : index
    %c1_43 = arith.constant 1 : index
    %c0_44 = arith.constant 0 : index
    %c0_45 = arith.constant 0 : index
    %29 = vector.load %arg1[%c0_42, %c1_43, %c0_44, %c0_45] : memref<1x9x9x64xf32, #tpu.memory_space<vmem>>, vector<1x1x7x64xf32>
    %30 = vector.shape_cast %29 : vector<1x1x7x64xf32> to vector<7x64xf32>
    %c0_46 = arith.constant 0 : index
    %c1_47 = arith.constant 1 : index
    %c1_48 = arith.constant 1 : index
    %c0_49 = arith.constant 0 : index
    %31 = vector.load %arg1[%c0_46, %c1_47, %c1_48, %c0_49] : memref<1x9x9x64xf32, #tpu.memory_space<vmem>>, vector<1x1x7x64xf32>
    %32 = vector.shape_cast %31 : vector<1x1x7x64xf32> to vector<7x64xf32>
    %c0_50 = arith.constant 0 : index
    %c1_51 = arith.constant 1 : index
    %c2_52 = arith.constant 2 : index
    %c0_53 = arith.constant 0 : index
    %33 = vector.load %arg1[%c0_50, %c1_51, %c2_52, %c0_53] : memref<1x9x9x64xf32, #tpu.memory_space<vmem>>, vector<1x1x7x64xf32>
    %34 = vector.shape_cast %33 : vector<1x1x7x64xf32> to vector<7x64xf32>
    %c0_54 = arith.constant 0 : index
    %c2_55 = arith.constant 2 : index
    %c0_56 = arith.constant 0 : index
    %c0_57 = arith.constant 0 : index
    %35 = vector.load %arg1[%c0_54, %c2_55, %c0_56, %c0_57] : memref<1x9x9x64xf32, #tpu.memory_space<vmem>>, vector<1x1x7x64xf32>
    %36 = vector.shape_cast %35 : vector<1x1x7x64xf32> to vector<7x64xf32>
    %c0_58 = arith.constant 0 : index
    %c2_59 = arith.constant 2 : index
    %c1_60 = arith.constant 1 : index
    %c0_61 = arith.constant 0 : index
    %37 = vector.load %arg1[%c0_58, %c2_59, %c1_60, %c0_61] : memref<1x9x9x64xf32, #tpu.memory_space<vmem>>, vector<1x1x7x64xf32>
    %38 = vector.shape_cast %37 : vector<1x1x7x64xf32> to vector<7x64xf32>
    %c0_62 = arith.constant 0 : index
    %c2_63 = arith.constant 2 : index
    %c2_64 = arith.constant 2 : index
    %c0_65 = arith.constant 0 : index
    %39 = vector.load %arg1[%c0_62, %c2_63, %c2_64, %c0_65] : memref<1x9x9x64xf32, #tpu.memory_space<vmem>>, vector<1x1x7x64xf32>
    %40 = vector.shape_cast %39 : vector<1x1x7x64xf32> to vector<7x64xf32>
    %c0_66 = arith.constant 0 : index
    %c3 = arith.constant 3 : index
    %c0_67 = arith.constant 0 : index
    %c0_68 = arith.constant 0 : index
    %41 = vector.load %arg1[%c0_66, %c3, %c0_67, %c0_68] : memref<1x9x9x64xf32, #tpu.memory_space<vmem>>, vector<1x1x7x64xf32>
    %42 = vector.shape_cast %41 : vector<1x1x7x64xf32> to vector<7x64xf32>
    %c0_69 = arith.constant 0 : index
    %c3_70 = arith.constant 3 : index
    %c1_71 = arith.constant 1 : index
    %c0_72 = arith.constant 0 : index
    %43 = vector.load %arg1[%c0_69, %c3_70, %c1_71, %c0_72] : memref<1x9x9x64xf32, #tpu.memory_space<vmem>>, vector<1x1x7x64xf32>
    %44 = vector.shape_cast %43 : vector<1x1x7x64xf32> to vector<7x64xf32>
    %c0_73 = arith.constant 0 : index
    %c3_74 = arith.constant 3 : index
    %c2_75 = arith.constant 2 : index
    %c0_76 = arith.constant 0 : index
    %45 = vector.load %arg1[%c0_73, %c3_74, %c2_75, %c0_76] : memref<1x9x9x64xf32, #tpu.memory_space<vmem>>, vector<1x1x7x64xf32>
    %46 = vector.shape_cast %45 : vector<1x1x7x64xf32> to vector<7x64xf32>
    %47 = tpu.concatenate %30, %32, %34, %36, %38, %40, %42, %44, %46 in 1 : vector<7x64xf32>, vector<7x64xf32>, vector<7x64xf32>, vector<7x64xf32>, vector<7x64xf32>, vector<7x64xf32>, vector<7x64xf32>, vector<7x64xf32>, vector<7x64xf32> -> vector<7x576xf32>
    %c0_77 = arith.constant 0 : index
    %c0_78 = arith.constant 0 : index
    %48 = vector.load %arg2[%c0_77, %c0_78] : memref<576x64xf32, #tpu.memory_space<vmem>>, vector<576x64xf32>
    %cst_79 = arith.constant dense<0.000000e+00> : vector<7x64xf32>
    %49 = tpu.matmul %47, %48, %cst_79 {dimension_numbers = #tpu.dot_dimension_numbers<[1], [0], [0], [1], [0, 0, 1, 1], [], []>} : vector<7x576xf32>, vector<576x64xf32>, vector<7x64xf32> -> vector<7x64xf32>
    %50 = vector.broadcast %0 : vector<1x64xf32> to vector<7x64xf32>
    %51 = arith.addf %49, %50 : vector<7x64xf32>
    %cst_80 = arith.constant 0.000000e+00 : f32
    %52 = vector.broadcast %cst_80 : f32 to vector<7x64xf32>
    %53 = arith.maximumf %51, %52 : vector<7x64xf32>
    %c0_81 = arith.constant 0 : index
    %c1_82 = arith.constant 1 : index
    %c0_83 = arith.constant 0 : index
    %c0_84 = arith.constant 0 : index
    %54 = vector.load %arg4[%c0_81, %c1_82, %c0_83, %c0_84] : memref<1x7x7x64xf32, #tpu.memory_space<vmem>>, vector<1x1x7x64xf32>
    %55 = vector.shape_cast %54 : vector<1x1x7x64xf32> to vector<7x64xf32>
    %56 = vector.shape_cast %53 : vector<7x64xf32> to vector<1x1x7x64xf32>
    tpu.vector_store %arg4[%c0_81, %c1_82, %c0_83, %c0_84], %56 {strides = array<i32>} : memref<1x7x7x64xf32, #tpu.memory_space<vmem>>, vector<1x1x7x64xf32>,
    %c0_85 = arith.constant 0 : index
    %c2_86 = arith.constant 2 : index
    %c0_87 = arith.constant 0 : index
    %c0_88 = arith.constant 0 : index
    %57 = vector.load %arg1[%c0_85, %c2_86, %c0_87, %c0_88] : memref<1x9x9x64xf32, #tpu.memory_space<vmem>>, vector<1x1x7x64xf32>
    %58 = vector.shape_cast %57 : vector<1x1x7x64xf32> to vector<7x64xf32>
    %c0_89 = arith.constant 0 : index
    %c2_90 = arith.constant 2 : index
    %c1_91 = arith.constant 1 : index
    %c0_92 = arith.constant 0 : index
    %59 = vector.load %arg1[%c0_89, %c2_90, %c1_91, %c0_92] : memref<1x9x9x64xf32, #tpu.memory_space<vmem>>, vector<1x1x7x64xf32>
    %60 = vector.shape_cast %59 : vector<1x1x7x64xf32> to vector<7x64xf32>
    %c0_93 = arith.constant 0 : index
    %c2_94 = arith.constant 2 : index
    %c2_95 = arith.constant 2 : index
    %c0_96 = arith.constant 0 : index
    %61 = vector.load %arg1[%c0_93, %c2_94, %c2_95, %c0_96] : memref<1x9x9x64xf32, #tpu.memory_space<vmem>>, vector<1x1x7x64xf32>
    %62 = vector.shape_cast %61 : vector<1x1x7x64xf32> to vector<7x64xf32>
    %c0_97 = arith.constant 0 : index
    %c3_98 = arith.constant 3 : index
    %c0_99 = arith.constant 0 : index
    %c0_100 = arith.constant 0 : index
    %63 = vector.load %arg1[%c0_97, %c3_98, %c0_99, %c0_100] : memref<1x9x9x64xf32, #tpu.memory_space<vmem>>, vector<1x1x7x64xf32>
    %64 = vector.shape_cast %63 : vector<1x1x7x64xf32> to vector<7x64xf32>
    %c0_101 = arith.constant 0 : index
    %c3_102 = arith.constant 3 : index
    %c1_103 = arith.constant 1 : index
    %c0_104 = arith.constant 0 : index
    %65 = vector.load %arg1[%c0_101, %c3_102, %c1_103, %c0_104] : memref<1x9x9x64xf32, #tpu.memory_space<vmem>>, vector<1x1x7x64xf32>
    %66 = vector.shape_cast %65 : vector<1x1x7x64xf32> to vector<7x64xf32>
    %c0_105 = arith.constant 0 : index
    %c3_106 = arith.constant 3 : index
    %c2_107 = arith.constant 2 : index
    %c0_108 = arith.constant 0 : index
    %67 = vector.load %arg1[%c0_105, %c3_106, %c2_107, %c0_108] : memref<1x9x9x64xf32, #tpu.memory_space<vmem>>, vector<1x1x7x64xf32>
    %68 = vector.shape_cast %67 : vector<1x1x7x64xf32> to vector<7x64xf32>
    %c0_109 = arith.constant 0 : index
    %c4 = arith.constant 4 : index
    %c0_110 = arith.constant 0 : index
    %c0_111 = arith.constant 0 : index
    %69 = vector.load %arg1[%c0_109, %c4, %c0_110, %c0_111] : memref<1x9x9x64xf32, #tpu.memory_space<vmem>>, vector<1x1x7x64xf32>
    %70 = vector.shape_cast %69 : vector<1x1x7x64xf32> to vector<7x64xf32>
    %c0_112 = arith.constant 0 : index
    %c4_113 = arith.constant 4 : index
    %c1_114 = arith.constant 1 : index
    %c0_115 = arith.constant 0 : index
    %71 = vector.load %arg1[%c0_112, %c4_113, %c1_114, %c0_115] : memref<1x9x9x64xf32, #tpu.memory_space<vmem>>, vector<1x1x7x64xf32>
    %72 = vector.shape_cast %71 : vector<1x1x7x64xf32> to vector<7x64xf32>
    %c0_116 = arith.constant 0 : index
    %c4_117 = arith.constant 4 : index
    %c2_118 = arith.constant 2 : index
    %c0_119 = arith.constant 0 : index
    %73 = vector.load %arg1[%c0_116, %c4_117, %c2_118, %c0_119] : memref<1x9x9x64xf32, #tpu.memory_space<vmem>>, vector<1x1x7x64xf32>
    %74 = vector.shape_cast %73 : vector<1x1x7x64xf32> to vector<7x64xf32>
    %75 = tpu.concatenate %58, %60, %62, %64, %66, %68, %70, %72, %74 in 1 : vector<7x64xf32>, vector<7x64xf32>, vector<7x64xf32>, vector<7x64xf32>, vector<7x64xf32>, vector<7x64xf32>, vector<7x64xf32>, vector<7x64xf32>, vector<7x64xf32> -> vector<7x576xf32>
    %c0_120 = arith.constant 0 : index
    %c0_121 = arith.constant 0 : index
    %76 = vector.load %arg2[%c0_120, %c0_121] : memref<576x64xf32, #tpu.memory_space<vmem>>, vector<576x64xf32>
    %cst_122 = arith.constant dense<0.000000e+00> : vector<7x64xf32>
    %77 = tpu.matmul %75, %76, %cst_122 {dimension_numbers = #tpu.dot_dimension_numbers<[1], [0], [0], [1], [0, 0, 1, 1], [], []>} : vector<7x576xf32>, vector<576x64xf32>, vector<7x64xf32> -> vector<7x64xf32>
    %78 = vector.broadcast %0 : vector<1x64xf32> to vector<7x64xf32>
    %79 = arith.addf %77, %78 : vector<7x64xf32>
    %cst_123 = arith.constant 0.000000e+00 : f32
    %80 = vector.broadcast %cst_123 : f32 to vector<7x64xf32>
    %81 = arith.maximumf %79, %80 : vector<7x64xf32>
    %c0_124 = arith.constant 0 : index
    %c2_125 = arith.constant 2 : index
    %c0_126 = arith.constant 0 : index
    %c0_127 = arith.constant 0 : index
    %82 = vector.load %arg4[%c0_124, %c2_125, %c0_126, %c0_127] : memref<1x7x7x64xf32, #tpu.memory_space<vmem>>, vector<1x1x7x64xf32>
    %83 = vector.shape_cast %82 : vector<1x1x7x64xf32> to vector<7x64xf32>
    %84 = vector.shape_cast %81 : vector<7x64xf32> to vector<1x1x7x64xf32>
    tpu.vector_store %arg4[%c0_124, %c2_125, %c0_126, %c0_127], %84 {strides = array<i32>} : memref<1x7x7x64xf32, #tpu.memory_space<vmem>>, vector<1x1x7x64xf32>,
    %c0_128 = arith.constant 0 : index
    %c3_129 = arith.constant 3 : index
    %c0_130 = arith.constant 0 : index
    %c0_131 = arith.constant 0 : index
    %85 = vector.load %arg1[%c0_128, %c3_129, %c0_130, %c0_131] : memref<1x9x9x64xf32, #tpu.memory_space<vmem>>, vector<1x1x7x64xf32>
    %86 = vector.shape_cast %85 : vector<1x1x7x64xf32> to vector<7x64xf32>
    %c0_132 = arith.constant 0 : index
    %c3_133 = arith.constant 3 : index
    %c1_134 = arith.constant 1 : index
    %c0_135 = arith.constant 0 : index
    %87 = vector.load %arg1[%c0_132, %c3_133, %c1_134, %c0_135] : memref<1x9x9x64xf32, #tpu.memory_space<vmem>>, vector<1x1x7x64xf32>
    %88 = vector.shape_cast %87 : vector<1x1x7x64xf32> to vector<7x64xf32>
    %c0_136 = arith.constant 0 : index
    %c3_137 = arith.constant 3 : index
    %c2_138 = arith.constant 2 : index
    %c0_139 = arith.constant 0 : index
    %89 = vector.load %arg1[%c0_136, %c3_137, %c2_138, %c0_139] : memref<1x9x9x64xf32, #tpu.memory_space<vmem>>, vector<1x1x7x64xf32>
    %90 = vector.shape_cast %89 : vector<1x1x7x64xf32> to vector<7x64xf32>
    %c0_140 = arith.constant 0 : index
    %c4_141 = arith.constant 4 : index
    %c0_142 = arith.constant 0 : index
    %c0_143 = arith.constant 0 : index
    %91 = vector.load %arg1[%c0_140, %c4_141, %c0_142, %c0_143] : memref<1x9x9x64xf32, #tpu.memory_space<vmem>>, vector<1x1x7x64xf32>
    %92 = vector.shape_cast %91 : vector<1x1x7x64xf32> to vector<7x64xf32>
    %c0_144 = arith.constant 0 : index
    %c4_145 = arith.constant 4 : index
    %c1_146 = arith.constant 1 : index
    %c0_147 = arith.constant 0 : index
    %93 = vector.load %arg1[%c0_144, %c4_145, %c1_146, %c0_147] : memref<1x9x9x64xf32, #tpu.memory_space<vmem>>, vector<1x1x7x64xf32>
    %94 = vector.shape_cast %93 : vector<1x1x7x64xf32> to vector<7x64xf32>
    %c0_148 = arith.constant 0 : index
    %c4_149 = arith.constant 4 : index
    %c2_150 = arith.constant 2 : index
    %c0_151 = arith.constant 0 : index
    %95 = vector.load %arg1[%c0_148, %c4_149, %c2_150, %c0_151] : memref<1x9x9x64xf32, #tpu.memory_space<vmem>>, vector<1x1x7x64xf32>
    %96 = vector.shape_cast %95 : vector<1x1x7x64xf32> to vector<7x64xf32>
    %c0_152 = arith.constant 0 : index
    %c5 = arith.constant 5 : index
    %c0_153 = arith.constant 0 : index
    %c0_154 = arith.constant 0 : index
    %97 = vector.load %arg1[%c0_152, %c5, %c0_153, %c0_154] : memref<1x9x9x64xf32, #tpu.memory_space<vmem>>, vector<1x1x7x64xf32>
    %98 = vector.shape_cast %97 : vector<1x1x7x64xf32> to vector<7x64xf32>
    %c0_155 = arith.constant 0 : index
    %c5_156 = arith.constant 5 : index
    %c1_157 = arith.constant 1 : index
    %c0_158 = arith.constant 0 : index
    %99 = vector.load %arg1[%c0_155, %c5_156, %c1_157, %c0_158] : memref<1x9x9x64xf32, #tpu.memory_space<vmem>>, vector<1x1x7x64xf32>
    %100 = vector.shape_cast %99 : vector<1x1x7x64xf32> to vector<7x64xf32>
    %c0_159 = arith.constant 0 : index
    %c5_160 = arith.constant 5 : index
    %c2_161 = arith.constant 2 : index
    %c0_162 = arith.constant 0 : index
    %101 = vector.load %arg1[%c0_159, %c5_160, %c2_161, %c0_162] : memref<1x9x9x64xf32, #tpu.memory_space<vmem>>, vector<1x1x7x64xf32>
    %102 = vector.shape_cast %101 : vector<1x1x7x64xf32> to vector<7x64xf32>
    %103 = tpu.concatenate %86, %88, %90, %92, %94, %96, %98, %100, %102 in 1 : vector<7x64xf32>, vector<7x64xf32>, vector<7x64xf32>, vector<7x64xf32>, vector<7x64xf32>, vector<7x64xf32>, vector<7x64xf32>, vector<7x64xf32>, vector<7x64xf32> -> vector<7x576xf32>
    %c0_163 = arith.constant 0 : index
    %c0_164 = arith.constant 0 : index
    %104 = vector.load %arg2[%c0_163, %c0_164] : memref<576x64xf32, #tpu.memory_space<vmem>>, vector<576x64xf32>
    %cst_165 = arith.constant dense<0.000000e+00> : vector<7x64xf32>
    %105 = tpu.matmul %103, %104, %cst_165 {dimension_numbers = #tpu.dot_dimension_numbers<[1], [0], [0], [1], [0, 0, 1, 1], [], []>} : vector<7x576xf32>, vector<576x64xf32>, vector<7x64xf32> -> vector<7x64xf32>
    %106 = vector.broadcast %0 : vector<1x64xf32> to vector<7x64xf32>
    %107 = arith.addf %105, %106 : vector<7x64xf32>
    %cst_166 = arith.constant 0.000000e+00 : f32
    %108 = vector.broadcast %cst_166 : f32 to vector<7x64xf32>
    %109 = arith.maximumf %107, %108 : vector<7x64xf32>
    %c0_167 = arith.constant 0 : index
    %c3_168 = arith.constant 3 : index
    %c0_169 = arith.constant 0 : index
    %c0_170 = arith.constant 0 : index
    %110 = vector.load %arg4[%c0_167, %c3_168, %c0_169, %c0_170] : memref<1x7x7x64xf32, #tpu.memory_space<vmem>>, vector<1x1x7x64xf32>
    %111 = vector.shape_cast %110 : vector<1x1x7x64xf32> to vector<7x64xf32>
    %112 = vector.shape_cast %109 : vector<7x64xf32> to vector<1x1x7x64xf32>
    tpu.vector_store %arg4[%c0_167, %c3_168, %c0_169, %c0_170], %112 {strides = array<i32>} : memref<1x7x7x64xf32, #tpu.memory_space<vmem>>, vector<1x1x7x64xf32>,
    %c0_171 = arith.constant 0 : index
    %c4_172 = arith.constant 4 : index
    %c0_173 = arith.constant 0 : index
    %c0_174 = arith.constant 0 : index
    %113 = vector.load %arg1[%c0_171, %c4_172, %c0_173, %c0_174] : memref<1x9x9x64xf32, #tpu.memory_space<vmem>>, vector<1x1x7x64xf32>
    %114 = vector.shape_cast %113 : vector<1x1x7x64xf32> to vector<7x64xf32>
    %c0_175 = arith.constant 0 : index
    %c4_176 = arith.constant 4 : index
    %c1_177 = arith.constant 1 : index
    %c0_178 = arith.constant 0 : index
    %115 = vector.load %arg1[%c0_175, %c4_176, %c1_177, %c0_178] : memref<1x9x9x64xf32, #tpu.memory_space<vmem>>, vector<1x1x7x64xf32>
    %116 = vector.shape_cast %115 : vector<1x1x7x64xf32> to vector<7x64xf32>
    %c0_179 = arith.constant 0 : index
    %c4_180 = arith.constant 4 : index
    %c2_181 = arith.constant 2 : index
    %c0_182 = arith.constant 0 : index
    %117 = vector.load %arg1[%c0_179, %c4_180, %c2_181, %c0_182] : memref<1x9x9x64xf32, #tpu.memory_space<vmem>>, vector<1x1x7x64xf32>
    %118 = vector.shape_cast %117 : vector<1x1x7x64xf32> to vector<7x64xf32>
    %c0_183 = arith.constant 0 : index
    %c5_184 = arith.constant 5 : index
    %c0_185 = arith.constant 0 : index
    %c0_186 = arith.constant 0 : index
    %119 = vector.load %arg1[%c0_183, %c5_184, %c0_185, %c0_186] : memref<1x9x9x64xf32, #tpu.memory_space<vmem>>, vector<1x1x7x64xf32>
    %120 = vector.shape_cast %119 : vector<1x1x7x64xf32> to vector<7x64xf32>
    %c0_187 = arith.constant 0 : index
    %c5_188 = arith.constant 5 : index
    %c1_189 = arith.constant 1 : index
    %c0_190 = arith.constant 0 : index
    %121 = vector.load %arg1[%c0_187, %c5_188, %c1_189, %c0_190] : memref<1x9x9x64xf32, #tpu.memory_space<vmem>>, vector<1x1x7x64xf32>
    %122 = vector.shape_cast %121 : vector<1x1x7x64xf32> to vector<7x64xf32>
    %c0_191 = arith.constant 0 : index
    %c5_192 = arith.constant 5 : index
    %c2_193 = arith.constant 2 : index
    %c0_194 = arith.constant 0 : index
    %123 = vector.load %arg1[%c0_191, %c5_192, %c2_193, %c0_194] : memref<1x9x9x64xf32, #tpu.memory_space<vmem>>, vector<1x1x7x64xf32>
    %124 = vector.shape_cast %123 : vector<1x1x7x64xf32> to vector<7x64xf32>
    %c0_195 = arith.constant 0 : index
    %c6 = arith.constant 6 : index
    %c0_196 = arith.constant 0 : index
    %c0_197 = arith.constant 0 : index
    %125 = vector.load %arg1[%c0_195, %c6, %c0_196, %c0_197] : memref<1x9x9x64xf32, #tpu.memory_space<vmem>>, vector<1x1x7x64xf32>
    %126 = vector.shape_cast %125 : vector<1x1x7x64xf32> to vector<7x64xf32>
    %c0_198 = arith.constant 0 : index
    %c6_199 = arith.constant 6 : index
    %c1_200 = arith.constant 1 : index
    %c0_201 = arith.constant 0 : index
    %127 = vector.load %arg1[%c0_198, %c6_199, %c1_200, %c0_201] : memref<1x9x9x64xf32, #tpu.memory_space<vmem>>, vector<1x1x7x64xf32>
    %128 = vector.shape_cast %127 : vector<1x1x7x64xf32> to vector<7x64xf32>
    %c0_202 = arith.constant 0 : index
    %c6_203 = arith.constant 6 : index
    %c2_204 = arith.constant 2 : index
    %c0_205 = arith.constant 0 : index
    %129 = vector.load %arg1[%c0_202, %c6_203, %c2_204, %c0_205] : memref<1x9x9x64xf32, #tpu.memory_space<vmem>>, vector<1x1x7x64xf32>
    %130 = vector.shape_cast %129 : vector<1x1x7x64xf32> to vector<7x64xf32>
    %131 = tpu.concatenate %114, %116, %118, %120, %122, %124, %126, %128, %130 in 1 : vector<7x64xf32>, vector<7x64xf32>, vector<7x64xf32>, vector<7x64xf32>, vector<7x64xf32>, vector<7x64xf32>, vector<7x64xf32>, vector<7x64xf32>, vector<7x64xf32> -> vector<7x576xf32>
    %c0_206 = arith.constant 0 : index
    %c0_207 = arith.constant 0 : index
    %132 = vector.load %arg2[%c0_206, %c0_207] : memref<576x64xf32, #tpu.memory_space<vmem>>, vector<576x64xf32>
    %cst_208 = arith.constant dense<0.000000e+00> : vector<7x64xf32>
    %133 = tpu.matmul %131, %132, %cst_208 {dimension_numbers = #tpu.dot_dimension_numbers<[1], [0], [0], [1], [0, 0, 1, 1], [], []>} : vector<7x576xf32>, vector<576x64xf32>, vector<7x64xf32> -> vector<7x64xf32>
    %134 = vector.broadcast %0 : vector<1x64xf32> to vector<7x64xf32>
    %135 = arith.addf %133, %134 : vector<7x64xf32>
    %cst_209 = arith.constant 0.000000e+00 : f32
    %136 = vector.broadcast %cst_209 : f32 to vector<7x64xf32>
    %137 = arith.maximumf %135, %136 : vector<7x64xf32>
    %c0_210 = arith.constant 0 : index
    %c4_211 = arith.constant 4 : index
    %c0_212 = arith.constant 0 : index
    %c0_213 = arith.constant 0 : index
    %138 = vector.load %arg4[%c0_210, %c4_211, %c0_212, %c0_213] : memref<1x7x7x64xf32, #tpu.memory_space<vmem>>, vector<1x1x7x64xf32>
    %139 = vector.shape_cast %138 : vector<1x1x7x64xf32> to vector<7x64xf32>
    %140 = vector.shape_cast %137 : vector<7x64xf32> to vector<1x1x7x64xf32>
    tpu.vector_store %arg4[%c0_210, %c4_211, %c0_212, %c0_213], %140 {strides = array<i32>} : memref<1x7x7x64xf32, #tpu.memory_space<vmem>>, vector<1x1x7x64xf32>,
    %c0_214 = arith.constant 0 : index
    %c5_215 = arith.constant 5 : index
    %c0_216 = arith.constant 0 : index
    %c0_217 = arith.constant 0 : index
    %141 = vector.load %arg1[%c0_214, %c5_215, %c0_216, %c0_217] : memref<1x9x9x64xf32, #tpu.memory_space<vmem>>, vector<1x1x7x64xf32>
    %142 = vector.shape_cast %141 : vector<1x1x7x64xf32> to vector<7x64xf32>
    %c0_218 = arith.constant 0 : index
    %c5_219 = arith.constant 5 : index
    %c1_220 = arith.constant 1 : index
    %c0_221 = arith.constant 0 : index
    %143 = vector.load %arg1[%c0_218, %c5_219, %c1_220, %c0_221] : memref<1x9x9x64xf32, #tpu.memory_space<vmem>>, vector<1x1x7x64xf32>
    %144 = vector.shape_cast %143 : vector<1x1x7x64xf32> to vector<7x64xf32>
    %c0_222 = arith.constant 0 : index
    %c5_223 = arith.constant 5 : index
    %c2_224 = arith.constant 2 : index
    %c0_225 = arith.constant 0 : index
    %145 = vector.load %arg1[%c0_222, %c5_223, %c2_224, %c0_225] : memref<1x9x9x64xf32, #tpu.memory_space<vmem>>, vector<1x1x7x64xf32>
    %146 = vector.shape_cast %145 : vector<1x1x7x64xf32> to vector<7x64xf32>
    %c0_226 = arith.constant 0 : index
    %c6_227 = arith.constant 6 : index
    %c0_228 = arith.constant 0 : index
    %c0_229 = arith.constant 0 : index
    %147 = vector.load %arg1[%c0_226, %c6_227, %c0_228, %c0_229] : memref<1x9x9x64xf32, #tpu.memory_space<vmem>>, vector<1x1x7x64xf32>
    %148 = vector.shape_cast %147 : vector<1x1x7x64xf32> to vector<7x64xf32>
    %c0_230 = arith.constant 0 : index
    %c6_231 = arith.constant 6 : index
    %c1_232 = arith.constant 1 : index
    %c0_233 = arith.constant 0 : index
    %149 = vector.load %arg1[%c0_230, %c6_231, %c1_232, %c0_233] : memref<1x9x9x64xf32, #tpu.memory_space<vmem>>, vector<1x1x7x64xf32>
    %150 = vector.shape_cast %149 : vector<1x1x7x64xf32> to vector<7x64xf32>
    %c0_234 = arith.constant 0 : index
    %c6_235 = arith.constant 6 : index
    %c2_236 = arith.constant 2 : index
    %c0_237 = arith.constant 0 : index
    %151 = vector.load %arg1[%c0_234, %c6_235, %c2_236, %c0_237] : memref<1x9x9x64xf32, #tpu.memory_space<vmem>>, vector<1x1x7x64xf32>
    %152 = vector.shape_cast %151 : vector<1x1x7x64xf32> to vector<7x64xf32>
    %c0_238 = arith.constant 0 : index
    %c7 = arith.constant 7 : index
    %c0_239 = arith.constant 0 : index
    %c0_240 = arith.constant 0 : index
    %153 = vector.load %arg1[%c0_238, %c7, %c0_239, %c0_240] : memref<1x9x9x64xf32, #tpu.memory_space<vmem>>, vector<1x1x7x64xf32>
    %154 = vector.shape_cast %153 : vector<1x1x7x64xf32> to vector<7x64xf32>
    %c0_241 = arith.constant 0 : index
    %c7_242 = arith.constant 7 : index
    %c1_243 = arith.constant 1 : index
    %c0_244 = arith.constant 0 : index
    %155 = vector.load %arg1[%c0_241, %c7_242, %c1_243, %c0_244] : memref<1x9x9x64xf32, #tpu.memory_space<vmem>>, vector<1x1x7x64xf32>
    %156 = vector.shape_cast %155 : vector<1x1x7x64xf32> to vector<7x64xf32>
    %c0_245 = arith.constant 0 : index
    %c7_246 = arith.constant 7 : index
    %c2_247 = arith.constant 2 : index
    %c0_248 = arith.constant 0 : index
    %157 = vector.load %arg1[%c0_245, %c7_246, %c2_247, %c0_248] : memref<1x9x9x64xf32, #tpu.memory_space<vmem>>, vector<1x1x7x64xf32>
    %158 = vector.shape_cast %157 : vector<1x1x7x64xf32> to vector<7x64xf32>
    %159 = tpu.concatenate %142, %144, %146, %148, %150, %152, %154, %156, %158 in 1 : vector<7x64xf32>, vector<7x64xf32>, vector<7x64xf32>, vector<7x64xf32>, vector<7x64xf32>, vector<7x64xf32>, vector<7x64xf32>, vector<7x64xf32>, vector<7x64xf32> -> vector<7x576xf32>
    %c0_249 = arith.constant 0 : index
    %c0_250 = arith.constant 0 : index
    %160 = vector.load %arg2[%c0_249, %c0_250] : memref<576x64xf32, #tpu.memory_space<vmem>>, vector<576x64xf32>
    %cst_251 = arith.constant dense<0.000000e+00> : vector<7x64xf32>
    %161 = tpu.matmul %159, %160, %cst_251 {dimension_numbers = #tpu.dot_dimension_numbers<[1], [0], [0], [1], [0, 0, 1, 1], [], []>} : vector<7x576xf32>, vector<576x64xf32>, vector<7x64xf32> -> vector<7x64xf32>
    %162 = vector.broadcast %0 : vector<1x64xf32> to vector<7x64xf32>
    %163 = arith.addf %161, %162 : vector<7x64xf32>
    %cst_252 = arith.constant 0.000000e+00 : f32
    %164 = vector.broadcast %cst_252 : f32 to vector<7x64xf32>
    %165 = arith.maximumf %163, %164 : vector<7x64xf32>
    %c0_253 = arith.constant 0 : index
    %c5_254 = arith.constant 5 : index
    %c0_255 = arith.constant 0 : index
    %c0_256 = arith.constant 0 : index
    %166 = vector.load %arg4[%c0_253, %c5_254, %c0_255, %c0_256] : memref<1x7x7x64xf32, #tpu.memory_space<vmem>>, vector<1x1x7x64xf32>
    %167 = vector.shape_cast %166 : vector<1x1x7x64xf32> to vector<7x64xf32>
    %168 = vector.shape_cast %165 : vector<7x64xf32> to vector<1x1x7x64xf32>
    tpu.vector_store %arg4[%c0_253, %c5_254, %c0_255, %c0_256], %168 {strides = array<i32>} : memref<1x7x7x64xf32, #tpu.memory_space<vmem>>, vector<1x1x7x64xf32>,
    %c0_257 = arith.constant 0 : index
    %c6_258 = arith.constant 6 : index
    %c0_259 = arith.constant 0 : index
    %c0_260 = arith.constant 0 : index
    %169 = vector.load %arg1[%c0_257, %c6_258, %c0_259, %c0_260] : memref<1x9x9x64xf32, #tpu.memory_space<vmem>>, vector<1x1x7x64xf32>
    %170 = vector.shape_cast %169 : vector<1x1x7x64xf32> to vector<7x64xf32>
    %c0_261 = arith.constant 0 : index
    %c6_262 = arith.constant 6 : index
    %c1_263 = arith.constant 1 : index
    %c0_264 = arith.constant 0 : index
    %171 = vector.load %arg1[%c0_261, %c6_262, %c1_263, %c0_264] : memref<1x9x9x64xf32, #tpu.memory_space<vmem>>, vector<1x1x7x64xf32>
    %172 = vector.shape_cast %171 : vector<1x1x7x64xf32> to vector<7x64xf32>
    %c0_265 = arith.constant 0 : index
    %c6_266 = arith.constant 6 : index
    %c2_267 = arith.constant 2 : index
    %c0_268 = arith.constant 0 : index
    %173 = vector.load %arg1[%c0_265, %c6_266, %c2_267, %c0_268] : memref<1x9x9x64xf32, #tpu.memory_space<vmem>>, vector<1x1x7x64xf32>
    %174 = vector.shape_cast %173 : vector<1x1x7x64xf32> to vector<7x64xf32>
    %c0_269 = arith.constant 0 : index
    %c7_270 = arith.constant 7 : index
    %c0_271 = arith.constant 0 : index
    %c0_272 = arith.constant 0 : index
    %175 = vector.load %arg1[%c0_269, %c7_270, %c0_271, %c0_272] : memref<1x9x9x64xf32, #tpu.memory_space<vmem>>, vector<1x1x7x64xf32>
    %176 = vector.shape_cast %175 : vector<1x1x7x64xf32> to vector<7x64xf32>
    %c0_273 = arith.constant 0 : index
    %c7_274 = arith.constant 7 : index
    %c1_275 = arith.constant 1 : index
    %c0_276 = arith.constant 0 : index
    %177 = vector.load %arg1[%c0_273, %c7_274, %c1_275, %c0_276] : memref<1x9x9x64xf32, #tpu.memory_space<vmem>>, vector<1x1x7x64xf32>
    %178 = vector.shape_cast %177 : vector<1x1x7x64xf32> to vector<7x64xf32>
    %c0_277 = arith.constant 0 : index
    %c7_278 = arith.constant 7 : index
    %c2_279 = arith.constant 2 : index
    %c0_280 = arith.constant 0 : index
    %179 = vector.load %arg1[%c0_277, %c7_278, %c2_279, %c0_280] : memref<1x9x9x64xf32, #tpu.memory_space<vmem>>, vector<1x1x7x64xf32>
    %180 = vector.shape_cast %179 : vector<1x1x7x64xf32> to vector<7x64xf32>
    %c0_281 = arith.constant 0 : index
    %c8 = arith.constant 8 : index
    %c0_282 = arith.constant 0 : index
    %c0_283 = arith.constant 0 : index
    %181 = vector.load %arg1[%c0_281, %c8, %c0_282, %c0_283] : memref<1x9x9x64xf32, #tpu.memory_space<vmem>>, vector<1x1x7x64xf32>
    %182 = vector.shape_cast %181 : vector<1x1x7x64xf32> to vector<7x64xf32>
    %c0_284 = arith.constant 0 : index
    %c8_285 = arith.constant 8 : index
    %c1_286 = arith.constant 1 : index
    %c0_287 = arith.constant 0 : index
    %183 = vector.load %arg1[%c0_284, %c8_285, %c1_286, %c0_287] : memref<1x9x9x64xf32, #tpu.memory_space<vmem>>, vector<1x1x7x64xf32>
    %184 = vector.shape_cast %183 : vector<1x1x7x64xf32> to vector<7x64xf32>
    %c0_288 = arith.constant 0 : index
    %c8_289 = arith.constant 8 : index
    %c2_290 = arith.constant 2 : index
    %c0_291 = arith.constant 0 : index
    %185 = vector.load %arg1[%c0_288, %c8_289, %c2_290, %c0_291] : memref<1x9x9x64xf32, #tpu.memory_space<vmem>>, vector<1x1x7x64xf32>
    %186 = vector.shape_cast %185 : vector<1x1x7x64xf32> to vector<7x64xf32>
    %187 = tpu.concatenate %170, %172, %174, %176, %178, %180, %182, %184, %186 in 1 : vector<7x64xf32>, vector<7x64xf32>, vector<7x64xf32>, vector<7x64xf32>, vector<7x64xf32>, vector<7x64xf32>, vector<7x64xf32>, vector<7x64xf32>, vector<7x64xf32> -> vector<7x576xf32>
    %c0_292 = arith.constant 0 : index
    %c0_293 = arith.constant 0 : index
    %188 = vector.load %arg2[%c0_292, %c0_293] : memref<576x64xf32, #tpu.memory_space<vmem>>, vector<576x64xf32>
    %cst_294 = arith.constant dense<0.000000e+00> : vector<7x64xf32>
    %189 = tpu.matmul %187, %188, %cst_294 {dimension_numbers = #tpu.dot_dimension_numbers<[1], [0], [0], [1], [0, 0, 1, 1], [], []>} : vector<7x576xf32>, vector<576x64xf32>, vector<7x64xf32> -> vector<7x64xf32>
    %190 = vector.broadcast %0 : vector<1x64xf32> to vector<7x64xf32>
    %191 = arith.addf %189, %190 : vector<7x64xf32>
    %cst_295 = arith.constant 0.000000e+00 : f32
    %192 = vector.broadcast %cst_295 : f32 to vector<7x64xf32>
    %193 = arith.maximumf %191, %192 : vector<7x64xf32>
    %c0_296 = arith.constant 0 : index
    %c6_297 = arith.constant 6 : index
    %c0_298 = arith.constant 0 : index
    %c0_299 = arith.constant 0 : index
    %194 = vector.load %arg4[%c0_296, %c6_297, %c0_298, %c0_299] : memref<1x7x7x64xf32, #tpu.memory_space<vmem>>, vector<1x1x7x64xf32>
    %195 = vector.shape_cast %194 : vector<1x1x7x64xf32> to vector<7x64xf32>
    %196 = vector.shape_cast %193 : vector<7x64xf32> to vector<1x1x7x64xf32>
    tpu.vector_store %arg4[%c0_296, %c6_297, %c0_298, %c0_299], %196 {strides = array<i32>} : memref<1x7x7x64xf32, #tpu.memory_space<vmem>>, vector<1x1x7x64xf32>,
    return
  }
  func.func @transform_0(%arg0: i32) -> (i32, i32, i32, i32) {
    %c0_i32 = arith.constant 0 : i32
    %c0_i32_0 = arith.constant 0 : i32
    %c0_i32_1 = arith.constant 0 : i32
    %c0_i32_2 = arith.constant 0 : i32
    return %arg0, %c0_i32, %c0_i32_0, %c0_i32_1 : i32, i32, i32, i32
  }
  func.func @transform_1(%arg0: i32) -> (i32, i32) {
    %c0_i32 = arith.constant 0 : i32
    %c0_i32_0 = arith.constant 0 : i32
    %c0_i32_1 = arith.constant 0 : i32
    return %c0_i32, %c0_i32_0 : i32, i32
  }
  func.func @transform_2(%arg0: i32) -> (i32, i32) {
    %c0_i32 = arith.constant 0 : i32
    %c0_i32_0 = arith.constant 0 : i32
    %c0_i32_1 = arith.constant 0 : i32
    return %c0_i32, %c0_i32_0 : i32, i32
  }
  func.func @transform_3(%arg0: i32) -> (i32, i32, i32, i32) {
    %c0_i32 = arith.constant 0 : i32
    %c0_i32_0 = arith.constant 0 : i32
    %c0_i32_1 = arith.constant 0 : i32
    %c0_i32_2 = arith.constant 0 : i32
    return %arg0, %c0_i32, %c0_i32_0, %c0_i32_1 : i32, i32, i32, i32
  }
}

module attributes {stable_mosaic.version = 11 : i64} {
  func.func @_fc_head_kernel(%arg0: i32, %arg1: memref<2x3136xf32, #tpu.memory_space<vmem>>, %arg2: memref<3136x64xf32, #tpu.memory_space<vmem>>, %arg3: memref<1x64xf32, #tpu.memory_space<vmem>>, %arg4: memref<64x56xf32, #tpu.memory_space<vmem>>, %arg5: memref<1x56xf32, #tpu.memory_space<vmem>>, %arg6: memref<2x48xf32, #tpu.memory_space<vmem>>) attributes {dimension_semantics = [#tpu.dimension_semantics<arbitrary>], iteration_bounds = array<i64: 1>, scalar_prefetch = 0 : i64, scratch_operands = 0 : i64, tpu.core_type = #tpu.core_type<tc>, window_params = [{pipeline_mode = #tpu.pipeline_mode<synchronous>, transform_indices = @transform_0, window_bounds = array<i64: 2, 3136>}, {pipeline_mode = #tpu.pipeline_mode<synchronous>, transform_indices = @transform_1, window_bounds = array<i64: 3136, 64>}, {pipeline_mode = #tpu.pipeline_mode<synchronous>, transform_indices = @transform_2, window_bounds = array<i64: 1, 64>}, {pipeline_mode = #tpu.pipeline_mode<synchronous>, transform_indices = @transform_3, window_bounds = array<i64: 64, 56>}, {pipeline_mode = #tpu.pipeline_mode<synchronous>, transform_indices = @transform_4, window_bounds = array<i64: 1, 56>}, {pipeline_mode = #tpu.pipeline_mode<synchronous>, transform_indices = @transform_5, window_bounds = array<i64: 2, 48>}]} {
    %c0 = arith.constant 0 : index
    %c0_0 = arith.constant 0 : index
    %0 = vector.load %arg1[%c0, %c0_0] : memref<2x3136xf32, #tpu.memory_space<vmem>>, vector<2x3136xf32>
    %c0_1 = arith.constant 0 : index
    %c0_2 = arith.constant 0 : index
    %1 = vector.load %arg2[%c0_1, %c0_2] : memref<3136x64xf32, #tpu.memory_space<vmem>>, vector<3136x64xf32>
    %cst = arith.constant dense<0.000000e+00> : vector<2x64xf32>
    %2 = tpu.matmul %0, %1, %cst {dimension_numbers = #tpu.dot_dimension_numbers<[1], [0], [0], [1], [0, 0, 1, 1], [], []>} : vector<2x3136xf32>, vector<3136x64xf32>, vector<2x64xf32> -> vector<2x64xf32>
    %c0_3 = arith.constant 0 : index
    %c0_4 = arith.constant 0 : index
    %3 = vector.load %arg3[%c0_3, %c0_4] : memref<1x64xf32, #tpu.memory_space<vmem>>, vector<1x64xf32>
    %4 = vector.broadcast %3 : vector<1x64xf32> to vector<2x64xf32>
    %5 = arith.addf %2, %4 : vector<2x64xf32>
    %cst_5 = arith.constant 0.000000e+00 : f32
    %6 = vector.broadcast %cst_5 : f32 to vector<2x64xf32>
    %7 = arith.maximumf %5, %6 : vector<2x64xf32>
    %c0_6 = arith.constant 0 : index
    %c0_7 = arith.constant 0 : index
    %8 = vector.load %arg4[%c0_6, %c0_7] : memref<64x56xf32, #tpu.memory_space<vmem>>, vector<64x56xf32>
    %cst_8 = arith.constant dense<0.000000e+00> : vector<2x56xf32>
    %9 = tpu.matmul %7, %8, %cst_8 {dimension_numbers = #tpu.dot_dimension_numbers<[1], [0], [0], [1], [0, 0, 1, 1], [], []>} : vector<2x64xf32>, vector<64x56xf32>, vector<2x56xf32> -> vector<2x56xf32>
    %c0_9 = arith.constant 0 : index
    %c0_10 = arith.constant 0 : index
    %10 = vector.load %arg5[%c0_9, %c0_10] : memref<1x56xf32, #tpu.memory_space<vmem>>, vector<1x56xf32>
    %11 = vector.broadcast %10 : vector<1x56xf32> to vector<2x56xf32>
    %12 = arith.addf %9, %11 : vector<2x56xf32>
    %13 = vector.extract_strided_slice %12 {offsets = [0, 0], sizes = [2, 48], strides = [1, 1]} : vector<2x56xf32> to vector<2x48xf32>
    %14 = vector.extract_strided_slice %12 {offsets = [0, 48], sizes = [2, 8], strides = [1, 1]} : vector<2x56xf32> to vector<2x8xf32>
    %15 = vector.extract_strided_slice %13 {offsets = [0, 0], sizes = [2, 8], strides = [1, 1]} : vector<2x48xf32> to vector<2x8xf32>
    %16 = vector.extract_strided_slice %13 {offsets = [0, 8], sizes = [2, 8], strides = [1, 1]} : vector<2x48xf32> to vector<2x8xf32>
    %17 = arith.addf %15, %16 : vector<2x8xf32>
    %18 = vector.extract_strided_slice %13 {offsets = [0, 16], sizes = [2, 8], strides = [1, 1]} : vector<2x48xf32> to vector<2x8xf32>
    %19 = arith.addf %17, %18 : vector<2x8xf32>
    %20 = vector.extract_strided_slice %13 {offsets = [0, 24], sizes = [2, 8], strides = [1, 1]} : vector<2x48xf32> to vector<2x8xf32>
    %21 = arith.addf %19, %20 : vector<2x8xf32>
    %22 = vector.extract_strided_slice %13 {offsets = [0, 32], sizes = [2, 8], strides = [1, 1]} : vector<2x48xf32> to vector<2x8xf32>
    %23 = arith.addf %21, %22 : vector<2x8xf32>
    %24 = vector.extract_strided_slice %13 {offsets = [0, 40], sizes = [2, 8], strides = [1, 1]} : vector<2x48xf32> to vector<2x8xf32>
    %25 = arith.addf %23, %24 : vector<2x8xf32>
    %cst_11 = arith.constant 0.166666672 : f32
    %26 = vector.broadcast %cst_11 : f32 to vector<2x8xf32>
    %27 = arith.mulf %25, %26 : vector<2x8xf32>
    %28 = arith.subf %14, %27 : vector<2x8xf32>
    %29 = tpu.concatenate %28, %28, %28, %28, %28, %28 in 1 : vector<2x8xf32>, vector<2x8xf32>, vector<2x8xf32>, vector<2x8xf32>, vector<2x8xf32>, vector<2x8xf32> -> vector<2x48xf32>
    %30 = arith.addf %13, %29 : vector<2x48xf32>
    %c0_12 = arith.constant 0 : index
    %c0_13 = arith.constant 0 : index
    %31 = vector.load %arg6[%c0_12, %c0_13] : memref<2x48xf32, #tpu.memory_space<vmem>>, vector<2x48xf32>
    tpu.vector_store %arg6[%c0_12, %c0_13], %30 {strides = array<i32>} : memref<2x48xf32, #tpu.memory_space<vmem>>, vector<2x48xf32>,
    return
  }
  func.func @transform_0(%arg0: i32) -> (i32, i32) {
    %c0_i32 = arith.constant 0 : i32
    %c0_i32_0 = arith.constant 0 : i32
    %c0_i32_1 = arith.constant 0 : i32
    return %c0_i32, %c0_i32_0 : i32, i32
  }
  func.func @transform_1(%arg0: i32) -> (i32, i32) {
    %c0_i32 = arith.constant 0 : i32
    %c0_i32_0 = arith.constant 0 : i32
    %c0_i32_1 = arith.constant 0 : i32
    return %c0_i32, %c0_i32_0 : i32, i32
  }
  func.func @transform_2(%arg0: i32) -> (i32, i32) {
    %c0_i32 = arith.constant 0 : i32
    %c0_i32_0 = arith.constant 0 : i32
    %c0_i32_1 = arith.constant 0 : i32
    return %c0_i32, %c0_i32_0 : i32, i32
  }
  func.func @transform_3(%arg0: i32) -> (i32, i32) {
    %c0_i32 = arith.constant 0 : i32
    %c0_i32_0 = arith.constant 0 : i32
    %c0_i32_1 = arith.constant 0 : i32
    return %c0_i32, %c0_i32_0 : i32, i32
  }
  func.func @transform_4(%arg0: i32) -> (i32, i32) {
    %c0_i32 = arith.constant 0 : i32
    %c0_i32_0 = arith.constant 0 : i32
    %c0_i32_1 = arith.constant 0 : i32
    return %c0_i32, %c0_i32_0 : i32, i32
  }
  func.func @transform_5(%arg0: i32) -> (i32, i32) {
    %c0_i32 = arith.constant 0 : i32
    %c0_i32_0 = arith.constant 0 : i32
    %c0_i32_1 = arith.constant 0 : i32
    return %c0_i32, %c0_i32_0 : i32, i32
  }
}

</mosaic_0001>

<bundles_post_ra>
// kernel: quantile_cnn_forward.4
= control target key start
LH: loop header
LB: loop body
LE: loop exit
PB: predicated region body
PF: predicated region fallthrough
CT: control target
= control target key end

     0   :  { %s5577_s12 = smov 0   ;;  %s7052_s0 = inlined_call_operand.vmem [shape: f32[2,21,21,64], index: 0, kind: input, shape index: {}]   ;;  %s7053_s1 = inlined_call_operand.vmem [shape: f32[256,32], index: 1, kind: input, shape index: {}]   ;;  %s7054_s2 = inlined_call_operand.vmem [shape: f32[1,32], index: 2, kind: input, shape index: {}]   ;;  %s7055_s3 = inlined_call_operand.vmem [shape: f32[2,20,20,32], index: 3, kind: output, shape index: {}]  }
   0x1 LB: > { %s3475_s13 = sadd.s32 4294967295, %s5554_s12   ;;  %p3479_p0 = scmp.ge.s32.totalorder %s5554_s12, 1  ;;  %s5554_s12 = sphi %s5577_s12, %s13_s12  }
   0x2   : > { %p137_p1 = scmp.lt.s32.totalorder %s5554_s12, 3 }
   0x4   : > { %p138_p2 = pnand %p3479_p0, %p137_p1 }
   0x5   : > { %p161_p3 = scmp.lt.s32.totalorder (!%p138_p2), %s3475_s13, 1  ;;  %v232_v0 = vld [vmem:[%s7053_s1 + $0x80] sm:$0xff] (!%p138_p2)  ;;  %v233_v1 = vld [vmem:[%s7053_s1 + $0x88] sm:$0xff] (!%p138_p2)  ;;  %v234_v5 = vld [vmem:[%s7053_s1 + $0x90] sm:$0xff] (!%p138_p2)  ;;  %s5556_s25 = smov (!%p138_p2), 64   ;;  %vm209_vm0 = vcmask (!%p138_p2), 523264  }
   0x6   : > { %141 = sbr.rel (%p138_p2) target bundleno = 658 (0x292), region = 32  ;;  %v216_v2 = vld [vmem:[%s7053_s1] sm:$0xff] (!%p138_p2)  ;;  %v5594_v3 = vpack.c.bf16 (!%p138_p2), %v233_v1, %v232_v0  ;;  %v217_v4 = vld [vmem:[%s7053_s1 + $0x8] sm:$0xff] (!%p138_p2)  ;;  %v235_v6 = vld [vmem:[%s7053_s1 + $0x98] sm:$0xff] (!%p138_p2)  ;;  %vm337_vm1 = vcmask (!%p138_p2), 261120   ;;  %vm340_vm2 = vcmask (!%p138_p2), 257024  }
   0x7   : > { %v5607_v7 = vpack.c.bf16 (!%p138_p2), %v217_v4, %v216_v2  ;;  %v5609_v8 = vpack.c.bf16 (!%p138_p2), %v235_v6, %v234_v5  ;;  %v218_v9 = vld [vmem:[%s7053_s1 + $0x10] sm:$0xff] (!%p138_p2)  ;;  %v219_v10 = vld [vmem:[%s7053_s1 + $0x18] sm:$0xff] (!%p138_p2)  ;;  %v236_v11 = vld [vmem:[%s7053_s1 + $0xa0] sm:$0xff] (!%p138_p2) }
   0x8   : > { %4597 = vmatprep.subr.bf16.mxu0 (!%p138_p2), %v5594_v3  ;;  %4629 = vmatprep.subr.bf16.mxu1 (!%p138_p2), %v5594_v3  ;;  %v237_v12 = vld [vmem:[%s7053_s1 + $0xa8] sm:$0xff] (!%p138_p2)  ;;  %v5628_v13 = vpack.c.bf16 (!%p138_p2), %v219_v10, %v218_v9  ;;  %v220_v15 = vld [vmem:[%s7053_s1 + $0x20] sm:$0xff] (!%p138_p2)  ;;  %v238_v17 = vld [vmem:[%s7053_s1 + $0xb0] sm:$0xff] (!%p138_p2) }
   0x9   : > { %4599 = vmatpush3.bf16.msra.mxu0 (!%p138_p2), %v5607_v7  ;;  %4631 = vmatpush3.bf16.msra.mxu1 (!%p138_p2), %v5607_v7  ;;  %v5632_v14 = vpack.c.bf16 (!%p138_p2), %v237_v12, %v236_v11  ;;  %v221_v16 = vld [vmem:[%s7053_s1 + $0x28] sm:$0xff] (!%p138_p2)  ;;  %v239_v18 = vld [vmem:[%s7053_s1 + $0xb8] sm:$0xff] (!%p138_p2)  ;;  %v222_v29 = vld [vmem:[%s7053_s1 + $0x30] sm:$0xff] (!%p138_p2) }
   0xa   : > { %4601 = vmatprep.subr.bf16.mxu0 (!%p138_p2), %v5609_v8  ;;  %4633 = vmatprep.subr.bf16.mxu1 (!%p138_p2), %v5609_v8  ;;  %v5664_v26 = vpack.c.bf16 (!%p138_p2), %v221_v16, %v220_v15  ;;  %v5669_v28 = vpack.c.bf16 (!%p138_p2), %v239_v18, %v238_v17  ;;  %v223_v30 = vld [vmem:[%s7053_s1 + $0x38] sm:$0xff] (!%p138_p2)  ;;  %v240_v32 = vld [vmem:[%s7053_s1 + $0xc0] sm:$0xff] (!%p138_p2)  ;;  %v241_v33 = vld [vmem:[%s7053_s1 + $0xc8] sm:$0xff] (!%p138_p2) }
   0xb   : > { %v5691_v39 = vpack.c.bf16 (!%p138_p2), %v223_v30, %v222_v29  ;;  %v5695_v40 = vpack.c.bf16 (!%p138_p2), %v241_v33, %v240_v32  ;;  %v224_v41 = vld [vmem:[%s7053_s1 + $0x40] sm:$0xff] (!%p138_p2)  ;;  %v225_v42 = vld [vmem:[%s7053_s1 + $0x48] sm:$0xff] (!%p138_p2)  ;;  %v242_v44 = vld [vmem:[%s7053_s1 + $0xd0] sm:$0xff] (!%p138_p2) }
   0xc   : > { %v5714_v48 = vpack.c.bf16 (!%p138_p2), %v225_v42, %v224_v41  ;;  %v243_v49 = vld [vmem:[%s7053_s1 + $0xd8] sm:$0xff] (!%p138_p2)  ;;  %v226_v51 = vld [vmem:[%s7053_s1 + $0x50] sm:$0xff] (!%p138_p2)  ;;  %v244_v54 = vld [vmem:[%s7053_s1 + $0xe0] sm:$0xff] (!%p138_p2) }
   0xd   : > { %s7057_s13 = smov (!%p161_p3, %s3475_s13), 1  ;;  %4603 = vmatpush3.bf16.msra.mxu0 %v5628_v13  ;;  %4635 = vmatpush3.bf16.msra.mxu1 %v5628_v13  ;;  %v5721_v50 = vpack.c.bf16 %v243_v49, %v242_v44  ;;  %v227_v52 = vld [vmem:[%s7053_s1 + $0x58] sm:$0xff]  ;;  %v245_v55 = vld [vmem:[%s7053_s1 + $0xe8] sm:$0xff]  ;;  %v228_v61 = vld [vmem:[%s7053_s1 + $0x60] sm:$0xff] }
   0xe   : > { %s5236_s7 = smul.u32 504, %s7057_s13  ;;  %4605 = vmatprep.subr.bf16.mxu0 %v5632_v14  ;;  %4637 = vmatprep.subr.bf16.mxu1 %v5632_v14  ;;  %v5743_v59 = vpack.c.bf16 %v227_v52, %v226_v51  ;;  %v5747_v60 = vpack.c.bf16 %v245_v55, %v244_v54  ;;  %v229_v62 = vld [vmem:[%s7053_s1 + $0x68] sm:$0xff]  ;;  %v246_v0 = vld [vmem:[%s7053_s1 + $0xf0] sm:$0xff]  ;;  %v247_v1 = vld [vmem:[%s7053_s1 + $0xf8] sm:$0xff] }
   0xf   : > { %v5770_v10 = vpack.c.bf16 %v229_v62, %v228_v61  ;;  %v5774_v11 = vpack.c.bf16 %v247_v1, %v246_v0  ;;  %v230_v12 = vld [vmem:[%s7053_s1 + $0x70] sm:$0xff]  ;;  %v231_v15 = vld [vmem:[%s7053_s1 + $0x78] sm:$0xff]  ;;  %s5237_s19 = smul.u32 480, %s7057_s13 }
  0x10   : > { %s5643_s16 = scalar_lea.vmem %s7052_s0, %s5236_s7 }
  0x11   : > { %v3485_v19 = vld [vmem:[%s5643_s16 + $0x19] sm:$0xff]  ;;  %v5653_v20 = vld [vmem:[%s5643_s16 + $0x31] sm:$0xff]  ;;  %v175_v21 = vld [vmem:[%s5643_s16 + $0x1] sm:$0xff]  ;;  %4607 = vmatpush3.bf16.msra.mxu0 %v5664_v26  ;;  %4639 = vmatpush3.bf16.msra.mxu1 %v5664_v26  ;;  %s6628_s23 = scalar_lea.vmem %s7055_s3, %s5237_s19 }
  0x12   : > { %v5247_v22 = vpack.i.bf16 %v5653_v20, %v3485_v19  ;;  %v3486_v23 = vld [vmem:[%s5643_s16 + $0x21] sm:$0xff]  ;;  %v5659_v24 = vld [vmem:[%s5643_s16 + $0x39] sm:$0xff]  ;;  %v176_v25 = vld [vmem:[%s5643_s16 + $0x9] sm:$0xff]  ;;  %v5252_v31 = vpack.i.bf16 %v3485_v19, %v175_v21  ;;  %4609 = vmatprep.subr.bf16.mxu0 %v5669_v28  ;;  %4641 = vmatprep.subr.bf16.mxu1 %v5669_v28 }
  0x13   : > { %v5257_v27 = vpack.i.bf16 %v5659_v24, %v3486_v23  ;;  %v5262_v34 = vpack.i.bf16 %v3486_v23, %v176_v25  ;;  %v3487_v35 = vld [vmem:[%s5643_s16 + $0x29] sm:$0xf]  ;;  %v3500_v36 = vld [vmem:[%s5643_s16 + $0x41] sm:$0xf]  ;;  %v177_v37 = vld [vmem:[%s5643_s16 + $0x11] sm:$0xf] }
  0x14   : > { %5248 = vrot.lane.b32.xlu0 %v5247_v22, %s5556_s25  ;;  %v3494_v38 = vld [vmem:[%s5643_s16 + $0x29] sm:$0xf]  ;;  %v5267_v43 = vpack.i.bf16 %v3500_v36, %v3487_v35  ;;  %v5710_v47 = vld [vmem:[%s5643_s16 + $0x61] sm:$0xff]  ;;  %v3514_v57 = vld [vmem:[%s5643_s16 + $0x51] sm:$0xff] }
  0x15   : > { %5258 = vrot.lane.b32.xlu1 %v5257_v27, %s5556_s25  ;;  %v5272_v45 = vpack.i.bf16 %v3494_v38, %v177_v37  ;;  %v3513_v46 = vld [vmem:[%s5643_s16 + $0x49] sm:$0xff]  ;;  %4611 = vmatpush3.bf16.msra.mxu0 %v5691_v39  ;;  %v5292_v2 = vpack.i.bf16 %v3514_v57, %v5659_v24  ;;  %v3515_v4 = vld [vmem:[%s5643_s16 + $0x59] sm:$0xf]  ;;  %v3530_v5 = vld [vmem:[%s5643_s16 + $0x71] sm:$0xf] }
  0x16   : > { %4643 = vmatpush3.bf16.msra.mxu1 %v5691_v39  ;;  %4613 = vmatprep.subr.bf16.mxu0 %v5695_v40  ;;  %v5277_v53 = vpack.i.bf16 %v5710_v47, %v3513_v46  ;;  %v5282_v56 = vpack.i.bf16 %v3513_v46, %v5653_v20  ;;  %v3529_v58 = vld [vmem:[%s5643_s16 + $0x69] sm:$0xff]  ;;  %v3509_v6 = vld [vmem:[%s5643_s16 + $0x41] sm:$0xf]  ;;  %v3524_v9 = vld [vmem:[%s5643_s16 + $0x59] sm:$0xf]  ;;  %v5297_v16 = vpack.i.bf16 %v3530_v5, %v3515_v4 }
  0x17   : > { %4645 = vmatprep.subr.bf16.mxu1 %v5695_v40  ;;  %v5287_v63 = vpack.i.bf16 %v3529_v58, %v3514_v57  ;;  %v5302_v17 = vpack.i.bf16 %v3524_v9, %v3509_v6  ;;  %v3543_v18 = vld [vmem:[%s5643_s16 + $0x79] sm:$0xff]  ;;  %v3558_v19 = vld [vmem:[%s5643_s16 + $0x91] sm:$0xff]  ;;  %v5788_v20 = vpack.c.bf16 %v231_v15, %v230_v12  ;;  %v3544_v23 = vld [vmem:[%s5643_s16 + $0x81] sm:$0xff] }
  0x18   : > { %5253 = vrot.lane.b32.xlu0 %v5252_v31, %s5556_s25  ;;  %v5307_v21 = vpack.i.bf16 %v3558_v19, %v3543_v18  ;;  %v5312_v22 = vpack.i.bf16 %v3543_v18, %v5710_v47  ;;  %v3559_v24 = vld [vmem:[%s5643_s16 + $0x99] sm:$0xff]  ;;  %v5322_v27 = vpack.i.bf16 %v3544_v23, %v3529_v58  ;;  %v3545_v29 = vld [vmem:[%s5643_s16 + $0x89] sm:$0xf]  ;;  %v3560_v30 = vld [vmem:[%s5643_s16 + $0xa1] sm:$0xf] }
  0x19   : > { %5263 = vrot.lane.b32.xlu1 %v5262_v34, %s5556_s25  ;;  %4615 = vmatpush3.bf16.msra.mxu0 %v5714_v48  ;;  %v5317_v25 = vpack.i.bf16 %v3559_v24, %v3544_v23  ;;  %v3539_v31 = vld [vmem:[%s5643_s16 + $0x71] sm:$0xf]  ;;  %v3554_v32 = vld [vmem:[%s5643_s16 + $0x89] sm:$0xf]  ;;  %v5327_v33 = vpack.i.bf16 %v3560_v30, %v3545_v29  ;;  %v3588_v36 = vld [vmem:[%s5643_s16 + $0xc1] sm:$0xff] }
  0x1a   : > { %4647 = vmatpush3.bf16.msra.mxu1 %v5714_v48  ;;  %4617 = vmatprep.subr.bf16.mxu0 %v5721_v50  ;;  %v5332_v34 = vpack.i.bf16 %v3554_v32, %v3539_v31  ;;  %v3573_v35 = vld [vmem:[%s5643_s16 + $0xa9] sm:$0xff]  ;;  %v3574_v41 = vld [vmem:[%s5643_s16 + $0xb1] sm:$0xff]  ;;  %v3569_v47 = vld [vmem:[%s5643_s16 + $0xa1] sm:$0xf] }
  0x1b   : > { %4649 = vmatprep.subr.bf16.mxu1 %v5721_v50  ;;  %v5337_v37 = vpack.i.bf16 %v3588_v36, %v3573_v35  ;;  %v5342_v38 = vpack.i.bf16 %v3573_v35, %v3558_v19  ;;  %v3589_v42 = vld [vmem:[%s5643_s16 + $0xc9] sm:$0xff]  ;;  %v5352_v44 = vpack.i.bf16 %v3574_v41, %v3559_v24  ;;  %v3590_v46 = vld [vmem:[%s5643_s16 + $0xd1] sm:$0xf]  ;;  %v3584_v49 = vld [vmem:[%s5643_s16 + $0xb9] sm:$0xf] }
  0x1c   : > { %5268 = vrot.lane.b32.xlu0 %v5267_v43, %s5556_s25  ;;  %v5347_v43 = vpack.i.bf16 %v3589_v42, %v3574_v41  ;;  %v5362_v52 = vpack.i.bf16 %v3584_v49, %v3569_v47  ;;  %v3618_v54 = vld [vmem:[%s5643_s16 + $0xf1] sm:$0xff]  ;;  %v3604_v57 = vld [vmem:[%s5643_s16 + $0xe1] sm:$0xff]  ;;  %v3619_v58 = vld [vmem:[%s5643_s16 + $0xf9] sm:$0xff] }
  0x1d   : > { %5273 = vrot.lane.b32.xlu1 %v5272_v45, %s5556_s25  ;;  %4619 = vmatpush3.bf16.msra.mxu0 %v5743_v59  ;;  %v3575_v45 = vld [vmem:[%s5643_s16 + $0xb9] sm:$0xf]  ;;  %v5377_v61 = vpack.i.bf16 %v3619_v58, %v3604_v57  ;;  %v5382_v62 = vpack.i.bf16 %v3604_v57, %v3589_v42  ;;  %v3620_v0 = vld [vmem:[%s5643_s16 + $0x101] sm:$0xf]  ;;  %v3599_v1 = vld [vmem:[%s5643_s16 + $0xd1] sm:$0xf] }
  0x1e   : > { %4651 = vmatpush3.bf16.msra.mxu1 %v5743_v59  ;;  %4621 = vmatprep.subr.bf16.mxu0 %v5747_v60  ;;  %v5357_v51 = vpack.i.bf16 %v3590_v46, %v3575_v45  ;;  %v3633_v6 = vld [vmem:[%s5643_s16 + $0x109] sm:$0xff]  ;;  %v3648_v9 = vld [vmem:[%s5643_s16 + $0x121] sm:$0xff]  ;;  %v3644_v24 = vld [vmem:[%s5643_s16 + $0x119] sm:$0xf] }
  0x1f   : > { %4653 = vmatprep.subr.bf16.mxu1 %v5747_v60  ;;  %v5397_v12 = vpack.i.bf16 %v3648_v9, %v3633_v6  ;;  %v5402_v15 = vpack.i.bf16 %v3633_v6, %v3618_v54  ;;  %v3629_v23 = vld [vmem:[%s5643_s16 + $0x101] sm:$0xf]  ;;  %v3663_v29 = vld [vmem:[%s5643_s16 + $0x139] sm:$0xff]  ;;  %v3678_v30 = vld [vmem:[%s5643_s16 + $0x151] sm:$0xff] }
  0x20   : > { %5278 = vrot.lane.b32.xlu0 %v5277_v53, %s5556_s25  ;;  %v3603_v53 = vld [vmem:[%s5643_s16 + $0xd9] sm:$0xff]  ;;  %v5427_v31 = vpack.i.bf16 %v3678_v30, %v3663_v29  ;;  %v5432_v32 = vpack.i.bf16 %v3663_v29, %v3648_v9  ;;  %v3659_v42 = vld [vmem:[%s5643_s16 + $0x131] sm:$0xf]  ;;  %v3693_v45 = vld [vmem:[%s5643_s16 + $0x169] sm:$0xff] }
  0x21   : > { %5283 = vrot.lane.b32.xlu1 %v5282_v56, %s5556_s25  ;;  %4623 = vmatpush3.bf16.msra.mxu0 %v5770_v10  ;;  %v5367_v55 = vpack.i.bf16 %v3618_v54, %v3603_v53  ;;  %v5372_v56 = vpack.i.bf16 %v3603_v53, %v3588_v36  ;;  %v5872_v46 = vld [vmem:[%s5643_s16 + $0x181] sm:$0xff]  ;;  %v5462_v49 = vpack.i.bf16 %v3693_v45, %v3678_v30  ;;  %v5879_v53 = vld [vmem:[%s5643_s16 + $0x30] sm:$0xff]  ;;  %v5887_v6 = vld [vmem:[%s5643_s16 + $0x38] sm:$0xff] }
  0x22   : > { %4655 = vmatpush3.bf16.msra.mxu1 %v5770_v10  ;;  %4625 = vmatprep.subr.bf16.mxu0 %v5774_v11  ;;  %v5457_v47 = vpack.i.bf16 %v5872_v46, %v3693_v45  ;;  %v3484_v29 = vld [vmem:[%s5643_s16 + $0x28] sm:$0xf]  ;;  %v3497_v30 = vld [vmem:[%s5643_s16 + $0x40] sm:$0xf] }
  0x23   : > { %4657 = vmatprep.subr.bf16.mxu1 %v5774_v11 }
  0x24   : > { %5288 = vrot.lane.b32.xlu0 %v5287_v63, %s5556_s25  ;;  %v3605_v63 = vld [vmem:[%s5643_s16 + $0xe9] sm:$0xf] }
  0x25   : > { %5293 = vrot.lane.b32.xlu1 %v5292_v2, %s5556_s25  ;;  %4627 = vmatpush3.bf16.msra.mxu0 %v5788_v20  ;;  %v3614_v2 = vld [vmem:[%s5643_s16 + $0xe9] sm:$0xf]  ;;  %v5387_v4 = vpack.i.bf16 %v3620_v0, %v3605_v63 }
  0x26   : > { %4659 = vmatpush3.bf16.msra.mxu1 %v5788_v20  ;;  %4661 = vmatprep.subr.bf16.mxu0 %v5594_v3  ;;  %v5392_v5 = vpack.i.bf16 %v3614_v2, %v3599_v1 }
  0x27   : > { %4693 = vmatprep.subr.bf16.mxu1 %v5594_v3 }
  0x28   : > { %5298 = vrot.lane.b32.xlu0 %v5297_v16, %s5556_s25  ;;  %v3634_v16 = vld [vmem:[%s5643_s16 + $0x111] sm:$0xff] }
  0x29   : > { %5303 = vrot.lane.b32.xlu1 %v5302_v17, %s5556_s25  ;;  %v3649_v17 = vld [vmem:[%s5643_s16 + $0x129] sm:$0xff]  ;;  %v5412_v19 = vpack.i.bf16 %v3634_v16, %v3619_v58 }
  0x2a   : > { %v5407_v18 = vpack.i.bf16 %v3649_v17, %v3634_v16 }
  0x2c   : > { %5308 = vrot.lane.b32.xlu0 %v5307_v21, %s5556_s25  ;;  %v3635_v21 = vld [vmem:[%s5643_s16 + $0x119] sm:$0xf] }
  0x2d   : > { %5313 = vrot.lane.b32.xlu1 %v5312_v22, %s5556_s25  ;;  %v3650_v22 = vld [vmem:[%s5643_s16 + $0x131] sm:$0xf] }
  0x30   : > { %5318 = vrot.lane.b32.xlu0 %v5317_v25, %s5556_s25  ;;  %v5417_v25 = vpack.i.bf16 %v3650_v22, %v3635_v21 }
  0x31   : > { %5323 = vrot.lane.b32.xlu1 %v5322_v27, %s5556_s25  ;;  %v5422_v27 = vpack.i.bf16 %v3644_v24, %v3629_v23 }
  0x34   : > { %5328 = vrot.lane.b32.xlu0 %v5327_v33, %s5556_s25  ;;  %v3664_v33 = vld [vmem:[%s5643_s16 + $0x141] sm:$0xff] }
  0x35   : > { %5333 = vrot.lane.b32.xlu1 %v5332_v34, %s5556_s25  ;;  %v5859_v34 = vld [vmem:[%s5643_s16 + $0x159] sm:$0xff]  ;;  %v5442_v36 = vpack.i.bf16 %v3664_v33, %v3649_v17 }
  0x36   : > { %v5437_v35 = vpack.i.bf16 %v5859_v34, %v3664_v33  ;;  %v174_v33 = vld [vmem:[%s5643_s16 + $0x10] sm:$0xf] }
  0x38   : > { %5338 = vrot.lane.b32.xlu0 %v5337_v37, %s5556_s25  ;;  %v3665_v37 = vld [vmem:[%s5643_s16 + $0x149] sm:$0xf] }
  0x39   : > { %5343 = vrot.lane.b32.xlu1 %v5342_v38, %s5556_s25  ;;  %v3680_v38 = vld [vmem:[%s5643_s16 + $0x161] sm:$0xf] }
  0x3a   : > { %v5447_v41 = vpack.i.bf16 %v3680_v38, %v3665_v37 }
  0x3c   : > { %5348 = vrot.lane.b32.xlu0 %v5347_v43, %s5556_s25  ;;  %v3674_v43 = vld [vmem:[%s5643_s16 + $0x149] sm:$0xf] }
  0x3d   : > { %5353 = vrot.lane.b32.xlu1 %v5352_v44, %s5556_s25  ;;  %v5452_v44 = vpack.i.bf16 %v3674_v43, %v3659_v42  ;;  %v5909_v42 = vld [vmem:[%s5643_s16 + $0x189] sm:$0xff] }
  0x40   : > { %5358 = vrot.lane.b32.xlu0 %v5357_v51, %s5556_s25 }
  0x41   : > { %5363 = vrot.lane.b32.xlu1 %v5362_v52, %s5556_s25  ;;  %v3482_v52 = vld [vmem:[%s5643_s16 + $0x18] sm:$0xff] }
  0x44   : > { %5368 = vrot.lane.b32.xlu0 %v5367_v55, %s5556_s25 }
  0x45   : > { %5373 = vrot.lane.b32.xlu1 %v5372_v56, %s5556_s25 }
  0x48   : > { %5378 = vrot.lane.b32.xlu0 %v5377_v61, %s5556_s25 }
  0x49   : > { %5383 = vrot.lane.b32.xlu1 %v5382_v62, %s5556_s25  ;;  %v172_v62 = vld [vmem:[%s5643_s16] sm:$0xff] }
  0x4c   : > { %5388 = vrot.lane.b32.xlu0 %v5387_v4, %s5556_s25 }
  0x4d   : > { %5393 = vrot.lane.b32.xlu1 %v5392_v5, %s5556_s25  ;;  %v3483_v5 = vld [vmem:[%s5643_s16 + $0x20] sm:$0xff] }
  0x50   : > { %5398 = vrot.lane.b32.xlu0 %v5397_v12, %s5556_s25 }
  0x51   : > { %5403 = vrot.lane.b32.xlu1 %v5402_v15, %s5556_s25  ;;  %v173_v15 = vld [vmem:[%s5643_s16 + $0x8] sm:$0xff] }
  0x54   : > { %5408 = vrot.lane.b32.xlu0 %v5407_v18, %s5556_s25 }
  0x55   : > { %5413 = vrot.lane.b32.xlu1 %v5412_v19, %s5556_s25 }
  0x58   : > { %5418 = vrot.lane.b32.xlu0 %v5417_v25, %s5556_s25 }
  0x59   : > { %5423 = vrot.lane.b32.xlu1 %v5422_v27, %s5556_s25 }
  0x5c   : > { %5428 = vrot.lane.b32.xlu0 %v5427_v31, %s5556_s25 }
  0x5d   : > { %5433 = vrot.lane.b32.xlu1 %v5432_v32, %s5556_s25 }
  0x60   : > { %5438 = vrot.lane.b32.xlu0 %v5437_v35, %s5556_s25  ;;  %v3491_v35 = vld [vmem:[%s5643_s16 + $0x28] sm:$0xf] }
  0x61   : > { %5443 = vrot.lane.b32.xlu1 %v5442_v36, %s5556_s25 }
  0x64   : > { %5448 = vrot.lane.b32.xlu0 %v5447_v41, %s5556_s25  ;;  %v3694_v41 = vld [vmem:[%s5643_s16 + $0x171] sm:$0xff] }
  0x65   : > { %5453 = vrot.lane.b32.xlu1 %v5452_v44, %s5556_s25 }
  0x68   : > { %5458 = vrot.lane.b32.xlu0 %v5457_v47, %s5556_s25 }
  0x69   : > { %5463 = vrot.lane.b32.xlu1 %v5462_v49, %s5556_s25  ;;  %v3510_v49 = vld [vmem:[%s5643_s16 + $0x48] sm:$0xff] }
  0x86   : > { %v5249_v51 = vpop.permute.xlu0 %5248 }
  0x87   : > { %v5251_v54 = vunpack.i.h.bf16 %v5249_v51  ;;  %v5250_v55 = vunpack.i.l.bf16 %v5249_v51  ;;  %v5259_v56 = vpop.permute.xlu1 %5258  ;;  %v5917_v51 = vld [vmem:[%s5643_s16 + $0x60] sm:$0xff] }
  0x88   : > { %v5261_v63 = vunpack.i.h.bf16 %v5259_v56  ;;  %v5260_v0 = vunpack.i.l.bf16 %v5259_v56  ;;  %v5472_v56 = vpack.i.bf16 %v3694_v41, %v5859_v34 }
  0x89   : > { %v213_v57 = vsel %vm209_vm0, %v3482_v52, %v5250_v55  ;;  %v382_v58 = vsel %vm209_vm0, %v5879_v53, %v5251_v54 }
  0x8a   : > { %318 = vmatprep.mubr.f32.mxu0 %v213_v57  ;;  %481 = vmatprep.mubr.f32.mxu1 %v382_v58  ;;  %v5254_v61 = vpop.permute.xlu0 %5253  ;;  %v214_v18 = vsel %vm209_vm0, %v3483_v5, %v5260_v0  ;;  %v383_v19 = vsel %vm209_vm0, %v5887_v6, %v5261_v63  ;;  %v3695_v57 = vld [vmem:[%s5643_s16 + $0x179] sm:$0xf]  ;;  %v3710_v58 = vld [vmem:[%s5643_s16 + $0x191] sm:$0xf] }
  0x8b   : > { %v5256_v1 = vunpack.i.h.bf16 %v5254_v61  ;;  %v5255_v2 = vunpack.i.l.bf16 %v5254_v61  ;;  %v5264_v4 = vpop.permute.xlu1 %5263  ;;  %v3689_v61 = vld [vmem:[%s5643_s16 + $0x161] sm:$0xf]  ;;  %5473 = vrot.lane.b32.xlu1 %v5472_v56, %s5556_s25  ;;  %v5477_v34 = vpack.i.bf16 %v3710_v58, %v3695_v57  ;;  %v3723_v0 = vld [vmem:[%s5643_s16 + $0x199] sm:$0xff] }
  0x8c   : > { %v5266_v9 = vunpack.i.h.bf16 %v5264_v4  ;;  %v5265_v12 = vunpack.i.l.bf16 %v5264_v4  ;;  %v5492_v4 = vpack.i.bf16 %v3723_v0, %v5872_v46 }
  0x8d   : > { %v210_v16 = vsel %vm209_vm0, %v172_v62, %v5255_v2  ;;  %v379_v17 = vsel %vm209_vm0, %v3482_v52, %v5256_v1  ;;  %v5467_v52 = vpack.i.bf16 %v5909_v42, %v3694_v41  ;;  %v3704_v62 = vld [vmem:[%s5643_s16 + $0x179] sm:$0xf]  ;;  %v5940_v1 = vld [vmem:[%s5643_s16 + $0x1b1] sm:$0xff]  ;;  %v3506_v41 = vld [vmem:[%s5643_s16 + $0x40] sm:$0xf] }
  0x8e   : > { %319 = vmatmul.mubr.f32.vlgmr.msra.gmra.mrb[0].mxu0 %v210_v16  ;;  %482 = vmatmul.mubr.f32.vlgmr.msra.gmra.mrb[0].mxu1 %v379_v17  ;;  %v5269_v21 = vpop.permute.xlu0 %5268  ;;  %v211_v25 = vsel %vm209_vm0, %v173_v15, %v5265_v12  ;;  %v380_v27 = vsel %vm209_vm0, %v3483_v5, %v5266_v9  ;;  %v5482_v63 = vpack.i.bf16 %v3704_v62, %v3689_v61  ;;  %v3725_v61 = vld [vmem:[%s5643_s16 + $0x1a9] sm:$0xf]  ;;  %v3719_v62 = vld [vmem:[%s5643_s16 + $0x191] sm:$0xf] }
  0x8f   : > { %4663 = vmatpush3.bf16.msra.mxu0 %v5607_v7  ;;  %4695 = vmatpush3.bf16.msra.mxu1 %v5607_v7  ;;  %v5271_v22 = vunpack.i.h.bf16 %v5269_v21  ;;  %v5270_v23 = vunpack.i.l.bf16 %v5269_v21  ;;  %v5274_v24 = vpop.permute.xlu1 %5273  ;;  %v5487_v2 = vpack.i.bf16 %v5940_v1, %v3723_v0  ;;  %v3768_v0 = vld [vmem:[%s5643_s16 + $0x1e1] sm:$0xff] }
  0x90   : > { %4665 = vmatprep.subr.bf16.mxu0 %v5609_v8  ;;  %4697 = vmatprep.subr.bf16.mxu1 %v5609_v8  ;;  %v5276_v31 = vunpack.i.h.bf16 %v5274_v24  ;;  %v5275_v32 = vunpack.i.l.bf16 %v5274_v24  ;;  %v3511_v24 = vld [vmem:[%s5643_s16 + $0x50] sm:$0xff] }
  0x91   : > { %323 = vmatprep.mubr.f32.mxu0 %v214_v18  ;;  %486 = vmatprep.mubr.f32.mxu1 %v383_v19  ;;  %v215_v37 = vsel %vm209_vm0, %v3484_v29, %v5270_v23  ;;  %v384_v38 = vsel %vm209_vm0, %v3497_v30, %v5271_v22 }
  0x92   : > { %324 = vmatmul.mubr.f32.gmra.mrb[2].mxu0 %v211_v25  ;;  %487 = vmatmul.mubr.f32.gmra.mrb[2].mxu1 %v380_v27  ;;  %v5279_v36 = vpop.permute.xlu0 %5278  ;;  %v212_v45 = vsel %vm209_vm0, %v174_v33, %v5275_v32  ;;  %v381_v47 = vsel %vm209_vm0, %v3491_v35, %v5276_v31  ;;  %v5969_v25 = vld [vmem:[%s5643_s16 + $0x68] sm:$0xff] }
  0x93   : > { %4667 = vmatpush3.bf16.msra.mxu0 %v5628_v13  ;;  %4699 = vmatpush3.bf16.msra.mxu1 %v5628_v13  ;;  %v5281_v43 = vunpack.i.h.bf16 %v5279_v36  ;;  %v5280_v44 = vunpack.i.l.bf16 %v5279_v36  ;;  %v5284_v5 = vpop.permute.xlu1 %5283 }
  0x94   : > { %4669 = vmatprep.subr.bf16.mxu0 %v5632_v14  ;;  %4701 = vmatprep.subr.bf16.mxu1 %v5632_v14  ;;  %v5286_v12 = vunpack.i.h.bf16 %v5284_v5  ;;  %v5285_v15 = vunpack.i.l.bf16 %v5284_v5 }
  0x95   : > { %328 = vmatprep.mubr.f32.mxu0 %v215_v37  ;;  %491 = vmatprep.mubr.f32.mxu1 %v384_v38  ;;  %v544_v54 = vsel %vm209_vm0, %v3510_v49, %v5280_v44  ;;  %v706_v55 = vsel %vm209_vm0, %v5917_v51, %v5281_v43  ;;  %v3512_v37 = vld [vmem:[%s5643_s16 + $0x58] sm:$0xf]  ;;  %v3527_v38 = vld [vmem:[%s5643_s16 + $0x70] sm:$0xf] }
  0x96   : > { %329 = vmatmul.mubr.f32.gmra.mrb[4].mxu0 %v212_v45  ;;  %492 = vmatmul.mubr.f32.gmra.mrb[4].mxu1 %v381_v47  ;;  %v5289_v9 = vpop.permute.xlu0 %5288  ;;  %v541_v19 = vsel %vm209_vm0, %v5879_v53, %v5285_v15  ;;  %v703_v21 = vsel %vm209_vm0, %v3510_v49, %v5286_v12  ;;  %v3521_v43 = vld [vmem:[%s5643_s16 + $0x58] sm:$0xf]  ;;  %v3749_v12 = vld [vmem:[%s5643_s16 + $0x1c1] sm:$0xf] }
  0x97   : > { %4671 = vmatpush3.bf16.msra.mxu0 %v5664_v26  ;;  %4703 = vmatpush3.bf16.msra.mxu1 %v5664_v26  ;;  %v5294_v46 = vpop.permute.xlu1 %5293  ;;  %v5291_v17 = vunpack.i.h.bf16 %v5289_v9  ;;  %v5290_v18 = vunpack.i.l.bf16 %v5289_v9  ;;  %v5990_v47 = vld [vmem:[%s5643_s16 + $0x78] sm:$0xff] }
  0x98   : > { %4673 = vmatprep.subr.bf16.mxu0 %v5669_v28  ;;  %4705 = vmatprep.subr.bf16.mxu1 %v5669_v28  ;;  %v5296_v22 = vunpack.i.h.bf16 %v5294_v46  ;;  %v5295_v23 = vunpack.i.l.bf16 %v5294_v46  ;;  %v3755_v9 = vld [vmem:[%s5643_s16 + $0x1d9] sm:$0xf]  ;;  %v3770_v46 = vld [vmem:[%s5643_s16 + $0x1f1] sm:$0xf] }
  0x99   : > { %643 = vmatprep.mubr.f32.mxu0 %v544_v54  ;;  %805 = vmatprep.mubr.f32.mxu1 %v706_v55  ;;  %v545_v30 = vsel %vm209_vm0, %v3511_v24, %v5290_v18  ;;  %v707_v31 = vsel %vm209_vm0, %v5969_v25, %v5291_v17  ;;  %v3724_v54 = vld [vmem:[%s5643_s16 + $0x1a1] sm:$0xff]  ;;  %v3739_v55 = vld [vmem:[%s5643_s16 + $0x1b9] sm:$0xff] }
  0x9a   : > { %5468 = vrot.lane.b32.xlu0 %v5467_v52, %s5556_s25  ;;  %5483 = vrot.lane.b32.xlu1 %v5482_v63, %s5556_s25  ;;  %v5299_v16 = vpop.permute.xlu0 %5298  ;;  %v542_v35 = vsel %vm209_vm0, %v5887_v6, %v5295_v23  ;;  %v704_v36 = vsel %vm209_vm0, %v3511_v24, %v5296_v22  ;;  %v5997_v52 = vld [vmem:[%s5643_s16 + $0x90] sm:$0xff]  ;;  %v5497_v57 = vpack.i.bf16 %v3739_v55, %v3724_v54  ;;  %v3764_v15 = vld [vmem:[%s5643_s16 + $0x1d9] sm:$0xf] }
  0x9b   : > { %4675 = vmatpush3.bf16.msra.mxu0 %v5691_v39  ;;  %4707 = vmatpush3.bf16.msra.mxu1 %v5691_v39  ;;  %v5304_v27 = vpop.permute.xlu1 %5303  ;;  %v5301_v29 = vunpack.i.h.bf16 %v5299_v16  ;;  %v5300_v53 = vunpack.i.l.bf16 %v5299_v16  ;;  %v5502_v58 = vpack.i.bf16 %v3724_v54, %v5909_v42  ;;  %v1212_v16 = vld [vmem:[%s7053_s1 + $0x88] sm:$0xff]  ;;  %v5542_v18 = vpack.i.bf16 %v3764_v15, %v3749_v12  ;;  %v1214_v24 = vld [vmem:[%s7053_s1 + $0x98] sm:$0xff] }
  0x9c   : > { %4677 = vmatprep.subr.bf16.mxu0 %v5695_v40  ;;  %4709 = vmatprep.subr.bf16.mxu1 %v5695_v40  ;;  %v5306_v33 = vunpack.i.h.bf16 %v5304_v27  ;;  %v1196_v22 = vld [vmem:[%s7053_s1 + $0x8] sm:$0xff] }
  0x9d   : > { %v546_v44 = vsel %vm209_vm0, %v3512_v37, %v5300_v53  ;;  %v708_v45 = vsel %vm209_vm0, %v3527_v38, %v5301_v29  ;;  %v1197_v53 = vld [vmem:[%s7053_s1 + $0x10] sm:$0xff]  ;;  %v6087_v37 = vld [vmem:[%s5643_s16 + $0x98] sm:$0xff] }
  0x9e   : > { %5478 = vrot.lane.b32.xlu0 %v5477_v34, %s5556_s25  ;;  %5493 = vrot.lane.b32.xlu1 %v5492_v4, %s5556_s25  ;;  %v5309_v32 = vpop.permute.xlu0 %5308  ;;  %v705_v49 = vsel %vm209_vm0, %v3521_v43, %v5306_v33  ;;  %v3734_v34 = vld [vmem:[%s5643_s16 + $0x1a9] sm:$0xf] }
  0x9f   : > { %4679 = vmatpush3.bf16.msra.mxu0 %v5714_v48  ;;  %4711 = vmatpush3.bf16.msra.mxu1 %v5714_v48  ;;  %v5311_v6 = vunpack.i.h.bf16 %v5309_v32  ;;  %v5512_v63 = vpack.i.bf16 %v3734_v34, %v3719_v62  ;;  %v3769_v4 = vld [vmem:[%s5643_s16 + $0x1e9] sm:$0xff]  ;;  %v1218_v34 = vld [vmem:[%s7053_s1 + $0xb8] sm:$0xff] }
  0xa0   : > { %4681 = vmatprep.subr.bf16.mxu0 %v5721_v50  ;;  %4713 = vmatprep.subr.bf16.mxu1 %v5721_v50  ;;  %v3551_v62 = vld [vmem:[%s5643_s16 + $0x88] sm:$0xf] }
  0xa1   : > { %v1030_v56 = vsel %vm209_vm0, %v5997_v52, %v5311_v6 }
  0xa2   : > { %5488 = vrot.lane.b32.xlu0 %v5487_v2, %s5556_s25  ;;  %5503 = vrot.lane.b32.xlu1 %v5502_v58, %s5556_s25 }
  0xa3   : > { %4683 = vmatpush3.bf16.msra.mxu0 %v5743_v59  ;;  %4715 = vmatpush3.bf16.msra.mxu1 %v5743_v59 }
  0xa4   : > { %4685 = vmatprep.subr.bf16.mxu0 %v5747_v60  ;;  %4717 = vmatprep.subr.bf16.mxu1 %v5747_v60 }
  0xa6   : > { %5498 = vrot.lane.b32.xlu0 %v5497_v57, %s5556_s25  ;;  %5513 = vrot.lane.b32.xlu1 %v5512_v63, %s5556_s25  ;;  %v3557_v57 = vld [vmem:[%s5643_s16 + $0xa0] sm:$0xf] }
  0xa7   : > { %4687 = vmatpush3.bf16.msra.mxu0 %v5770_v10  ;;  %4719 = vmatpush3.bf16.msra.mxu1 %v5770_v10 }
  0xa8   : > { %4689 = vmatprep.subr.bf16.mxu0 %v5774_v11  ;;  %4721 = vmatprep.subr.bf16.mxu1 %v5774_v11 }
  0xab   : > { %4691 = vmatpush3.bf16.msra.mxu0 %v5788_v20  ;;  %4723 = vmatpush3.bf16.msra.mxu1 %v5788_v20 }
  0xac   : > { %4725 = vmatprep.subr.bf16.mxu0 %v5594_v3  ;;  %4757 = vmatprep.subr.bf16.mxu1 %v5594_v3  ;;  %v5305_v3 = vunpack.i.l.bf16 %v5304_v27 }
  0xae   : > { %644 = vmatmul.mubr.f32.vlgmr.msra.gmra.mrb[6].mxu0 %v541_v19  ;;  %806 = vmatmul.mubr.f32.vlgmr.msra.gmra.mrb[6].mxu1 %v703_v21  ;;  %v1195_v21 = vld [vmem:[%s7053_s1] sm:$0xff] }
  0xaf   : > { %4727 = vmatpush3.bf16.msra.mxu0 %v5607_v7  ;;  %4759 = vmatpush3.bf16.msra.mxu1 %v5607_v7  ;;  %v5310_v7 = vunpack.i.l.bf16 %v5309_v32  ;;  %v6069_v29 = vpack.c.bf16 %v1196_v22, %v1195_v21  ;;  %v1205_v22 = vld [vmem:[%s7053_s1 + $0x50] sm:$0xff] }
  0xb0   : > { %4729 = vmatprep.subr.bf16.mxu0 %v5609_v8  ;;  %4761 = vmatprep.subr.bf16.mxu1 %v5609_v8  ;;  %v543_v8 = vsel %vm209_vm0, %v3506_v41, %v5305_v3 }
  0xb1   : > { %648 = vmatprep.mubr.f32.mxu0 %v545_v30  ;;  %810 = vmatprep.mubr.f32.mxu1 %v707_v31 }
  0xb2   : > { %649 = vmatmul.mubr.f32.gmra.mrb[8].mxu0 %v542_v35  ;;  %811 = vmatmul.mubr.f32.gmra.mrb[8].mxu1 %v704_v36  ;;  %v3541_v36 = vld [vmem:[%s5643_s16 + $0x80] sm:$0xff] }
  0xb3   : > { %4731 = vmatpush3.bf16.msra.mxu0 %v5628_v13  ;;  %4763 = vmatpush3.bf16.msra.mxu1 %v5628_v13  ;;  %v868_v13 = vsel %vm209_vm0, %v5990_v47, %v5310_v7 }
  0xb4   : > { %4733 = vmatprep.subr.bf16.mxu0 %v5632_v14  ;;  %4765 = vmatprep.subr.bf16.mxu1 %v5632_v14  ;;  %v3740_v14 = vld [vmem:[%s5643_s16 + $0x1c1] sm:$0xf] }
  0xb5   : > { %653 = vmatprep.mubr.f32.mxu0 %v546_v44  ;;  %815 = vmatprep.mubr.f32.mxu1 %v708_v45  ;;  %v5507_v42 = vpack.i.bf16 %v3740_v14, %v3725_v61  ;;  %v1200_v61 = vld [vmem:[%s7053_s1 + $0x28] sm:$0xff]  ;;  %v3536_v14 = vld [vmem:[%s5643_s16 + $0x70] sm:$0xf] }
  0xb6   : > { %654 = vmatmul.mubr.f32.gmra.mrb[10].mxu0 %v543_v8  ;;  %816 = vmatmul.mubr.f32.gmra.mrb[10].mxu1 %v705_v49 }
  0xb7   : > { %4735 = vmatpush3.bf16.msra.mxu0 %v5664_v26  ;;  %4767 = vmatpush3.bf16.msra.mxu1 %v5664_v26  ;;  %v3753_v26 = vld [vmem:[%s5643_s16 + $0x1c9] sm:$0xff] }
  0xb8   : > { %4737 = vmatprep.subr.bf16.mxu0 %v5669_v28  ;;  %4769 = vmatprep.subr.bf16.mxu1 %v5669_v28  ;;  %v5517_v28 = vpack.i.bf16 %v3768_v0, %v3753_v26  ;;  %v5522_v2 = vpack.i.bf16 %v3753_v26, %v5940_v1 }
  0xb9   : > { %967 = vmatprep.mubr.f32.mxu0 %v868_v13  ;;  %1129 = vmatprep.mubr.f32.mxu1 %v1030_v56  ;;  %v3542_v56 = vld [vmem:[%s5643_s16 + $0x88] sm:$0xf] }
  0xba   : > { %5508 = vrot.lane.b32.xlu0 %v5507_v42, %s5556_s25  ;;  %5523 = vrot.lane.b32.xlu1 %v5522_v2, %s5556_s25 }
  0xbb   : > { %4739 = vmatpush3.bf16.msra.mxu0 %v5691_v39  ;;  %4771 = vmatpush3.bf16.msra.mxu1 %v5691_v39  ;;  %v3754_v39 = vld [vmem:[%s5643_s16 + $0x1d1] sm:$0xff] }
  0xbc   : > { %4741 = vmatprep.subr.bf16.mxu0 %v5695_v40  ;;  %4773 = vmatprep.subr.bf16.mxu1 %v5695_v40  ;;  %v5314_v40 = vpop.permute.xlu1 %5313  ;;  %v5527_v5 = vpack.i.bf16 %v3769_v4, %v3754_v39  ;;  %v5532_v1 = vpack.i.bf16 %v3754_v39, %v3739_v55  ;;  %v6138_v4 = vld [vmem:[%s5643_s16 + $0xa8] sm:$0xff] }
  0xbd   : > { %v5315_v19 = vunpack.i.l.bf16 %v5314_v40 }
  0xbe   : > { %5518 = vrot.lane.b32.xlu0 %v5517_v28, %s5556_s25  ;;  %5533 = vrot.lane.b32.xlu1 %v5532_v1, %s5556_s25  ;;  %v1201_v1 = vld [vmem:[%s7053_s1 + $0x30] sm:$0xff] }
  0xbf   : > { %4743 = vmatpush3.bf16.msra.mxu0 %v5714_v48  ;;  %4775 = vmatpush3.bf16.msra.mxu1 %v5714_v48  ;;  %v5319_v48 = vpop.permute.xlu0 %5318  ;;  %v865_v32 = vsel %vm209_vm0, %v5917_v51, %v5315_v19  ;;  %v1216_v51 = vld [vmem:[%s7053_s1 + $0xa8] sm:$0xff] }
  0xc0   : > { %4745 = vmatprep.subr.bf16.mxu0 %v5721_v50  ;;  %4777 = vmatprep.subr.bf16.mxu1 %v5721_v50  ;;  %v1211_v50 = vld [vmem:[%s7053_s1 + $0x80] sm:$0xff]  ;;  %v5324_v17 = vpop.permute.xlu1 %5323  ;;  %v5321_v30 = vunpack.i.h.bf16 %v5319_v48  ;;  %v5320_v31 = vunpack.i.l.bf16 %v5319_v48 }
  0xc1   : > { %v6061_v23 = vpack.c.bf16 %v1212_v16, %v1211_v50  ;;  %v5326_v3 = vunpack.i.h.bf16 %v5324_v17  ;;  %v5325_v35 = vunpack.i.l.bf16 %v5324_v17  ;;  %v1219_v48 = vld [vmem:[%s7053_s1 + $0xc0] sm:$0xff] }
  0xc2   : > { %5528 = vrot.lane.b32.xlu0 %v5527_v5, %s5556_s25  ;;  %5543 = vrot.lane.b32.xlu1 %v5542_v18, %s5556_s25  ;;  %v869_v44 = vsel %vm209_vm0, %v3541_v36, %v5320_v31  ;;  %v1031_v45 = vsel %vm209_vm0, %v6087_v37, %v5321_v30  ;;  %v1203_v17 = vld [vmem:[%s7053_s1 + $0x40] sm:$0xff]  ;;  %v1221_v18 = vld [vmem:[%s7053_s1 + $0xd0] sm:$0xff] }
  0xc3   : > { %4747 = vmatpush3.bf16.msra.mxu0 %v5743_v59  ;;  %4779 = vmatpush3.bf16.msra.mxu1 %v5743_v59  ;;  %v5537_v59 = vpack.i.bf16 %v3770_v46, %v3755_v9  ;;  %v5329_v27 = vpop.permute.xlu0 %5328  ;;  %v866_v54 = vsel %vm209_vm0, %v5969_v25, %v5325_v35  ;;  %v1028_v55 = vsel %vm209_vm0, %v3541_v36, %v5326_v3  ;;  %v1217_v25 = vld [vmem:[%s7053_s1 + $0xb0] sm:$0xff]  ;;  %v1202_v9 = vld [vmem:[%s7053_s1 + $0x38] sm:$0xff]  ;;  %v1220_v46 = vld [vmem:[%s7053_s1 + $0xc8] sm:$0xff] }
  0xc4   : > { %4749 = vmatprep.subr.bf16.mxu0 %v5747_v60  ;;  %4781 = vmatprep.subr.bf16.mxu1 %v5747_v60  ;;  %v5316_v60 = vunpack.i.h.bf16 %v5314_v40  ;;  %v5334_v41 = vpop.permute.xlu1 %5333  ;;  %v5331_v7 = vunpack.i.h.bf16 %v5329_v27  ;;  %v5330_v6 = vunpack.i.l.bf16 %v5329_v27  ;;  %v6141_v40 = vld [vmem:[%s5643_s16 + $0xc0] sm:$0xff]  ;;  %v6145_v5 = vpack.c.bf16 %v1218_v34, %v1217_v25  ;;  %v1224_v27 = vld [vmem:[%s7053_s1 + $0xe8] sm:$0xff] }
  0xc5   : > { %v5336_v8 = vunpack.i.h.bf16 %v5334_v41  ;;  %v5335_v49 = vunpack.i.l.bf16 %v5334_v41  ;;  %v6165_v50 = vpack.c.bf16 %v1202_v9, %v1201_v1  ;;  %v6169_v16 = vpack.c.bf16 %v1220_v46, %v1219_v48  ;;  %v1207_v30 = vld [vmem:[%s7053_s1 + $0x60] sm:$0xff]  ;;  %v1208_v31 = vld [vmem:[%s7053_s1 + $0x68] sm:$0xff]  ;;  %v3581_v9 = vld [vmem:[%s5643_s16 + $0xb8] sm:$0xf] }
  0xc6   : > { %5538 = vrot.lane.b32.xlu0 %v5537_v59, %s5556_s25  ;;  %v1027_v33 = vsel %vm209_vm0, %v5990_v47, %v5316_v60  ;;  %v1199_v47 = vld [vmem:[%s7053_s1 + $0x20] sm:$0xff]  ;;  %v870_v26 = vsel %vm209_vm0, %v3542_v56, %v5330_v6  ;;  %v1032_v0 = vsel %vm209_vm0, %v3557_v57, %v5331_v7  ;;  %v1204_v59 = vld [vmem:[%s7053_s1 + $0x48] sm:$0xff]  ;;  %v1222_v60 = vld [vmem:[%s7053_s1 + $0xd8] sm:$0xff]  ;;  %v6225_v35 = vpack.c.bf16 %v1208_v31, %v1207_v30 }
  0xc7   : > { %4751 = vmatpush3.bf16.msra.mxu0 %v5770_v10  ;;  %4783 = vmatpush3.bf16.msra.mxu1 %v5770_v10  ;;  %v1213_v10 = vld [vmem:[%s7053_s1 + $0x90] sm:$0xff]  ;;  %v5339_v13 = vpop.permute.xlu0 %5338  ;;  %v6133_v28 = vpack.c.bf16 %v1200_v61, %v1199_v47  ;;  %v867_v2 = vsel %vm209_vm0, %v3536_v14, %v5335_v49  ;;  %v1029_v39 = vsel %vm209_vm0, %v3551_v62, %v5336_v8  ;;  %v6251_v61 = vld [vmem:[%s5643_s16 + $0xc8] sm:$0xff]  ;;  %v3566_v1 = vld [vmem:[%s5643_s16 + $0xa0] sm:$0xf] }
  0xc8   : > { %4753 = vmatprep.subr.bf16.mxu0 %v5774_v11  ;;  %4785 = vmatprep.subr.bf16.mxu1 %v5774_v11  ;;  %v1198_v11 = vld [vmem:[%s7053_s1 + $0x18] sm:$0xff]  ;;  %v6091_v38 = vpack.c.bf16 %v1214_v24, %v1213_v10  ;;  %v5341_v42 = vunpack.i.h.bf16 %v5339_v13  ;;  %v5340_v63 = vunpack.i.l.bf16 %v5339_v13  ;;  %v6185_v19 = vpack.c.bf16 %v1204_v59, %v1203_v17  ;;  %v1223_v24 = vld [vmem:[%s7053_s1 + $0xe0] sm:$0xff]  ;;  %v5344_v3 = vpop.permute.xlu1 %5343  ;;  %v3571_v57 = vld [vmem:[%s5643_s16 + $0xb0] sm:$0xff] }
  0xc9   : > { %v6093_v43 = vpack.c.bf16 %v1198_v11, %v1197_v53  ;;  %v6189_v21 = vpack.c.bf16 %v1222_v60, %v1221_v18  ;;  %v1206_v10 = vld [vmem:[%s7053_s1 + $0x58] sm:$0xff]  ;;  %v6209_v11 = vpack.c.bf16 %v1224_v27, %v1223_v24  ;;  %v5346_v6 = vunpack.i.h.bf16 %v5344_v3  ;;  %v6277_v18 = vld [vmem:[%s5643_s16 + $0xf0] sm:$0xff] }
  0xca   : > { %v1192_v12 = vsel %vm209_vm0, %v6138_v4, %v5340_v63  ;;  %v1354_v15 = vsel %vm209_vm0, %v6141_v40, %v5341_v42  ;;  %v6205_v53 = vpack.c.bf16 %v1206_v10, %v1205_v22  ;;  %v3600_v59 = vld [vmem:[%s5643_s16 + $0xd8] sm:$0xff] }
  0xcb   : > { %4755 = vmatpush3.bf16.msra.mxu0 %v5788_v20  ;;  %4787 = vmatpush3.bf16.msra.mxu1 %v5788_v20  ;;  %v1215_v20 = vld [vmem:[%s7053_s1 + $0xa0] sm:$0xff]  ;;  %v5349_v36 = vpop.permute.xlu0 %5348 }
  0xcc   : > { %4789 = vmatprep.subr.bf16.mxu0 %v6061_v23  ;;  %4821 = vmatprep.subr.bf16.mxu1 %v6061_v23  ;;  %v6116_v58 = vpack.c.bf16 %v1216_v51, %v1215_v20  ;;  %v1209_v20 = vld [vmem:[%s7053_s1 + $0x70] sm:$0xff]  ;;  %v1210_v51 = vld [vmem:[%s7053_s1 + $0x78] sm:$0xff]  ;;  %v5354_v7 = vpop.permute.xlu1 %5353  ;;  %v5351_v8 = vunpack.i.h.bf16 %v5349_v36  ;;  %v5350_v49 = vunpack.i.l.bf16 %v5349_v36 }
  0xcd   : > { %v5356_v13 = vunpack.i.h.bf16 %v5354_v7  ;;  %v5355_v56 = vunpack.i.l.bf16 %v5354_v7 }
  0xce   : > { %968 = vmatmul.mubr.f32.vlgmr.msra.gmra.mrb[12].mxu0 %v865_v32  ;;  %1130 = vmatmul.mubr.f32.vlgmr.msra.gmra.mrb[12].mxu1 %v1027_v33  ;;  %v1225_v32 = vld [vmem:[%s7053_s1 + $0xf0] sm:$0xff]  ;;  %v1226_v33 = vld [vmem:[%s7053_s1 + $0xf8] sm:$0xff]  ;;  %v1193_v25 = vsel %vm209_vm0, %v3571_v57, %v5350_v49  ;;  %v1355_v34 = vsel %vm209_vm0, %v6251_v61, %v5351_v8 }
  0xcf   : > { %4791 = vmatpush3.bf16.msra.mxu0 %v6069_v29  ;;  %4823 = vmatpush3.bf16.msra.mxu1 %v6069_v29  ;;  %v6229_v41 = vpack.c.bf16 %v1226_v33, %v1225_v32  ;;  %v5359_v47 = vpop.permute.xlu0 %5358 }
  0xd0   : > { %4793 = vmatprep.subr.bf16.mxu0 %v6091_v38  ;;  %4825 = vmatprep.subr.bf16.mxu1 %v6091_v38  ;;  %v5364_v14 = vpop.permute.xlu1 %5363  ;;  %v5361_v62 = vunpack.i.h.bf16 %v5359_v47 }
  0xd1   : > { %972 = vmatprep.mubr.f32.mxu0 %v869_v44  ;;  %1134 = vmatprep.mubr.f32.mxu1 %v1031_v45  ;;  %v5345_v44 = vunpack.i.l.bf16 %v5344_v3  ;;  %v6239_v45 = vpack.c.bf16 %v1210_v51, %v1209_v20  ;;  %v5366_v42 = vunpack.i.h.bf16 %v5364_v14  ;;  %v5365_v63 = vunpack.i.l.bf16 %v5364_v14  ;;  %v3602_v14 = vld [vmem:[%s5643_s16 + $0xe8] sm:$0xf] }
  0xd2   : > { %973 = vmatmul.mubr.f32.gmra.mrb[14].mxu0 %v866_v54  ;;  %1135 = vmatmul.mubr.f32.gmra.mrb[14].mxu1 %v1028_v55  ;;  %v1351_v55 = vsel %vm209_vm0, %v6138_v4, %v5346_v6  ;;  %v3587_v4 = vld [vmem:[%s5643_s16 + $0xd0] sm:$0xf]  ;;  %v3601_v6 = vld [vmem:[%s5643_s16 + $0xe0] sm:$0xff] }
  0xd3   : > { %4795 = vmatpush3.bf16.msra.mxu0 %v6093_v43  ;;  %4827 = vmatpush3.bf16.msra.mxu1 %v6093_v43  ;;  %v1189_v54 = vsel %vm209_vm0, %v5997_v52, %v5345_v44  ;;  %v5360_v52 = vunpack.i.l.bf16 %v5359_v47  ;;  %v1353_v17 = vsel %vm209_vm0, %v3581_v9, %v5366_v42  ;;  %v6311_v44 = vld [vmem:[%s5643_s16 + $0xf8] sm:$0xff] }
  0xd4   : > { %4797 = vmatprep.subr.bf16.mxu0 %v6116_v58  ;;  %4829 = vmatprep.subr.bf16.mxu1 %v6116_v58  ;;  %v5374_v10 = vpop.permute.xlu1 %5373 }
  0xd5   : > { %977 = vmatprep.mubr.f32.mxu0 %v870_v26  ;;  %1139 = vmatprep.mubr.f32.mxu1 %v1032_v0  ;;  %v1190_v26 = vsel %vm209_vm0, %v6087_v37, %v5355_v56  ;;  %v1352_v0 = vsel %vm209_vm0, %v3571_v57, %v5356_v13  ;;  %v5376_v30 = vunpack.i.h.bf16 %v5374_v10  ;;  %v5375_v31 = vunpack.i.l.bf16 %v5374_v10 }
  0xd6   : > { %978 = vmatmul.mubr.f32.gmra.mrb[16].mxu0 %v867_v2  ;;  %1140 = vmatmul.mubr.f32.gmra.mrb[16].mxu1 %v1029_v39  ;;  %v5369_v2 = vpop.permute.xlu0 %5368  ;;  %v3572_v39 = vld [vmem:[%s5643_s16 + $0xb8] sm:$0xf] }
  0xd7   : > { %4799 = vmatpush3.bf16.msra.mxu0 %v6133_v28  ;;  %4831 = vmatpush3.bf16.msra.mxu1 %v6133_v28  ;;  %v5371_v48 = vunpack.i.h.bf16 %v5369_v2  ;;  %v5370_v46 = vunpack.i.l.bf16 %v5369_v2  ;;  %v1194_v37 = vsel %vm209_vm0, %v3572_v39, %v5360_v52  ;;  %v1513_v36 = vsel %vm209_vm0, %v6141_v40, %v5375_v31  ;;  %v3596_v52 = vld [vmem:[%s5643_s16 + $0xd0] sm:$0xf] }
  0xd8   : > { %4801 = vmatprep.subr.bf16.mxu0 %v6145_v5  ;;  %4833 = vmatprep.subr.bf16.mxu1 %v6145_v5  ;;  %v5384_v27 = vpop.permute.xlu1 %5383  ;;  %v1675_v20 = vsel %vm209_vm0, %v3600_v59, %v5376_v30 }
  0xd9   : > { %1291 = vmatprep.mubr.f32.mxu0 %v1192_v12  ;;  %1453 = vmatprep.mubr.f32.mxu1 %v1354_v15  ;;  %v1356_v12 = vsel %vm209_vm0, %v3587_v4, %v5361_v62  ;;  %v1191_v15 = vsel %vm209_vm0, %v3566_v1, %v5365_v63  ;;  %v1516_v60 = vsel %vm209_vm0, %v3600_v59, %v5370_v46  ;;  %v5386_v51 = vunpack.i.h.bf16 %v5384_v27  ;;  %v3617_v62 = vld [vmem:[%s5643_s16 + $0x100] sm:$0xf]  ;;  %v2186_v4 = vld [vmem:[%s7053_s1 + $0x98] sm:$0xff] }
  0xda   : > { %v1678_v22 = vsel %vm209_vm0, %v6277_v18, %v5371_v48  ;;  %v5379_v24 = vpop.permute.xlu0 %5378  ;;  %v5385_v7 = vunpack.i.l.bf16 %v5384_v27  ;;  %v2169_v48 = vld [vmem:[%s7053_s1 + $0x10] sm:$0xff] }
  0xdb   : > { %4803 = vmatpush3.bf16.msra.mxu0 %v6165_v50  ;;  %4835 = vmatpush3.bf16.msra.mxu1 %v6165_v50  ;;  %v5381_v33 = vunpack.i.h.bf16 %v5379_v24  ;;  %v5380_v3 = vunpack.i.l.bf16 %v5379_v24  ;;  %v1676_v56 = vsel %vm209_vm0, %v3601_v6, %v5386_v51 }
  0xdc   : > { %4805 = vmatprep.subr.bf16.mxu0 %v6169_v16  ;;  %4837 = vmatprep.subr.bf16.mxu1 %v6169_v16  ;;  %v5394_v47 = vpop.permute.xlu1 %5393 }
  0xdd   : > { %v1517_v49 = vsel %vm209_vm0, %v3601_v6, %v5380_v3  ;;  %v5395_v13 = vunpack.i.l.bf16 %v5394_v47  ;;  %v2171_v3 = vld [vmem:[%s7053_s1 + $0x20] sm:$0xff] }
  0xde   : > { %v5389_v32 = vpop.permute.xlu0 %5388 }
  0xdf   : > { %4807 = vmatpush3.bf16.msra.mxu0 %v6185_v19  ;;  %4839 = vmatpush3.bf16.msra.mxu1 %v6185_v19  ;;  %v5391_v8 = vunpack.i.h.bf16 %v5389_v32  ;;  %v5390_v40 = vunpack.i.l.bf16 %v5389_v32  ;;  %v1515_v63 = vsel %vm209_vm0, %v3596_v52, %v5395_v13  ;;  %v2190_v13 = vld [vmem:[%s7053_s1 + $0xb8] sm:$0xff] }
  0xe0   : > { %4809 = vmatprep.subr.bf16.mxu0 %v6189_v21  ;;  %4841 = vmatprep.subr.bf16.mxu1 %v6189_v21 }
  0xe1   : > { %v1680_v42 = vsel %vm209_vm0, %v3617_v62, %v5391_v8  ;;  %v3647_v8 = vld [vmem:[%s5643_s16 + $0x130] sm:$0xf] }
  0xe2   : > { %v5399_v57 = vpop.permute.xlu0 %5398 }
  0xe3   : > { %4811 = vmatpush3.bf16.msra.mxu0 %v6205_v53  ;;  %4843 = vmatpush3.bf16.msra.mxu1 %v6205_v53 }
  0xe4   : > { %4813 = vmatprep.subr.bf16.mxu0 %v6209_v11  ;;  %4845 = vmatprep.subr.bf16.mxu1 %v6209_v11 }
  0xe7   : > { %4815 = vmatpush3.bf16.msra.mxu0 %v6225_v35  ;;  %4847 = vmatpush3.bf16.msra.mxu1 %v6225_v35 }
  0xe8   : > { %4817 = vmatprep.subr.bf16.mxu0 %v6229_v41  ;;  %4849 = vmatprep.subr.bf16.mxu1 %v6229_v41 }
  0xeb   : > { %4819 = vmatpush3.bf16.msra.mxu0 %v6239_v45  ;;  %4851 = vmatpush3.bf16.msra.mxu1 %v6239_v45 }
  0xec   : > { %4853 = vmatprep.subr.bf16.mxu0 %v6061_v23  ;;  %4885 = vmatprep.subr.bf16.mxu1 %v6061_v23 }
  0xee   : > { %1292 = vmatmul.mubr.f32.vlgmr.msra.gmra.mrb[18].mxu0 %v1189_v54  ;;  %1454 = vmatmul.mubr.f32.vlgmr.msra.gmra.mrb[18].mxu1 %v1351_v55  ;;  %v1679_v54 = vsel %vm209_vm0, %v6311_v44, %v5381_v33  ;;  %v5396_v55 = vunpack.i.h.bf16 %v5394_v47  ;;  %v3632_v47 = vld [vmem:[%s5643_s16 + $0x118] sm:$0xf] }
  0xef   : > { %4855 = vmatpush3.bf16.msra.mxu0 %v6069_v29  ;;  %4887 = vmatpush3.bf16.msra.mxu1 %v6069_v29 }
  0xf0   : > { %4857 = vmatprep.subr.bf16.mxu0 %v6091_v38  ;;  %4889 = vmatprep.subr.bf16.mxu1 %v6091_v38 }
  0xf1   : > { %1296 = vmatprep.mubr.f32.mxu0 %v1193_v25  ;;  %1458 = vmatprep.mubr.f32.mxu1 %v1355_v34  ;;  %v3611_v25 = vld [vmem:[%s5643_s16 + $0xe8] sm:$0xf]  ;;  %v5400_v34 = vunpack.i.l.bf16 %v5399_v57 }
  0xf2   : > { %1297 = vmatmul.mubr.f32.gmra.mrb[20].mxu0 %v1190_v26  ;;  %1459 = vmatmul.mubr.f32.gmra.mrb[20].mxu1 %v1352_v0  ;;  %v3630_v26 = vld [vmem:[%s5643_s16 + $0x108] sm:$0xff]  ;;  %v6337_v0 = vld [vmem:[%s5643_s16 + $0x120] sm:$0xff] }
  0xf3   : > { %4859 = vmatpush3.bf16.msra.mxu0 %v6093_v43  ;;  %4891 = vmatpush3.bf16.msra.mxu1 %v6093_v43  ;;  %v1840_v2 = vsel %vm209_vm0, %v3630_v26, %v5400_v34  ;;  %v6453_v34 = vld [vmem:[%s5643_s16 + $0x150] sm:$0xff] }
  0xf4   : > { %4861 = vmatprep.subr.bf16.mxu0 %v6116_v58  ;;  %4893 = vmatprep.subr.bf16.mxu1 %v6116_v58 }
  0xf5   : > { %1301 = vmatprep.mubr.f32.mxu0 %v1194_v37  ;;  %1463 = vmatprep.mubr.f32.mxu1 %v1356_v12 }
  0xf6   : > { %1302 = vmatmul.mubr.f32.gmra.mrb[22].mxu0 %v1191_v15  ;;  %1464 = vmatmul.mubr.f32.gmra.mrb[22].mxu1 %v1353_v17 }
  0xf7   : > { %4863 = vmatpush3.bf16.msra.mxu0 %v6133_v28  ;;  %4895 = vmatpush3.bf16.msra.mxu1 %v6133_v28 }
  0xf8   : > { %4865 = vmatprep.subr.bf16.mxu0 %v6145_v5  ;;  %4897 = vmatprep.subr.bf16.mxu1 %v6145_v5 }
  0xf9   : > { %1615 = vmatprep.mubr.f32.mxu0 %v1516_v60  ;;  %1777 = vmatprep.mubr.f32.mxu1 %v1678_v22  ;;  %v3631_v60 = vld [vmem:[%s5643_s16 + $0x110] sm:$0xff]  ;;  %v6399_v22 = vld [vmem:[%s5643_s16 + $0x128] sm:$0xff] }
  0xfb   : > { %4867 = vmatpush3.bf16.msra.mxu0 %v6165_v50  ;;  %4899 = vmatpush3.bf16.msra.mxu1 %v6165_v50 }
  0xfc   : > { %4869 = vmatprep.subr.bf16.mxu0 %v6169_v16  ;;  %4901 = vmatprep.subr.bf16.mxu1 %v6169_v16 }
  0xff   : > { %4871 = vmatpush3.bf16.msra.mxu0 %v6185_v19  ;;  %4903 = vmatpush3.bf16.msra.mxu1 %v6185_v19 }
 0x100   : > { %4873 = vmatprep.subr.bf16.mxu0 %v6189_v21  ;;  %4905 = vmatprep.subr.bf16.mxu1 %v6189_v21 }
 0x103   : > { %4875 = vmatpush3.bf16.msra.mxu0 %v6205_v53  ;;  %4907 = vmatpush3.bf16.msra.mxu1 %v6205_v53 }
 0x104   : > { %4877 = vmatprep.subr.bf16.mxu0 %v6209_v11  ;;  %4909 = vmatprep.subr.bf16.mxu1 %v6209_v11 }
 0x107   : > { %4879 = vmatpush3.bf16.msra.mxu0 %v6225_v35  ;;  %4911 = vmatpush3.bf16.msra.mxu1 %v6225_v35 }
 0x108   : > { %4881 = vmatprep.subr.bf16.mxu0 %v6229_v41  ;;  %4913 = vmatprep.subr.bf16.mxu1 %v6229_v41 }
 0x10b   : > { %4883 = vmatpush3.bf16.msra.mxu0 %v6239_v45  ;;  %4915 = vmatpush3.bf16.msra.mxu1 %v6239_v45 }
 0x10c   : > { %4917 = vmatprep.subr.bf16.mxu0 %v6061_v23  ;;  %4949 = vmatprep.subr.bf16.mxu1 %v6061_v23  ;;  %v1514_v23 = vsel %vm209_vm0, %v6251_v61, %v5385_v7  ;;  %v1518_v61 = vsel %vm209_vm0, %v3602_v14, %v5390_v40 }
 0x10e   : > { %1616 = vmatmul.mubr.f32.vlgmr.msra.gmra.mrb[24].mxu0 %v1513_v36  ;;  %1778 = vmatmul.mubr.f32.vlgmr.msra.gmra.mrb[24].mxu1 %v1675_v20 }
 0x10f   : > { %4919 = vmatpush3.bf16.msra.mxu0 %v6069_v29  ;;  %4951 = vmatpush3.bf16.msra.mxu1 %v6069_v29  ;;  %v5401_v29 = vunpack.i.h.bf16 %v5399_v57 }
 0x110   : > { %4921 = vmatprep.subr.bf16.mxu0 %v6091_v38  ;;  %4953 = vmatprep.subr.bf16.mxu1 %v6091_v38  ;;  %v1677_v38 = vsel %vm209_vm0, %v3611_v25, %v5396_v55  ;;  %v3641_v55 = vld [vmem:[%s5643_s16 + $0x118] sm:$0xf] }
 0x111   : > { %1620 = vmatprep.mubr.f32.mxu0 %v1517_v49  ;;  %1782 = vmatprep.mubr.f32.mxu1 %v1679_v54  ;;  %v2172_v49 = vld [vmem:[%s7053_s1 + $0x28] sm:$0xff]  ;;  %v3626_v54 = vld [vmem:[%s5643_s16 + $0x100] sm:$0xf] }
 0x112   : > { %1621 = vmatmul.mubr.f32.gmra.mrb[26].mxu0 %v1514_v23  ;;  %1783 = vmatmul.mubr.f32.gmra.mrb[26].mxu1 %v1676_v56  ;;  %v6445_v62 = vpack.c.bf16 %v2172_v49, %v2171_v3  ;;  %v6563_v49 = vld [vmem:[%s5643_s16 + $0x158] sm:$0xff] }
 0x113   : > { %4923 = vmatpush3.bf16.msra.mxu0 %v6093_v43  ;;  %4955 = vmatpush3.bf16.msra.mxu1 %v6093_v43  ;;  %v2002_v43 = vsel %vm209_vm0, %v6337_v0, %v5401_v29  ;;  %v6450_v29 = vld [vmem:[%s5643_s16 + $0x138] sm:$0xff] }
 0x114   : > { %4925 = vmatprep.subr.bf16.mxu0 %v6116_v58  ;;  %4957 = vmatprep.subr.bf16.mxu1 %v6116_v58  ;;  %v5404_v58 = vpop.permute.xlu1 %5403 }
 0x115   : > { %1625 = vmatprep.mubr.f32.mxu0 %v1518_v61  ;;  %1787 = vmatprep.mubr.f32.mxu1 %v1680_v42  ;;  %v2173_v42 = vld [vmem:[%s7053_s1 + $0x30] sm:$0xff] }
 0x116   : > { %1626 = vmatmul.mubr.f32.gmra.mrb[28].mxu0 %v1515_v63  ;;  %1788 = vmatmul.mubr.f32.gmra.mrb[28].mxu1 %v1677_v38  ;;  %v2174_v63 = vld [vmem:[%s7053_s1 + $0x38] sm:$0xff]  ;;  %v2191_v38 = vld [vmem:[%s7053_s1 + $0xc0] sm:$0xff] }
 0x117   : > { %4927 = vmatpush3.bf16.msra.mxu0 %v6133_v28  ;;  %4959 = vmatpush3.bf16.msra.mxu1 %v6133_v28  ;;  %v5409_v28 = vpop.permute.xlu0 %5408 }
 0x118   : > { %4929 = vmatprep.subr.bf16.mxu0 %v6145_v5  ;;  %4961 = vmatprep.subr.bf16.mxu1 %v6145_v5  ;;  %v2183_v5 = vld [vmem:[%s7053_s1 + $0x80] sm:$0xff]  ;;  %v5411_v46 = vunpack.i.h.bf16 %v5409_v28  ;;  %v5410_v37 = vunpack.i.l.bf16 %v5409_v28 }
 0x119   : > { %1939 = vmatprep.mubr.f32.mxu0 %v1840_v2  ;;  %2101 = vmatprep.mubr.f32.mxu1 %v2002_v43 }
 0x11a   : > { %v1841_v32 = vsel %vm209_vm0, %v3631_v60, %v5410_v37  ;;  %v2003_v33 = vsel %vm209_vm0, %v6399_v22, %v5411_v46  ;;  %v2179_v46 = vld [vmem:[%s7053_s1 + $0x60] sm:$0xff]  ;;  %v2180_v37 = vld [vmem:[%s7053_s1 + $0x68] sm:$0xff] }
 0x11b   : > { %4931 = vmatpush3.bf16.msra.mxu0 %v6165_v50  ;;  %4963 = vmatpush3.bf16.msra.mxu1 %v6165_v50  ;;  %v2184_v50 = vld [vmem:[%s7053_s1 + $0x88] sm:$0xff]  ;;  %v5419_v1 = vpop.permute.xlu0 %5418 }
 0x11c   : > { %4933 = vmatprep.subr.bf16.mxu0 %v6169_v16  ;;  %4965 = vmatprep.subr.bf16.mxu1 %v6169_v16  ;;  %v5414_v16 = vpop.permute.xlu1 %5413  ;;  %v6376_v39 = vpack.c.bf16 %v2184_v50, %v2183_v5  ;;  %v5421_v30 = vunpack.i.h.bf16 %v5419_v1  ;;  %v5420_v31 = vunpack.i.l.bf16 %v5419_v1  ;;  %v2175_v5 = vld [vmem:[%s7053_s1 + $0x40] sm:$0xff]  ;;  %v2176_v50 = vld [vmem:[%s7053_s1 + $0x48] sm:$0xff] }
 0x11d   : > { %v5416_v17 = vunpack.i.h.bf16 %v5414_v16  ;;  %v5415_v59 = vunpack.i.l.bf16 %v5414_v16  ;;  %v2193_v16 = vld [vmem:[%s7053_s1 + $0xd0] sm:$0xff]  ;;  %v2196_v1 = vld [vmem:[%s7053_s1 + $0xe8] sm:$0xff] }
 0x11e   : > { %v1842_v57 = vsel %vm209_vm0, %v3632_v47, %v5420_v31  ;;  %v2004_v14 = vsel %vm209_vm0, %v3647_v8, %v5421_v30  ;;  %v3661_v8 = vld [vmem:[%s5643_s16 + $0x140] sm:$0xff] }
 0x11f   : > { %4935 = vmatpush3.bf16.msra.mxu0 %v6185_v19  ;;  %4967 = vmatpush3.bf16.msra.mxu1 %v6185_v19  ;;  %v5406_v19 = vunpack.i.h.bf16 %v5404_v58  ;;  %v1838_v51 = vsel %vm209_vm0, %v6311_v44, %v5415_v59  ;;  %v2000_v7 = vsel %vm209_vm0, %v3631_v60, %v5416_v17  ;;  %v5429_v6 = vpop.permute.xlu0 %5428  ;;  %v2189_v44 = vld [vmem:[%s7053_s1 + $0xb0] sm:$0xff]  ;;  %v6537_v59 = vpack.c.bf16 %v2180_v37, %v2179_v46  ;;  %v6617_v37 = vld [vmem:[%s7054_s2] ss:$0 sm:$0xff] }
 0x120   : > { %4937 = vmatprep.subr.bf16.mxu0 %v6189_v21  ;;  %4969 = vmatprep.subr.bf16.mxu1 %v6189_v21  ;;  %v5405_v21 = vunpack.i.l.bf16 %v5404_v58  ;;  %v5424_v24 = vpop.permute.xlu1 %5423  ;;  %v5431_v23 = vunpack.i.h.bf16 %v5429_v6  ;;  %v5430_v56 = vunpack.i.l.bf16 %v5429_v6  ;;  %v6457_v61 = vpack.c.bf16 %v2190_v13, %v2189_v44 }
 0x121   : > { %v1999_v15 = vsel %vm209_vm0, %v3630_v26, %v5406_v19  ;;  %v5426_v36 = vunpack.i.h.bf16 %v5424_v24  ;;  %v5425_v20 = vunpack.i.l.bf16 %v5424_v24  ;;  %v2192_v26 = vld [vmem:[%s7053_s1 + $0xc8] sm:$0xff]  ;;  %v6477_v58 = vpack.c.bf16 %v2174_v63, %v2173_v42  ;;  %v2194_v19 = vld [vmem:[%s7053_s1 + $0xd8] sm:$0xff]  ;;  %v3656_v42 = vld [vmem:[%s5643_s16 + $0x130] sm:$0xf] }
 0x122   : > { %v1837_v12 = vsel %vm209_vm0, %v6277_v18, %v5405_v21  ;;  %v2188_v18 = vld [vmem:[%s7053_s1 + $0xa8] sm:$0xff]  ;;  %v2164_v2 = vsel %vm209_vm0, %v6450_v29, %v5430_v56  ;;  %v2326_v43 = vsel %vm209_vm0, %v6453_v34, %v5431_v23  ;;  %v6481_v28 = vpack.c.bf16 %v2192_v26, %v2191_v38 }
 0x123   : > { %4939 = vmatpush3.bf16.msra.mxu0 %v6205_v53  ;;  %4971 = vmatpush3.bf16.msra.mxu1 %v6205_v53  ;;  %v2167_v53 = vld [vmem:[%s7053_s1] sm:$0xff]  ;;  %v1839_v52 = vsel %vm209_vm0, %v3626_v54, %v5425_v20  ;;  %v2001_v25 = vsel %vm209_vm0, %v3641_v55, %v5426_v36  ;;  %v6497_v21 = vpack.c.bf16 %v2176_v50, %v2175_v5  ;;  %v5439_v60 = vpop.permute.xlu0 %5438  ;;  %v3671_v63 = vld [vmem:[%s5643_s16 + $0x148] sm:$0xf] }
 0x124   : > { %4941 = vmatprep.subr.bf16.mxu0 %v6209_v11  ;;  %4973 = vmatprep.subr.bf16.mxu1 %v6209_v11  ;;  %v2168_v11 = vld [vmem:[%s7053_s1 + $0x8] sm:$0xff]  ;;  %v5434_v17 = vpop.permute.xlu1 %5433  ;;  %v5441_v36 = vunpack.i.h.bf16 %v5439_v60  ;;  %v5440_v20 = vunpack.i.l.bf16 %v5439_v60 }
 0x125   : > { %v6384_v9 = vpack.c.bf16 %v2168_v11, %v2167_v53  ;;  %v6501_v53 = vpack.c.bf16 %v2194_v19, %v2193_v16  ;;  %v2177_v11 = vld [vmem:[%s7053_s1 + $0x50] sm:$0xff]  ;;  %v5436_v31 = vunpack.i.h.bf16 %v5434_v17  ;;  %v6588_v50 = vld [vmem:[%s5643_s16 + $0x168] sm:$0xff]  ;;  %v6591_v16 = vld [vmem:[%s5643_s16 + $0x180] sm:$0xff] }
 0x126   : > { %v2165_v44 = vsel %vm209_vm0, %v3661_v8, %v5440_v20  ;;  %v2327_v13 = vsel %vm209_vm0, %v6563_v49, %v5441_v36 }
 0x127   : > { %4943 = vmatpush3.bf16.msra.mxu0 %v6225_v35  ;;  %4975 = vmatpush3.bf16.msra.mxu1 %v6225_v35  ;;  %v2185_v35 = vld [vmem:[%s7053_s1 + $0x90] sm:$0xff]  ;;  %v5449_v3 = vpop.permute.xlu0 %5448 }
 0x128   : > { %4945 = vmatprep.subr.bf16.mxu0 %v6229_v41  ;;  %4977 = vmatprep.subr.bf16.mxu1 %v6229_v41  ;;  %v2170_v41 = vld [vmem:[%s7053_s1 + $0x18] sm:$0xff]  ;;  %v6403_v10 = vpack.c.bf16 %v2186_v4, %v2185_v35  ;;  %v2195_v4 = vld [vmem:[%s7053_s1 + $0xe0] sm:$0xff]  ;;  %v5444_v30 = vpop.permute.xlu1 %5443  ;;  %v5451_v55 = vunpack.i.h.bf16 %v5449_v3 }
 0x129   : > { %v6405_v27 = vpack.c.bf16 %v2170_v41, %v2169_v48  ;;  %v2178_v35 = vld [vmem:[%s7053_s1 + $0x58] sm:$0xff]  ;;  %v6521_v41 = vpack.c.bf16 %v2196_v1, %v2195_v4  ;;  %v5446_v6 = vunpack.i.h.bf16 %v5444_v30  ;;  %v5445_v47 = vunpack.i.l.bf16 %v5444_v30 }
 0x12a   : > { %v6517_v48 = vpack.c.bf16 %v2178_v35, %v2177_v11 }
 0x12b   : > { %4947 = vmatpush3.bf16.msra.mxu0 %v6239_v45  ;;  %4979 = vmatpush3.bf16.msra.mxu1 %v6239_v45  ;;  %v2187_v45 = vld [vmem:[%s7053_s1 + $0xa0] sm:$0xff] }
 0x12c   : > { %4981 = vmatprep.subr.bf16.mxu0 %v6376_v39  ;;  %5013 = vmatprep.subr.bf16.mxu1 %v6376_v39  ;;  %v6428_v40 = vpack.c.bf16 %v2188_v18, %v2187_v45  ;;  %v2181_v45 = vld [vmem:[%s7053_s1 + $0x70] sm:$0xff]  ;;  %v2182_v18 = vld [vmem:[%s7053_s1 + $0x78] sm:$0xff]  ;;  %v5454_v54 = vpop.permute.xlu1 %5453 }
 0x12d   : > { %v5456_v23 = vunpack.i.h.bf16 %v5454_v54  ;;  %v5455_v56 = vunpack.i.l.bf16 %v5454_v54 }
 0x12e   : > { %1940 = vmatmul.mubr.f32.vlgmr.msra.gmra.mrb[30].mxu0 %v1837_v12  ;;  %2102 = vmatmul.mubr.f32.vlgmr.msra.gmra.mrb[30].mxu1 %v1999_v15  ;;  %v2197_v12 = vld [vmem:[%s7053_s1 + $0xf0] sm:$0xff]  ;;  %v2198_v15 = vld [vmem:[%s7053_s1 + $0xf8] sm:$0xff] }
 0x12f   : > { %4983 = vmatpush3.bf16.msra.mxu0 %v6384_v9  ;;  %5015 = vmatpush3.bf16.msra.mxu1 %v6384_v9  ;;  %v6541_v24 = vpack.c.bf16 %v2198_v15, %v2197_v12  ;;  %v2325_v5 = vsel %vm209_vm0, %v3671_v63, %v5456_v23  ;;  %v3691_v63 = vld [vmem:[%s5643_s16 + $0x170] sm:$0xff] }
 0x130   : > { %4985 = vmatprep.subr.bf16.mxu0 %v6403_v10  ;;  %5017 = vmatprep.subr.bf16.mxu1 %v6403_v10  ;;  %v5464_v35 = vpop.permute.xlu1 %5463 }
 0x131   : > { %1944 = vmatprep.mubr.f32.mxu0 %v1841_v32  ;;  %2106 = vmatprep.mubr.f32.mxu1 %v2003_v33  ;;  %v5435_v32 = vunpack.i.l.bf16 %v5434_v17  ;;  %v6551_v33 = vpack.c.bf16 %v2182_v18, %v2181_v45  ;;  %v5465_v36 = vunpack.i.l.bf16 %v5464_v35 }
 0x132   : > { %1945 = vmatmul.mubr.f32.gmra.mrb[32].mxu0 %v1838_v51  ;;  %2107 = vmatmul.mubr.f32.gmra.mrb[32].mxu1 %v2000_v7  ;;  %v2323_v7 = vsel %vm209_vm0, %v6450_v29, %v5436_v31  ;;  %v3677_v29 = vld [vmem:[%s5643_s16 + $0x160] sm:$0xf] }
 0x133   : > { %4987 = vmatpush3.bf16.msra.mxu0 %v6405_v27  ;;  %5019 = vmatpush3.bf16.msra.mxu1 %v6405_v27  ;;  %v2161_v51 = vsel %vm209_vm0, %v6337_v0, %v5435_v32  ;;  %v5450_v0 = vunpack.i.l.bf16 %v5449_v3  ;;  %v5466_v3 = vunpack.i.h.bf16 %v5464_v35 }
 0x134   : > { %4989 = vmatprep.subr.bf16.mxu0 %v6428_v40  ;;  %5021 = vmatprep.subr.bf16.mxu1 %v6428_v40  ;;  %v5474_v45 = vpop.permute.xlu1 %5473 }
 0x135   : > { %1949 = vmatprep.mubr.f32.mxu0 %v1842_v57  ;;  %2111 = vmatprep.mubr.f32.mxu1 %v2004_v14  ;;  %v2162_v57 = vsel %vm209_vm0, %v6399_v22, %v5445_v47  ;;  %v2324_v14 = vsel %vm209_vm0, %v3661_v8, %v5446_v6 }
 0x136   : > { %1950 = vmatmul.mubr.f32.gmra.mrb[34].mxu0 %v1839_v52  ;;  %2112 = vmatmul.mubr.f32.gmra.mrb[34].mxu1 %v2001_v25  ;;  %v5459_v52 = vpop.permute.xlu0 %5458  ;;  %v3662_v25 = vld [vmem:[%s5643_s16 + $0x148] sm:$0xf] }
 0x137   : > { %4991 = vmatpush3.bf16.msra.mxu0 %v6445_v62  ;;  %5023 = vmatpush3.bf16.msra.mxu1 %v6445_v62  ;;  %v5461_v38 = vunpack.i.h.bf16 %v5459_v52  ;;  %v5460_v26 = vunpack.i.l.bf16 %v5459_v52  ;;  %v2166_v22 = vsel %vm209_vm0, %v3662_v25, %v5450_v0 }
 0x138   : > { %4993 = vmatprep.subr.bf16.mxu0 %v6457_v61  ;;  %5025 = vmatprep.subr.bf16.mxu1 %v6457_v61 }
 0x139   : > { %2263 = vmatprep.mubr.f32.mxu0 %v2164_v2  ;;  %2425 = vmatprep.mubr.f32.mxu1 %v2326_v43  ;;  %v2328_v2 = vsel %vm209_vm0, %v3677_v29, %v5451_v55  ;;  %v2163_v43 = vsel %vm209_vm0, %v3656_v42, %v5455_v56  ;;  %v2488_v19 = vsel %vm209_vm0, %v6588_v50, %v5460_v26  ;;  %v5476_v29 = vunpack.i.h.bf16 %v5474_v45 }
 0x13a   : > { %v2650_v11 = vsel %vm209_vm0, %v6591_v16, %v5461_v38  ;;  %v6611_v4 = vpop.permute.xlu0 %5468  ;;  %v5475_v42 = vunpack.i.l.bf16 %v5474_v45  ;;  %v6650_v38 = vld [vmem:[%s5643_s16 + $0x188] sm:$0xff]  ;;  %v3692_v45 = vld [vmem:[%s5643_s16 + $0x178] sm:$0xf] }
 0x13b   : > { %4995 = vmatpush3.bf16.msra.mxu0 %v6477_v58  ;;  %5027 = vmatpush3.bf16.msra.mxu1 %v6477_v58  ;;  %v5471_v23 = vunpack.i.h.bf16 %v6611_v4  ;;  %v5470_v56 = vunpack.i.l.bf16 %v6611_v4 }
 0x13c   : > { %4997 = vmatprep.subr.bf16.mxu0 %v6481_v28  ;;  %5029 = vmatprep.subr.bf16.mxu1 %v6481_v28  ;;  %v2486_v4 = vsel %vm209_vm0, %v6563_v49, %v5475_v42  ;;  %v3701_v49 = vld [vmem:[%s5643_s16 + $0x178] sm:$0xf] }
 0x13e   : > { %v6634_v54 = vpop.permute.xlu0 %5478 }
 0x13f   : > { %4999 = vmatpush3.bf16.msra.mxu0 %v6497_v21  ;;  %5031 = vmatpush3.bf16.msra.mxu1 %v6497_v21  ;;  %v5480_v35 = vunpack.i.l.bf16 %v6634_v54 }
 0x140   : > { %5001 = vmatprep.subr.bf16.mxu0 %v6501_v53  ;;  %5033 = vmatprep.subr.bf16.mxu1 %v6501_v53 }
 0x143   : > { %5003 = vmatpush3.bf16.msra.mxu0 %v6517_v48  ;;  %5035 = vmatpush3.bf16.msra.mxu1 %v6517_v48 }
 0x144   : > { %5005 = vmatprep.subr.bf16.mxu0 %v6521_v41  ;;  %5037 = vmatprep.subr.bf16.mxu1 %v6521_v41 }
 0x147   : > { %5007 = vmatpush3.bf16.msra.mxu0 %v6537_v59  ;;  %5039 = vmatpush3.bf16.msra.mxu1 %v6537_v59 }
 0x148   : > { %5009 = vmatprep.subr.bf16.mxu0 %v6541_v24  ;;  %5041 = vmatprep.subr.bf16.mxu1 %v6541_v24 }
 0x14b   : > { %5011 = vmatpush3.bf16.msra.mxu0 %v6551_v33  ;;  %5043 = vmatpush3.bf16.msra.mxu1 %v6551_v33 }
 0x14c   : > { %5045 = vmatprep.subr.bf16.mxu0 %v6376_v39  ;;  %5077 = vmatprep.subr.bf16.mxu1 %v6376_v39 }
 0x14e   : > { %2264 = vmatmul.mubr.f32.vlgmr.msra.gmra.mrb[36].mxu0 %v2161_v51  ;;  %2426 = vmatmul.mubr.f32.vlgmr.msra.gmra.mrb[36].mxu1 %v2323_v7 }
 0x14f   : > { %5047 = vmatpush3.bf16.msra.mxu0 %v6384_v9  ;;  %5079 = vmatpush3.bf16.msra.mxu1 %v6384_v9 }
 0x150   : > { %5049 = vmatprep.subr.bf16.mxu0 %v6403_v10  ;;  %5081 = vmatprep.subr.bf16.mxu1 %v6403_v10 }
 0x151   : > { %2268 = vmatprep.mubr.f32.mxu0 %v2165_v44  ;;  %2430 = vmatprep.mubr.f32.mxu1 %v2327_v13 }
 0x152   : > { %2269 = vmatmul.mubr.f32.gmra.mrb[38].mxu0 %v2162_v57  ;;  %2431 = vmatmul.mubr.f32.gmra.mrb[38].mxu1 %v2324_v14  ;;  %v2485_v57 = vsel %vm209_vm0, %v6453_v34, %v5465_v36  ;;  %v2647_v14 = vsel %vm209_vm0, %v6588_v50, %v5466_v3 }
 0x153   : > { %5051 = vmatpush3.bf16.msra.mxu0 %v6405_v27  ;;  %5083 = vmatpush3.bf16.msra.mxu1 %v6405_v27 }
 0x154   : > { %5053 = vmatprep.subr.bf16.mxu0 %v6428_v40  ;;  %5085 = vmatprep.subr.bf16.mxu1 %v6428_v40 }
 0x155   : > { %2273 = vmatprep.mubr.f32.mxu0 %v2166_v22  ;;  %2435 = vmatprep.mubr.f32.mxu1 %v2328_v2 }
 0x156   : > { %2274 = vmatmul.mubr.f32.gmra.mrb[40].mxu0 %v2163_v43  ;;  %2436 = vmatmul.mubr.f32.gmra.mrb[40].mxu1 %v2325_v5  ;;  %v5484_v43 = vpop.permute.xlu1 %5483 }
 0x157   : > { %5055 = vmatpush3.bf16.msra.mxu0 %v6445_v62  ;;  %5087 = vmatpush3.bf16.msra.mxu1 %v6445_v62 }
 0x158   : > { %5057 = vmatprep.subr.bf16.mxu0 %v6457_v61  ;;  %5089 = vmatprep.subr.bf16.mxu1 %v6457_v61 }
 0x159   : > { %2587 = vmatprep.mubr.f32.mxu0 %v2488_v19  ;;  %2749 = vmatprep.mubr.f32.mxu1 %v2650_v11  ;;  %v2489_v19 = vsel %vm209_vm0, %v3691_v63, %v5470_v56  ;;  %v2651_v11 = vsel %vm209_vm0, %v6650_v38, %v5471_v23 }
 0x15b   : > { %5059 = vmatpush3.bf16.msra.mxu0 %v6477_v58  ;;  %5091 = vmatpush3.bf16.msra.mxu1 %v6477_v58 }
 0x15c   : > { %5061 = vmatprep.subr.bf16.mxu0 %v6481_v28  ;;  %5093 = vmatprep.subr.bf16.mxu1 %v6481_v28 }
 0x15f   : > { %5063 = vmatpush3.bf16.msra.mxu0 %v6497_v21  ;;  %5095 = vmatpush3.bf16.msra.mxu1 %v6497_v21 }
 0x160   : > { %5065 = vmatprep.subr.bf16.mxu0 %v6501_v53  ;;  %5097 = vmatprep.subr.bf16.mxu1 %v6501_v53 }
 0x161   : > { %v3808_v1 = vpop.f32.mrb[0].mxu0  ;;  %v3849_v46 = vpop.f32.mrb[0].mxu1 }
 0x162   : > { %v3809_v12 = vpop.f32.mrb[1].mxu0  ;;  %v3850_v15 = vpop.f32.mrb[1].mxu1 }
 0x163   : > { %v3810_v17 = vadd.f32 %v3809_v12, %v3808_v1  ;;  %v3851_v60 = vadd.f32 %v3850_v15, %v3849_v46  ;;  %5067 = vmatpush3.bf16.msra.mxu0 %v6517_v48  ;;  %5099 = vmatpush3.bf16.msra.mxu1 %v6517_v48  ;;  %v2648_v1 = vsel %vm209_vm0, %v3691_v63, %v5476_v29  ;;  %v5486_v15 = vunpack.i.h.bf16 %v5484_v43 }
 0x164   : > { %5069 = vmatprep.subr.bf16.mxu0 %v6521_v41  ;;  %5101 = vmatprep.subr.bf16.mxu1 %v6521_v41 }
 0x165   : > { %v321_v18 = vadd.f32 %v3810_v17, %v6617_v37  ;;  %v484_v30 = vadd.f32 %v3851_v60, %v6617_v37  ;;  %v3811_v31 = vpop.f32.mrb[2].mxu0  ;;  %v3852_v32 = vpop.f32.mrb[2].mxu1  ;;  %v5485_v17 = vunpack.i.l.bf16 %v5484_v43  ;;  %v2649_v36 = vsel %vm209_vm0, %v3701_v49, %v5486_v15 }
 0x166   : > { %v3812_v20 = vpop.f32.mrb[3].mxu0  ;;  %v3853_v51 = vpop.f32.mrb[3].mxu1 }
 0x167   : > { %v334_v7 = vmax.f32 %v321_v18, 0.0  ;;  %v497_v6 = vmax.f32 %v484_v30, 0.0  ;;  %5071 = vmatpush3.bf16.msra.mxu0 %v6537_v59  ;;  %5103 = vmatpush3.bf16.msra.mxu1 %v6537_v59  ;;  %v3813_v47 = vadd.f32 %v3812_v20, %v3811_v31  ;;  %v3854_v8 = vadd.f32 %v3853_v51, %v3852_v32  ;;  %v5489_v60 = vpop.permute.xlu0 %5488  ;;  %v3707_v18 = vld [vmem:[%s5643_s16 + $0x190] sm:$0xf]  ;;  %v3686_v30 = vld [vmem:[%s5643_s16 + $0x160] sm:$0xf] }
 0x168   : > { %5073 = vmatprep.subr.bf16.mxu0 %v6541_v24  ;;  %5105 = vmatprep.subr.bf16.mxu1 %v6541_v24  ;;  %v5490_v31 = vunpack.i.l.bf16 %v5489_v60  ;;  %v2490_v32 = vsel %vm209_vm0, %v3692_v45, %v5480_v35  ;;  %v6689_v20 = vld [vmem:[%s5643_s16 + $0x198] sm:$0xff]  ;;  %v6692_v51 = vld [vmem:[%s5643_s16 + $0x1b0] sm:$0xff] }
 0x169   : > { %338 = vst.msk [vmem:[%s6628_s23] sm:$0xff] %vm337_vm1, %v334_v7  ;;  %3501 = vst.msk [vmem:[%s6628_s23 + $0x18] sm:$0xff] %vm337_vm1, %v497_v6  ;;  %v326_v55 = vadd.f32 %v3813_v47, %v6617_v37  ;;  %v489_v0 = vadd.f32 %v3854_v8, %v6617_v37  ;;  %v3814_v44 = vpop.f32.mrb[4].mxu0  ;;  %v3855_v13 = vpop.f32.mrb[4].mxu1 }
 0x16a   : > { %v3815_v52 = vpop.f32.mrb[5].mxu0  ;;  %v3856_v25 = vpop.f32.mrb[5].mxu1  ;;  %v2812_v7 = vsel %vm209_vm0, %v6689_v20, %v5490_v31 }
 0x16b   : > { %5075 = vmatpush3.bf16.msra.mxu0 %v6551_v33  ;;  %5107 = vmatpush3.bf16.msra.mxu1 %v6551_v33  ;;  %v335_v26 = vmax.f32 %v326_v55, 0.0  ;;  %v498_v22 = vmax.f32 %v489_v0, 0.0  ;;  %v3816_v2 = vadd.f32 %v3815_v52, %v3814_v44  ;;  %v3857_v34 = vadd.f32 %v3856_v25, %v3855_v13  ;;  %v3156_v0 = vld [vmem:[%s7053_s1 + $0x88] sm:$0xff] }
 0x16c   : > { %5109 = vmatprep.subr.bf16.mxu0 %v6376_v39  ;;  %5141 = vmatprep.subr.bf16.mxu1 %v6376_v39  ;;  %v5481_v39 = vunpack.i.h.bf16 %v6634_v54 }
 0x16d   : > { %339 = vst.msk [vmem:[%s6628_s23 + $0x8] sm:$0xff] %vm337_vm1, %v335_v26  ;;  %3502 = vst.msk [vmem:[%s6628_s23 + $0x20] sm:$0xff] %vm337_vm1, %v498_v22  ;;  %v331_v5 = vadd.f32 %v3816_v2, %v6617_v37  ;;  %v494_v50 = vadd.f32 %v3857_v34, %v6617_v37  ;;  %v3157_v22 = vld [vmem:[%s7053_s1 + $0x90] sm:$0xff]  ;;  %v3142_v34 = vld [vmem:[%s7053_s1 + $0x18] sm:$0xff] }
 0x16e   : > { %2588 = vmatmul.mubr.f32.vlgmr.msra.gmra.mrb[42].mxu0 %v2485_v57  ;;  %2750 = vmatmul.mubr.f32.vlgmr.msra.gmra.mrb[42].mxu1 %v2647_v14  ;;  %v2652_v3 = vsel %vm209_vm0, %v3707_v18, %v5481_v39 }
 0x16f   : > { %5111 = vmatpush3.bf16.msra.mxu0 %v6384_v9  ;;  %5143 = vmatpush3.bf16.msra.mxu1 %v6384_v9  ;;  %v336_v46 = vmax.f32 %v331_v5, 0.0  ;;  %v499_v12 = vmax.f32 %v494_v50, 0.0  ;;  %v5491_v9 = vunpack.i.h.bf16 %v5489_v60  ;;  %v6768_v60 = vld [vmem:[%s5643_s16 + $0x1b8] sm:$0xff] }
 0x170   : > { %5113 = vmatprep.subr.bf16.mxu0 %v6403_v10  ;;  %5145 = vmatprep.subr.bf16.mxu1 %v6403_v10  ;;  %v2487_v10 = vsel %vm209_vm0, %v3686_v30, %v5485_v17  ;;  %v3721_v17 = vld [vmem:[%s5643_s16 + $0x1a0] sm:$0xff] }
 0x171   : > { %341 = vst.msk [vmem:[%s6628_s23 + $0x10] sm:$0xf] %vm340_vm2, %v336_v46  ;;  %3503 = vst.msk [vmem:[%s6628_s23 + $0x28] sm:$0xf] %vm340_vm2, %v499_v12  ;;  %2592 = vmatprep.mubr.f32.mxu0 %v2489_v19  ;;  %2754 = vmatprep.mubr.f32.mxu1 %v2651_v11 }
 0x172   : > { %2593 = vmatmul.mubr.f32.gmra.mrb[44].mxu0 %v2486_v4  ;;  %2755 = vmatmul.mubr.f32.gmra.mrb[44].mxu1 %v2648_v1 }
 0x173   : > { %5115 = vmatpush3.bf16.msra.mxu0 %v6405_v27  ;;  %5147 = vmatpush3.bf16.msra.mxu1 %v6405_v27  ;;  %v2974_v27 = vsel %vm209_vm0, %v6692_v51, %v5491_v9 }
 0x174   : > { %5117 = vmatprep.subr.bf16.mxu0 %v6428_v40  ;;  %5149 = vmatprep.subr.bf16.mxu1 %v6428_v40  ;;  %v5494_v40 = vpop.permute.xlu1 %5493 }
 0x175   : > { %2597 = vmatprep.mubr.f32.mxu0 %v2490_v32  ;;  %2759 = vmatprep.mubr.f32.mxu1 %v2652_v3  ;;  %v5496_v23 = vunpack.i.h.bf16 %v5494_v40  ;;  %v5495_v56 = vunpack.i.l.bf16 %v5494_v40  ;;  %v3159_v32 = vld [vmem:[%s7053_s1 + $0xa0] sm:$0xff]  ;;  %v3160_v3 = vld [vmem:[%s7053_s1 + $0xa8] sm:$0xff] }
 0x176   : > { %2598 = vmatmul.mubr.f32.gmra.mrb[46].mxu0 %v2487_v10  ;;  %2760 = vmatmul.mubr.f32.gmra.mrb[46].mxu1 %v2649_v36 }
 0x177   : > { %5119 = vmatpush3.bf16.msra.mxu0 %v6445_v62  ;;  %5151 = vmatpush3.bf16.msra.mxu1 %v6445_v62  ;;  %v6712_v62 = vpop.permute.xlu0 %5498  ;;  %v2809_v35 = vsel %vm209_vm0, %v6591_v16, %v5495_v56  ;;  %v2971_v4 = vsel %vm209_vm0, %v6689_v20, %v5496_v23 }
 0x178   : > { %5121 = vmatprep.subr.bf16.mxu0 %v6457_v61  ;;  %5153 = vmatprep.subr.bf16.mxu1 %v6457_v61  ;;  %v5501_v11 = vunpack.i.h.bf16 %v6712_v62  ;;  %v5500_v39 = vunpack.i.l.bf16 %v6712_v62 }
 0x179   : > { %2911 = vmatprep.mubr.f32.mxu0 %v2812_v7  ;;  %3073 = vmatprep.mubr.f32.mxu1 %v2974_v27  ;;  %v3143_v7 = vld [vmem:[%s7053_s1 + $0x20] sm:$0xff] }
 0x17a   : > { %v2813_v36 = vsel %vm209_vm0, %v3721_v17, %v5500_v39  ;;  %v2975_v20 = vsel %vm209_vm0, %v6768_v60, %v5501_v11  ;;  %v3166_v11 = vld [vmem:[%s7053_s1 + $0xd8] sm:$0xff] }
 0x17b   : > { %5123 = vmatpush3.bf16.msra.mxu0 %v6477_v58  ;;  %5155 = vmatpush3.bf16.msra.mxu1 %v6477_v58  ;;  %v6741_v2 = vpop.permute.xlu0 %5508 }
 0x17c   : > { %5125 = vmatprep.subr.bf16.mxu0 %v6481_v28  ;;  %5157 = vmatprep.subr.bf16.mxu1 %v6481_v28  ;;  %v3155_v28 = vld [vmem:[%s7053_s1 + $0x80] sm:$0xff]  ;;  %v5511_v27 = vunpack.i.h.bf16 %v6741_v2  ;;  %v5510_v40 = vunpack.i.l.bf16 %v6741_v2  ;;  %v3164_v2 = vld [vmem:[%s7053_s1 + $0xc8] sm:$0xff] }
 0x17d   : > { %v5172_v63 = vpack.c.bf16 %v3156_v0, %v3155_v28  ;;  %v3737_v28 = vld [vmem:[%s5643_s16 + $0x1c0] sm:$0xf]  ;;  %v3731_v0 = vld [vmem:[%s5643_s16 + $0x1a8] sm:$0xf] }
 0x17f   : > { %5127 = vmatpush3.bf16.msra.mxu0 %v6497_v21  ;;  %5159 = vmatpush3.bf16.msra.mxu1 %v6497_v21  ;;  %v6721_v21 = vpop.permute.xlu1 %5503 }
 0x180   : > { %5129 = vmatprep.subr.bf16.mxu0 %v6501_v53  ;;  %5161 = vmatprep.subr.bf16.mxu1 %v6501_v53  ;;  %v5506_v12 = vunpack.i.h.bf16 %v6721_v21  ;;  %v5505_v15 = vunpack.i.l.bf16 %v6721_v21  ;;  %v5519_v21 = vpop.permute.xlu0 %5518 }
 0x181   : > { %v3890_v61 = vpop.f32.mrb[6].mxu0  ;;  %v3931_v6 = vpop.f32.mrb[6].mxu1  ;;  %v5521_v23 = vunpack.i.h.bf16 %v5519_v21  ;;  %v5520_v56 = vunpack.i.l.bf16 %v5519_v21 }
 0x182   : > { %v3891_v47 = vpop.f32.mrb[7].mxu0  ;;  %v3932_v8 = vpop.f32.mrb[7].mxu1  ;;  %v2810_v62 = vsel %vm209_vm0, %v6650_v38, %v5505_v15  ;;  %v3144_v38 = vld [vmem:[%s7053_s1 + $0x28] sm:$0xff] }
 0x183   : > { %v3892_v58 = vadd.f32 %v3891_v47, %v3890_v61  ;;  %v3933_v54 = vadd.f32 %v3932_v8, %v3931_v6  ;;  %5131 = vmatpush3.bf16.msra.mxu0 %v6517_v48  ;;  %5163 = vmatpush3.bf16.msra.mxu1 %v6517_v48  ;;  %v3139_v48 = vld [vmem:[%s7053_s1] sm:$0xff]  ;;  %v5514_v31 = vpop.permute.xlu1 %5513  ;;  %v2972_v61 = vsel %vm209_vm0, %v3721_v17, %v5506_v12  ;;  %v3168_v12 = vld [vmem:[%s7053_s1 + $0xe8] sm:$0xff] }
 0x184   : > { %5133 = vmatprep.subr.bf16.mxu0 %v6521_v41  ;;  %5165 = vmatprep.subr.bf16.mxu1 %v6521_v41  ;;  %v3140_v41 = vld [vmem:[%s7053_s1 + $0x8] sm:$0xff]  ;;  %v5516_v8 = vunpack.i.h.bf16 %v5514_v31 }
 0x185   : > { %v646_v53 = vadd.f32 %v3892_v58, %v6617_v37  ;;  %v808_v55 = vadd.f32 %v3933_v54, %v6617_v37  ;;  %v3893_v44 = vpop.f32.mrb[8].mxu0  ;;  %v3934_v13 = vpop.f32.mrb[8].mxu1  ;;  %v5174_v26 = vpack.c.bf16 %v3140_v41, %v3139_v48  ;;  %v5515_v58 = vunpack.i.l.bf16 %v5514_v31  ;;  %v3722_v54 = vld [vmem:[%s5643_s16 + $0x1a8] sm:$0xf]  ;;  %v3161_v48 = vld [vmem:[%s7053_s1 + $0xb0] sm:$0xff]  ;;  %v3162_v41 = vld [vmem:[%s7053_s1 + $0xb8] sm:$0xff] }
 0x186   : > { %v3894_v57 = vpop.f32.mrb[9].mxu0  ;;  %v3935_v14 = vpop.f32.mrb[9].mxu1  ;;  %v3169_v31 = vld [vmem:[%s7053_s1 + $0xf0] sm:$0xff] }
 0x187   : > { %v659_v52 = vmax.f32 %v646_v53, 0.0  ;;  %v821_v25 = vmax.f32 %v808_v55, 0.0  ;;  %5135 = vmatpush3.bf16.msra.mxu0 %v6537_v59  ;;  %5167 = vmatpush3.bf16.msra.mxu1 %v6537_v59  ;;  %v3895_v29 = vadd.f32 %v3894_v57, %v3893_v44  ;;  %v3936_v42 = vadd.f32 %v3935_v14, %v3934_v13  ;;  %v3158_v59 = vld [vmem:[%s7053_s1 + $0x98] sm:$0xff]  ;;  %v3716_v55 = vld [vmem:[%s5643_s16 + $0x190] sm:$0xf]  ;;  %v5524_v15 = vpop.permute.xlu1 %5523 }
 0x188   : > { %5137 = vmatprep.subr.bf16.mxu0 %v6541_v24  ;;  %5169 = vmatprep.subr.bf16.mxu1 %v6541_v24  ;;  %v3141_v24 = vld [vmem:[%s7053_s1 + $0x10] sm:$0xff]  ;;  %v5176_v49 = vpack.c.bf16 %v3158_v59, %v3157_v22  ;;  %v5180_v53 = vpack.c.bf16 %v3160_v3, %v3159_v32  ;;  %v2814_v44 = vsel %vm209_vm0, %v3722_v54, %v5510_v40  ;;  %v3163_v22 = vld [vmem:[%s7053_s1 + $0xc0] sm:$0xff]  ;;  %v3170_v32 = vld [vmem:[%s7053_s1 + $0xf8] sm:$0xff]  ;;  %v5525_v54 = vunpack.i.l.bf16 %v5524_v15 }
 0x189   : > { %3516 = vst.msk [vmem:[%s6628_s23 + $0x30] sm:$0xff] %vm337_vm1, %v659_v52  ;;  %3531 = vst.msk [vmem:[%s6628_s23 + $0x48] sm:$0xff] %vm337_vm1, %v821_v25  ;;  %v651_v43 = vadd.f32 %v3895_v29, %v6617_v37  ;;  %v813_v5 = vadd.f32 %v3936_v42, %v6617_v37  ;;  %v3896_v50 = vpop.f32.mrb[10].mxu0  ;;  %v3937_v19 = vpop.f32.mrb[10].mxu1  ;;  %v5178_v9 = vpack.c.bf16 %v3142_v34, %v3141_v24  ;;  %v6817_v25 = vld [vmem:[%s5643_s16 + $0x1c8] sm:$0xff]  ;;  %v3765_v29 = vld [vmem:[%s5643_s16 + $0x1e0] sm:$0xff] }
 0x18a   : > { %v3897_v1 = vpop.f32.mrb[11].mxu0  ;;  %v3938_v46 = vpop.f32.mrb[11].mxu1  ;;  %v2976_v13 = vsel %vm209_vm0, %v3737_v28, %v5511_v27  ;;  %v5182_v57 = vpack.c.bf16 %v3144_v38, %v3143_v7  ;;  %v2811_v14 = vsel %vm209_vm0, %v3716_v55, %v5515_v58  ;;  %v2973_v52 = vsel %vm209_vm0, %v3731_v0, %v5516_v8  ;;  %v3153_v7 = vld [vmem:[%s7053_s1 + $0x70] sm:$0xff]  ;;  %v3154_v27 = vld [vmem:[%s7053_s1 + $0x78] sm:$0xff] }
 0x18b   : > { %5139 = vmatpush3.bf16.msra.mxu0 %v6551_v33  ;;  %5171 = vmatpush3.bf16.msra.mxu1 %v6551_v33  ;;  %v660_v45 = vmax.f32 %v651_v43, 0.0  ;;  %v822_v16 = vmax.f32 %v813_v5, 0.0  ;;  %v3898_v18 = vadd.f32 %v3897_v1, %v3896_v50  ;;  %v3939_v30 = vadd.f32 %v3938_v46, %v3937_v19  ;;  %v3147_v5 = vld [vmem:[%s7053_s1 + $0x40] sm:$0xff]  ;;  %v3148_v50 = vld [vmem:[%s7053_s1 + $0x48] sm:$0xff]  ;;  %v3165_v19 = vld [vmem:[%s7053_s1 + $0xd0] sm:$0xff] }
 0x18c   : > { %5173 = vmatprep.subr.bf16.mxu0 %v5172_v63  ;;  %5205 = vmatprep.subr.bf16.mxu1 %v5172_v63  ;;  %v5184_v42 = vpack.c.bf16 %v3162_v41, %v3161_v48  ;;  %v3145_v63 = vld [vmem:[%s7053_s1 + $0x30] sm:$0xff]  ;;  %v3136_v59 = vsel %vm209_vm0, %v6817_v25, %v5520_v56  ;;  %v3298_v24 = vsel %vm209_vm0, %v3765_v29, %v5521_v23  ;;  %v3150_v1 = vld [vmem:[%s7053_s1 + $0x58] sm:$0xff]  ;;  %v3167_v46 = vld [vmem:[%s7053_s1 + $0xe0] sm:$0xff]  ;;  %v5526_v58 = vunpack.i.h.bf16 %v5524_v15 }
 0x18d   : > { %3517 = vst.msk [vmem:[%s6628_s23 + $0x38] sm:$0xff] %vm337_vm1, %v660_v45  ;;  %3532 = vst.msk [vmem:[%s6628_s23 + $0x50] sm:$0xff] %vm337_vm1, %v822_v16  ;;  %v656_v33 = vadd.f32 %v3898_v18, %v6617_v37  ;;  %v818_v10 = vadd.f32 %v3939_v30, %v6617_v37  ;;  %v5188_v43 = vpack.c.bf16 %v3164_v2, %v3163_v22  ;;  %v3151_v16 = vld [vmem:[%s7053_s1 + $0x60] sm:$0xff]  ;;  %v3152_v18 = vld [vmem:[%s7053_s1 + $0x68] sm:$0xff]  ;;  %v6865_v30 = vpop.permute.xlu0 %5528 }
 0x18e   : > { %2912 = vmatmul.mubr.f32.vlgmr.msra.gmra.mrb[48].mxu0 %v2809_v35  ;;  %3074 = vmatmul.mubr.f32.vlgmr.msra.gmra.mrb[48].mxu1 %v2971_v4  ;;  %v5190_v39 = vpack.c.bf16 %v3148_v50, %v3147_v5  ;;  %v5192_v35 = vpack.c.bf16 %v3166_v11, %v3165_v19  ;;  %v3149_v4 = vld [vmem:[%s7053_s1 + $0x50] sm:$0xff]  ;;  %v5196_v45 = vpack.c.bf16 %v3168_v12, %v3167_v46  ;;  %v5531_v41 = vunpack.i.h.bf16 %v6865_v30  ;;  %v3766_v56 = vld [vmem:[%s5643_s16 + $0x1e8] sm:$0xff] }
 0x18f   : > { %5175 = vmatpush3.bf16.msra.mxu0 %v5174_v26  ;;  %5207 = vmatpush3.bf16.msra.mxu1 %v5174_v26  ;;  %v661_v6 = vmax.f32 %v656_v33, 0.0  ;;  %v823_v47 = vmax.f32 %v818_v10, 0.0  ;;  %v3146_v26 = vld [vmem:[%s7053_s1 + $0x38] sm:$0xff]  ;;  %v5194_v17 = vpack.c.bf16 %v3150_v1, %v3149_v4  ;;  %v5200_v40 = vpack.c.bf16 %v3170_v32, %v3169_v31  ;;  %v3751_v23 = vld [vmem:[%s5643_s16 + $0x1d0] sm:$0xff] }
 0x190   : > { %5177 = vmatprep.subr.bf16.mxu0 %v5176_v49  ;;  %5209 = vmatprep.subr.bf16.mxu1 %v5176_v49  ;;  %v5186_v34 = vpack.c.bf16 %v3146_v26, %v3145_v63  ;;  %v5202_v28 = vpack.c.bf16 %v3154_v27, %v3153_v7  ;;  %v3133_v26 = vsel %vm209_vm0, %v6692_v51, %v5525_v54  ;;  %v3767_v4 = vld [vmem:[%s5643_s16 + $0x1f0] sm:$0xf] }
 0x191   : > { %3518 = vst.msk [vmem:[%s6628_s23 + $0x40] sm:$0xf] %vm340_vm2, %v661_v6  ;;  %3533 = vst.msk [vmem:[%s6628_s23 + $0x58] sm:$0xf] %vm340_vm2, %v823_v47  ;;  %2916 = vmatprep.mubr.f32.mxu0 %v2813_v36  ;;  %3078 = vmatprep.mubr.f32.mxu1 %v2975_v20  ;;  %v5198_v20 = vpack.c.bf16 %v3152_v18, %v3151_v16  ;;  %v3295_v22 = vsel %vm209_vm0, %v6817_v25, %v5526_v58 }
 0x192   : > { %2917 = vmatmul.mubr.f32.gmra.mrb[50].mxu0 %v2810_v62  ;;  %3079 = vmatmul.mubr.f32.gmra.mrb[50].mxu1 %v2972_v61  ;;  %v5534_v62 = vpop.permute.xlu1 %5533  ;;  %v3299_v51 = vsel %vm209_vm0, %v3766_v56, %v5531_v41 }
 0x193   : > { %5179 = vmatpush3.bf16.msra.mxu0 %v5178_v9  ;;  %5211 = vmatpush3.bf16.msra.mxu1 %v5178_v9  ;;  %v5535_v63 = vunpack.i.l.bf16 %v5534_v62 }
 0x194   : > { %5181 = vmatprep.subr.bf16.mxu0 %v5180_v53  ;;  %5213 = vmatprep.subr.bf16.mxu1 %v5180_v53 }
 0x195   : > { %2921 = vmatprep.mubr.f32.mxu0 %v2814_v44  ;;  %3083 = vmatprep.mubr.f32.mxu1 %v2976_v13  ;;  %v5530_v44 = vunpack.i.l.bf16 %v6865_v30  ;;  %v5539_v13 = vpop.permute.xlu0 %5538  ;;  %v3134_v46 = vsel %vm209_vm0, %v6768_v60, %v5535_v63 }
 0x196   : > { %2922 = vmatmul.mubr.f32.gmra.mrb[52].mxu0 %v2811_v14  ;;  %3084 = vmatmul.mubr.f32.gmra.mrb[52].mxu1 %v2973_v52  ;;  %v5541_v50 = vunpack.i.h.bf16 %v5539_v13  ;;  %v5540_v19 = vunpack.i.l.bf16 %v5539_v13 }
 0x197   : > { %5183 = vmatpush3.bf16.msra.mxu0 %v5182_v57  ;;  %5215 = vmatpush3.bf16.msra.mxu1 %v5182_v57  ;;  %v3137_v11 = vsel %vm209_vm0, %v3751_v23, %v5530_v44 }
 0x198   : > { %5185 = vmatprep.subr.bf16.mxu0 %v5184_v42  ;;  %5217 = vmatprep.subr.bf16.mxu1 %v5184_v42  ;;  %v5536_v42 = vunpack.i.h.bf16 %v5534_v62  ;;  %v3300_v30 = vsel %vm209_vm0, %v3767_v4, %v5541_v50 }
 0x199   : > { %3235 = vmatprep.mubr.f32.mxu0 %v3136_v59  ;;  %3397 = vmatprep.mubr.f32.mxu1 %v3298_v24 }
 0x19a   : > { %v3296_v12 = vsel %vm209_vm0, %v3751_v23, %v5536_v42 }
 0x19b   : > { %5187 = vmatpush3.bf16.msra.mxu0 %v5186_v34  ;;  %5219 = vmatpush3.bf16.msra.mxu1 %v5186_v34 }
 0x19c   : > { %5189 = vmatprep.subr.bf16.mxu0 %v5188_v43  ;;  %5221 = vmatprep.subr.bf16.mxu1 %v5188_v43 }
 0x19f   : > { %5191 = vmatpush3.bf16.msra.mxu0 %v5190_v39  ;;  %5223 = vmatpush3.bf16.msra.mxu1 %v5190_v39  ;;  %v5544_v39 = vpop.permute.xlu1 %5543 }
 0x1a0   : > { %5193 = vmatprep.subr.bf16.mxu0 %v5192_v35  ;;  %5225 = vmatprep.subr.bf16.mxu1 %v5192_v35  ;;  %v3752_v35 = vld [vmem:[%s5643_s16 + $0x1d8] sm:$0xf]  ;;  %v5546_v15 = vunpack.i.h.bf16 %v5544_v39 }
 0x1a1   : > { %v3972_v49 = vpop.f32.mrb[12].mxu0  ;;  %v4013_v9 = vpop.f32.mrb[12].mxu1  ;;  %v3138_v18 = vsel %vm209_vm0, %v3752_v35, %v5540_v19 }
 0x1a2   : > { %v3973_v3 = vpop.f32.mrb[13].mxu0  ;;  %v4014_v33 = vpop.f32.mrb[13].mxu1 }
 0x1a3   : > { %v3974_v10 = vadd.f32 %v3973_v3, %v3972_v49  ;;  %v4015_v36 = vadd.f32 %v4014_v33, %v4013_v9  ;;  %5195 = vmatpush3.bf16.msra.mxu0 %v5194_v17  ;;  %5227 = vmatpush3.bf16.msra.mxu1 %v5194_v17  ;;  %v5545_v17 = vunpack.i.l.bf16 %v5544_v39  ;;  %v3746_v49 = vld [vmem:[%s5643_s16 + $0x1c0] sm:$0xf]  ;;  %v3761_v9 = vld [vmem:[%s5643_s16 + $0x1d8] sm:$0xf] }
 0x1a4   : > { %5197 = vmatprep.subr.bf16.mxu0 %v5196_v45  ;;  %5229 = vmatprep.subr.bf16.mxu1 %v5196_v45  ;;  %v3297_v31 = vsel %vm209_vm0, %v3761_v9, %v5546_v15 }
 0x1a5   : > { %v970_v61 = vadd.f32 %v3974_v10, %v6617_v37  ;;  %v1132_v6 = vadd.f32 %v4015_v36, %v6617_v37  ;;  %v3975_v47 = vpop.f32.mrb[14].mxu0  ;;  %v4016_v8 = vpop.f32.mrb[14].mxu1  ;;  %v3135_v60 = vsel %vm209_vm0, %v3746_v49, %v5545_v17 }
 0x1a6   : > { %v3976_v21 = vpop.f32.mrb[15].mxu0  ;;  %v4017_v53 = vpop.f32.mrb[15].mxu1 }
 0x1a7   : > { %v983_v38 = vmax.f32 %v970_v61, 0.0  ;;  %v1145_v55 = vmax.f32 %v1132_v6, 0.0  ;;  %5199 = vmatpush3.bf16.msra.mxu0 %v5198_v20  ;;  %5231 = vmatpush3.bf16.msra.mxu1 %v5198_v20  ;;  %v3977_v0 = vadd.f32 %v3976_v21, %v3975_v47  ;;  %v4018_v48 = vadd.f32 %v4017_v53, %v4016_v8 }
 0x1a8   : > { %5201 = vmatprep.subr.bf16.mxu0 %v5200_v40  ;;  %5233 = vmatprep.subr.bf16.mxu1 %v5200_v40 }
 0x1a9   : > { %3546 = vst.msk [vmem:[%s6628_s23 + $0x60] sm:$0xff] %vm337_vm1, %v983_v38  ;;  %3561 = vst.msk [vmem:[%s6628_s23 + $0x78] sm:$0xff] %vm337_vm1, %v1145_v55  ;;  %v975_v57 = vadd.f32 %v3977_v0, %v6617_v37  ;;  %v1137_v14 = vadd.f32 %v4018_v48, %v6617_v37  ;;  %v3978_v52 = vpop.f32.mrb[16].mxu0  ;;  %v4019_v29 = vpop.f32.mrb[16].mxu1 }
 0x1aa   : > { %v3979_v2 = vpop.f32.mrb[17].mxu0  ;;  %v4020_v59 = vpop.f32.mrb[17].mxu1 }
 0x1ab   : > { %5203 = vmatpush3.bf16.msra.mxu0 %v5202_v28  ;;  %5235 = vmatpush3.bf16.msra.mxu1 %v5202_v28  ;;  %v984_v24 = vmax.f32 %v975_v57, 0.0  ;;  %v1146_v34 = vmax.f32 %v1137_v14, 0.0  ;;  %v3980_v43 = vadd.f32 %v3979_v2, %v3978_v52  ;;  %v4021_v5 = vadd.f32 %v4020_v59, %v4019_v29 }
 0x1ad   : > { %3547 = vst.msk [vmem:[%s6628_s23 + $0x68] sm:$0xff] %vm337_vm1, %v984_v24  ;;  %3562 = vst.msk [vmem:[%s6628_s23 + $0x80] sm:$0xff] %vm337_vm1, %v1146_v34  ;;  %v980_v25 = vadd.f32 %v3980_v43, %v6617_v37  ;;  %v1142_v1 = vadd.f32 %v4021_v5, %v6617_v37 }
 0x1ae   : > { %3236 = vmatmul.mubr.f32.vlgmr.msra.gmra.mrb[54].mxu0 %v3133_v26  ;;  %3398 = vmatmul.mubr.f32.vlgmr.msra.gmra.mrb[54].mxu1 %v3295_v22 }
 0x1af   : > { %3240 = vmatprep.mubr.f32.mxu0 %v3137_v11  ;;  %3402 = vmatprep.mubr.f32.mxu1 %v3299_v51  ;;  %v985_v45 = vmax.f32 %v980_v25, 0.0  ;;  %v1147_v16 = vmax.f32 %v1142_v1, 0.0 }
 0x1b1   : > { %3548 = vst.msk [vmem:[%s6628_s23 + $0x70] sm:$0xf] %vm340_vm2, %v985_v45  ;;  %3563 = vst.msk [vmem:[%s6628_s23 + $0x88] sm:$0xf] %vm340_vm2, %v1147_v16 }
 0x1b2   : > { %3241 = vmatmul.mubr.f32.gmra.mrb[56].mxu0 %v3134_v46  ;;  %3403 = vmatmul.mubr.f32.gmra.mrb[56].mxu1 %v3296_v12 }
 0x1b3   : > { %3245 = vmatprep.mubr.f32.mxu0 %v3138_v18  ;;  %3407 = vmatprep.mubr.f32.mxu1 %v3300_v30 }
 0x1b6   : > { %3246 = vmatmul.mubr.f32.gmra.mrb[58].mxu0 %v3135_v60  ;;  %3408 = vmatmul.mubr.f32.gmra.mrb[58].mxu1 %v3297_v31 }
 0x1c1   : > { %v4054_v32 = vpop.f32.mrb[18].mxu0  ;;  %v4095_v3 = vpop.f32.mrb[18].mxu1 }
 0x1c2   : > { %v4055_v33 = vpop.f32.mrb[19].mxu0  ;;  %v4096_v10 = vpop.f32.mrb[19].mxu1 }
 0x1c3   : > { %v4056_v36 = vadd.f32 %v4055_v33, %v4054_v32  ;;  %v4097_v20 = vadd.f32 %v4096_v10, %v4095_v3 }
 0x1c5   : > { %v1294_v7 = vadd.f32 %v4056_v36, %v6617_v37  ;;  %v1456_v27 = vadd.f32 %v4097_v20, %v6617_v37  ;;  %v4057_v40 = vpop.f32.mrb[20].mxu0  ;;  %v4098_v62 = vpop.f32.mrb[20].mxu1 }
 0x1c6   : > { %v4058_v61 = vpop.f32.mrb[21].mxu0  ;;  %v4099_v6 = vpop.f32.mrb[21].mxu1 }
 0x1c7   : > { %v1307_v47 = vmax.f32 %v1294_v7, 0.0  ;;  %v1469_v8 = vmax.f32 %v1456_v27, 0.0  ;;  %v4059_v58 = vadd.f32 %v4058_v61, %v4057_v40  ;;  %v4100_v54 = vadd.f32 %v4099_v6, %v4098_v62 }
 0x1c9   : > { %3576 = vst.msk [vmem:[%s6628_s23 + $0x90] sm:$0xff] %vm337_vm1, %v1307_v47  ;;  %3591 = vst.msk [vmem:[%s6628_s23 + $0xa8] sm:$0xff] %vm337_vm1, %v1469_v8  ;;  %v1299_v28 = vadd.f32 %v4059_v58, %v6617_v37  ;;  %v1461_v21 = vadd.f32 %v4100_v54, %v6617_v37  ;;  %v4060_v53 = vpop.f32.mrb[22].mxu0  ;;  %v4101_v38 = vpop.f32.mrb[22].mxu1 }
 0x1ca   : > { %v4061_v55 = vpop.f32.mrb[23].mxu0  ;;  %v4102_v0 = vpop.f32.mrb[23].mxu1 }
 0x1cb   : > { %v1308_v48 = vmax.f32 %v1299_v28, 0.0  ;;  %v1470_v41 = vmax.f32 %v1461_v21, 0.0  ;;  %v4062_v44 = vadd.f32 %v4061_v55, %v4060_v53  ;;  %v4103_v13 = vadd.f32 %v4102_v0, %v4101_v38 }
 0x1cd   : > { %3577 = vst.msk [vmem:[%s6628_s23 + $0x98] sm:$0xff] %vm337_vm1, %v1308_v48  ;;  %3592 = vst.msk [vmem:[%s6628_s23 + $0xb0] sm:$0xff] %vm337_vm1, %v1470_v41  ;;  %v1304_v23 = vadd.f32 %v4062_v44, %v6617_v37  ;;  %v1466_v56 = vadd.f32 %v4103_v13, %v6617_v37 }
 0x1cf   : > { %v1309_v57 = vmax.f32 %v1304_v23, 0.0  ;;  %v1471_v14 = vmax.f32 %v1466_v56, 0.0 }
 0x1d1   : > { %3578 = vst.msk [vmem:[%s6628_s23 + $0xa0] sm:$0xf] %vm340_vm2, %v1309_v57  ;;  %3593 = vst.msk [vmem:[%s6628_s23 + $0xb8] sm:$0xf] %vm340_vm2, %v1471_v14 }
 0x1e1   : > { %v4136_v52 = vpop.f32.mrb[24].mxu0  ;;  %v4177_v29 = vpop.f32.mrb[24].mxu1 }
 0x1e2   : > { %v4137_v42 = vpop.f32.mrb[25].mxu0  ;;  %v4178_v63 = vpop.f32.mrb[25].mxu1 }
 0x1e3   : > { %v4138_v26 = vadd.f32 %v4137_v42, %v4136_v52  ;;  %v4179_v22 = vadd.f32 %v4178_v63, %v4177_v29 }
 0x1e5   : > { %v1618_v2 = vadd.f32 %v4138_v26, %v6617_v37  ;;  %v1780_v59 = vadd.f32 %v4179_v22, %v6617_v37  ;;  %v4139_v24 = vpop.f32.mrb[26].mxu0  ;;  %v4180_v34 = vpop.f32.mrb[26].mxu1 }
 0x1e6   : > { %v4140_v43 = vpop.f32.mrb[27].mxu0  ;;  %v4181_v5 = vpop.f32.mrb[27].mxu1 }
 0x1e7   : > { %v1631_v50 = vmax.f32 %v1618_v2, 0.0  ;;  %v1793_v19 = vmax.f32 %v1780_v59, 0.0  ;;  %v4141_v11 = vadd.f32 %v4140_v43, %v4139_v24  ;;  %v4182_v51 = vadd.f32 %v4181_v5, %v4180_v34 }
 0x1e9   : > { %3606 = vst.msk [vmem:[%s6628_s23 + $0xc0] sm:$0xff] %vm337_vm1, %v1631_v50  ;;  %3621 = vst.msk [vmem:[%s6628_s23 + $0xd8] sm:$0xff] %vm337_vm1, %v1793_v19  ;;  %v1623_v39 = vadd.f32 %v4141_v11, %v6617_v37  ;;  %v1785_v35 = vadd.f32 %v4182_v51, %v6617_v37  ;;  %v4142_v4 = vpop.f32.mrb[28].mxu0  ;;  %v4183_v25 = vpop.f32.mrb[28].mxu1 }
 0x1ea   : > { %v4143_v1 = vpop.f32.mrb[29].mxu0  ;;  %v4184_v46 = vpop.f32.mrb[29].mxu1 }
 0x1eb   : > { %v1632_v12 = vmax.f32 %v1623_v39, 0.0  ;;  %v1794_v15 = vmax.f32 %v1785_v35, 0.0  ;;  %v4144_v17 = vadd.f32 %v4143_v1, %v4142_v4  ;;  %v4185_v45 = vadd.f32 %v4184_v46, %v4183_v25 }
 0x1ed   : > { %3607 = vst.msk [vmem:[%s6628_s23 + $0xc8] sm:$0xff] %vm337_vm1, %v1632_v12  ;;  %3622 = vst.msk [vmem:[%s6628_s23 + $0xe0] sm:$0xff] %vm337_vm1, %v1794_v15  ;;  %v1628_v16 = vadd.f32 %v4144_v17, %v6617_v37  ;;  %v1790_v18 = vadd.f32 %v4185_v45, %v6617_v37 }
 0x1ef   : > { %v1633_v30 = vmax.f32 %v1628_v16, 0.0  ;;  %v1795_v49 = vmax.f32 %v1790_v18, 0.0 }
 0x1f1   : > { %3608 = vst.msk [vmem:[%s6628_s23 + $0xd0] sm:$0xf] %vm340_vm2, %v1633_v30  ;;  %3623 = vst.msk [vmem:[%s6628_s23 + $0xe8] sm:$0xf] %vm340_vm2, %v1795_v49 }
 0x201   : > { %v4218_v9 = vpop.f32.mrb[30].mxu0  ;;  %v4259_v60 = vpop.f32.mrb[30].mxu1 }
 0x202   : > { %v4219_v31 = vpop.f32.mrb[31].mxu0  ;;  %v4260_v32 = vpop.f32.mrb[31].mxu1 }
 0x203   : > { %v4220_v3 = vadd.f32 %v4219_v31, %v4218_v9  ;;  %v4261_v33 = vadd.f32 %v4260_v32, %v4259_v60  ;;  %v6993_v32 = vld [vmem:[%s7054_s2] ss:$0 sm:$0xff] }
 0x205   : > { %v1942_v10 = vadd.f32 %v4220_v3, %v6617_v37  ;;  %v2104_v36 = vadd.f32 %v4261_v33, %v6617_v37  ;;  %v4221_v20 = vpop.f32.mrb[32].mxu0  ;;  %v4262_v7 = vpop.f32.mrb[32].mxu1 }
 0x206   : > { %v4222_v27 = vpop.f32.mrb[33].mxu0  ;;  %v4263_v40 = vpop.f32.mrb[33].mxu1 }
 0x207   : > { %v1955_v62 = vmax.f32 %v1942_v10, 0.0  ;;  %v2117_v61 = vmax.f32 %v2104_v36, 0.0  ;;  %v4223_v6 = vadd.f32 %v4222_v27, %v4221_v20  ;;  %v4264_v47 = vadd.f32 %v4263_v40, %v4262_v7 }
 0x209   : > { %3636 = vst.msk [vmem:[%s6628_s23 + $0xf0] sm:$0xff] %vm337_vm1, %v1955_v62  ;;  %3651 = vst.msk [vmem:[%s6628_s23 + $0x108] sm:$0xff] %vm337_vm1, %v2117_v61  ;;  %v1947_v8 = vadd.f32 %v4223_v6, %v6617_v37  ;;  %v2109_v58 = vadd.f32 %v4264_v47, %v6617_v37  ;;  %v4224_v54 = vpop.f32.mrb[34].mxu0  ;;  %v4265_v28 = vpop.f32.mrb[34].mxu1 }
 0x20a   : > { %v4225_v21 = vpop.f32.mrb[35].mxu0  ;;  %v4266_v53 = vpop.f32.mrb[35].mxu1 }
 0x20b   : > { %v1956_v38 = vmax.f32 %v1947_v8, 0.0  ;;  %v2118_v55 = vmax.f32 %v2109_v58, 0.0  ;;  %v4226_v0 = vadd.f32 %v4225_v21, %v4224_v54  ;;  %v4267_v48 = vadd.f32 %v4266_v53, %v4265_v28 }
 0x20d   : > { %3637 = vst.msk [vmem:[%s6628_s23 + $0xf8] sm:$0xff] %vm337_vm1, %v1956_v38  ;;  %3652 = vst.msk [vmem:[%s6628_s23 + $0x110] sm:$0xff] %vm337_vm1, %v2118_v55  ;;  %v1952_v41 = vadd.f32 %v4226_v0, %v6617_v37  ;;  %v2114_v44 = vadd.f32 %v4267_v48, %v6617_v37 }
 0x20f   : > { %v1957_v13 = vmax.f32 %v1952_v41, 0.0  ;;  %v2119_v23 = vmax.f32 %v2114_v44, 0.0 }
 0x211   : > { %3638 = vst.msk [vmem:[%s6628_s23 + $0x100] sm:$0xf] %vm340_vm2, %v1957_v13  ;;  %3653 = vst.msk [vmem:[%s6628_s23 + $0x118] sm:$0xf] %vm340_vm2, %v2119_v23 }
 0x221   : > { %v4300_v56 = vpop.f32.mrb[36].mxu0  ;;  %v4341_v57 = vpop.f32.mrb[36].mxu1 }
 0x222   : > { %v4301_v14 = vpop.f32.mrb[37].mxu0  ;;  %v4342_v52 = vpop.f32.mrb[37].mxu1 }
 0x223   : > { %v4302_v29 = vadd.f32 %v4301_v14, %v4300_v56  ;;  %v4343_v42 = vadd.f32 %v4342_v52, %v4341_v57 }
 0x225   : > { %v2266_v63 = vadd.f32 %v4302_v29, %v6617_v37  ;;  %v2428_v26 = vadd.f32 %v4343_v42, %v6617_v37  ;;  %v4303_v22 = vpop.f32.mrb[38].mxu0  ;;  %v4344_v2 = vpop.f32.mrb[38].mxu1 }
 0x226   : > { %v4304_v59 = vpop.f32.mrb[39].mxu0  ;;  %v4345_v24 = vpop.f32.mrb[39].mxu1 }
 0x227   : > { %v2279_v34 = vmax.f32 %v2266_v63, 0.0  ;;  %v2441_v43 = vmax.f32 %v2428_v26, 0.0  ;;  %v4305_v5 = vadd.f32 %v4304_v59, %v4303_v22  ;;  %v4346_v50 = vadd.f32 %v4345_v24, %v4344_v2 }
 0x229   : > { %3666 = vst.msk [vmem:[%s6628_s23 + $0x120] sm:$0xff] %vm337_vm1, %v2279_v34  ;;  %3681 = vst.msk [vmem:[%s6628_s23 + $0x138] sm:$0xff] %vm337_vm1, %v2441_v43  ;;  %v2271_v19 = vadd.f32 %v4305_v5, %v6617_v37  ;;  %v2433_v11 = vadd.f32 %v4346_v50, %v6617_v37  ;;  %v4306_v51 = vpop.f32.mrb[40].mxu0  ;;  %v4347_v39 = vpop.f32.mrb[40].mxu1 }
 0x22a   : > { %v4307_v35 = vpop.f32.mrb[41].mxu0  ;;  %v4348_v4 = vpop.f32.mrb[41].mxu1 }
 0x22b   : > { %v2280_v25 = vmax.f32 %v2271_v19, 0.0  ;;  %v2442_v1 = vmax.f32 %v2433_v11, 0.0  ;;  %v4308_v46 = vadd.f32 %v4307_v35, %v4306_v51  ;;  %v4349_v12 = vadd.f32 %v4348_v4, %v4347_v39 }
 0x22d   : > { %3667 = vst.msk [vmem:[%s6628_s23 + $0x128] sm:$0xff] %vm337_vm1, %v2280_v25  ;;  %3682 = vst.msk [vmem:[%s6628_s23 + $0x140] sm:$0xff] %vm337_vm1, %v2442_v1  ;;  %v2276_v15 = vadd.f32 %v4308_v46, %v6617_v37  ;;  %v2438_v17 = vadd.f32 %v4349_v12, %v6617_v37 }
 0x22f   : > { %v2281_v45 = vmax.f32 %v2276_v15, 0.0  ;;  %v2443_v16 = vmax.f32 %v2438_v17, 0.0 }
 0x231   : > { %3668 = vst.msk [vmem:[%s6628_s23 + $0x130] sm:$0xf] %vm340_vm2, %v2281_v45  ;;  %3683 = vst.msk [vmem:[%s6628_s23 + $0x148] sm:$0xf] %vm340_vm2, %v2443_v16 }
 0x241   : > { %v4382_v18 = vpop.f32.mrb[42].mxu0  ;;  %v4423_v30 = vpop.f32.mrb[42].mxu1 }
 0x242   : > { %v4383_v49 = vpop.f32.mrb[43].mxu0  ;;  %v4424_v9 = vpop.f32.mrb[43].mxu1 }
 0x243   : > { %v4384_v60 = vadd.f32 %v4383_v49, %v4382_v18  ;;  %v4425_v31 = vadd.f32 %v4424_v9, %v4423_v30 }
 0x245   : > { %v2590_v37 = vadd.f32 %v6993_v32, %v4384_v60  ;;  %v2752_v3 = vadd.f32 %v6993_v32, %v4425_v31  ;;  %v4385_v33 = vpop.f32.mrb[44].mxu0  ;;  %v4426_v10 = vpop.f32.mrb[44].mxu1 }
 0x246   : > { %v4386_v36 = vpop.f32.mrb[45].mxu0  ;;  %v4427_v20 = vpop.f32.mrb[45].mxu1 }
 0x247   : > { %v2603_v7 = vmax.f32 %v2590_v37, 0.0  ;;  %v2765_v27 = vmax.f32 %v2752_v3, 0.0  ;;  %v4387_v40 = vadd.f32 %v4386_v36, %v4385_v33  ;;  %v4428_v62 = vadd.f32 %v4427_v20, %v4426_v10 }
 0x249   : > { %3696 = vst.msk [vmem:[%s6628_s23 + $0x150] sm:$0xff] %vm337_vm1, %v2603_v7  ;;  %3711 = vst.msk [vmem:[%s6628_s23 + $0x168] sm:$0xff] %vm337_vm1, %v2765_v27  ;;  %v2595_v61 = vadd.f32 %v6993_v32, %v4387_v40  ;;  %v2757_v6 = vadd.f32 %v6993_v32, %v4428_v62  ;;  %v4388_v47 = vpop.f32.mrb[46].mxu0  ;;  %v4429_v8 = vpop.f32.mrb[46].mxu1 }
 0x24a   : > { %v4389_v58 = vpop.f32.mrb[47].mxu0  ;;  %v4430_v54 = vpop.f32.mrb[47].mxu1 }
 0x24b   : > { %v2604_v28 = vmax.f32 %v2595_v61, 0.0  ;;  %v2766_v21 = vmax.f32 %v2757_v6, 0.0  ;;  %v4390_v53 = vadd.f32 %v4389_v58, %v4388_v47  ;;  %v4431_v38 = vadd.f32 %v4430_v54, %v4429_v8 }
 0x24d   : > { %3697 = vst.msk [vmem:[%s6628_s23 + $0x158] sm:$0xff] %vm337_vm1, %v2604_v28  ;;  %3712 = vst.msk [vmem:[%s6628_s23 + $0x170] sm:$0xff] %vm337_vm1, %v2766_v21  ;;  %v2600_v55 = vadd.f32 %v6993_v32, %v4390_v53  ;;  %v2762_v0 = vadd.f32 %v6993_v32, %v4431_v38 }
 0x24f   : > { %v2605_v48 = vmax.f32 %v2600_v55, 0.0  ;;  %v2767_v41 = vmax.f32 %v2762_v0, 0.0 }
 0x251   : > { %3698 = vst.msk [vmem:[%s6628_s23 + $0x160] sm:$0xf] %vm340_vm2, %v2605_v48  ;;  %3713 = vst.msk [vmem:[%s6628_s23 + $0x178] sm:$0xf] %vm340_vm2, %v2767_v41 }
 0x261   : > { %v4464_v44 = vpop.f32.mrb[48].mxu0  ;;  %v4505_v13 = vpop.f32.mrb[48].mxu1 }
 0x262   : > { %v4465_v23 = vpop.f32.mrb[49].mxu0  ;;  %v4506_v56 = vpop.f32.mrb[49].mxu1 }
 0x263   : > { %v4466_v57 = vadd.f32 %v4465_v23, %v4464_v44  ;;  %v4507_v14 = vadd.f32 %v4506_v56, %v4505_v13 }
 0x265   : > { %v2914_v52 = vadd.f32 %v6993_v32, %v4466_v57  ;;  %v3076_v29 = vadd.f32 %v6993_v32, %v4507_v14  ;;  %v4467_v42 = vpop.f32.mrb[50].mxu0  ;;  %v4508_v63 = vpop.f32.mrb[50].mxu1 }
 0x266   : > { %v4468_v26 = vpop.f32.mrb[51].mxu0  ;;  %v4509_v22 = vpop.f32.mrb[51].mxu1 }
 0x267   : > { %v2927_v2 = vmax.f32 %v2914_v52, 0.0  ;;  %v3089_v59 = vmax.f32 %v3076_v29, 0.0  ;;  %v4469_v24 = vadd.f32 %v4468_v26, %v4467_v42  ;;  %v4510_v34 = vadd.f32 %v4509_v22, %v4508_v63 }
 0x269   : > { %3726 = vst.msk [vmem:[%s6628_s23 + $0x180] sm:$0xff] %vm337_vm1, %v2927_v2  ;;  %3741 = vst.msk [vmem:[%s6628_s23 + $0x198] sm:$0xff] %vm337_vm1, %v3089_v59  ;;  %v2919_v43 = vadd.f32 %v6993_v32, %v4469_v24  ;;  %v3081_v5 = vadd.f32 %v6993_v32, %v4510_v34  ;;  %v4470_v50 = vpop.f32.mrb[52].mxu0  ;;  %v4511_v19 = vpop.f32.mrb[52].mxu1 }
 0x26a   : > { %v4471_v11 = vpop.f32.mrb[53].mxu0  ;;  %v4512_v51 = vpop.f32.mrb[53].mxu1 }
 0x26b   : > { %v2928_v39 = vmax.f32 %v2919_v43, 0.0  ;;  %v3090_v35 = vmax.f32 %v3081_v5, 0.0  ;;  %v4472_v4 = vadd.f32 %v4471_v11, %v4470_v50  ;;  %v4513_v25 = vadd.f32 %v4512_v51, %v4511_v19 }
 0x26d   : > { %3727 = vst.msk [vmem:[%s6628_s23 + $0x188] sm:$0xff] %vm337_vm1, %v2928_v39  ;;  %3742 = vst.msk [vmem:[%s6628_s23 + $0x1a0] sm:$0xff] %vm337_vm1, %v3090_v35  ;;  %v2924_v1 = vadd.f32 %v6993_v32, %v4472_v4  ;;  %v3086_v46 = vadd.f32 %v6993_v32, %v4513_v25 }
 0x26f   : > { %v2929_v12 = vmax.f32 %v2924_v1, 0.0  ;;  %v3091_v15 = vmax.f32 %v3086_v46, 0.0 }
 0x271   : > { %3728 = vst.msk [vmem:[%s6628_s23 + $0x190] sm:$0xf] %vm340_vm2, %v2929_v12  ;;  %3743 = vst.msk [vmem:[%s6628_s23 + $0x1a8] sm:$0xf] %vm340_vm2, %v3091_v15 }
 0x281   : > { %v4546_v17 = vpop.f32.mrb[54].mxu0  ;;  %v4587_v45 = vpop.f32.mrb[54].mxu1 }
 0x282   : > { %v4547_v16 = vpop.f32.mrb[55].mxu0  ;;  %v4588_v18 = vpop.f32.mrb[55].mxu1 }
 0x283   : > { %v4548_v30 = vadd.f32 %v4547_v16, %v4546_v17  ;;  %v4589_v49 = vadd.f32 %v4588_v18, %v4587_v45 }
 0x285   : > { %v3238_v9 = vadd.f32 %v6993_v32, %v4548_v30  ;;  %v3400_v60 = vadd.f32 %v6993_v32, %v4589_v49  ;;  %v4549_v31 = vpop.f32.mrb[56].mxu0  ;;  %v4590_v37 = vpop.f32.mrb[56].mxu1 }
 0x286   : > { %v4550_v3 = vpop.f32.mrb[57].mxu0  ;;  %v4591_v33 = vpop.f32.mrb[57].mxu1 }
 0x287   : > { %v3251_v10 = vmax.f32 %v3238_v9, 0.0  ;;  %v3413_v36 = vmax.f32 %v3400_v60, 0.0  ;;  %v4551_v20 = vadd.f32 %v4550_v3, %v4549_v31  ;;  %v4592_v7 = vadd.f32 %v4591_v33, %v4590_v37 }
 0x289   : > { %3756 = vst.msk [vmem:[%s6628_s23 + $0x1b0] sm:$0xff] %vm337_vm1, %v3251_v10  ;;  %3771 = vst.msk [vmem:[%s6628_s23 + $0x1c8] sm:$0xff] %vm337_vm1, %v3413_v36  ;;  %v3243_v27 = vadd.f32 %v6993_v32, %v4551_v20  ;;  %v3405_v40 = vadd.f32 %v6993_v32, %v4592_v7  ;;  %v4552_v62 = vpop.f32.mrb[58].mxu0  ;;  %v4593_v61 = vpop.f32.mrb[58].mxu1 }
 0x28a   : > { %v4553_v6 = vpop.f32.mrb[59].mxu0  ;;  %v4594_v47 = vpop.f32.mrb[59].mxu1 }
 0x28b   : > { %v3252_v8 = vmax.f32 %v3243_v27, 0.0  ;;  %v3414_v58 = vmax.f32 %v3405_v40, 0.0  ;;  %v4554_v54 = vadd.f32 %v4553_v6, %v4552_v62  ;;  %v4595_v28 = vadd.f32 %v4594_v47, %v4593_v61 }
 0x28d   : > { %3757 = vst.msk [vmem:[%s6628_s23 + $0x1b8] sm:$0xff] %vm337_vm1, %v3252_v8  ;;  %3772 = vst.msk [vmem:[%s6628_s23 + $0x1d0] sm:$0xff] %vm337_vm1, %v3414_v58  ;;  %v3248_v21 = vadd.f32 %v6993_v32, %v4554_v54  ;;  %v3410_v53 = vadd.f32 %v6993_v32, %v4595_v28 }
 0x28f   : > { %v3253_v38 = vmax.f32 %v3248_v21, 0.0  ;;  %v3415_v55 = vmax.f32 %v3410_v53, 0.0 }
 0x291   : > { %3758 = vst.msk [vmem:[%s6628_s23 + $0x1c0] sm:$0xf] %vm340_vm2, %v3253_v38  ;;  %3773 = vst.msk [vmem:[%s6628_s23 + $0x1d8] sm:$0xf] %vm340_vm2, %v3415_v55 }
 0x292 PF: > { %s13_s12 = sadd.s32 1, %s5554_s12  }
 0x293   : > { %p10_p4 = scmp.ge.s32.totalorder %s13_s12, 4  }
 0x295   :  { %12 = sbr.rel (!%p10_p4) target bundleno = 1 (0x1), region = 101 }

// kernel: quantile_cnn_forward.5
= control target key start
LH: loop header
LB: loop body
LE: loop exit
PB: predicated region body
PF: predicated region fallthrough
CT: control target
= control target key end

     0   :  { %s3678_s12 = smov 0   ;;  %s4816_s0 = inlined_call_operand.vmem [shape: f32[2,10,10,128], index: 0, kind: input, shape index: {}]   ;;  %s4817_s1 = inlined_call_operand.vmem [shape: f32[512,64], index: 1, kind: input, shape index: {}]   ;;  %s4818_s2 = inlined_call_operand.vmem [shape: f32[1,64], index: 2, kind: input, shape index: {}]   ;;  %s4819_s3 = inlined_call_operand.vmem [shape: f32[2,9,9,64], index: 3, kind: output, shape index: {}]  }
   0x1 LB: > { %s2286_s13 = sadd.s32 4294967295, %s3656_s12   ;;  %p2290_p0 = scmp.ge.s32.totalorder %s3656_s12, 1  ;;  %s3656_s12 = sphi %s3678_s12, %s13_s12  }
   0x2   : > { %p137_p1 = scmp.lt.s32.totalorder %s3656_s12, 3 }
   0x4   : > { %p138_p2 = pnand %p2290_p0, %p137_p1 }
   0x5   : > { %v197_v0 = vld [vmem:[%s4817_s1 + $0x80] sm:$0xff] (!%p138_p2)  ;;  %v198_v1 = vld [vmem:[%s4817_s1 + $0x88] sm:$0xff] (!%p138_p2)  ;;  %v199_v11 = vld [vmem:[%s4817_s1 + $0x90] sm:$0xff] (!%p138_p2)  ;;  %p3774_p3 = scmp.lt.s32.totalorder (!%p138_p2), %s2286_s13, 1  ;;  %vm403_vm0 = vcmask (!%p138_p2), 523264   ;;  %vm405_vm1 = vcmask (!%p138_p2), 516096  }
   0x6   : > { %141 = sbr.rel (%p138_p2) target bundleno = 522 (0x20a), region = 32  ;;  %v181_v2 = vld [vmem:[%s4817_s1] sm:$0xff] (!%p138_p2)  ;;  %v3695_v3 = vpack.c.bf16 (!%p138_p2), %v198_v1, %v197_v0  ;;  %v182_v4 = vld [vmem:[%s4817_s1 + $0x8] sm:$0xff] (!%p138_p2)  ;;  %v200_v13 = vld [vmem:[%s4817_s1 + $0x98] sm:$0xff] (!%p138_p2) }
   0x7   : > { %v229_v5 = vld [vmem:[%s4817_s1 + $0x180] sm:$0xff] (!%p138_p2)  ;;  %v230_v6 = vld [vmem:[%s4817_s1 + $0x188] sm:$0xff] (!%p138_p2)  ;;  %v3706_v7 = vpack.c.bf16 (!%p138_p2), %v182_v4, %v181_v2  ;;  %v183_v14 = vld [vmem:[%s4817_s1 + $0x10] sm:$0xff] (!%p138_p2)  ;;  %v3733_v16 = vpack.c.bf16 (!%p138_p2), %v200_v13, %v199_v11 }
   0x8   : > { %v3708_v8 = vpack.c.bf16 (!%p138_p2), %v230_v6, %v229_v5  ;;  %v213_v9 = vld [vmem:[%s4817_s1 + $0x100] sm:$0xff] (!%p138_p2)  ;;  %v214_v10 = vld [vmem:[%s4817_s1 + $0x108] sm:$0xff] (!%p138_p2)  ;;  %3065 = vmatprep.subr.bf16.mxu0 (!%p138_p2), %v3695_v3  ;;  %v184_v15 = vld [vmem:[%s4817_s1 + $0x18] sm:$0xff] (!%p138_p2) }
   0x9   : > { %v3720_v12 = vpack.c.bf16 (!%p138_p2), %v214_v10, %v213_v9  ;;  %3067 = vmatpush3.bf16.msra.mxu0 (!%p138_p2), %v3706_v7  ;;  %v3735_v17 = vpack.c.bf16 (!%p138_p2), %v184_v15, %v183_v14  ;;  %v231_v18 = vld [vmem:[%s4817_s1 + $0x190] sm:$0xff] (!%p138_p2)  ;;  %v232_v19 = vld [vmem:[%s4817_s1 + $0x198] sm:$0xff] (!%p138_p2)  ;;  %v201_v23 = vld [vmem:[%s4817_s1 + $0xa0] sm:$0xff] (!%p138_p2) }
   0xa   : > { %3097 = vmatprep.subr.bf16.mxu1 (!%p138_p2), %v3708_v8  ;;  %v215_v20 = vld [vmem:[%s4817_s1 + $0x110] sm:$0xff] (!%p138_p2)  ;;  %v3747_v21 = vpack.c.bf16 (!%p138_p2), %v232_v19, %v231_v18  ;;  %v216_v22 = vld [vmem:[%s4817_s1 + $0x118] sm:$0xff] (!%p138_p2)  ;;  %v202_v24 = vld [vmem:[%s4817_s1 + $0xa8] sm:$0xff] (!%p138_p2)  ;;  %3069 = vmatprep.subr.bf16.mxu0 (!%p138_p2), %v3733_v16 }
   0xb   : > { %3099 = vmatpush3.bf16.msra.mxu1 (!%p138_p2), %v3720_v12  ;;  %v3759_v25 = vpack.c.bf16 (!%p138_p2), %v216_v22, %v215_v20  ;;  %v3761_v26 = vpack.c.bf16 (!%p138_p2), %v202_v24, %v201_v23  ;;  %v185_v27 = vld [vmem:[%s4817_s1 + $0x20] sm:$0xff] (!%p138_p2)  ;;  %v186_v28 = vld [vmem:[%s4817_s1 + $0x28] sm:$0xff] (!%p138_p2)  ;;  %v203_v35 = vld [vmem:[%s4817_s1 + $0xb0] sm:$0xff] (!%p138_p2) }
   0xc   : > { %v233_v29 = vld [vmem:[%s4817_s1 + $0x1a0] sm:$0xff] (!%p138_p2)  ;;  %3101 = vmatprep.subr.bf16.mxu1 (!%p138_p2), %v3747_v21  ;;  %v234_v30 = vld [vmem:[%s4817_s1 + $0x1a8] sm:$0xff] (!%p138_p2)  ;;  %v3789_v33 = vpack.c.bf16 (!%p138_p2), %v186_v28, %v185_v27  ;;  %v204_v36 = vld [vmem:[%s4817_s1 + $0xb8] sm:$0xff] (!%p138_p2) }
   0xd   : > { %v217_v31 = vld [vmem:[%s4817_s1 + $0x120] sm:$0xff]  ;;  %v218_v32 = vld [vmem:[%s4817_s1 + $0x128] sm:$0xff]  ;;  %3071 = vmatpush3.bf16.msra.mxu0 %v3735_v17  ;;  %v3791_v34 = vpack.c.bf16 %v234_v30, %v233_v29  ;;  %v187_v37 = vld [vmem:[%s4817_s1 + $0x30] sm:$0xff]  ;;  %v3806_v39 = vpack.c.bf16 %v204_v36, %v203_v35  ;;  %s4822_s13 = smov (!%p3774_p3, %s2286_s13), 1 }
   0xe   : > { %3073 = vmatprep.subr.bf16.mxu0 %v3761_v26  ;;  %v3804_v38 = vpack.c.bf16 %v218_v32, %v217_v31  ;;  %v188_v40 = vld [vmem:[%s4817_s1 + $0x38] sm:$0xff]  ;;  %v235_v41 = vld [vmem:[%s4817_s1 + $0x1b0] sm:$0xff]  ;;  %v205_v46 = vld [vmem:[%s4817_s1 + $0xc0] sm:$0xff]  ;;  %s3640_s24 = smul.u32 160, %s4822_s13 }
   0xf   : > { %3103 = vmatpush3.bf16.msra.mxu1 %v3759_v25  ;;  %v236_v42 = vld [vmem:[%s4817_s1 + $0x1b8] sm:$0xff]  ;;  %v219_v44 = vld [vmem:[%s4817_s1 + $0x130] sm:$0xff]  ;;  %v206_v47 = vld [vmem:[%s4817_s1 + $0xc8] sm:$0xff]  ;;  %v3839_v48 = vpack.c.bf16 %v188_v40, %v187_v37  ;;  %s3641_s7 = smul.u32 144, %s4822_s13 }
  0x10   : > { %3105 = vmatprep.subr.bf16.mxu1 %v3791_v34  ;;  %v3818_v43 = vpack.c.bf16 %v236_v42, %v235_v41  ;;  %v220_v45 = vld [vmem:[%s4817_s1 + $0x138] sm:$0xff]  ;;  %v237_v49 = vld [vmem:[%s4817_s1 + $0x1c0] sm:$0xff]  ;;  %v238_v50 = vld [vmem:[%s4817_s1 + $0x1c8] sm:$0xff]  ;;  %v3851_v52 = vpack.c.bf16 %v206_v47, %v205_v46  ;;  %s3914_s18 = scalar_lea.vmem %s4816_s0, %s3640_s24 }
  0x11   : > { %3075 = vmatpush3.bf16.msra.mxu0 %v3789_v33  ;;  %v3849_v51 = vpack.c.bf16 %v220_v45, %v219_v44  ;;  %v189_v53 = vld [vmem:[%s4817_s1 + $0x40] sm:$0xff]  ;;  %v190_v54 = vld [vmem:[%s4817_s1 + $0x48] sm:$0xff]  ;;  %v3863_v56 = vpack.c.bf16 %v238_v50, %v237_v49  ;;  %v207_v58 = vld [vmem:[%s4817_s1 + $0xd0] sm:$0xff]  ;;  %s4556_s19 = scalar_lea.vmem %s4819_s3, %s3641_s7 }
  0x12   : > { %3077 = vmatprep.subr.bf16.mxu0 %v3806_v39  ;;  %v221_v55 = vld [vmem:[%s4817_s1 + $0x140] sm:$0xff]  ;;  %v222_v57 = vld [vmem:[%s4817_s1 + $0x148] sm:$0xff]  ;;  %v208_v59 = vld [vmem:[%s4817_s1 + $0xd8] sm:$0xff]  ;;  %v3882_v62 = vpack.c.bf16 %v190_v54, %v189_v53 }
  0x13   : > { %3107 = vmatpush3.bf16.msra.mxu1 %v3804_v38  ;;  %v239_v60 = vld [vmem:[%s4817_s1 + $0x1d0] sm:$0xff]  ;;  %v240_v61 = vld [vmem:[%s4817_s1 + $0x1d8] sm:$0xff]  ;;  %v3886_v63 = vpack.c.bf16 %v222_v57, %v221_v55  ;;  %v3888_v0 = vpack.c.bf16 %v208_v59, %v207_v58  ;;  %v209_v9 = vld [vmem:[%s4817_s1 + $0xe0] sm:$0xff] }
  0x14   : > { %3109 = vmatprep.subr.bf16.mxu1 %v3818_v43  ;;  %v191_v1 = vld [vmem:[%s4817_s1 + $0x50] sm:$0xff]  ;;  %v192_v2 = vld [vmem:[%s4817_s1 + $0x58] sm:$0xff]  ;;  %v3900_v5 = vpack.c.bf16 %v240_v61, %v239_v60  ;;  %v210_v10 = vld [vmem:[%s4817_s1 + $0xe8] sm:$0xff] }
  0x15   : > { %3079 = vmatpush3.bf16.msra.mxu0 %v3839_v48  ;;  %v223_v4 = vld [vmem:[%s4817_s1 + $0x150] sm:$0xff]  ;;  %v224_v6 = vld [vmem:[%s4817_s1 + $0x158] sm:$0xff]  ;;  %v241_v11 = vld [vmem:[%s4817_s1 + $0x1e0] sm:$0xff]  ;;  %v3923_v14 = vpack.c.bf16 %v192_v2, %v191_v1  ;;  %v3935_v20 = vpack.c.bf16 %v210_v10, %v209_v9 }
  0x16   : > { %3081 = vmatprep.subr.bf16.mxu0 %v3851_v52  ;;  %v242_v13 = vld [vmem:[%s4817_s1 + $0x1e8] sm:$0xff]  ;;  %v193_v15 = vld [vmem:[%s4817_s1 + $0x60] sm:$0xff]  ;;  %v3933_v19 = vpack.c.bf16 %v224_v6, %v223_v4  ;;  %v211_v28 = vld [vmem:[%s4817_s1 + $0xf0] sm:$0xff] }
  0x17   : > { %3111 = vmatpush3.bf16.msra.mxu1 %v3849_v51  ;;  %v194_v18 = vld [vmem:[%s4817_s1 + $0x68] sm:$0xff]  ;;  %v225_v22 = vld [vmem:[%s4817_s1 + $0x160] sm:$0xff]  ;;  %v3945_v27 = vpack.c.bf16 %v242_v13, %v241_v11  ;;  %v212_v29 = vld [vmem:[%s4817_s1 + $0xf8] sm:$0xff] }
  0x18   : > { %3113 = vmatprep.subr.bf16.mxu1 %v3863_v56  ;;  %v226_v23 = vld [vmem:[%s4817_s1 + $0x168] sm:$0xff]  ;;  %v2295_v30 = vld [vmem:[%s3914_s18 + $0x11] sm:$0xff]  ;;  %v3961_v35 = vpack.c.bf16 %v194_v18, %v193_v15  ;;  %v3967_v37 = vpack.c.bf16 %v212_v29, %v211_v28  ;;  %v172_v49 = vld [vmem:[%s3914_s18] sm:$0xff] }
  0x19   : > { %3083 = vmatpush3.bf16.msra.mxu0 %v3882_v62  ;;  %v174_v24 = vld [vmem:[%s3914_s18 + $0x1] sm:$0xff]  ;;  %v243_v31 = vld [vmem:[%s4817_s1 + $0x1f0] sm:$0xff]  ;;  %v244_v32 = vld [vmem:[%s4817_s1 + $0x1f8] sm:$0xff]  ;;  %390 = vmatprep.mubr.f32.mxu1 %v2295_v30  ;;  %v3965_v36 = vpack.c.bf16 %v226_v23, %v225_v22 }
  0x1a   : > { %3085 = vmatprep.subr.bf16.mxu0 %v3888_v0  ;;  %315 = vmatprep.mubr.f32.mxu0 %v174_v24  ;;  %v195_v40 = vld [vmem:[%s4817_s1 + $0x70] sm:$0xff]  ;;  %v196_v41 = vld [vmem:[%s4817_s1 + $0x78] sm:$0xff]  ;;  %v3976_v42 = vpack.c.bf16 %v244_v32, %v243_v31  ;;  %v175_v53 = vld [vmem:[%s3914_s18 + $0x9] sm:$0x1] }
  0x1b   : > { %3115 = vmatpush3.bf16.msra.mxu1 %v3886_v63  ;;  %v227_v44 = vld [vmem:[%s4817_s1 + $0x170] sm:$0xff]  ;;  %v228_v45 = vld [vmem:[%s4817_s1 + $0x178] sm:$0xff]  ;;  %v3985_v46 = vpack.c.bf16 %v196_v41, %v195_v40  ;;  %v173_v54 = vld [vmem:[%s3914_s18 + $0x8] sm:$0x1] }
  0x1c   : > { %3117 = vmatprep.subr.bf16.mxu1 %v3900_v5  ;;  %v3989_v47 = vpack.c.bf16 %v228_v45, %v227_v44  ;;  %v2293_v50 = vld [vmem:[%s3914_s18 + $0x10] sm:$0xff]  ;;  %v2296_v55 = vld [vmem:[%s3914_s18 + $0x19] sm:$0x1]  ;;  %v2294_v57 = vld [vmem:[%s3914_s18 + $0x18] sm:$0x1] }
  0x1d   : > { %3087 = vmatpush3.bf16.msra.mxu0 %v3923_v14  ;;  %v2304_v58 = vld [vmem:[%s3914_s18 + $0x21] sm:$0xff]  ;;  %v2301_v60 = vld [vmem:[%s3914_s18 + $0x19] sm:$0x1]  ;;  %v2299_v61 = vld [vmem:[%s3914_s18 + $0x18] sm:$0x1] }
  0x1e   : > { %3089 = vmatprep.subr.bf16.mxu0 %v3935_v20  ;;  %v2302_v59 = vld [vmem:[%s3914_s18 + $0x20] sm:$0xff]  ;;  %v2305_v1 = vld [vmem:[%s3914_s18 + $0x29] sm:$0x1]  ;;  %v2303_v2 = vld [vmem:[%s3914_s18 + $0x28] sm:$0x1] }
  0x1f   : > { %3119 = vmatpush3.bf16.msra.mxu1 %v3933_v19  ;;  %v2314_v4 = vld [vmem:[%s3914_s18 + $0x31] sm:$0xff]  ;;  %v2311_v9 = vld [vmem:[%s3914_s18 + $0x29] sm:$0x1]  ;;  %v2309_v10 = vld [vmem:[%s3914_s18 + $0x28] sm:$0x1] }
  0x20   : > { %3121 = vmatprep.subr.bf16.mxu1 %v3945_v27  ;;  %v4073_v6 = vld [vmem:[%s3914_s18 + $0x30] sm:$0xff]  ;;  %v2315_v11 = vld [vmem:[%s3914_s18 + $0x39] sm:$0x1]  ;;  %v2313_v13 = vld [vmem:[%s3914_s18 + $0x38] sm:$0x1] }
  0x21   : > { %3091 = vmatpush3.bf16.msra.mxu0 %v3961_v35  ;;  %v1135_v15 = vld [vmem:[%s4817_s1 + $0x118] sm:$0xff]  ;;  %v1120_v18 = vld [vmem:[%s4817_s1 + $0xa0] sm:$0xff]  ;;  %v1153_v22 = vld [vmem:[%s4817_s1 + $0x1a8] sm:$0xff] }
  0x22   : > { %3093 = vmatprep.subr.bf16.mxu0 %v3967_v37  ;;  %v2321_v23 = vld [vmem:[%s3914_s18 + $0x39] sm:$0x1]  ;;  %v2319_v28 = vld [vmem:[%s3914_s18 + $0x38] sm:$0x1]  ;;  %v2325_v29 = vld [vmem:[%s3914_s18 + $0x49] sm:$0x1] }
  0x23   : > { %3123 = vmatpush3.bf16.msra.mxu1 %v3965_v36  ;;  %v1105_v32 = vld [vmem:[%s4817_s1 + $0x28] sm:$0xff]  ;;  %v1122_v41 = vld [vmem:[%s4817_s1 + $0xb0] sm:$0xff]  ;;  %v1155_v45 = vld [vmem:[%s4817_s1 + $0x1b8] sm:$0xff] }
  0x24   : > { %3125 = vmatprep.subr.bf16.mxu1 %v3976_v42  ;;  %v1137_v40 = vld [vmem:[%s4817_s1 + $0x128] sm:$0xff]  ;;  %v1154_v44 = vld [vmem:[%s4817_s1 + $0x1b0] sm:$0xff] }
  0x25   : > { %3095 = vmatpush3.bf16.msra.mxu0 %v3985_v46 }
  0x26   : > { %3129 = vmatprep.subr.bf16.mxu0 %v3695_v3 }
  0x27   : > { %3127 = vmatpush3.bf16.msra.mxu1 %v3989_v47 }
  0x28   : > { %3161 = vmatprep.subr.bf16.mxu1 %v3708_v8  ;;  %316 = vmatmul.mubr.f32.vlgmr.msra.gmra.mrb[0].mxu0 %v172_v49 }
  0x29   : > { %3131 = vmatpush3.bf16.msra.mxu0 %v3706_v7  ;;  %320 = vmatprep.mubr.f32.mxu0 %v175_v53  ;;  %v1106_v53 = vld [vmem:[%s4817_s1 + $0x30] sm:$0xff] }
  0x2a   : > { %391 = vmatmul.mubr.f32.vlgmr.msra.gmra.mrb[0].mxu1 %v2293_v50  ;;  %3133 = vmatprep.subr.bf16.mxu0 %v3733_v16 }
  0x2b   : > { %3163 = vmatpush3.bf16.msra.mxu1 %v3720_v12  ;;  %395 = vmatprep.mubr.f32.mxu1 %v2296_v55  ;;  %v1138_v55 = vld [vmem:[%s4817_s1 + $0x130] sm:$0xff] }
  0x2c   : > { %3165 = vmatprep.subr.bf16.mxu1 %v3747_v21  ;;  %321 = vmatmul.mubr.f32.gmra.mrb[2].mxu0 %v173_v54  ;;  %v1107_v54 = vld [vmem:[%s4817_s1 + $0x38] sm:$0xff] }
  0x2d   : > { %3135 = vmatpush3.bf16.msra.mxu0 %v3735_v17  ;;  %544 = vmatprep.mubr.f32.mxu0 %v2295_v30 }
  0x2e   : > { %396 = vmatmul.mubr.f32.gmra.mrb[2].mxu1 %v2294_v57  ;;  %3137 = vmatprep.subr.bf16.mxu0 %v3761_v26  ;;  %v4256_v57 = vpack.c.bf16 %v1155_v45, %v1154_v44  ;;  %v1114_v45 = vld [vmem:[%s4817_s1 + $0x70] sm:$0xff] }
  0x2f   : > { %3167 = vmatpush3.bf16.msra.mxu1 %v3759_v25  ;;  %619 = vmatprep.mubr.f32.mxu1 %v2304_v58 }
  0x30   : > { %3169 = vmatprep.subr.bf16.mxu1 %v3791_v34 }
  0x31   : > { %3139 = vmatpush3.bf16.msra.mxu0 %v3789_v33 }
  0x32   : > { %3141 = vmatprep.subr.bf16.mxu0 %v3806_v39 }
  0x33   : > { %3171 = vmatpush3.bf16.msra.mxu1 %v3804_v38 }
  0x34   : > { %3173 = vmatprep.subr.bf16.mxu1 %v3818_v43 }
  0x35   : > { %3143 = vmatpush3.bf16.msra.mxu0 %v3839_v48 }
  0x36   : > { %3145 = vmatprep.subr.bf16.mxu0 %v3851_v52 }
  0x37   : > { %3175 = vmatpush3.bf16.msra.mxu1 %v3849_v51 }
  0x38   : > { %3177 = vmatprep.subr.bf16.mxu1 %v3863_v56 }
  0x39   : > { %3147 = vmatpush3.bf16.msra.mxu0 %v3882_v62 }
  0x3a   : > { %3149 = vmatprep.subr.bf16.mxu0 %v3888_v0 }
  0x3b   : > { %3179 = vmatpush3.bf16.msra.mxu1 %v3886_v63 }
  0x3c   : > { %3181 = vmatprep.subr.bf16.mxu1 %v3900_v5 }
  0x3d   : > { %3151 = vmatpush3.bf16.msra.mxu0 %v3923_v14 }
  0x3e   : > { %3153 = vmatprep.subr.bf16.mxu0 %v3935_v20 }
  0x3f   : > { %3183 = vmatpush3.bf16.msra.mxu1 %v3933_v19 }
  0x40   : > { %3185 = vmatprep.subr.bf16.mxu1 %v3945_v27 }
  0x41   : > { %3155 = vmatpush3.bf16.msra.mxu0 %v3961_v35 }
  0x42   : > { %3157 = vmatprep.subr.bf16.mxu0 %v3967_v37 }
  0x43   : > { %3187 = vmatpush3.bf16.msra.mxu1 %v3965_v36 }
  0x44   : > { %3189 = vmatprep.subr.bf16.mxu1 %v3976_v42 }
  0x45   : > { %3159 = vmatpush3.bf16.msra.mxu0 %v3985_v46 }
  0x46   : > { %3193 = vmatprep.subr.bf16.mxu0 %v3695_v3 }
  0x47   : > { %3191 = vmatpush3.bf16.msra.mxu1 %v3989_v47 }
  0x48   : > { %3225 = vmatprep.subr.bf16.mxu1 %v3708_v8  ;;  %545 = vmatmul.mubr.f32.vlgmr.msra.gmra.mrb[4].mxu0 %v2293_v50 }
  0x49   : > { %3195 = vmatpush3.bf16.msra.mxu0 %v3706_v7  ;;  %549 = vmatprep.mubr.f32.mxu0 %v2301_v60  ;;  %v1125_v60 = vld [vmem:[%s4817_s1 + $0xc8] sm:$0xff] }
  0x4a   : > { %620 = vmatmul.mubr.f32.vlgmr.msra.gmra.mrb[4].mxu1 %v2302_v59  ;;  %3197 = vmatprep.subr.bf16.mxu0 %v3733_v16 }
  0x4b   : > { %3227 = vmatpush3.bf16.msra.mxu1 %v3720_v12  ;;  %624 = vmatprep.mubr.f32.mxu1 %v2305_v1  ;;  %v1157_v1 = vld [vmem:[%s4817_s1 + $0x1c8] sm:$0xff] }
  0x4c   : > { %3229 = vmatprep.subr.bf16.mxu1 %v3747_v21  ;;  %550 = vmatmul.mubr.f32.gmra.mrb[6].mxu0 %v2299_v61  ;;  %v1156_v61 = vld [vmem:[%s4817_s1 + $0x1c0] sm:$0xff] }
  0x4d   : > { %3199 = vmatpush3.bf16.msra.mxu0 %v3735_v17  ;;  %772 = vmatprep.mubr.f32.mxu0 %v2304_v58  ;;  %v1139_v58 = vld [vmem:[%s4817_s1 + $0x138] sm:$0xff] }
  0x4e   : > { %625 = vmatmul.mubr.f32.gmra.mrb[6].mxu1 %v2303_v2  ;;  %3201 = vmatprep.subr.bf16.mxu0 %v3761_v26  ;;  %v4276_v2 = vpack.c.bf16 %v1107_v54, %v1106_v53  ;;  %v1115_v53 = vld [vmem:[%s4817_s1 + $0x78] sm:$0xff] }
  0x4f   : > { %3231 = vmatpush3.bf16.msra.mxu1 %v3759_v25  ;;  %847 = vmatprep.mubr.f32.mxu1 %v2314_v4 }
  0x50   : > { %3233 = vmatprep.subr.bf16.mxu1 %v3791_v34 }
  0x51   : > { %3203 = vmatpush3.bf16.msra.mxu0 %v3789_v33 }
  0x52   : > { %3205 = vmatprep.subr.bf16.mxu0 %v3806_v39 }
  0x53   : > { %3235 = vmatpush3.bf16.msra.mxu1 %v3804_v38 }
  0x54   : > { %3237 = vmatprep.subr.bf16.mxu1 %v3818_v43 }
  0x55   : > { %3207 = vmatpush3.bf16.msra.mxu0 %v3839_v48 }
  0x56   : > { %3209 = vmatprep.subr.bf16.mxu0 %v3851_v52 }
  0x57   : > { %3239 = vmatpush3.bf16.msra.mxu1 %v3849_v51 }
  0x58   : > { %3241 = vmatprep.subr.bf16.mxu1 %v3863_v56 }
  0x59   : > { %3211 = vmatpush3.bf16.msra.mxu0 %v3882_v62 }
  0x5a   : > { %3213 = vmatprep.subr.bf16.mxu0 %v3888_v0 }
  0x5b   : > { %3243 = vmatpush3.bf16.msra.mxu1 %v3886_v63 }
  0x5c   : > { %3245 = vmatprep.subr.bf16.mxu1 %v3900_v5 }
  0x5d   : > { %3215 = vmatpush3.bf16.msra.mxu0 %v3923_v14 }
  0x5e   : > { %3217 = vmatprep.subr.bf16.mxu0 %v3935_v20 }
  0x5f   : > { %3247 = vmatpush3.bf16.msra.mxu1 %v3933_v19 }
  0x60   : > { %3249 = vmatprep.subr.bf16.mxu1 %v3945_v27 }
  0x61   : > { %3219 = vmatpush3.bf16.msra.mxu0 %v3961_v35 }
  0x62   : > { %3221 = vmatprep.subr.bf16.mxu0 %v3967_v37 }
  0x63   : > { %3251 = vmatpush3.bf16.msra.mxu1 %v3965_v36 }
  0x64   : > { %3253 = vmatprep.subr.bf16.mxu1 %v3976_v42 }
  0x65   : > { %3223 = vmatpush3.bf16.msra.mxu0 %v3985_v46 }
  0x66   : > { %3257 = vmatprep.subr.bf16.mxu0 %v3695_v3  ;;  %v4087_v3 = vld [vmem:[%s3914_s18 + $0x41] sm:$0xff] }
  0x67   : > { %3255 = vmatpush3.bf16.msra.mxu1 %v3989_v47 }
  0x68   : > { %3289 = vmatprep.subr.bf16.mxu1 %v3708_v8  ;;  %773 = vmatmul.mubr.f32.vlgmr.msra.gmra.mrb[8].mxu0 %v2302_v59  ;;  %v1117_v8 = vld [vmem:[%s4817_s1 + $0x88] sm:$0xff]  ;;  %v1124_v59 = vld [vmem:[%s4817_s1 + $0xc0] sm:$0xff] }
  0x69   : > { %3259 = vmatpush3.bf16.msra.mxu0 %v3706_v7  ;;  %777 = vmatprep.mubr.f32.mxu0 %v2311_v9  ;;  %v1116_v7 = vld [vmem:[%s4817_s1 + $0x80] sm:$0xff] }
  0x6a   : > { %848 = vmatmul.mubr.f32.vlgmr.msra.gmra.mrb[8].mxu1 %v4073_v6  ;;  %3261 = vmatprep.subr.bf16.mxu0 %v3733_v16  ;;  %v1149_v16 = vld [vmem:[%s4817_s1 + $0x188] sm:$0xff]  ;;  %v1108_v9 = vld [vmem:[%s4817_s1 + $0x40] sm:$0xff] }
  0x6b   : > { %3291 = vmatpush3.bf16.msra.mxu1 %v3720_v12  ;;  %852 = vmatprep.mubr.f32.mxu1 %v2315_v11  ;;  %v1148_v12 = vld [vmem:[%s4817_s1 + $0x180] sm:$0xff] }
  0x6c   : > { %3293 = vmatprep.subr.bf16.mxu1 %v3747_v21  ;;  %778 = vmatmul.mubr.f32.gmra.mrb[10].mxu0 %v2309_v10  ;;  %v1100_v21 = vld [vmem:[%s4817_s1] sm:$0xff]  ;;  %v1109_v10 = vld [vmem:[%s4817_s1 + $0x48] sm:$0xff] }
  0x6d   : > { %3263 = vmatpush3.bf16.msra.mxu0 %v3735_v17  ;;  %1000 = vmatprep.mubr.f32.mxu0 %v2314_v4  ;;  %v4124_v17 = vpack.c.bf16 %v1117_v8, %v1116_v7  ;;  %v4280_v4 = vpack.c.bf16 %v1139_v58, %v1138_v55  ;;  %v1140_v11 = vld [vmem:[%s4817_s1 + $0x140] sm:$0xff]  ;;  %v1126_v7 = vld [vmem:[%s4817_s1 + $0xd0] sm:$0xff]  ;;  %v1127_v8 = vld [vmem:[%s4817_s1 + $0xd8] sm:$0xff] }
  0x6e   : > { %853 = vmatmul.mubr.f32.gmra.mrb[10].mxu1 %v2313_v13  ;;  %3265 = vmatprep.subr.bf16.mxu0 %v3761_v26  ;;  %v1132_v26 = vld [vmem:[%s4817_s1 + $0x100] sm:$0xff]  ;;  %v4294_v13 = vpack.c.bf16 %v1157_v1, %v1156_v61  ;;  %v1146_v55 = vld [vmem:[%s4817_s1 + $0x170] sm:$0xff]  ;;  %v1147_v58 = vld [vmem:[%s4817_s1 + $0x178] sm:$0xff] }
  0x6f   : > { %3295 = vmatpush3.bf16.msra.mxu1 %v3759_v25  ;;  %1075 = vmatprep.mubr.f32.mxu1 %v4087_v3  ;;  %v1101_v25 = vld [vmem:[%s4817_s1 + $0x8] sm:$0xff]  ;;  %v2332_v61 = vld [vmem:[%s3914_s18 + $0x50] sm:$0xff] }
  0x70   : > { %3297 = vmatprep.subr.bf16.mxu1 %v3791_v34  ;;  %v1133_v34 = vld [vmem:[%s4817_s1 + $0x108] sm:$0xff] }
  0x71   : > { %3267 = vmatpush3.bf16.msra.mxu0 %v3789_v33  ;;  %v4136_v33 = vpack.c.bf16 %v1149_v16, %v1148_v12  ;;  %v1158_v12 = vld [vmem:[%s4817_s1 + $0x1d0] sm:$0xff]  ;;  %v1159_v16 = vld [vmem:[%s4817_s1 + $0x1d8] sm:$0xff]  ;;  %v2331_v1 = vld [vmem:[%s3914_s18 + $0x49] sm:$0x1] }
  0x72   : > { %3269 = vmatprep.subr.bf16.mxu0 %v3806_v39  ;;  %v1119_v39 = vld [vmem:[%s4817_s1 + $0x98] sm:$0xff] }
  0x73   : > { %3299 = vmatpush3.bf16.msra.mxu1 %v3804_v38  ;;  %v1118_v38 = vld [vmem:[%s4817_s1 + $0x90] sm:$0xff] }
  0x74   : > { %3301 = vmatprep.subr.bf16.mxu1 %v3818_v43  ;;  %v1150_v43 = vld [vmem:[%s4817_s1 + $0x190] sm:$0xff] }
  0x75   : > { %3271 = vmatpush3.bf16.msra.mxu0 %v3839_v48  ;;  %v1151_v48 = vld [vmem:[%s4817_s1 + $0x198] sm:$0xff] }
  0x76   : > { %3273 = vmatprep.subr.bf16.mxu0 %v3851_v52  ;;  %v4157_v52 = vld [vmem:[%s3914_s18 + $0x40] sm:$0xff] }
  0x77   : > { %3303 = vmatpush3.bf16.msra.mxu1 %v3849_v51  ;;  %v4154_v51 = vpack.c.bf16 %v1101_v25, %v1100_v21  ;;  %v4312_v21 = vpack.c.bf16 %v1109_v10, %v1108_v9  ;;  %v2329_v9 = vld [vmem:[%s3914_s18 + $0x48] sm:$0x1]  ;;  %v2335_v10 = vld [vmem:[%s3914_s18 + $0x59] sm:$0x1] }
  0x78   : > { %3305 = vmatprep.subr.bf16.mxu1 %v3863_v56  ;;  %v4161_v56 = vpack.c.bf16 %v1133_v34, %v1132_v26  ;;  %v4318_v26 = vpack.c.bf16 %v1127_v8, %v1126_v7  ;;  %v1110_v34 = vld [vmem:[%s4817_s1 + $0x50] sm:$0xff]  ;;  %v2339_v7 = vld [vmem:[%s3914_s18 + $0x58] sm:$0x1]  ;;  %v2345_v8 = vld [vmem:[%s3914_s18 + $0x69] sm:$0x1] }
  0x79   : > { %3275 = vmatpush3.bf16.msra.mxu0 %v3882_v62  ;;  %v4163_v62 = vpack.c.bf16 %v1119_v39, %v1118_v38  ;;  %v1111_v38 = vld [vmem:[%s4817_s1 + $0x58] sm:$0xff]  ;;  %v1142_v39 = vld [vmem:[%s4817_s1 + $0x150] sm:$0xff] }
  0x7a   : > { %3277 = vmatprep.subr.bf16.mxu0 %v3888_v0  ;;  %v1103_v0 = vld [vmem:[%s4817_s1 + $0x18] sm:$0xff] }
  0x7b   : > { %3307 = vmatpush3.bf16.msra.mxu1 %v3886_v63  ;;  %v1102_v63 = vld [vmem:[%s4817_s1 + $0x10] sm:$0xff] }
  0x7c   : > { %3309 = vmatprep.subr.bf16.mxu1 %v3900_v5  ;;  %v1134_v5 = vld [vmem:[%s4817_s1 + $0x110] sm:$0xff]  ;;  %v4196_v24 = vpack.c.bf16 %v1103_v0, %v1102_v63  ;;  %v1128_v63 = vld [vmem:[%s4817_s1 + $0xe0] sm:$0xff]  ;;  %v1129_v0 = vld [vmem:[%s4817_s1 + $0xe8] sm:$0xff] }
  0x7d   : > { %3279 = vmatpush3.bf16.msra.mxu0 %v3923_v14  ;;  %v4175_v14 = vpack.c.bf16 %v1151_v48, %v1150_v43  ;;  %v4205_v30 = vpack.c.bf16 %v1135_v15, %v1134_v5  ;;  %v4330_v43 = vpack.c.bf16 %v1159_v16, %v1158_v12  ;;  %v1143_v48 = vld [vmem:[%s4817_s1 + $0x158] sm:$0xff]  ;;  %v1160_v5 = vld [vmem:[%s4817_s1 + $0x1e0] sm:$0xff]  ;;  %v1161_v15 = vld [vmem:[%s4817_s1 + $0x1e8] sm:$0xff] }
  0x7e   : > { %3281 = vmatprep.subr.bf16.mxu0 %v3935_v20  ;;  %v1152_v20 = vld [vmem:[%s4817_s1 + $0x1a0] sm:$0xff]  ;;  %v2343_v12 = vld [vmem:[%s3914_s18 + $0x68] sm:$0x1]  ;;  %v2354_v16 = vld [vmem:[%s3914_s18 + $0x71] sm:$0xff] }
  0x7f   : > { %3311 = vmatpush3.bf16.msra.mxu1 %v3933_v19  ;;  %v1121_v19 = vld [vmem:[%s4817_s1 + $0xa8] sm:$0xff] }
  0x80   : > { %3313 = vmatprep.subr.bf16.mxu1 %v3945_v27  ;;  %v1104_v27 = vld [vmem:[%s4817_s1 + $0x20] sm:$0xff]  ;;  %v4207_v31 = vpack.c.bf16 %v1121_v19, %v1120_v18  ;;  %v4348_v18 = vpack.c.bf16 %v1111_v38, %v1110_v34  ;;  %v4352_v19 = vpack.c.bf16 %v1143_v48, %v1142_v39  ;;  %v4497_v34 = vld [vmem:[%s3914_s18 + $0x70] sm:$0xff]  ;;  %v2351_v38 = vld [vmem:[%s3914_s18 + $0x69] sm:$0x1] }
  0x81   : > { %3283 = vmatpush3.bf16.msra.mxu0 %v3961_v35  ;;  %v1136_v35 = vld [vmem:[%s4817_s1 + $0x120] sm:$0xff]  ;;  %v2349_v39 = vld [vmem:[%s3914_s18 + $0x68] sm:$0x1]  ;;  %v2355_v48 = vld [vmem:[%s3914_s18 + $0x79] sm:$0x1] }
  0x82   : > { %3285 = vmatprep.subr.bf16.mxu0 %v3967_v37  ;;  %v4217_v37 = vpack.c.bf16 %v1153_v22, %v1152_v20  ;;  %v4242_v49 = vpack.c.bf16 %v1137_v40, %v1136_v35  ;;  %v4354_v20 = vpack.c.bf16 %v1129_v0, %v1128_v63  ;;  %v1112_v22 = vld [vmem:[%s4817_s1 + $0x60] sm:$0xff]  ;;  %v1131_v35 = vld [vmem:[%s4817_s1 + $0xf8] sm:$0xff] }
  0x83   : > { %3315 = vmatpush3.bf16.msra.mxu1 %v3965_v36  ;;  %v2323_v36 = vld [vmem:[%s3914_s18 + $0x48] sm:$0x1]  ;;  %v1163_v40 = vld [vmem:[%s4817_s1 + $0x1f8] sm:$0xff]  ;;  %v2044_v0 = vld [vmem:[%s4817_s1 + $0x100] sm:$0xff] }
  0x84   : > { %3317 = vmatprep.subr.bf16.mxu1 %v3976_v42  ;;  %v1123_v42 = vld [vmem:[%s4817_s1 + $0xb8] sm:$0xff] }
  0x85   : > { %3287 = vmatpush3.bf16.msra.mxu0 %v3985_v46  ;;  %v4235_v46 = vpack.c.bf16 %v1105_v32, %v1104_v27  ;;  %v4244_v50 = vpack.c.bf16 %v1123_v42, %v1122_v41  ;;  %v1144_v27 = vld [vmem:[%s4817_s1 + $0x160] sm:$0xff]  ;;  %v1130_v32 = vld [vmem:[%s4817_s1 + $0xf0] sm:$0xff]  ;;  %v2353_v63 = vld [vmem:[%s3914_s18 + $0x78] sm:$0x1] }
  0x86   : > { %3321 = vmatprep.subr.bf16.mxu0 %v4124_v17  ;;  %v4390_v44 = vpack.c.bf16 %v1131_v35, %v1130_v32  ;;  %v4590_v32 = vld [vmem:[%s3914_s18 + $0x80] sm:$0xff] }
  0x87   : > { %3319 = vmatpush3.bf16.msra.mxu1 %v3989_v47  ;;  %v4238_v47 = vld [vmem:[%s3914_s18 + $0x51] sm:$0xff] }
  0x88   : > { %3353 = vmatprep.subr.bf16.mxu1 %v4136_v33  ;;  %1001 = vmatmul.mubr.f32.vlgmr.msra.gmra.mrb[12].mxu0 %v4073_v6  ;;  %v4282_v6 = vpack.c.bf16 %v1125_v60, %v1124_v59  ;;  %v4408_v59 = vpack.c.bf16 %v1115_v53, %v1114_v45  ;;  %v4412_v60 = vpack.c.bf16 %v1147_v58, %v1146_v55  ;;  %v2047_v53 = vld [vmem:[%s4817_s1 + $0x118] sm:$0xff]  ;;  %v2033_v55 = vld [vmem:[%s4817_s1 + $0xa8] sm:$0xff] }
  0x89   : > { %3323 = vmatpush3.bf16.msra.mxu0 %v4154_v51  ;;  %1005 = vmatprep.mubr.f32.mxu0 %v2321_v23  ;;  %v1113_v23 = vld [vmem:[%s4817_s1 + $0x68] sm:$0xff] }
  0x8a   : > { %1076 = vmatmul.mubr.f32.vlgmr.msra.gmra.mrb[12].mxu1 %v4157_v52  ;;  %3325 = vmatprep.subr.bf16.mxu0 %v4163_v62  ;;  %v4384_v41 = vpack.c.bf16 %v1113_v23, %v1112_v22  ;;  %v2031_v22 = vld [vmem:[%s4817_s1 + $0x98] sm:$0xff] }
  0x8b   : > { %3355 = vmatpush3.bf16.msra.mxu1 %v4161_v56  ;;  %1080 = vmatprep.mubr.f32.mxu1 %v2325_v29  ;;  %v1145_v29 = vld [vmem:[%s4817_s1 + $0x168] sm:$0xff] }
  0x8c   : > { %3357 = vmatprep.subr.bf16.mxu1 %v4175_v14  ;;  %1006 = vmatmul.mubr.f32.gmra.mrb[14].mxu0 %v2319_v28  ;;  %v4366_v28 = vpack.c.bf16 %v1161_v15, %v1160_v5  ;;  %v4388_v42 = vpack.c.bf16 %v1145_v29, %v1144_v27  ;;  %v2062_v27 = vld [vmem:[%s4817_s1 + $0x190] sm:$0xff] }
  0x8d   : > { %3327 = vmatpush3.bf16.msra.mxu0 %v4196_v24  ;;  %1228 = vmatprep.mubr.f32.mxu0 %v4087_v3  ;;  %v1141_v3 = vld [vmem:[%s4817_s1 + $0x148] sm:$0xff] }
  0x8e   : > { %1081 = vmatmul.mubr.f32.gmra.mrb[14].mxu1 %v2323_v36  ;;  %3329 = vmatprep.subr.bf16.mxu0 %v4207_v31  ;;  %v4316_v25 = vpack.c.bf16 %v1141_v3, %v1140_v11  ;;  %v1162_v36 = vld [vmem:[%s4817_s1 + $0x1f0] sm:$0xff]  ;;  %v2333_v11 = vld [vmem:[%s3914_s18 + $0x58] sm:$0x1]  ;;  %v2341_v3 = vld [vmem:[%s3914_s18 + $0x59] sm:$0x1] }
  0x8f   : > { %3359 = vmatpush3.bf16.msra.mxu1 %v4205_v30  ;;  %1303 = vmatprep.mubr.f32.mxu1 %v4238_v47  ;;  %v4399_v54 = vpack.c.bf16 %v1163_v40, %v1162_v36 }
  0x90   : > { %3361 = vmatprep.subr.bf16.mxu1 %v4217_v37 }
  0x91   : > { %3331 = vmatpush3.bf16.msra.mxu0 %v4235_v46 }
  0x92   : > { %3333 = vmatprep.subr.bf16.mxu0 %v4244_v50 }
  0x93   : > { %3363 = vmatpush3.bf16.msra.mxu1 %v4242_v49 }
  0x94   : > { %3365 = vmatprep.subr.bf16.mxu1 %v4256_v57 }
  0x95   : > { %3335 = vmatpush3.bf16.msra.mxu0 %v4276_v2 }
  0x96   : > { %3337 = vmatprep.subr.bf16.mxu0 %v4282_v6 }
  0x97   : > { %3367 = vmatpush3.bf16.msra.mxu1 %v4280_v4 }
  0x98   : > { %3369 = vmatprep.subr.bf16.mxu1 %v4294_v13 }
  0x99   : > { %3339 = vmatpush3.bf16.msra.mxu0 %v4312_v21 }
  0x9a   : > { %3341 = vmatprep.subr.bf16.mxu0 %v4318_v26 }
  0x9b   : > { %3371 = vmatpush3.bf16.msra.mxu1 %v4316_v25 }
  0x9c   : > { %3373 = vmatprep.subr.bf16.mxu1 %v4330_v43 }
  0x9d   : > { %3343 = vmatpush3.bf16.msra.mxu0 %v4348_v18 }
  0x9e   : > { %3345 = vmatprep.subr.bf16.mxu0 %v4354_v20 }
  0x9f   : > { %3375 = vmatpush3.bf16.msra.mxu1 %v4352_v19 }
  0xa0   : > { %3377 = vmatprep.subr.bf16.mxu1 %v4366_v28 }
  0xa1   : > { %3347 = vmatpush3.bf16.msra.mxu0 %v4384_v41 }
  0xa2   : > { %3349 = vmatprep.subr.bf16.mxu0 %v4390_v44 }
  0xa3   : > { %3379 = vmatpush3.bf16.msra.mxu1 %v4388_v42 }
  0xa4   : > { %3381 = vmatprep.subr.bf16.mxu1 %v4399_v54 }
  0xa5   : > { %3351 = vmatpush3.bf16.msra.mxu0 %v4408_v59 }
  0xa6   : > { %3385 = vmatprep.subr.bf16.mxu0 %v4124_v17 }
  0xa7   : > { %3383 = vmatpush3.bf16.msra.mxu1 %v4412_v60 }
  0xa8   : > { %3417 = vmatprep.subr.bf16.mxu1 %v4136_v33  ;;  %1229 = vmatmul.mubr.f32.vlgmr.msra.gmra.mrb[16].mxu0 %v4157_v52  ;;  %v2344_v52 = vld [vmem:[%s3914_s18 + $0x61] sm:$0xff] }
  0xa9   : > { %3387 = vmatpush3.bf16.msra.mxu0 %v4154_v51  ;;  %1233 = vmatprep.mubr.f32.mxu0 %v2331_v1 }
  0xaa   : > { %1304 = vmatmul.mubr.f32.vlgmr.msra.gmra.mrb[16].mxu1 %v2332_v61  ;;  %3389 = vmatprep.subr.bf16.mxu0 %v4163_v62 }
  0xab   : > { %3419 = vmatpush3.bf16.msra.mxu1 %v4161_v56  ;;  %1308 = vmatprep.mubr.f32.mxu1 %v2335_v10  ;;  %v2359_v10 = vld [vmem:[%s3914_s18 + $0x78] sm:$0x1] }
  0xac   : > { %3421 = vmatprep.subr.bf16.mxu1 %v4175_v14  ;;  %1234 = vmatmul.mubr.f32.gmra.mrb[18].mxu0 %v2329_v9  ;;  %v2016_v9 = vld [vmem:[%s4817_s1 + $0x20] sm:$0xff] }
  0xad   : > { %3391 = vmatpush3.bf16.msra.mxu0 %v4196_v24  ;;  %1456 = vmatprep.mubr.f32.mxu0 %v4238_v47  ;;  %v2342_v47 = vld [vmem:[%s3914_s18 + $0x60] sm:$0xff] }
  0xae   : > { %1309 = vmatmul.mubr.f32.gmra.mrb[18].mxu1 %v2333_v11  ;;  %3393 = vmatprep.subr.bf16.mxu0 %v4207_v31  ;;  %v2365_v11 = vld [vmem:[%s3914_s18 + $0x89] sm:$0x1] }
  0xaf   : > { %3423 = vmatpush3.bf16.msra.mxu1 %v4205_v30  ;;  %1531 = vmatprep.mubr.f32.mxu1 %v2344_v52 }
  0xb0   : > { %3425 = vmatprep.subr.bf16.mxu1 %v4217_v37 }
  0xb1   : > { %3395 = vmatpush3.bf16.msra.mxu0 %v4235_v46 }
  0xb2   : > { %3397 = vmatprep.subr.bf16.mxu0 %v4244_v50 }
  0xb3   : > { %3427 = vmatpush3.bf16.msra.mxu1 %v4242_v49 }
  0xb4   : > { %3429 = vmatprep.subr.bf16.mxu1 %v4256_v57 }
  0xb5   : > { %3399 = vmatpush3.bf16.msra.mxu0 %v4276_v2 }
  0xb6   : > { %3401 = vmatprep.subr.bf16.mxu0 %v4282_v6 }
  0xb7   : > { %3431 = vmatpush3.bf16.msra.mxu1 %v4280_v4 }
  0xb8   : > { %3433 = vmatprep.subr.bf16.mxu1 %v4294_v13 }
  0xb9   : > { %3403 = vmatpush3.bf16.msra.mxu0 %v4312_v21 }
  0xba   : > { %3405 = vmatprep.subr.bf16.mxu0 %v4318_v26 }
  0xbb   : > { %3435 = vmatpush3.bf16.msra.mxu1 %v4316_v25 }
  0xbc   : > { %3437 = vmatprep.subr.bf16.mxu1 %v4330_v43 }
  0xbd   : > { %3407 = vmatpush3.bf16.msra.mxu0 %v4348_v18 }
  0xbe   : > { %3409 = vmatprep.subr.bf16.mxu0 %v4354_v20 }
  0xbf   : > { %3439 = vmatpush3.bf16.msra.mxu1 %v4352_v19 }
  0xc0   : > { %3441 = vmatprep.subr.bf16.mxu1 %v4366_v28 }
  0xc1   : > { %3411 = vmatpush3.bf16.msra.mxu0 %v4384_v41 }
  0xc2   : > { %3413 = vmatprep.subr.bf16.mxu0 %v4390_v44 }
  0xc3   : > { %3443 = vmatpush3.bf16.msra.mxu1 %v4388_v42 }
  0xc4   : > { %3445 = vmatprep.subr.bf16.mxu1 %v4399_v54 }
  0xc5   : > { %3415 = vmatpush3.bf16.msra.mxu0 %v4408_v59 }
  0xc6   : > { %3449 = vmatprep.subr.bf16.mxu0 %v4124_v17 }
  0xc7   : > { %3447 = vmatpush3.bf16.msra.mxu1 %v4412_v60 }
  0xc8   : > { %3481 = vmatprep.subr.bf16.mxu1 %v4136_v33  ;;  %1457 = vmatmul.mubr.f32.vlgmr.msra.gmra.mrb[20].mxu0 %v2332_v61  ;;  %v2361_v61 = vld [vmem:[%s3914_s18 + $0x79] sm:$0x1] }
  0xc9   : > { %3451 = vmatpush3.bf16.msra.mxu0 %v4154_v51  ;;  %1461 = vmatprep.mubr.f32.mxu0 %v2341_v3  ;;  %v2017_v3 = vld [vmem:[%s4817_s1 + $0x28] sm:$0xff] }
  0xca   : > { %1532 = vmatmul.mubr.f32.vlgmr.msra.gmra.mrb[20].mxu1 %v2342_v47  ;;  %3453 = vmatprep.subr.bf16.mxu0 %v4163_v62 }
  0xcb   : > { %3483 = vmatpush3.bf16.msra.mxu1 %v4161_v56  ;;  %1536 = vmatprep.mubr.f32.mxu1 %v2345_v8  ;;  %v2363_v8 = vld [vmem:[%s3914_s18 + $0x88] sm:$0x1] }
  0xcc   : > { %3485 = vmatprep.subr.bf16.mxu1 %v4175_v14  ;;  %1462 = vmatmul.mubr.f32.gmra.mrb[22].mxu0 %v2339_v7  ;;  %v2048_v7 = vld [vmem:[%s4817_s1 + $0x120] sm:$0xff] }
  0xcd   : > { %3455 = vmatpush3.bf16.msra.mxu0 %v4196_v24  ;;  %1684 = vmatprep.mubr.f32.mxu0 %v2344_v52 }
  0xce   : > { %1537 = vmatmul.mubr.f32.gmra.mrb[22].mxu1 %v2343_v12  ;;  %3457 = vmatprep.subr.bf16.mxu0 %v4207_v31 }
  0xcf   : > { %3487 = vmatpush3.bf16.msra.mxu1 %v4205_v30  ;;  %1759 = vmatprep.mubr.f32.mxu1 %v2354_v16 }
  0xd0   : > { %3489 = vmatprep.subr.bf16.mxu1 %v4217_v37 }
  0xd1   : > { %3459 = vmatpush3.bf16.msra.mxu0 %v4235_v46 }
  0xd2   : > { %3461 = vmatprep.subr.bf16.mxu0 %v4244_v50 }
  0xd3   : > { %3491 = vmatpush3.bf16.msra.mxu1 %v4242_v49 }
  0xd4   : > { %3493 = vmatprep.subr.bf16.mxu1 %v4256_v57 }
  0xd5   : > { %3463 = vmatpush3.bf16.msra.mxu0 %v4276_v2 }
  0xd6   : > { %3465 = vmatprep.subr.bf16.mxu0 %v4282_v6 }
  0xd7   : > { %3495 = vmatpush3.bf16.msra.mxu1 %v4280_v4 }
  0xd8   : > { %3497 = vmatprep.subr.bf16.mxu1 %v4294_v13 }
  0xd9   : > { %3467 = vmatpush3.bf16.msra.mxu0 %v4312_v21 }
  0xda   : > { %3469 = vmatprep.subr.bf16.mxu0 %v4318_v26 }
  0xdb   : > { %3499 = vmatpush3.bf16.msra.mxu1 %v4316_v25 }
  0xdc   : > { %3501 = vmatprep.subr.bf16.mxu1 %v4330_v43 }
  0xdd   : > { %3471 = vmatpush3.bf16.msra.mxu0 %v4348_v18 }
  0xde   : > { %3473 = vmatprep.subr.bf16.mxu0 %v4354_v20 }
  0xdf   : > { %3503 = vmatpush3.bf16.msra.mxu1 %v4352_v19 }
  0xe0   : > { %3505 = vmatprep.subr.bf16.mxu1 %v4366_v28 }
  0xe1   : > { %3475 = vmatpush3.bf16.msra.mxu0 %v4384_v41 }
  0xe2   : > { %3477 = vmatprep.subr.bf16.mxu0 %v4390_v44 }
  0xe3   : > { %3507 = vmatpush3.bf16.msra.mxu1 %v4388_v42 }
  0xe4   : > { %3509 = vmatprep.subr.bf16.mxu1 %v4399_v54 }
  0xe5   : > { %3479 = vmatpush3.bf16.msra.mxu0 %v4408_v59 }
  0xe6   : > { %3513 = vmatprep.subr.bf16.mxu0 %v4124_v17  ;;  %v4511_v17 = vld [vmem:[%s3914_s18 + $0x81] sm:$0xff] }
  0xe7   : > { %3511 = vmatpush3.bf16.msra.mxu1 %v4412_v60 }
  0xe8   : > { %3545 = vmatprep.subr.bf16.mxu1 %v4136_v33  ;;  %1685 = vmatmul.mubr.f32.vlgmr.msra.gmra.mrb[24].mxu0 %v2342_v47 }
  0xe9   : > { %3515 = vmatpush3.bf16.msra.mxu0 %v4154_v51  ;;  %1689 = vmatprep.mubr.f32.mxu0 %v2351_v38  ;;  %v4532_v51 = vld [vmem:[%s4818_s2] ss:$0 sm:$0xff]  ;;  %v2035_v38 = vld [vmem:[%s4817_s1 + $0xb8] sm:$0xff] }
  0xea   : > { %1760 = vmatmul.mubr.f32.vlgmr.msra.gmra.mrb[24].mxu1 %v4497_v34  ;;  %3517 = vmatprep.subr.bf16.mxu0 %v4163_v62 }
  0xeb   : > { %3547 = vmatpush3.bf16.msra.mxu1 %v4161_v56  ;;  %1764 = vmatprep.mubr.f32.mxu1 %v2355_v48  ;;  %v2067_v48 = vld [vmem:[%s4817_s1 + $0x1b8] sm:$0xff] }
  0xec   : > { %3549 = vmatprep.subr.bf16.mxu1 %v4175_v14  ;;  %1690 = vmatmul.mubr.f32.gmra.mrb[26].mxu0 %v2349_v39  ;;  %v2066_v39 = vld [vmem:[%s4817_s1 + $0x1b0] sm:$0xff] }
  0xed   : > { %3519 = vmatpush3.bf16.msra.mxu0 %v4196_v24  ;;  %1912 = vmatprep.mubr.f32.mxu0 %v2354_v16  ;;  %v2049_v16 = vld [vmem:[%s4817_s1 + $0x128] sm:$0xff] }
  0xee   : > { %1765 = vmatmul.mubr.f32.gmra.mrb[26].mxu1 %v2353_v63  ;;  %3521 = vmatprep.subr.bf16.mxu0 %v4207_v31  ;;  %v3586_v63 = vpack.c.bf16 %v2017_v3, %v2016_v9 }
  0xef   : > { %3551 = vmatpush3.bf16.msra.mxu1 %v4205_v30  ;;  %1987 = vmatprep.mubr.f32.mxu1 %v4511_v17 }
  0xf0   : > { %3553 = vmatprep.subr.bf16.mxu1 %v4217_v37  ;;  %v2028_v37 = vld [vmem:[%s4817_s1 + $0x80] sm:$0xff] }
  0xf1   : > { %3523 = vmatpush3.bf16.msra.mxu0 %v4235_v46  ;;  %v2029_v46 = vld [vmem:[%s4817_s1 + $0x88] sm:$0xff] }
  0xf2   : > { %3525 = vmatprep.subr.bf16.mxu0 %v4244_v50  ;;  %v2060_v50 = vld [vmem:[%s4817_s1 + $0x180] sm:$0xff] }
  0xf3   : > { %3555 = vmatpush3.bf16.msra.mxu1 %v4242_v49 }
  0xf4   : > { %3557 = vmatprep.subr.bf16.mxu1 %v4256_v57  ;;  %v2061_v57 = vld [vmem:[%s4817_s1 + $0x188] sm:$0xff] }
  0xf5   : > { %3527 = vmatpush3.bf16.msra.mxu0 %v4276_v2 }
  0xf6   : > { %3529 = vmatprep.subr.bf16.mxu0 %v4282_v6 }
  0xf7   : > { %3559 = vmatpush3.bf16.msra.mxu1 %v4280_v4 }
  0xf8   : > { %3561 = vmatprep.subr.bf16.mxu1 %v4294_v13 }
  0xf9   : > { %3531 = vmatpush3.bf16.msra.mxu0 %v4312_v21 }
  0xfa   : > { %3533 = vmatprep.subr.bf16.mxu0 %v4318_v26  ;;  %v2012_v26 = vld [vmem:[%s4817_s1] sm:$0xff] }
  0xfb   : > { %3563 = vmatpush3.bf16.msra.mxu1 %v4316_v25  ;;  %v2412_v33 = vpop.f32.mrb[0].mxu0  ;;  %v3576_v25 = vpack.c.bf16 %v2029_v46, %v2028_v37  ;;  %v2051_v37 = vld [vmem:[%s4817_s1 + $0x138] sm:$0xff]  ;;  %v2036_v46 = vld [vmem:[%s4817_s1 + $0xc0] sm:$0xff] }
  0xfc   : > { %3565 = vmatprep.subr.bf16.mxu1 %v4330_v43  ;;  %v2413_v56 = vpop.f32.mrb[1].mxu0  ;;  %v2013_v43 = vld [vmem:[%s4817_s1 + $0x8] sm:$0xff] }
  0xfd   : > { %v2450_v62 = vpop.f32.mrb[0].mxu1  ;;  %v2414_v14 = vadd.f32 %v2413_v56, %v2412_v33  ;;  %3535 = vmatpush3.bf16.msra.mxu0 %v4348_v18  ;;  %v3608_v18 = vpack.c.bf16 %v2061_v57, %v2060_v50  ;;  %v3578_v29 = vpack.c.bf16 %v2013_v43, %v2012_v26  ;;  %v2374_v33 = vld [vmem:[%s3914_s18 + $0x91] sm:$0xff]  ;;  %v3618_v56 = vpack.c.bf16 %v2049_v16, %v2048_v7  ;;  %v2068_v50 = vld [vmem:[%s4817_s1 + $0x1c0] sm:$0xff]  ;;  %v2069_v57 = vld [vmem:[%s4817_s1 + $0x1c8] sm:$0xff] }
  0xfe   : > { %v2451_v24 = vpop.f32.mrb[1].mxu1  ;;  %3537 = vmatprep.subr.bf16.mxu0 %v4354_v20  ;;  %v2030_v20 = vld [vmem:[%s4817_s1 + $0x90] sm:$0xff]  ;;  %v2053_v26 = vld [vmem:[%s4817_s1 + $0x148] sm:$0xff] }
  0xff   : > { %v2452_v30 = vadd.f32 %v2451_v24, %v2450_v62  ;;  %3567 = vmatpush3.bf16.msra.mxu1 %v4352_v19  ;;  %v318_v31 = vadd.f32 %v2414_v14, %v4532_v51  ;;  %v2415_v49 = vpop.f32.mrb[2].mxu0  ;;  %v2045_v19 = vld [vmem:[%s4817_s1 + $0x108] sm:$0xff]  ;;  %v3580_v40 = vpack.c.bf16 %v2031_v22, %v2030_v20  ;;  %v2018_v14 = vld [vmem:[%s4817_s1 + $0x30] sm:$0xff]  ;;  %v2019_v24 = vld [vmem:[%s4817_s1 + $0x38] sm:$0xff] }
 0x100   : > { %3569 = vmatprep.subr.bf16.mxu1 %v4366_v28  ;;  %v2416_v2 = vpop.f32.mrb[3].mxu0  ;;  %v2063_v28 = vld [vmem:[%s4817_s1 + $0x198] sm:$0xff]  ;;  %v3610_v36 = vpack.c.bf16 %v2045_v19, %v2044_v0  ;;  %v2038_v43 = vld [vmem:[%s4817_s1 + $0xd0] sm:$0xff] }
 0x101   : > { %v2453_v4 = vpop.f32.mrb[2].mxu1  ;;  %v393_v6 = vadd.f32 %v2452_v30, %v318_v31  ;;  %3539 = vmatpush3.bf16.msra.mxu0 %v4384_v41  ;;  %v2417_v13 = vadd.f32 %v2416_v2, %v2415_v49  ;;  %v2014_v41 = vld [vmem:[%s4817_s1 + $0x10] sm:$0xff]  ;;  %v3612_v45 = vpack.c.bf16 %v2063_v28, %v2062_v27  ;;  %v3620_v31 = vpack.c.bf16 %v2067_v48, %v2066_v39  ;;  %v2037_v49 = vld [vmem:[%s4817_s1 + $0xc8] sm:$0xff]  ;;  %v2039_v0 = vld [vmem:[%s4817_s1 + $0xd8] sm:$0xff] }
 0x102   : > { %v2454_v21 = vpop.f32.mrb[3].mxu1  ;;  %3541 = vmatprep.subr.bf16.mxu0 %v4390_v44  ;;  %v2046_v44 = vld [vmem:[%s4817_s1 + $0x110] sm:$0xff]  ;;  %v3590_v2 = vpack.c.bf16 %v2019_v24, %v2018_v14  ;;  %v3596_v20 = vpack.c.bf16 %v2039_v0, %v2038_v43 }
 0x103   : > { %3571 = vmatpush3.bf16.msra.mxu1 %v4388_v42  ;;  %v2455_v5 = vadd.f32 %v2454_v21, %v2453_v4  ;;  %v401_v15 = vmax.f32 %v393_v6, 0.0  ;;  %v323_v23 = vadd.f32 %v2417_v13, %v4532_v51  ;;  %v2015_v42 = vld [vmem:[%s4817_s1 + $0x18] sm:$0xff]  ;;  %v3614_v52 = vpack.c.bf16 %v2047_v53, %v2046_v44  ;;  %v2050_v30 = vld [vmem:[%s4817_s1 + $0x130] sm:$0xff]  ;;  %v2020_v13 = vld [vmem:[%s4817_s1 + $0x40] sm:$0xff] }
 0x104   : > { %3573 = vmatprep.subr.bf16.mxu1 %v4399_v54  ;;  %v2032_v54 = vld [vmem:[%s4817_s1 + $0xa0] sm:$0xff]  ;;  %v3582_v1 = vpack.c.bf16 %v2015_v42, %v2014_v41  ;;  %v3622_v4 = vpack.c.bf16 %v2051_v37, %v2050_v30  ;;  %v3592_v6 = vpack.c.bf16 %v2037_v49, %v2036_v46  ;;  %v2022_v22 = vld [vmem:[%s4817_s1 + $0x50] sm:$0xff]  ;;  %v2073_v41 = vld [vmem:[%s4817_s1 + $0x1e8] sm:$0xff] }
 0x105   : > { %404 = vst.msk [vmem:[%s4556_s19] sm:$0xff] %vm403_vm0, %v401_v15  ;;  %3543 = vmatpush3.bf16.msra.mxu0 %v4408_v59  ;;  %v398_v35 = vadd.f32 %v2455_v5, %v323_v23  ;;  %v2064_v59 = vld [vmem:[%s4817_s1 + $0x1a0] sm:$0xff]  ;;  %v3584_v47 = vpack.c.bf16 %v2033_v55, %v2032_v54  ;;  %v2070_v5 = vld [vmem:[%s4817_s1 + $0x1d0] sm:$0xff]  ;;  %v2071_v15 = vld [vmem:[%s4817_s1 + $0x1d8] sm:$0xff] }
 0x106   : > { %3577 = vmatprep.subr.bf16.mxu0 %v3576_v25  ;;  %v2052_v21 = vld [vmem:[%s4817_s1 + $0x140] sm:$0xff]  ;;  %v3624_v25 = vpack.c.bf16 %v2069_v57, %v2068_v50  ;;  %v2023_v23 = vld [vmem:[%s4817_s1 + $0x58] sm:$0xff]  ;;  %v2054_v27 = vld [vmem:[%s4817_s1 + $0x150] sm:$0xff]  ;;  %v3628_v28 = vpack.c.bf16 %v2071_v15, %v2070_v5 }
 0x107   : > { %3575 = vmatpush3.bf16.msra.mxu1 %v4412_v60  ;;  %v402_v58 = vmax.f32 %v398_v35, 0.0  ;;  %v2065_v60 = vld [vmem:[%s4817_s1 + $0x1a8] sm:$0xff]  ;;  %v3626_v19 = vpack.c.bf16 %v2053_v26, %v2052_v21  ;;  %v2040_v35 = vld [vmem:[%s4817_s1 + $0xe0] sm:$0xff]  ;;  %v3598_v42 = vpack.c.bf16 %v2023_v23, %v2022_v22 }
 0x108   : > { %3609 = vmatprep.subr.bf16.mxu1 %v3608_v18  ;;  %1913 = vmatmul.mubr.f32.vlgmr.msra.gmra.mrb[28].mxu0 %v4497_v34  ;;  %v3616_v12 = vpack.c.bf16 %v2065_v60, %v2064_v59  ;;  %v2034_v34 = vld [vmem:[%s4817_s1 + $0xb0] sm:$0xff]  ;;  %v2024_v53 = vld [vmem:[%s4817_s1 + $0x60] sm:$0xff]  ;;  %v2025_v54 = vld [vmem:[%s4817_s1 + $0x68] sm:$0xff] }
 0x109   : > { %3579 = vmatpush3.bf16.msra.mxu0 %v3578_v29  ;;  %406 = vst.msk [vmem:[%s4556_s19 + $0x8] sm:$0x1] %vm405_vm1, %v402_v58  ;;  %1917 = vmatprep.mubr.f32.mxu0 %v2361_v61  ;;  %v3588_v62 = vpack.c.bf16 %v2035_v38, %v2034_v34  ;;  %v2055_v29 = vld [vmem:[%s4817_s1 + $0x158] sm:$0xff]  ;;  %v2056_v55 = vld [vmem:[%s4817_s1 + $0x160] sm:$0xff]  ;;  %v2057_v60 = vld [vmem:[%s4817_s1 + $0x168] sm:$0xff]  ;;  %v3602_v7 = vpack.c.bf16 %v2025_v54, %v2024_v53 }
 0x10a   : > { %1988 = vmatmul.mubr.f32.vlgmr.msra.gmra.mrb[28].mxu1 %v4590_v32  ;;  %3581 = vmatprep.subr.bf16.mxu0 %v3580_v40  ;;  %v2072_v40 = vld [vmem:[%s4817_s1 + $0x1e0] sm:$0xff]  ;;  %v3630_v44 = vpack.c.bf16 %v2055_v29, %v2054_v27  ;;  %v2042_v61 = vld [vmem:[%s4817_s1 + $0xf0] sm:$0xff]  ;;  %v2027_v38 = vld [vmem:[%s4817_s1 + $0x78] sm:$0xff] }
 0x10b   : > { %3611 = vmatpush3.bf16.msra.mxu1 %v3610_v36  ;;  %1992 = vmatprep.mubr.f32.mxu1 %v2365_v11  ;;  %v2041_v36 = vld [vmem:[%s4817_s1 + $0xe8] sm:$0xff]  ;;  %v3632_v59 = vpack.c.bf16 %v2073_v41, %v2072_v40  ;;  %v2074_v11 = vld [vmem:[%s4817_s1 + $0x1f0] sm:$0xff] }
 0x10c   : > { %3613 = vmatprep.subr.bf16.mxu1 %v3612_v45  ;;  %1918 = vmatmul.mubr.f32.gmra.mrb[30].mxu0 %v2359_v10  ;;  %v3600_v45 = vpack.c.bf16 %v2041_v36, %v2040_v35  ;;  %v2026_v34 = vld [vmem:[%s4817_s1 + $0x70] sm:$0xff]  ;;  %v2369_v21 = vld [vmem:[%s3914_s18 + $0x88] sm:$0x1] }
 0x10d   : > { %3583 = vmatpush3.bf16.msra.mxu0 %v3582_v1  ;;  %2140 = vmatprep.mubr.f32.mxu0 %v4511_v17  ;;  %v2021_v17 = vld [vmem:[%s4817_s1 + $0x48] sm:$0xff]  ;;  %v2043_v1 = vld [vmem:[%s4817_s1 + $0xf8] sm:$0xff]  ;;  %v3606_v30 = vpack.c.bf16 %v2027_v38, %v2026_v34 }
 0x10e   : > { %1993 = vmatmul.mubr.f32.gmra.mrb[30].mxu1 %v2363_v8  ;;  %3585 = vmatprep.subr.bf16.mxu0 %v3584_v47  ;;  %v3594_v18 = vpack.c.bf16 %v2021_v17, %v2020_v13  ;;  %v3604_v16 = vpack.c.bf16 %v2043_v1, %v2042_v61  ;;  %v2375_v13 = vld [vmem:[%s3914_s18 + $0x99] sm:$0x1] }
 0x10f   : > { %3615 = vmatpush3.bf16.msra.mxu1 %v3614_v52  ;;  %2215 = vmatprep.mubr.f32.mxu1 %v2374_v33  ;;  %v2075_v52 = vld [vmem:[%s4817_s1 + $0x1f8] sm:$0xff] }
 0x110   : > { %3617 = vmatprep.subr.bf16.mxu1 %v3616_v12  ;;  %v3634_v12 = vpack.c.bf16 %v2057_v60, %v2056_v55  ;;  %v3636_v48 = vpack.c.bf16 %v2075_v52, %v2074_v11  ;;  %v2059_v33 = vld [vmem:[%s4817_s1 + $0x178] sm:$0xff] }
 0x111   : > { %3587 = vmatpush3.bf16.msra.mxu0 %v3586_v63  ;;  %v2058_v63 = vld [vmem:[%s4817_s1 + $0x170] sm:$0xff] }
 0x112   : > { %3589 = vmatprep.subr.bf16.mxu0 %v3588_v62  ;;  %v3638_v46 = vpack.c.bf16 %v2059_v33, %v2058_v63 }
 0x113   : > { %3619 = vmatpush3.bf16.msra.mxu1 %v3618_v56 }
 0x114   : > { %3621 = vmatprep.subr.bf16.mxu1 %v3620_v31 }
 0x115   : > { %3591 = vmatpush3.bf16.msra.mxu0 %v3590_v2 }
 0x116   : > { %3593 = vmatprep.subr.bf16.mxu0 %v3592_v6  ;;  %v2371_v6 = vld [vmem:[%s3914_s18 + $0x89] sm:$0x1] }
 0x117   : > { %3623 = vmatpush3.bf16.msra.mxu1 %v3622_v4  ;;  %v2372_v4 = vld [vmem:[%s3914_s18 + $0x90] sm:$0xff] }
 0x118   : > { %3625 = vmatprep.subr.bf16.mxu1 %v3624_v25  ;;  %v2373_v25 = vld [vmem:[%s3914_s18 + $0x98] sm:$0x1] }
 0x119   : > { %3595 = vmatpush3.bf16.msra.mxu0 %v3594_v18 }
 0x11a   : > { %3597 = vmatprep.subr.bf16.mxu0 %v3596_v20 }
 0x11b   : > { %3627 = vmatpush3.bf16.msra.mxu1 %v3626_v19  ;;  %v2488_v58 = vpop.f32.mrb[4].mxu0 }
 0x11c   : > { %3629 = vmatprep.subr.bf16.mxu1 %v3628_v28  ;;  %v2489_v9 = vpop.f32.mrb[5].mxu0 }
 0x11d   : > { %v2526_v10 = vpop.f32.mrb[4].mxu1  ;;  %v2490_v47 = vadd.f32 %v2489_v9, %v2488_v58  ;;  %3599 = vmatpush3.bf16.msra.mxu0 %v3598_v42 }
 0x11e   : > { %v2527_v3 = vpop.f32.mrb[5].mxu1  ;;  %3601 = vmatprep.subr.bf16.mxu0 %v3600_v45 }
 0x11f   : > { %v2528_v8 = vadd.f32 %v2527_v3, %v2526_v10  ;;  %3631 = vmatpush3.bf16.msra.mxu1 %v3630_v44  ;;  %v547_v39 = vadd.f32 %v2490_v47, %v4532_v51  ;;  %v2491_v56 = vpop.f32.mrb[6].mxu0 }
 0x120   : > { %3633 = vmatprep.subr.bf16.mxu1 %v3632_v59  ;;  %v2492_v62 = vpop.f32.mrb[7].mxu0 }
 0x121   : > { %v2529_v14 = vpop.f32.mrb[6].mxu1  ;;  %v622_v24 = vadd.f32 %v2528_v8, %v547_v39  ;;  %3603 = vmatpush3.bf16.msra.mxu0 %v3602_v7  ;;  %v2493_v31 = vadd.f32 %v2492_v62, %v2491_v56 }
 0x122   : > { %v2530_v37 = vpop.f32.mrb[7].mxu1  ;;  %3605 = vmatprep.subr.bf16.mxu0 %v3604_v16 }
 0x123   : > { %3635 = vmatpush3.bf16.msra.mxu1 %v3634_v12  ;;  %v2531_v49 = vadd.f32 %v2530_v37, %v2529_v14  ;;  %v630_v50 = vmax.f32 %v622_v24, 0.0  ;;  %v552_v57 = vadd.f32 %v2493_v31, %v4532_v51 }
 0x124   : > { %3637 = vmatprep.subr.bf16.mxu1 %v3636_v48 }
 0x125   : > { %2306 = vst.msk [vmem:[%s4556_s19 + $0x10] sm:$0xff] %vm403_vm0, %v630_v50  ;;  %3607 = vmatpush3.bf16.msra.mxu0 %v3606_v30  ;;  %v627_v2 = vadd.f32 %v2531_v49, %v552_v57 }
 0x127   : > { %3639 = vmatpush3.bf16.msra.mxu1 %v3638_v46  ;;  %v631_v17 = vmax.f32 %v627_v2, 0.0 }
 0x128   : > { %2141 = vmatmul.mubr.f32.vlgmr.msra.gmra.mrb[32].mxu0 %v4590_v32 }
 0x129   : > { %2145 = vmatprep.mubr.f32.mxu0 %v2371_v6  ;;  %2307 = vst.msk [vmem:[%s4556_s19 + $0x18] sm:$0x1] %vm405_vm1, %v631_v17 }
 0x12a   : > { %2216 = vmatmul.mubr.f32.vlgmr.msra.gmra.mrb[32].mxu1 %v2372_v4 }
 0x12b   : > { %2220 = vmatprep.mubr.f32.mxu1 %v2375_v13 }
 0x12c   : > { %2146 = vmatmul.mubr.f32.gmra.mrb[34].mxu0 %v2369_v21 }
 0x12e   : > { %2221 = vmatmul.mubr.f32.gmra.mrb[34].mxu1 %v2373_v25 }
 0x13b   : > { %v2564_v26 = vpop.f32.mrb[8].mxu0 }
 0x13c   : > { %v2565_v43 = vpop.f32.mrb[9].mxu0 }
 0x13d   : > { %v2602_v0 = vpop.f32.mrb[8].mxu1  ;;  %v2566_v5 = vadd.f32 %v2565_v43, %v2564_v26 }
 0x13e   : > { %v2603_v15 = vpop.f32.mrb[9].mxu1 }
 0x13f   : > { %v2604_v18 = vadd.f32 %v2603_v15, %v2602_v0  ;;  %v775_v19 = vadd.f32 %v2566_v5, %v4532_v51  ;;  %v2567_v32 = vpop.f32.mrb[10].mxu0 }
 0x140   : > { %v2568_v20 = vpop.f32.mrb[11].mxu0 }
 0x141   : > { %v2605_v22 = vpop.f32.mrb[10].mxu1  ;;  %v850_v23 = vadd.f32 %v2604_v18, %v775_v19  ;;  %v2569_v27 = vadd.f32 %v2568_v20, %v2567_v32 }
 0x142   : > { %v2606_v28 = vpop.f32.mrb[11].mxu1 }
 0x143   : > { %v2607_v29 = vadd.f32 %v2606_v28, %v2605_v22  ;;  %v858_v35 = vmax.f32 %v850_v23, 0.0  ;;  %v780_v36 = vadd.f32 %v2569_v27, %v4532_v51 }
 0x145   : > { %2316 = vst.msk [vmem:[%s4556_s19 + $0x20] sm:$0xff] %vm403_vm0, %v858_v35  ;;  %v855_v40 = vadd.f32 %v2607_v29, %v780_v36 }
 0x147   : > { %v859_v41 = vmax.f32 %v855_v40, 0.0 }
 0x149   : > { %2317 = vst.msk [vmem:[%s4556_s19 + $0x28] sm:$0x1] %vm405_vm1, %v859_v41 }
 0x15b   : > { %v2640_v42 = vpop.f32.mrb[12].mxu0 }
 0x15c   : > { %v2641_v44 = vpop.f32.mrb[13].mxu0 }
 0x15d   : > { %v2678_v45 = vpop.f32.mrb[12].mxu1  ;;  %v2642_v53 = vadd.f32 %v2641_v44, %v2640_v42 }
 0x15e   : > { %v2679_v54 = vpop.f32.mrb[13].mxu1 }
 0x15f   : > { %v2680_v55 = vadd.f32 %v2679_v54, %v2678_v45  ;;  %v1003_v58 = vadd.f32 %v2642_v53, %v4532_v51  ;;  %v2643_v59 = vpop.f32.mrb[14].mxu0 }
 0x160   : > { %v2644_v60 = vpop.f32.mrb[15].mxu0 }
 0x161   : > { %v2681_v61 = vpop.f32.mrb[14].mxu1  ;;  %v1078_v1 = vadd.f32 %v2680_v55, %v1003_v58  ;;  %v2645_v9 = vadd.f32 %v2644_v60, %v2643_v59 }
 0x162   : > { %v2682_v10 = vpop.f32.mrb[15].mxu1 }
 0x163   : > { %v2683_v11 = vadd.f32 %v2682_v10, %v2681_v61  ;;  %v1086_v52 = vmax.f32 %v1078_v1, 0.0  ;;  %v1008_v47 = vadd.f32 %v2645_v9, %v4532_v51 }
 0x165   : > { %2326 = vst.msk [vmem:[%s4556_s19 + $0x30] sm:$0xff] %vm403_vm0, %v1086_v52  ;;  %v1083_v3 = vadd.f32 %v2683_v11, %v1008_v47 }
 0x167   : > { %v1087_v7 = vmax.f32 %v1083_v3, 0.0 }
 0x169   : > { %2327 = vst.msk [vmem:[%s4556_s19 + $0x38] sm:$0x1] %vm405_vm1, %v1087_v7 }
 0x17b   : > { %v2716_v8 = vpop.f32.mrb[16].mxu0 }
 0x17c   : > { %v2717_v12 = vpop.f32.mrb[17].mxu0 }
 0x17d   : > { %v2754_v16 = vpop.f32.mrb[16].mxu1  ;;  %v2718_v34 = vadd.f32 %v2717_v12, %v2716_v8 }
 0x17e   : > { %v2755_v38 = vpop.f32.mrb[17].mxu1 }
 0x17f   : > { %v2756_v39 = vadd.f32 %v2755_v38, %v2754_v16  ;;  %v1231_v48 = vadd.f32 %v2718_v34, %v4532_v51  ;;  %v2719_v63 = vpop.f32.mrb[18].mxu0 }
 0x180   : > { %v2720_v33 = vpop.f32.mrb[19].mxu0 }
 0x181   : > { %v2757_v56 = vpop.f32.mrb[18].mxu1  ;;  %v1306_v62 = vadd.f32 %v2756_v39, %v1231_v48  ;;  %v2721_v14 = vadd.f32 %v2720_v33, %v2719_v63 }
 0x182   : > { %v2758_v24 = vpop.f32.mrb[19].mxu1 }
 0x183   : > { %v2759_v30 = vadd.f32 %v2758_v24, %v2757_v56  ;;  %v1314_v31 = vmax.f32 %v1306_v62, 0.0  ;;  %v1236_v37 = vadd.f32 %v2721_v14, %v4532_v51 }
 0x185   : > { %2336 = vst.msk [vmem:[%s4556_s19 + $0x40] sm:$0xff] %vm403_vm0, %v1314_v31  ;;  %v1311_v46 = vadd.f32 %v2759_v30, %v1236_v37 }
 0x187   : > { %v1315_v49 = vmax.f32 %v1311_v46, 0.0 }
 0x189   : > { %2337 = vst.msk [vmem:[%s4556_s19 + $0x48] sm:$0x1] %vm405_vm1, %v1315_v49 }
 0x19b   : > { %v2792_v50 = vpop.f32.mrb[20].mxu0 }
 0x19c   : > { %v2793_v57 = vpop.f32.mrb[21].mxu0 }
 0x19d   : > { %v2830_v2 = vpop.f32.mrb[20].mxu1  ;;  %v2794_v4 = vadd.f32 %v2793_v57, %v2792_v50 }
 0x19e   : > { %v2831_v6 = vpop.f32.mrb[21].mxu1 }
 0x19f   : > { %v2832_v13 = vadd.f32 %v2831_v6, %v2830_v2  ;;  %v1459_v17 = vadd.f32 %v2794_v4, %v4532_v51  ;;  %v2795_v21 = vpop.f32.mrb[22].mxu0 }
 0x1a0   : > { %v2796_v25 = vpop.f32.mrb[23].mxu0 }
 0x1a1   : > { %v2833_v26 = vpop.f32.mrb[22].mxu1  ;;  %v1534_v43 = vadd.f32 %v2832_v13, %v1459_v17  ;;  %v2797_v0 = vadd.f32 %v2796_v25, %v2795_v21 }
 0x1a2   : > { %v2834_v5 = vpop.f32.mrb[23].mxu1 }
 0x1a3   : > { %v2835_v15 = vadd.f32 %v2834_v5, %v2833_v26  ;;  %v1542_v18 = vmax.f32 %v1534_v43, 0.0  ;;  %v1464_v19 = vadd.f32 %v2797_v0, %v4532_v51 }
 0x1a5   : > { %2346 = vst.msk [vmem:[%s4556_s19 + $0x50] sm:$0xff] %vm403_vm0, %v1542_v18  ;;  %v1539_v32 = vadd.f32 %v2835_v15, %v1464_v19 }
 0x1a7   : > { %v1543_v20 = vmax.f32 %v1539_v32, 0.0 }
 0x1a9   : > { %2347 = vst.msk [vmem:[%s4556_s19 + $0x58] sm:$0x1] %vm405_vm1, %v1543_v20 }
 0x1bb   : > { %v2868_v22 = vpop.f32.mrb[24].mxu0 }
 0x1bc   : > { %v2869_v23 = vpop.f32.mrb[25].mxu0 }
 0x1bd   : > { %v2906_v27 = vpop.f32.mrb[24].mxu1  ;;  %v2870_v28 = vadd.f32 %v2869_v23, %v2868_v22 }
 0x1be   : > { %v2907_v29 = vpop.f32.mrb[25].mxu1 }
 0x1bf   : > { %v2908_v35 = vadd.f32 %v2907_v29, %v2906_v27  ;;  %v1687_v36 = vadd.f32 %v2870_v28, %v4532_v51  ;;  %v2871_v40 = vpop.f32.mrb[26].mxu0 }
 0x1c0   : > { %v2872_v41 = vpop.f32.mrb[27].mxu0 }
 0x1c1   : > { %v2909_v42 = vpop.f32.mrb[26].mxu1  ;;  %v1762_v44 = vadd.f32 %v2908_v35, %v1687_v36  ;;  %v2873_v45 = vadd.f32 %v2872_v41, %v2871_v40 }
 0x1c2   : > { %v2910_v53 = vpop.f32.mrb[27].mxu1 }
 0x1c3   : > { %v2911_v54 = vadd.f32 %v2910_v53, %v2909_v42  ;;  %v1770_v55 = vmax.f32 %v1762_v44, 0.0  ;;  %v1692_v58 = vadd.f32 %v2873_v45, %v4532_v51 }
 0x1c5   : > { %2356 = vst.msk [vmem:[%s4556_s19 + $0x60] sm:$0xff] %vm403_vm0, %v1770_v55  ;;  %v1767_v59 = vadd.f32 %v2911_v54, %v1692_v58 }
 0x1c7   : > { %v1771_v60 = vmax.f32 %v1767_v59, 0.0 }
 0x1c9   : > { %2357 = vst.msk [vmem:[%s4556_s19 + $0x68] sm:$0x1] %vm405_vm1, %v1771_v60 }
 0x1db   : > { %v2944_v61 = vpop.f32.mrb[28].mxu0 }
 0x1dc   : > { %v2945_v1 = vpop.f32.mrb[29].mxu0 }
 0x1dd   : > { %v2982_v9 = vpop.f32.mrb[28].mxu1  ;;  %v2946_v10 = vadd.f32 %v2945_v1, %v2944_v61 }
 0x1de   : > { %v2983_v11 = vpop.f32.mrb[29].mxu1 }
 0x1df   : > { %v2984_v52 = vadd.f32 %v2983_v11, %v2982_v9  ;;  %v1915_v47 = vadd.f32 %v2946_v10, %v4532_v51  ;;  %v2947_v3 = vpop.f32.mrb[30].mxu0 }
 0x1e0   : > { %v2948_v7 = vpop.f32.mrb[31].mxu0 }
 0x1e1   : > { %v2985_v8 = vpop.f32.mrb[30].mxu1  ;;  %v1990_v12 = vadd.f32 %v2984_v52, %v1915_v47  ;;  %v2949_v16 = vadd.f32 %v2948_v7, %v2947_v3 }
 0x1e2   : > { %v2986_v34 = vpop.f32.mrb[31].mxu1 }
 0x1e3   : > { %v2987_v38 = vadd.f32 %v2986_v34, %v2985_v8  ;;  %v1998_v39 = vmax.f32 %v1990_v12, 0.0  ;;  %v1920_v48 = vadd.f32 %v2949_v16, %v4532_v51 }
 0x1e5   : > { %2366 = vst.msk [vmem:[%s4556_s19 + $0x70] sm:$0xff] %vm403_vm0, %v1998_v39  ;;  %v1995_v63 = vadd.f32 %v2987_v38, %v1920_v48 }
 0x1e7   : > { %v1999_v33 = vmax.f32 %v1995_v63, 0.0 }
 0x1e9   : > { %2367 = vst.msk [vmem:[%s4556_s19 + $0x78] sm:$0x1] %vm405_vm1, %v1999_v33 }
 0x1fb   : > { %v3020_v56 = vpop.f32.mrb[32].mxu0 }
 0x1fc   : > { %v3021_v62 = vpop.f32.mrb[33].mxu0 }
 0x1fd   : > { %v3058_v14 = vpop.f32.mrb[32].mxu1  ;;  %v3022_v24 = vadd.f32 %v3021_v62, %v3020_v56 }
 0x1fe   : > { %v3059_v30 = vpop.f32.mrb[33].mxu1 }
 0x1ff   : > { %v3060_v31 = vadd.f32 %v3059_v30, %v3058_v14  ;;  %v2143_v37 = vadd.f32 %v3022_v24, %v4532_v51  ;;  %v3023_v46 = vpop.f32.mrb[34].mxu0 }
 0x200   : > { %v3024_v49 = vpop.f32.mrb[35].mxu0 }
 0x201   : > { %v3061_v50 = vpop.f32.mrb[34].mxu1  ;;  %v2218_v57 = vadd.f32 %v3060_v31, %v2143_v37  ;;  %v3025_v2 = vadd.f32 %v3024_v49, %v3023_v46 }
 0x202   : > { %v3062_v4 = vpop.f32.mrb[35].mxu1 }
 0x203   : > { %v3063_v6 = vadd.f32 %v3062_v4, %v3061_v50  ;;  %v2226_v13 = vmax.f32 %v2218_v57, 0.0  ;;  %v2148_v17 = vadd.f32 %v3025_v2, %v4532_v51 }
 0x205   : > { %2376 = vst.msk [vmem:[%s4556_s19 + $0x80] sm:$0xff] %vm403_vm0, %v2226_v13  ;;  %v2223_v21 = vadd.f32 %v3063_v6, %v2148_v17 }
 0x207   : > { %v2227_v25 = vmax.f32 %v2223_v21, 0.0 }
 0x209   : > { %2377 = vst.msk [vmem:[%s4556_s19 + $0x88] sm:$0x1] %vm405_vm1, %v2227_v25 }
 0x20a PF: > { %s13_s12 = sadd.s32 1, %s3656_s12  }
 0x20b   : > { %p10_p4 = scmp.ge.s32.totalorder %s13_s12, 4  }
 0x20d   :  { %12 = sbr.rel (!%p10_p4) target bundleno = 1 (0x1), region = 79 }

// kernel: quantile_cnn_forward.6
= control target key start
LH: loop header
LB: loop body
LE: loop exit
PB: predicated region body
PF: predicated region fallthrough
CT: control target
= control target key end

     0   :  { %s3878_s12 = smov 0   ;;  %s5065_s0 = inlined_call_operand.vmem [shape: f32[2,9,9,64], index: 0, kind: input, shape index: {}]   ;;  %s5066_s1 = inlined_call_operand.vmem [shape: f32[576,64], index: 1, kind: input, shape index: {}]   ;;  %s5067_s2 = inlined_call_operand.vmem [shape: f32[1,64], index: 2, kind: input, shape index: {}]   ;;  %s5068_s3 = inlined_call_operand.vmem [shape: f32[2,7,7,64], index: 3, kind: output, shape index: {}]  }
   0x1 LB: > { %s2461_s13 = sadd.s32 4294967295, %s3852_s12   ;;  %p2465_p0 = scmp.ge.s32.totalorder %s3852_s12, 1  ;;  %s3852_s12 = sphi %s3878_s12, %s13_s12  }
   0x2   : > { %p137_p1 = scmp.lt.s32.totalorder %s3852_s12, 3 }
   0x4   : > { %p138_p2 = pnand %p2465_p0, %p137_p1 }
   0x5   : > { %p161_p3 = scmp.lt.s32.totalorder (!%p138_p2), %s2461_s13, 1  ;;  %v220_v0 = vld [vmem:[%s5066_s1 + $0x80] sm:$0xff] (!%p138_p2)  ;;  %v221_v1 = vld [vmem:[%s5066_s1 + $0x88] sm:$0xff] (!%p138_p2)  ;;  %v222_v5 = vld [vmem:[%s5066_s1 + $0x90] sm:$0xff] (!%p138_p2)  ;;  %s3854_s8 = smov (!%p138_p2), 64   ;;  %vm199_vm0 = vcmask (!%p138_p2), 523264  }
   0x6   : > { %141 = sbr.rel (%p138_p2) target bundleno = 612 (0x264), region = 32  ;;  %v204_v2 = vld [vmem:[%s5066_s1] sm:$0xff] (!%p138_p2)  ;;  %v3895_v3 = vpack.c.bf16 (!%p138_p2), %v221_v1, %v220_v0  ;;  %v205_v4 = vld [vmem:[%s5066_s1 + $0x8] sm:$0xff] (!%p138_p2)  ;;  %v223_v6 = vld [vmem:[%s5066_s1 + $0x98] sm:$0xff] (!%p138_p2)  ;;  %vm3856_vm1 = vmmov (!%p138_p2), 0   ;;  %vm496_vm2 = vcmask (!%p138_p2), 522240  }
   0x7   : > { %v3908_v7 = vpack.c.bf16 (!%p138_p2), %v205_v4, %v204_v2  ;;  %v3910_v8 = vpack.c.bf16 (!%p138_p2), %v223_v6, %v222_v5  ;;  %v252_v9 = vld [vmem:[%s5066_s1 + $0x180] sm:$0xff] (!%p138_p2)  ;;  %v253_v10 = vld [vmem:[%s5066_s1 + $0x188] sm:$0xff] (!%p138_p2)  ;;  %v206_v11 = vld [vmem:[%s5066_s1 + $0x10] sm:$0xff] (!%p138_p2) }
   0x8   : > { %3231 = vmatprep.subr.bf16.mxu0 (!%p138_p2), %v3895_v3  ;;  %v3922_v12 = vpack.c.bf16 (!%p138_p2), %v253_v10, %v252_v9  ;;  %v207_v13 = vld [vmem:[%s5066_s1 + $0x18] sm:$0xff] (!%p138_p2)  ;;  %v236_v14 = vld [vmem:[%s5066_s1 + $0x100] sm:$0xff] (!%p138_p2)  ;;  %v237_v15 = vld [vmem:[%s5066_s1 + $0x108] sm:$0xff] (!%p138_p2) }
   0x9   : > { %3233 = vmatpush3.bf16.msra.mxu0 (!%p138_p2), %v3908_v7  ;;  %v3935_v16 = vpack.c.bf16 (!%p138_p2), %v207_v13, %v206_v11  ;;  %v3937_v17 = vpack.c.bf16 (!%p138_p2), %v237_v15, %v236_v14  ;;  %v224_v18 = vld [vmem:[%s5066_s1 + $0xa0] sm:$0xff] (!%p138_p2)  ;;  %v225_v19 = vld [vmem:[%s5066_s1 + $0xa8] sm:$0xff] (!%p138_p2)  ;;  %v254_v20 = vld [vmem:[%s5066_s1 + $0x190] sm:$0xff] (!%p138_p2) }
   0xa   : > { %3235 = vmatprep.subr.bf16.mxu0 (!%p138_p2), %v3910_v8  ;;  %3263 = vmatprep.subr.bf16.mxu1 (!%p138_p2), %v3922_v12  ;;  %v3950_v21 = vpack.c.bf16 (!%p138_p2), %v225_v19, %v224_v18  ;;  %v255_v22 = vld [vmem:[%s5066_s1 + $0x198] sm:$0xff] (!%p138_p2)  ;;  %v208_v23 = vld [vmem:[%s5066_s1 + $0x20] sm:$0xff] (!%p138_p2)  ;;  %v209_v24 = vld [vmem:[%s5066_s1 + $0x28] sm:$0xff] (!%p138_p2) }
   0xb   : > { %3265 = vmatpush3.bf16.msra.mxu1 (!%p138_p2), %v3937_v17  ;;  %v3967_v25 = vpack.c.bf16 (!%p138_p2), %v255_v22, %v254_v20  ;;  %v238_v26 = vld [vmem:[%s5066_s1 + $0x110] sm:$0xff] (!%p138_p2)  ;;  %v239_v27 = vld [vmem:[%s5066_s1 + $0x118] sm:$0xff] (!%p138_p2)  ;;  %v3988_v37 = vpack.c.bf16 (!%p138_p2), %v209_v24, %v208_v23  ;;  %v256_v48 = vld [vmem:[%s5066_s1 + $0x1a0] sm:$0xff] (!%p138_p2) }
   0xc   : > { %v3978_v31 = vpack.c.bf16 (!%p138_p2), %v239_v27, %v238_v26  ;;  %v226_v32 = vld [vmem:[%s5066_s1 + $0xb0] sm:$0xff] (!%p138_p2)  ;;  %v227_v47 = vld [vmem:[%s5066_s1 + $0xb8] sm:$0xff] (!%p138_p2)  ;;  %v257_v49 = vld [vmem:[%s5066_s1 + $0x1a8] sm:$0xff] (!%p138_p2) }
   0xd   : > { %s5070_s13 = smov (!%p161_p3, %s2461_s13), 1  ;;  %3237 = vmatpush3.bf16.msra.mxu0 %v3935_v16  ;;  %3267 = vmatprep.subr.bf16.mxu1 %v3967_v25  ;;  %v4010_v50 = vpack.c.bf16 %v227_v47, %v226_v32  ;;  %v4012_v51 = vpack.c.bf16 %v257_v49, %v256_v48  ;;  %v210_v52 = vld [vmem:[%s5066_s1 + $0x30] sm:$0xff]  ;;  %v211_v53 = vld [vmem:[%s5066_s1 + $0x38] sm:$0xff]  ;;  %v240_v54 = vld [vmem:[%s5066_s1 + $0x120] sm:$0xff] }
   0xe   : > { %s3762_s11 = smul.u32 144, %s5070_s13  ;;  %3239 = vmatprep.subr.bf16.mxu0 %v3950_v21  ;;  %v4023_v55 = vpack.c.bf16 %v211_v53, %v210_v52  ;;  %v241_v56 = vld [vmem:[%s5066_s1 + $0x128] sm:$0xff]  ;;  %v228_v57 = vld [vmem:[%s5066_s1 + $0xc0] sm:$0xff]  ;;  %v258_v62 = vld [vmem:[%s5066_s1 + $0x1b0] sm:$0xff] }
   0xf   : > { %3269 = vmatpush3.bf16.msra.mxu1 %v3978_v31  ;;  %v229_v58 = vld [vmem:[%s5066_s1 + $0xc8] sm:$0xff]  ;;  %v4036_v60 = vpack.c.bf16 %v241_v56, %v240_v54  ;;  %v259_v63 = vld [vmem:[%s5066_s1 + $0x1b8] sm:$0xff]  ;;  %v212_v0 = vld [vmem:[%s5066_s1 + $0x40] sm:$0xff]  ;;  %s3763_s14 = smul.u32 56, %s5070_s13 }
  0x10   : > { %s3964_s28 = scalar_lea.vmem %s5065_s0, %s3762_s11  ;;  %v4038_v61 = vpack.c.bf16 %v229_v58, %v228_v57  ;;  %3271 = vmatprep.subr.bf16.mxu1 %v4012_v51  ;;  %v4051_v2 = vpack.c.bf16 %v259_v63, %v258_v62  ;;  %v213_v4 = vld [vmem:[%s5066_s1 + $0x48] sm:$0xff]  ;;  %v242_v5 = vld [vmem:[%s5066_s1 + $0x130] sm:$0xff]  ;;  %v243_v6 = vld [vmem:[%s5066_s1 + $0x138] sm:$0xff] }
  0x11   : > { %v173_v28 = vld [vmem:[%s3964_s28 + $0x1] sm:$0x7f]  ;;  %v2468_v29 = vld [vmem:[%s3964_s28 + $0x10] sm:$0x7f]  ;;  %3241 = vmatpush3.bf16.msra.mxu0 %v3988_v37  ;;  %v4064_v9 = vpack.c.bf16 %v213_v4, %v212_v0  ;;  %v4066_v10 = vpack.c.bf16 %v243_v6, %v242_v5  ;;  %v231_v13 = vld [vmem:[%s5066_s1 + $0xd8] sm:$0xff]  ;;  %s4988_s6 = scalar_lea.vmem %s5068_s3, %s3763_s14 }
  0x12   : > { %v2470_v30 = vld [vmem:[%s3964_s28 + $0x12] sm:$0x7f]  ;;  %v3776_v33 = vpack.i.bf16 %v173_v28, %v2468_v29  ;;  %v2472_v34 = vld [vmem:[%s3964_s28 + $0x21] sm:$0x7f]  ;;  %3243 = vmatprep.subr.bf16.mxu0 %v4010_v50  ;;  %v261_v18 = vld [vmem:[%s5066_s1 + $0x1c8] sm:$0xff] }
  0x13   : > { %v2477_v35 = vld [vmem:[%s3964_s28 + $0x11] sm:$0x7f]  ;;  %v2479_v36 = vld [vmem:[%s3964_s28 + $0x20] sm:$0x7f]  ;;  %v3781_v42 = vpack.i.bf16 %v2470_v30, %v2472_v34  ;;  %3273 = vmatpush3.bf16.msra.mxu1 %v4036_v60  ;;  %v215_v20 = vld [vmem:[%s5066_s1 + $0x58] sm:$0xff] }
  0x14   : > { %v3786_v38 = vpack.i.bf16 %v2477_v35, %v2479_v36  ;;  %v2481_v39 = vld [vmem:[%s3964_s28 + $0x22] sm:$0x7f]  ;;  %v2483_v40 = vld [vmem:[%s3964_s28 + $0x31] sm:$0x7f]  ;;  %3777 = vrot.lane.b32.xlu0 %v3776_v33, %s3854_s8  ;;  %3275 = vmatprep.subr.bf16.mxu1 %v4051_v2  ;;  %v263_v29 = vld [vmem:[%s5066_s1 + $0x1d8] sm:$0xff] }
  0x15   : > { %v2488_v41 = vld [vmem:[%s3964_s28 + $0x21] sm:$0x7f]  ;;  %v2490_v43 = vld [vmem:[%s3964_s28 + $0x30] sm:$0x7f]  ;;  %v3791_v46 = vpack.i.bf16 %v2481_v39, %v2483_v40  ;;  %3245 = vmatpush3.bf16.msra.mxu0 %v4023_v55  ;;  %v245_v24 = vld [vmem:[%s5066_s1 + $0x148] sm:$0xff] }
  0x16   : > { %v2492_v44 = vld [vmem:[%s3964_s28 + $0x32] sm:$0x7f]  ;;  %v2494_v45 = vld [vmem:[%s3964_s28 + $0x41] sm:$0x7f]  ;;  %3787 = vrot.lane.b32.xlu1 %v3786_v38, %s3854_s8  ;;  %v3796_v59 = vpack.i.bf16 %v2488_v41, %v2490_v43  ;;  %3247 = vmatprep.subr.bf16.mxu0 %v4038_v61  ;;  %v233_v27 = vld [vmem:[%s5066_s1 + $0xe8] sm:$0xff] }
  0x17   : > { %v3801_v1 = vpack.i.bf16 %v2492_v44, %v2494_v45  ;;  %v230_v11 = vld [vmem:[%s5066_s1 + $0xd0] sm:$0xff]  ;;  %v260_v14 = vld [vmem:[%s5066_s1 + $0x1c0] sm:$0xff]  ;;  %3277 = vmatpush3.bf16.msra.mxu1 %v4066_v10  ;;  %v217_v34 = vld [vmem:[%s5066_s1 + $0x68] sm:$0xff] }
  0x18   : > { %3782 = vrot.lane.b32.xlu0 %v3781_v42, %s3854_s8  ;;  %v4079_v15 = vpack.c.bf16 %v231_v13, %v230_v11  ;;  %v214_v19 = vld [vmem:[%s5066_s1 + $0x50] sm:$0xff]  ;;  %v4091_v22 = vpack.c.bf16 %v261_v18, %v260_v14  ;;  %v244_v23 = vld [vmem:[%s5066_s1 + $0x140] sm:$0xff]  ;;  %v247_v39 = vld [vmem:[%s5066_s1 + $0x158] sm:$0xff]  ;;  %v3855_v14 = vmov 0.0|0.0  }
  0x19   : > { %v232_v26 = vld [vmem:[%s5066_s1 + $0xe0] sm:$0xff]  ;;  %v262_v28 = vld [vmem:[%s5066_s1 + $0x1d0] sm:$0xff]  ;;  %3249 = vmatpush3.bf16.msra.mxu0 %v4064_v9  ;;  %v4114_v30 = vpack.c.bf16 %v215_v20, %v214_v19  ;;  %v4116_v32 = vpack.c.bf16 %v245_v24, %v244_v23  ;;  %v235_v41 = vld [vmem:[%s5066_s1 + $0xf8] sm:$0xff] }
  0x1a   : > { %3792 = vrot.lane.b32.xlu1 %v3791_v46, %s3854_s8  ;;  %v216_v33 = vld [vmem:[%s5066_s1 + $0x60] sm:$0xff]  ;;  %3251 = vmatprep.subr.bf16.mxu0 %v4079_v15  ;;  %v4126_v35 = vpack.c.bf16 %v233_v27, %v232_v26  ;;  %v4128_v36 = vpack.c.bf16 %v263_v29, %v262_v28  ;;  %v246_v38 = vld [vmem:[%s5066_s1 + $0x150] sm:$0xff]  ;;  %v265_v43 = vld [vmem:[%s5066_s1 + $0x1e8] sm:$0xff] }
  0x1b   : > { %3279 = vmatprep.subr.bf16.mxu1 %v4091_v22  ;;  %v234_v40 = vld [vmem:[%s5066_s1 + $0xf0] sm:$0xff]  ;;  %v264_v42 = vld [vmem:[%s5066_s1 + $0x1e0] sm:$0xff]  ;;  %v4150_v44 = vpack.c.bf16 %v217_v34, %v216_v33  ;;  %v4152_v45 = vpack.c.bf16 %v247_v39, %v246_v38  ;;  %v219_v53 = vld [vmem:[%s5066_s1 + $0x78] sm:$0xff] }
  0x1c   : > { %3797 = vrot.lane.b32.xlu0 %v3796_v59, %s3854_s8  ;;  %3281 = vmatpush3.bf16.msra.mxu1 %v4116_v32  ;;  %v218_v46 = vld [vmem:[%s5066_s1 + $0x70] sm:$0xff]  ;;  %v2501_v48 = vld [vmem:[%s3964_s28 + $0x40] sm:$0x7f]  ;;  %v4161_v49 = vpack.c.bf16 %v235_v41, %v234_v40  ;;  %v4163_v52 = vpack.c.bf16 %v265_v43, %v264_v42  ;;  %v249_v56 = vld [vmem:[%s5066_s1 + $0x168] sm:$0xff] }
  0x1d   : > { %3253 = vmatpush3.bf16.msra.mxu0 %v4114_v30  ;;  %v2499_v47 = vld [vmem:[%s3964_s28 + $0x31] sm:$0x7f]  ;;  %3283 = vmatprep.subr.bf16.mxu1 %v4128_v36  ;;  %v248_v54 = vld [vmem:[%s5066_s1 + $0x160] sm:$0xff]  ;;  %v267_v59 = vld [vmem:[%s5066_s1 + $0x1f8] sm:$0xff]  ;;  %v4183_v62 = vpack.c.bf16 %v219_v53, %v218_v46 }
  0x1e   : > { %3802 = vrot.lane.b32.xlu1 %v3801_v1, %s3854_s8  ;;  %3255 = vmatprep.subr.bf16.mxu0 %v4126_v35  ;;  %v3806_v57 = vpack.i.bf16 %v2499_v47, %v2501_v48  ;;  %v266_v58 = vld [vmem:[%s5066_s1 + $0x1f0] sm:$0xff]  ;;  %v4185_v63 = vpack.c.bf16 %v249_v56, %v248_v54  ;;  %v2503_v0 = vld [vmem:[%s3964_s28 + $0x42] sm:$0x7f]  ;;  %v251_v5 = vld [vmem:[%s5066_s1 + $0x178] sm:$0xff] }
  0x1f   : > { %v4190_v1 = vpack.c.bf16 %v267_v59, %v266_v58  ;;  %v250_v4 = vld [vmem:[%s5066_s1 + $0x170] sm:$0xff]  ;;  %v2510_v18 = vld [vmem:[%s3964_s28 + $0x41] sm:$0x7f]  ;;  %v269_v43 = vld [vmem:[%s5066_s1 + $0x208] sm:$0xff] }
  0x20   : > { %3807 = vrot.lane.b32.xlu0 %v3806_v57, %s3854_s8  ;;  %3285 = vmatpush3.bf16.msra.mxu1 %v4152_v45  ;;  %v2505_v6 = vld [vmem:[%s3964_s28 + $0x51] sm:$0x7f]  ;;  %v4201_v13 = vpack.c.bf16 %v251_v5, %v250_v4  ;;  %v2516_v24 = vld [vmem:[%s3964_s28 + $0x61] sm:$0x7f] }
  0x21   : > { %3257 = vmatpush3.bf16.msra.mxu0 %v4150_v44  ;;  %3287 = vmatprep.subr.bf16.mxu1 %v4163_v52  ;;  %v3811_v11 = vpack.i.bf16 %v2503_v0, %v2505_v6  ;;  %v2512_v19 = vld [vmem:[%s3964_s28 + $0x50] sm:$0x7f]  ;;  %v2523_v28 = vld [vmem:[%s3964_s28 + $0x60] sm:$0x7f] }
  0x22   : > { %3259 = vmatprep.subr.bf16.mxu0 %v4161_v49  ;;  %v3816_v20 = vpack.i.bf16 %v2510_v18, %v2512_v19  ;;  %v2514_v23 = vld [vmem:[%s3964_s28 + $0x52] sm:$0x7f]  ;;  %v2525_v33 = vld [vmem:[%s3964_s28 + $0x62] sm:$0x7f] }
  0x23   : > { %3812 = vrot.lane.b32.xlu1 %v3811_v11, %s3854_s8  ;;  %v3821_v26 = vpack.i.bf16 %v2514_v23, %v2516_v24  ;;  %v2521_v27 = vld [vmem:[%s3964_s28 + $0x51] sm:$0x7f]  ;;  %v2532_v39 = vld [vmem:[%s3964_s28 + $0x61] sm:$0x7f]  ;;  %v271_v11 = vld [vmem:[%s5066_s1 + $0x218] sm:$0xff] }
  0x24   : > { %3289 = vmatpush3.bf16.msra.mxu1 %v4185_v63  ;;  %3817 = vrot.lane.b32.xlu0 %v3816_v20, %s3854_s8  ;;  %v3826_v29 = vpack.i.bf16 %v2521_v27, %v2523_v28  ;;  %v2527_v34 = vld [vmem:[%s3964_s28 + $0x71] sm:$0x7f]  ;;  %v268_v42 = vld [vmem:[%s5066_s1 + $0x200] sm:$0xff]  ;;  %v3857_v28 = vmov 0.0  }
  0x25   : > { %3261 = vmatpush3.bf16.msra.mxu0 %v4183_v62  ;;  %3291 = vmatprep.subr.bf16.mxu1 %v4190_v1  ;;  %v3831_v38 = vpack.i.bf16 %v2525_v33, %v2527_v34  ;;  %v2534_v40 = vld [vmem:[%s3964_s28 + $0x70] sm:$0x7f]  ;;  %v2538_v47 = vld [vmem:[%s3964_s28 + $0x81] sm:$0x7f]  ;;  %v4233_v59 = vpack.c.bf16 %v269_v43, %v268_v42  ;;  %v275_v43 = vld [vmem:[%s5066_s1 + $0x238] sm:$0xff] }
  0x26   : > { %3294 = vmatprep.subr.bf16.mxu0 %v3855_v14  ;;  %v3836_v41 = vpack.i.bf16 %v2532_v39, %v2534_v40  ;;  %v2536_v46 = vld [vmem:[%s3964_s28 + $0x72] sm:$0x7f]  ;;  %v174_v53 = vld [vmem:[%s3964_s28 + $0x2] sm:$0x7f] }
  0x27   : > { %3822 = vrot.lane.b32.xlu1 %v3821_v26, %s3854_s8  ;;  %v172_v54 = vld [vmem:[%s3964_s28] sm:$0x7f]  ;;  %v3841_v56 = vpack.i.bf16 %v2536_v46, %v2538_v47  ;;  %v270_v6 = vld [vmem:[%s5066_s1 + $0x210] sm:$0xff]  ;;  %v273_v39 = vld [vmem:[%s5066_s1 + $0x228] sm:$0xff] }
  0x28   : > { %3293 = vmatpush3.bf16.msra.mxu1 %v4201_v13  ;;  %3827 = vrot.lane.b32.xlu0 %v3826_v29, %s3854_s8  ;;  %v2471_v19 = vld [vmem:[%s3964_s28 + $0x20] sm:$0x7f]  ;;  %v2469_v20 = vld [vmem:[%s3964_s28 + $0x11] sm:$0x7f]  ;;  %v4250_v27 = vpack.c.bf16 %v271_v11, %v270_v6 }
  0x29   : > { %3307 = vmatprep.subr.bf16.mxu1 %v3895_v3  ;;  %v2478_v29 = vld [vmem:[%s3964_s28 + $0x12] sm:$0x7f]  ;;  %v2480_v6 = vld [vmem:[%s3964_s28 + $0x21] sm:$0x7f] }
  0x2a   : > { %v274_v42 = vld [vmem:[%s5066_s1 + $0x230] sm:$0xff] }
  0x2b   : > { %3832 = vrot.lane.b32.xlu1 %v3831_v38, %s3854_s8  ;;  %v272_v38 = vld [vmem:[%s5066_s1 + $0x220] sm:$0xff]  ;;  %v4279_v46 = vpack.c.bf16 %v275_v43, %v274_v42  ;;  %v1197_v43 = vld [vmem:[%s5066_s1 + $0x108] sm:$0xff] }
  0x2c   : > { %3837 = vrot.lane.b32.xlu0 %v3836_v41, %s3854_s8  ;;  %v4267_v41 = vpack.c.bf16 %v273_v39, %v272_v38  ;;  %v1171_v38 = vld [vmem:[%s5066_s1 + $0x38] sm:$0xff]  ;;  %v1196_v42 = vld [vmem:[%s5066_s1 + $0x100] sm:$0xff] }
  0x2f   : > { %3842 = vrot.lane.b32.xlu1 %v3841_v56, %s3854_s8 }
  0x86   : > { %v3778_v48 = vpop.permute.xlu0 %3777 }
  0x87   : > { %v3780_v57 = vunpack.i.h.bf16 %v3778_v48  ;;  %v3779_v58 = vunpack.i.l.bf16 %v3778_v48 }
  0x88   : > { %v4235_v0 = vpop.permute.xlu1 %3787 }
  0x89   : > { %v201_v4 = vsel %vm199_vm0, %v174_v53, %v3779_v58  ;;  %v200_v5 = vsel %vm199_vm0, %v172_v54, %v3780_v57  ;;  %v3789_v26 = vunpack.i.l.bf16 %v4235_v0  ;;  %v2473_v53 = vld [vmem:[%s3964_s28 + $0x22] sm:$0x7f]  ;;  %v2482_v54 = vld [vmem:[%s3964_s28 + $0x30] sm:$0x7f]  ;;  %v3790_v57 = vunpack.i.h.bf16 %v4235_v0 }
  0x8a   : > { %v3783_v18 = vpop.permute.xlu0 %3782  ;;  %349 = vmatprep.mubr.f32.mxu0 %v201_v4  ;;  %v2476_v58 = vld [vmem:[%s3964_s28 + $0x10] sm:$0x7f] }
  0x8b   : > { %v3785_v23 = vunpack.i.h.bf16 %v3783_v18  ;;  %v3784_v24 = vunpack.i.l.bf16 %v3783_v18  ;;  %350 = vmatmul.mubr.f32.vlgmr.msra.gmra.mrb[0].mxu0 %v200_v5  ;;  %v525_v40 = vsel %vm199_vm0, %v2478_v29, %v3789_v26  ;;  %v524_v4 = vsel %vm199_vm0, %v2476_v58, %v3790_v57  ;;  %v2484_v26 = vld [vmem:[%s3964_s28 + $0x32] sm:$0x7f]  ;;  %v2493_v29 = vld [vmem:[%s3964_s28 + $0x40] sm:$0x7f] }
  0x8c   : > { %3296 = vmatpush3.bf16.msra.mxu0 %v4233_v59  ;;  %3113 = vmatprep.mubr.msk.f32.mxu0 %vm3856_vm1, %v3857_v28  ;;  %v3793_v47 = vpop.permute.xlu1 %3792 }
  0x8d   : > { %v203_v33 = vsel %vm199_vm0, %v2471_v19, %v3784_v24  ;;  %3297 = vmatprep.subr.bf16.mxu0 %v3855_v14  ;;  %v202_v34 = vsel %vm199_vm0, %v2469_v20, %v3785_v23  ;;  %v3794_v48 = vunpack.i.l.bf16 %v3793_v47  ;;  %v3795_v0 = vunpack.i.h.bf16 %v3793_v47  ;;  %v2489_v20 = vld [vmem:[%s3964_s28 + $0x22] sm:$0x7f] }
  0x8e   : > { %419 = vmatprep.mubr.f32.mxu1 %v203_v33  ;;  %v3798_v5 = vpop.permute.xlu0 %3797  ;;  %v1188_v47 = vld [vmem:[%s5066_s1 + $0xc0] sm:$0xff] }
  0x8f   : > { %420 = vmatmul.mubr.f32.vlgmr.msra.gmra.mrb[0].mxu1 %v202_v34  ;;  %v527_v56 = vsel %vm199_vm0, %v2482_v54, %v3794_v48  ;;  %v3799_v11 = vunpack.i.l.bf16 %v3798_v5  ;;  %v526_v18 = vsel %vm199_vm0, %v2480_v6, %v3795_v0  ;;  %v1170_v34 = vld [vmem:[%s5066_s1 + $0x30] sm:$0xff]  ;;  %v1189_v48 = vld [vmem:[%s5066_s1 + $0xc8] sm:$0xff]  ;;  %v1215_v54 = vld [vmem:[%s5066_s1 + $0x198] sm:$0xff] }
  0x90   : > { %3299 = vmatpush3.bf16.msra.mxu0 %v4250_v27  ;;  %3309 = vmatpush3.bf16.msra.mxu1 %v3908_v7  ;;  %v4328_v19 = vpop.permute.xlu1 %3802  ;;  %v4489_v58 = vpack.c.bf16 %v1171_v38, %v1170_v34  ;;  %v1172_v0 = vld [vmem:[%s5066_s1 + $0x40] sm:$0xff]  ;;  %v2504_v6 = vld [vmem:[%s3964_s28 + $0x50] sm:$0x7f] }
  0x91   : > { %3300 = vmatprep.subr.bf16.mxu0 %v3855_v14  ;;  %3311 = vmatprep.subr.bf16.mxu1 %v3910_v8  ;;  %v3804_v23 = vunpack.i.l.bf16 %v4328_v19  ;;  %v843_v24 = vsel %vm199_vm0, %v2489_v20, %v3799_v11  ;;  %v1190_v20 = vld [vmem:[%s5066_s1 + $0xd0] sm:$0xff] }
  0x92   : > { %667 = vmatprep.mubr.f32.mxu1 %v525_v40  ;;  %v1178_v34 = vld [vmem:[%s5066_s1 + $0x70] sm:$0xff] }
  0x94   : > { %3302 = vmatpush3.bf16.msra.mxu0 %v4267_v41  ;;  %3313 = vmatpush3.bf16.msra.mxu1 %v3935_v16 }
  0x95   : > { %3303 = vmatprep.subr.bf16.mxu0 %v3855_v14  ;;  %3315 = vmatprep.subr.bf16.mxu1 %v3950_v21  ;;  %v4459_v39 = vpop.permute.xlu1 %3812 }
  0x96   : > { %v3814_v57 = vunpack.i.l.bf16 %v4459_v39 }
  0x98   : > { %3305 = vmatpush3.bf16.msra.mxu0 %v4279_v46  ;;  %3317 = vmatpush3.bf16.msra.mxu1 %v3988_v37 }
  0x99   : > { %3319 = vmatprep.subr.bf16.mxu1 %v4010_v50  ;;  %3339 = vmatprep.subr.bf16.mxu0 %v3922_v12 }
  0x9b   : > { %3114 = vmatmul.mubr.msk.f32.vlgmr.msra.gmra.mrb[2].mxu0 %vm199_vm0, %v2473_v53  ;;  %v1214_v53 = vld [vmem:[%s5066_s1 + $0x190] sm:$0xff] }
  0x9c   : > { %3321 = vmatpush3.bf16.msra.mxu1 %v4023_v55  ;;  %3341 = vmatpush3.bf16.msra.mxu0 %v3937_v17  ;;  %v4504_v11 = vpack.c.bf16 %v1215_v54, %v1214_v53  ;;  %v1222_v53 = vld [vmem:[%s5066_s1 + $0x1d0] sm:$0xff]  ;;  %v1223_v54 = vld [vmem:[%s5066_s1 + $0x1d8] sm:$0xff] }
  0x9d   : > { %3323 = vmatprep.subr.bf16.mxu1 %v4038_v61  ;;  %3343 = vmatprep.subr.bf16.mxu0 %v3967_v25 }
  0x9e   : > { %737 = vmatprep.mubr.f32.mxu0 %v527_v56  ;;  %v2495_v56 = vld [vmem:[%s3964_s28 + $0x42] sm:$0x7f] }
  0xa0   : > { %3325 = vmatpush3.bf16.msra.mxu1 %v4064_v9  ;;  %3345 = vmatpush3.bf16.msra.mxu0 %v3978_v31 }
  0xa1   : > { %3327 = vmatprep.subr.bf16.mxu1 %v4079_v15  ;;  %3347 = vmatprep.subr.bf16.mxu0 %v4012_v51 }
  0xa4   : > { %3329 = vmatpush3.bf16.msra.mxu1 %v4114_v30  ;;  %3349 = vmatpush3.bf16.msra.mxu0 %v4036_v60 }
  0xa5   : > { %3331 = vmatprep.subr.bf16.mxu1 %v4126_v35  ;;  %3351 = vmatprep.subr.bf16.mxu0 %v4051_v2 }
  0xa8   : > { %3333 = vmatpush3.bf16.msra.mxu1 %v4150_v44  ;;  %3353 = vmatpush3.bf16.msra.mxu0 %v4066_v10 }
  0xa9   : > { %3335 = vmatprep.subr.bf16.mxu1 %v4161_v49  ;;  %3355 = vmatprep.subr.bf16.mxu0 %v4091_v22 }
  0xac   : > { %3337 = vmatpush3.bf16.msra.mxu1 %v4183_v62  ;;  %3357 = vmatpush3.bf16.msra.mxu0 %v4116_v32 }
  0xad   : > { %3359 = vmatprep.subr.bf16.mxu0 %v4128_v36  ;;  %3370 = vmatprep.subr.bf16.mxu1 %v3855_v14 }
  0xaf   : > { %668 = vmatmul.mubr.f32.vlgmr.msra.gmra.mrb[2].mxu1 %v524_v4  ;;  %v4491_v4 = vpack.c.bf16 %v1197_v43, %v1196_v42  ;;  %v1179_v43 = vld [vmem:[%s5066_s1 + $0x78] sm:$0xff] }
  0xb0   : > { %3361 = vmatpush3.bf16.msra.mxu0 %v4152_v45  ;;  %3372 = vmatpush3.bf16.msra.mxu1 %v4233_v59 }
  0xb1   : > { %3363 = vmatprep.subr.bf16.mxu0 %v4163_v52  ;;  %3373 = vmatprep.subr.bf16.mxu1 %v3855_v14 }
  0xb2   : > { %3132 = vmatprep.mubr.msk.f32.mxu1 %vm3856_vm1, %v3857_v28 }
  0xb4   : > { %3365 = vmatpush3.bf16.msra.mxu0 %v4185_v63  ;;  %3375 = vmatpush3.bf16.msra.mxu1 %v4250_v27 }
  0xb5   : > { %3367 = vmatprep.subr.bf16.mxu0 %v4190_v1  ;;  %3376 = vmatprep.subr.bf16.mxu1 %v3855_v14 }
  0xb8   : > { %3369 = vmatpush3.bf16.msra.mxu0 %v4201_v13  ;;  %3378 = vmatpush3.bf16.msra.mxu1 %v4267_v41 }
  0xb9   : > { %3379 = vmatprep.subr.bf16.mxu1 %v3855_v14  ;;  %3383 = vmatprep.subr.bf16.mxu0 %v3895_v3  ;;  %v845_v3 = vsel %vm199_vm0, %v2493_v29, %v3804_v23  ;;  %v1191_v23 = vld [vmem:[%s5066_s1 + $0xd8] sm:$0xff]  ;;  %v1163_v29 = vsel %vm199_vm0, %v2504_v6, %v3814_v57  ;;  %v4631_v57 = vpack.c.bf16 %v1179_v43, %v1178_v34  ;;  %v2498_v6 = vld [vmem:[%s3964_s28 + $0x30] sm:$0x7f]  ;;  %v3823_v34 = vpop.permute.xlu1 %3822  ;;  %v2511_v43 = vld [vmem:[%s3964_s28 + $0x42] sm:$0x7f] }
  0xbb   : > { %738 = vmatmul.mubr.f32.vlgmr.msra.gmra.mrb[4].mxu0 %v526_v18  ;;  %v1198_v18 = vld [vmem:[%s5066_s1 + $0x110] sm:$0xff] }
  0xbc   : > { %3381 = vmatpush3.bf16.msra.mxu1 %v4279_v46  ;;  %3385 = vmatpush3.bf16.msra.mxu0 %v3908_v7  ;;  %v3800_v7 = vunpack.i.h.bf16 %v3798_v5  ;;  %v1173_v5 = vld [vmem:[%s5066_s1 + $0x48] sm:$0xff] }
  0xbd   : > { %3387 = vmatprep.subr.bf16.mxu0 %v3910_v8  ;;  %3415 = vmatprep.subr.bf16.mxu1 %v3922_v12  ;;  %v2487_v8 = vld [vmem:[%s3964_s28 + $0x20] sm:$0x7f] }
  0xbe   : > { %985 = vmatprep.mubr.f32.mxu0 %v843_v24  ;;  %v1180_v12 = vld [vmem:[%s5066_s1 + $0x80] sm:$0xff] }
  0xbf   : > { %3133 = vmatmul.mubr.msk.f32.vlgmr.msra.gmra.mrb[4].mxu1 %vm199_vm0, %v2484_v26  ;;  %v1216_v24 = vld [vmem:[%s5066_s1 + $0x1a0] sm:$0xff]  ;;  %v1217_v26 = vld [vmem:[%s5066_s1 + $0x1a8] sm:$0xff] }
  0xc0   : > { %3389 = vmatpush3.bf16.msra.mxu0 %v3935_v16  ;;  %3417 = vmatpush3.bf16.msra.mxu1 %v3937_v17  ;;  %v1181_v16 = vld [vmem:[%s5066_s1 + $0x88] sm:$0xff]  ;;  %v3805_v17 = vunpack.i.h.bf16 %v4328_v19  ;;  %v1199_v19 = vld [vmem:[%s5066_s1 + $0x118] sm:$0xff] }
  0xc1   : > { %3391 = vmatprep.subr.bf16.mxu0 %v3950_v21  ;;  %3419 = vmatprep.subr.bf16.mxu1 %v3967_v25  ;;  %v842_v21 = vsel %vm199_vm0, %v2487_v8, %v3800_v7  ;;  %v4378_v25 = vpop.permute.xlu0 %3807  ;;  %v4530_v7 = vpack.c.bf16 %v1199_v19, %v1198_v18  ;;  %v1174_v8 = vld [vmem:[%s5066_s1 + $0x50] sm:$0xff]  ;;  %v1207_v19 = vld [vmem:[%s5066_s1 + $0x158] sm:$0xff] }
  0xc2   : > { %1055 = vmatprep.mubr.f32.mxu1 %v845_v3  ;;  %v4528_v3 = vpack.c.bf16 %v1173_v5, %v1172_v0  ;;  %v4637_v5 = vpack.c.bf16 %v1223_v54, %v1222_v53  ;;  %v1206_v18 = vld [vmem:[%s5066_s1 + $0x150] sm:$0xff]  ;;  %v2515_v54 = vld [vmem:[%s3964_s28 + $0x60] sm:$0x7f] }
  0xc3   : > { %v2506_v53 = vld [vmem:[%s3964_s28 + $0x52] sm:$0x7f] }
  0xc4   : > { %3393 = vmatpush3.bf16.msra.mxu0 %v3988_v37  ;;  %3421 = vmatpush3.bf16.msra.mxu1 %v3978_v31  ;;  %v2491_v31 = vld [vmem:[%s3964_s28 + $0x31] sm:$0x7f]  ;;  %v4383_v37 = vpack.c.bf16 %v1181_v16, %v1180_v12  ;;  %v1175_v12 = vld [vmem:[%s5066_s1 + $0x58] sm:$0xff]  ;;  %v4540_v16 = vpack.c.bf16 %v1191_v23, %v1190_v20  ;;  %v1225_v20 = vld [vmem:[%s5066_s1 + $0x1e8] sm:$0xff] }
  0xc5   : > { %3395 = vmatprep.subr.bf16.mxu0 %v4010_v50  ;;  %3423 = vmatprep.subr.bf16.mxu1 %v4012_v51  ;;  %v1164_v50 = vld [vmem:[%s5066_s1] sm:$0xff]  ;;  %v1165_v51 = vld [vmem:[%s5066_s1 + $0x8] sm:$0xff] }
  0xc8   : > { %3397 = vmatpush3.bf16.msra.mxu0 %v4023_v55  ;;  %3425 = vmatpush3.bf16.msra.mxu1 %v4036_v60  ;;  %v1182_v55 = vld [vmem:[%s5066_s1 + $0x90] sm:$0xff]  ;;  %v1183_v60 = vld [vmem:[%s5066_s1 + $0x98] sm:$0xff] }
  0xc9   : > { %3399 = vmatprep.subr.bf16.mxu0 %v4038_v61  ;;  %3427 = vmatprep.subr.bf16.mxu1 %v4051_v2  ;;  %v3809_v61 = vunpack.i.l.bf16 %v4378_v25  ;;  %v844_v2 = vsel %vm199_vm0, %v2491_v31, %v3805_v17  ;;  %v4542_v17 = vpack.c.bf16 %v1217_v26, %v1216_v24  ;;  %v1201_v31 = vld [vmem:[%s5066_s1 + $0x128] sm:$0xff]  ;;  %v4655_v24 = vpack.c.bf16 %v1207_v19, %v1206_v18  ;;  %v2509_v18 = vld [vmem:[%s3964_s28 + $0x40] sm:$0x7f] }
  0xca   : > { %v1546_v19 = vld [vmem:[%s5066_s1 + $0x200] sm:$0xff] }
  0xcc   : > { %3401 = vmatpush3.bf16.msra.mxu0 %v4064_v9  ;;  %3429 = vmatpush3.bf16.msra.mxu1 %v4066_v10  ;;  %v4401_v9 = vpack.c.bf16 %v1165_v51, %v1164_v50  ;;  %v2500_v10 = vld [vmem:[%s3964_s28 + $0x32] sm:$0x7f]  ;;  %v1192_v50 = vld [vmem:[%s5066_s1 + $0xe0] sm:$0xff]  ;;  %v1193_v51 = vld [vmem:[%s5066_s1 + $0xe8] sm:$0xff] }
  0xcd   : > { %3403 = vmatprep.subr.bf16.mxu0 %v4079_v15  ;;  %3431 = vmatprep.subr.bf16.mxu1 %v4091_v22  ;;  %v4406_v15 = vpack.c.bf16 %v1183_v60, %v1182_v55  ;;  %v1166_v22 = vld [vmem:[%s5066_s1 + $0x10] sm:$0xff]  ;;  %v1219_v60 = vld [vmem:[%s5066_s1 + $0x1b8] sm:$0xff] }
  0xce   : > { %v1218_v55 = vld [vmem:[%s5066_s1 + $0x1b0] sm:$0xff] }
  0xd0   : > { %3405 = vmatpush3.bf16.msra.mxu0 %v4114_v30  ;;  %3433 = vmatpush3.bf16.msra.mxu1 %v4116_v32  ;;  %v1167_v30 = vld [vmem:[%s5066_s1 + $0x18] sm:$0xff]  ;;  %v1184_v32 = vld [vmem:[%s5066_s1 + $0xa0] sm:$0xff] }
  0xd1   : > { %3407 = vmatprep.subr.bf16.mxu0 %v4126_v35  ;;  %3435 = vmatprep.subr.bf16.mxu1 %v4128_v36  ;;  %v1185_v35 = vld [vmem:[%s5066_s1 + $0xa8] sm:$0xff]  ;;  %v1161_v36 = vsel %vm199_vm0, %v2500_v10, %v3809_v61  ;;  %v4564_v61 = vpack.c.bf16 %v1175_v12, %v1174_v8  ;;  %v1176_v10 = vld [vmem:[%s5066_s1 + $0x60] sm:$0xff]  ;;  %v1226_v12 = vld [vmem:[%s5066_s1 + $0x1f0] sm:$0xff] }
  0xd2   : > { %v1209_v8 = vld [vmem:[%s5066_s1 + $0x168] sm:$0xff] }
  0xd4   : > { %3409 = vmatpush3.bf16.msra.mxu0 %v4150_v44  ;;  %3437 = vmatpush3.bf16.msra.mxu1 %v4152_v45  ;;  %v4425_v44 = vpack.c.bf16 %v1167_v30, %v1166_v22  ;;  %v4429_v45 = vpack.c.bf16 %v1185_v35, %v1184_v32  ;;  %v1177_v22 = vld [vmem:[%s5066_s1 + $0x68] sm:$0xff]  ;;  %v4576_v30 = vpack.c.bf16 %v1193_v51, %v1192_v50  ;;  %v1202_v35 = vld [vmem:[%s5066_s1 + $0x130] sm:$0xff] }
  0xd5   : > { %3411 = vmatprep.subr.bf16.mxu0 %v4161_v49  ;;  %3439 = vmatprep.subr.bf16.mxu1 %v4163_v52  ;;  %v1168_v49 = vld [vmem:[%s5066_s1 + $0x20] sm:$0xff]  ;;  %v1169_v52 = vld [vmem:[%s5066_s1 + $0x28] sm:$0xff]  ;;  %v4578_v32 = vpack.c.bf16 %v1219_v60, %v1218_v55  ;;  %v1210_v50 = vld [vmem:[%s5066_s1 + $0x170] sm:$0xff] }
  0xd6   : > { %v4451_v33 = vpack.c.bf16 %v1169_v52, %v1168_v49  ;;  %v1194_v49 = vld [vmem:[%s5066_s1 + $0xf0] sm:$0xff]  ;;  %v1195_v52 = vld [vmem:[%s5066_s1 + $0xf8] sm:$0xff]  ;;  %v1233_v60 = vld [vmem:[%s5066_s1 + $0x228] sm:$0xff] }
  0xd7   : > { %v4609_v38 = vpack.c.bf16 %v1195_v52, %v1194_v49  ;;  %v1211_v55 = vld [vmem:[%s5066_s1 + $0x178] sm:$0xff]  ;;  %v2502_v49 = vld [vmem:[%s3964_s28 + $0x41] sm:$0x7f]  ;;  %v1234_v52 = vld [vmem:[%s5066_s1 + $0x230] sm:$0xff] }
  0xd8   : > { %3413 = vmatpush3.bf16.msra.mxu0 %v4183_v62  ;;  %3441 = vmatpush3.bf16.msra.mxu1 %v4185_v63  ;;  %v1186_v62 = vld [vmem:[%s5066_s1 + $0xb0] sm:$0xff]  ;;  %v1187_v63 = vld [vmem:[%s5066_s1 + $0xb8] sm:$0xff] }
  0xd9   : > { %3443 = vmatprep.subr.bf16.mxu1 %v4190_v1  ;;  %3446 = vmatprep.subr.bf16.mxu0 %v3855_v14  ;;  %v1212_v1 = vld [vmem:[%s5066_s1 + $0x180] sm:$0xff]  ;;  %v4463_v40 = vpack.c.bf16 %v1187_v63, %v1186_v62  ;;  %v1221_v63 = vld [vmem:[%s5066_s1 + $0x1c8] sm:$0xff] }
  0xda   : > { %v1220_v62 = vld [vmem:[%s5066_s1 + $0x1c0] sm:$0xff] }
  0xdb   : > { %986 = vmatmul.mubr.f32.vlgmr.msra.gmra.mrb[6].mxu0 %v842_v21  ;;  %v1200_v21 = vld [vmem:[%s5066_s1 + $0x120] sm:$0xff]  ;;  %v4611_v42 = vpack.c.bf16 %v1221_v63, %v1220_v62 }
  0xdc   : > { %3445 = vmatpush3.bf16.msra.mxu1 %v4201_v13  ;;  %3448 = vmatpush3.bf16.msra.mxu0 %v4233_v59  ;;  %v1213_v13 = vld [vmem:[%s5066_s1 + $0x188] sm:$0xff] }
  0xdd   : > { %3449 = vmatprep.subr.bf16.mxu0 %v3855_v14  ;;  %3459 = vmatprep.subr.bf16.mxu1 %v4383_v37 }
  0xde   : > { %3151 = vmatprep.mubr.msk.f32.mxu0 %vm3856_vm1, %v3857_v28 }
  0xdf   : > { %1056 = vmatmul.mubr.f32.vlgmr.msra.gmra.mrb[6].mxu1 %v844_v2  ;;  %v4566_v2 = vpack.c.bf16 %v1201_v31, %v1200_v21  ;;  %v1227_v21 = vld [vmem:[%s5066_s1 + $0x1f8] sm:$0xff] }
  0xe0   : > { %3451 = vmatpush3.bf16.msra.mxu0 %v4250_v27  ;;  %3461 = vmatpush3.bf16.msra.mxu1 %v4401_v9  ;;  %v4682_v51 = vpack.c.bf16 %v1227_v21, %v1226_v12  ;;  %v2513_v12 = vld [vmem:[%s3964_s28 + $0x51] sm:$0x7f] }
  0xe1   : > { %3452 = vmatprep.subr.bf16.mxu0 %v3855_v14  ;;  %3463 = vmatprep.subr.bf16.mxu1 %v4406_v15  ;;  %v1548_v21 = vld [vmem:[%s5066_s1 + $0x210] sm:$0xff] }
  0xe2   : > { %1303 = vmatprep.mubr.f32.mxu1 %v1161_v36  ;;  %v1203_v36 = vld [vmem:[%s5066_s1 + $0x138] sm:$0xff] }
  0xe4   : > { %3454 = vmatpush3.bf16.msra.mxu0 %v4267_v41  ;;  %3465 = vmatpush3.bf16.msra.mxu1 %v4425_v44  ;;  %v4465_v41 = vpack.c.bf16 %v1213_v13, %v1212_v1  ;;  %v4600_v1 = vpack.c.bf16 %v1177_v22, %v1176_v10  ;;  %v4602_v13 = vpack.c.bf16 %v1203_v36, %v1202_v35  ;;  %v3815_v10 = vunpack.i.h.bf16 %v4459_v39  ;;  %v3818_v36 = vpop.permute.xlu0 %3817 }
  0xe5   : > { %3455 = vmatprep.subr.bf16.mxu0 %v3855_v14  ;;  %3467 = vmatprep.subr.bf16.mxu1 %v4429_v45  ;;  %v4698_v22 = vpack.c.bf16 %v1211_v55, %v1210_v50  ;;  %v3819_v39 = vunpack.i.l.bf16 %v3818_v36  ;;  %v1549_v50 = vld [vmem:[%s5066_s1 + $0x218] sm:$0xff] }
  0xe6   : > { %v1162_v62 = vsel %vm199_vm0, %v2502_v49, %v3815_v10  ;;  %v2522_v10 = vld [vmem:[%s3964_s28 + $0x52] sm:$0x7f] }
  0xe8   : > { %3457 = vmatpush3.bf16.msra.mxu0 %v4279_v46  ;;  %3469 = vmatpush3.bf16.msra.mxu1 %v4451_v33  ;;  %v4502_v46 = vpack.c.bf16 %v1189_v48, %v1188_v47  ;;  %v1204_v47 = vld [vmem:[%s5066_s1 + $0x140] sm:$0xff]  ;;  %v1205_v48 = vld [vmem:[%s5066_s1 + $0x148] sm:$0xff] }
  0xe9   : > { %3471 = vmatprep.subr.bf16.mxu1 %v4463_v40  ;;  %3491 = vmatprep.subr.bf16.mxu0 %v4465_v41  ;;  %v4633_v0 = vpack.c.bf16 %v1205_v48, %v1204_v47  ;;  %v3824_v47 = vunpack.i.l.bf16 %v3823_v34  ;;  %v1479_v48 = vsel %vm199_vm0, %v2511_v43, %v3819_v39 }
  0xeb   : > { %3152 = vmatmul.mubr.msk.f32.vlgmr.msra.gmra.mrb[8].mxu0 %vm199_vm0, %v2495_v56  ;;  %v3810_v56 = vunpack.i.h.bf16 %v4378_v25  ;;  %v1224_v25 = vld [vmem:[%s5066_s1 + $0x1e0] sm:$0xff] }
  0xec   : > { %3473 = vmatpush3.bf16.msra.mxu1 %v4489_v58  ;;  %3493 = vmatpush3.bf16.msra.mxu0 %v4491_v4  ;;  %v4659_v26 = vpack.c.bf16 %v1225_v20, %v1224_v25  ;;  %v1547_v25 = vld [vmem:[%s5066_s1 + $0x208] sm:$0xff]  ;;  %v3825_v20 = vunpack.i.h.bf16 %v3823_v34  ;;  %v2528_v34 = vld [vmem:[%s3964_s28 + $0x72] sm:$0x7f] }
  0xed   : > { %3475 = vmatprep.subr.bf16.mxu1 %v4502_v46  ;;  %3495 = vmatprep.subr.bf16.mxu0 %v4504_v11  ;;  %v1160_v23 = vsel %vm199_vm0, %v2498_v6, %v3810_v56  ;;  %v1481_v56 = vsel %vm199_vm0, %v2515_v54, %v3824_v47  ;;  %v3820_v6 = vunpack.i.h.bf16 %v3818_v36  ;;  %v2537_v47 = vld [vmem:[%s3964_s28 + $0x80] sm:$0x7f]  ;;  %v2123_v54 = vld [vmem:[%s5066_s1 + $0x28] sm:$0xff] }
  0xee   : > { %1373 = vmatprep.mubr.f32.mxu0 %v1163_v29  ;;  %v1208_v29 = vld [vmem:[%s5066_s1 + $0x160] sm:$0xff] }
  0xef   : > { %v4675_v31 = vpack.c.bf16 %v1209_v8, %v1208_v29  ;;  %v4762_v29 = vpack.c.bf16 %v1547_v25, %v1546_v19  ;;  %v3828_v8 = vpop.permute.xlu0 %3827 }
  0xf0   : > { %3477 = vmatpush3.bf16.msra.mxu1 %v4528_v3  ;;  %3497 = vmatpush3.bf16.msra.mxu0 %v4530_v7  ;;  %v3829_v55 = vunpack.i.l.bf16 %v3828_v8 }
  0xf1   : > { %3479 = vmatprep.subr.bf16.mxu1 %v4540_v16  ;;  %3499 = vmatprep.subr.bf16.mxu0 %v4542_v17 }
  0xf2   : > { %v1797_v36 = vsel %vm199_vm0, %v2522_v10, %v3829_v55 }
  0xf4   : > { %3481 = vmatpush3.bf16.msra.mxu1 %v4564_v61  ;;  %3501 = vmatpush3.bf16.msra.mxu0 %v4566_v2 }
  0xf5   : > { %3483 = vmatprep.subr.bf16.mxu1 %v4576_v30  ;;  %3503 = vmatprep.subr.bf16.mxu0 %v4578_v32 }
  0xf8   : > { %3485 = vmatpush3.bf16.msra.mxu1 %v4600_v1  ;;  %3505 = vmatpush3.bf16.msra.mxu0 %v4602_v13 }
  0xf9   : > { %3487 = vmatprep.subr.bf16.mxu1 %v4609_v38  ;;  %3507 = vmatprep.subr.bf16.mxu0 %v4611_v42 }
  0xfc   : > { %3489 = vmatpush3.bf16.msra.mxu1 %v4631_v57  ;;  %3509 = vmatpush3.bf16.msra.mxu0 %v4633_v0 }
  0xfd   : > { %3511 = vmatprep.subr.bf16.mxu0 %v4637_v5  ;;  %3522 = vmatprep.subr.bf16.mxu1 %v3855_v14 }
  0xff   : > { %1304 = vmatmul.mubr.f32.vlgmr.msra.gmra.mrb[8].mxu1 %v1160_v23  ;;  %v1478_v23 = vsel %vm199_vm0, %v2509_v18, %v3820_v6  ;;  %v2141_v6 = vld [vmem:[%s5066_s1 + $0xb8] sm:$0xff] }
 0x100   : > { %3513 = vmatpush3.bf16.msra.mxu0 %v4655_v24  ;;  %3524 = vmatpush3.bf16.msra.mxu1 %v4233_v59  ;;  %v1232_v59 = vld [vmem:[%s5066_s1 + $0x220] sm:$0xff] }
 0x101   : > { %3515 = vmatprep.subr.bf16.mxu0 %v4659_v26  ;;  %3525 = vmatprep.subr.bf16.mxu1 %v3855_v14  ;;  %v4700_v35 = vpack.c.bf16 %v1233_v60, %v1232_v59  ;;  %v1480_v59 = vsel %vm199_vm0, %v2513_v12, %v3825_v20  ;;  %v4776_v60 = vpack.c.bf16 %v1549_v50, %v1548_v21  ;;  %v4897_v20 = vld [vmem:[%s5067_s2] ss:$0 sm:$0xff]  ;;  %v2125_v12 = vld [vmem:[%s5066_s1 + $0x38] sm:$0xff]  ;;  %v2143_v50 = vld [vmem:[%s5066_s1 + $0xc8] sm:$0xff] }
 0x102   : > { %3170 = vmatprep.mubr.msk.f32.mxu1 %vm3856_vm1, %v3857_v28 }
 0x104   : > { %3517 = vmatpush3.bf16.msra.mxu0 %v4675_v31  ;;  %3527 = vmatpush3.bf16.msra.mxu1 %v4250_v27  ;;  %v1235_v27 = vld [vmem:[%s5066_s1 + $0x238] sm:$0xff] }
 0x105   : > { %3519 = vmatprep.subr.bf16.mxu0 %v4682_v51  ;;  %3528 = vmatprep.subr.bf16.mxu1 %v3855_v14  ;;  %v4714_v63 = vpack.c.bf16 %v1235_v27, %v1234_v52  ;;  %v2526_v52 = vld [vmem:[%s3964_s28 + $0x70] sm:$0x7f]  ;;  %v2139_v27 = vld [vmem:[%s5066_s1 + $0xa8] sm:$0xff] }
 0x108   : > { %3521 = vmatpush3.bf16.msra.mxu0 %v4698_v22  ;;  %3530 = vmatpush3.bf16.msra.mxu1 %v4700_v35 }
 0x109   : > { %3531 = vmatprep.subr.bf16.mxu1 %v3855_v14  ;;  %3535 = vmatprep.subr.bf16.mxu0 %v4383_v37 }
 0x10b   : > { %1374 = vmatmul.mubr.f32.vlgmr.msra.gmra.mrb[10].mxu0 %v1162_v62 }
 0x10c   : > { %3533 = vmatpush3.bf16.msra.mxu1 %v4714_v63  ;;  %3537 = vmatpush3.bf16.msra.mxu0 %v4401_v9 }
 0x10d   : > { %3539 = vmatprep.subr.bf16.mxu0 %v4406_v15  ;;  %3567 = vmatprep.subr.bf16.mxu1 %v4465_v41 }
 0x10e   : > { %1621 = vmatprep.mubr.f32.mxu0 %v1479_v48 }
 0x10f   : > { %3171 = vmatmul.mubr.msk.f32.vlgmr.msra.gmra.mrb[10].mxu1 %vm199_vm0, %v2506_v53  ;;  %v2122_v53 = vld [vmem:[%s5066_s1 + $0x20] sm:$0xff] }
 0x110   : > { %3541 = vmatpush3.bf16.msra.mxu0 %v4425_v44  ;;  %3569 = vmatpush3.bf16.msra.mxu1 %v4491_v4  ;;  %v3696_v25 = vpack.c.bf16 %v2123_v54, %v2122_v53 }
 0x111   : > { %3543 = vmatprep.subr.bf16.mxu0 %v4429_v45  ;;  %3571 = vmatprep.subr.bf16.mxu1 %v4504_v11 }
 0x112   : > { %1691 = vmatprep.mubr.f32.mxu1 %v1481_v56 }
 0x114   : > { %3545 = vmatpush3.bf16.msra.mxu0 %v4451_v33  ;;  %3573 = vmatpush3.bf16.msra.mxu1 %v4530_v7 }
 0x115   : > { %3547 = vmatprep.subr.bf16.mxu0 %v4463_v40  ;;  %3575 = vmatprep.subr.bf16.mxu1 %v4542_v17 }
 0x118   : > { %3549 = vmatpush3.bf16.msra.mxu0 %v4489_v58  ;;  %3577 = vmatpush3.bf16.msra.mxu1 %v4566_v2 }
 0x119   : > { %3551 = vmatprep.subr.bf16.mxu0 %v4502_v46  ;;  %3579 = vmatprep.subr.bf16.mxu1 %v4578_v32 }
 0x11c   : > { %3553 = vmatpush3.bf16.msra.mxu0 %v4528_v3  ;;  %3581 = vmatpush3.bf16.msra.mxu1 %v4602_v13 }
 0x11d   : > { %3555 = vmatprep.subr.bf16.mxu0 %v4540_v16  ;;  %3583 = vmatprep.subr.bf16.mxu1 %v4611_v42 }
 0x120   : > { %3557 = vmatpush3.bf16.msra.mxu0 %v4564_v61  ;;  %3585 = vmatpush3.bf16.msra.mxu1 %v4633_v0 }
 0x121   : > { %3559 = vmatprep.subr.bf16.mxu0 %v4576_v30  ;;  %3587 = vmatprep.subr.bf16.mxu1 %v4637_v5 }
 0x124   : > { %3561 = vmatpush3.bf16.msra.mxu0 %v4600_v1  ;;  %3589 = vmatpush3.bf16.msra.mxu1 %v4655_v24 }
 0x125   : > { %3563 = vmatprep.subr.bf16.mxu0 %v4609_v38  ;;  %3591 = vmatprep.subr.bf16.mxu1 %v4659_v26 }
 0x128   : > { %3565 = vmatpush3.bf16.msra.mxu0 %v4631_v57  ;;  %3593 = vmatpush3.bf16.msra.mxu1 %v4675_v31 }
 0x129   : > { %3595 = vmatprep.subr.bf16.mxu1 %v4682_v51  ;;  %3598 = vmatprep.subr.bf16.mxu0 %v3855_v14 }
 0x12b   : > { %1622 = vmatmul.mubr.f32.vlgmr.msra.gmra.mrb[12].mxu0 %v1478_v23 }
 0x12c   : > { %3597 = vmatpush3.bf16.msra.mxu1 %v4698_v22  ;;  %3600 = vmatpush3.bf16.msra.mxu0 %v4762_v29 }
 0x12d   : > { %3601 = vmatprep.subr.bf16.mxu0 %v3855_v14  ;;  %3611 = vmatprep.subr.bf16.mxu1 %v4383_v37  ;;  %v3833_v37 = vpop.permute.xlu1 %3832 }
 0x12e   : > { %3189 = vmatprep.mubr.msk.f32.mxu0 %vm3856_vm1, %v3857_v28  ;;  %v3834_v49 = vunpack.i.l.bf16 %v3833_v37 }
 0x12f   : > { %1692 = vmatmul.mubr.f32.vlgmr.msra.gmra.mrb[12].mxu1 %v1480_v59 }
 0x130   : > { %3603 = vmatpush3.bf16.msra.mxu0 %v4776_v60  ;;  %3613 = vmatpush3.bf16.msra.mxu1 %v4401_v9  ;;  %v2517_v9 = vld [vmem:[%s3964_s28 + $0x62] sm:$0x7f] }
 0x131   : > { %3604 = vmatprep.subr.bf16.mxu0 %v3855_v14  ;;  %3615 = vmatprep.subr.bf16.mxu1 %v4406_v15  ;;  %v1799_v15 = vsel %vm199_vm0, %v2526_v52, %v3834_v49  ;;  %v2127_v49 = vld [vmem:[%s5066_s1 + $0x48] sm:$0xff] }
 0x132   : > { %1939 = vmatprep.mubr.f32.mxu1 %v1797_v36 }
 0x134   : > { %3606 = vmatpush3.bf16.msra.mxu0 %v4700_v35  ;;  %3617 = vmatpush3.bf16.msra.mxu1 %v4425_v44  ;;  %v3830_v44 = vunpack.i.h.bf16 %v3828_v8  ;;  %v2124_v8 = vld [vmem:[%s5066_s1 + $0x30] sm:$0xff] }
 0x135   : > { %3607 = vmatprep.subr.bf16.mxu0 %v3855_v14  ;;  %3619 = vmatprep.subr.bf16.mxu1 %v4429_v45  ;;  %v2520_v45 = vld [vmem:[%s3964_s28 + $0x50] sm:$0x7f]  ;;  %v3700_v10 = vpack.c.bf16 %v2125_v12, %v2124_v8  ;;  %v2531_v8 = vld [vmem:[%s3964_s28 + $0x60] sm:$0x7f] }
 0x138   : > { %3609 = vmatpush3.bf16.msra.mxu0 %v4714_v63  ;;  %3621 = vmatpush3.bf16.msra.mxu1 %v4451_v33  ;;  %v1796_v33 = vsel %vm199_vm0, %v2520_v45, %v3830_v44  ;;  %v2128_v45 = vld [vmem:[%s5066_s1 + $0x50] sm:$0xff] }
 0x139   : > { %3623 = vmatprep.subr.bf16.mxu1 %v4463_v40  ;;  %3643 = vmatprep.subr.bf16.mxu0 %v4465_v41  ;;  %v2134_v40 = vld [vmem:[%s5066_s1 + $0x80] sm:$0xff] }
 0x13b   : > { %3190 = vmatmul.mubr.msk.f32.vlgmr.msra.gmra.mrb[14].mxu0 %vm199_vm0, %v2517_v9  ;;  %v2144_v9 = vld [vmem:[%s5066_s1 + $0xd0] sm:$0xff] }
 0x13c   : > { %3625 = vmatpush3.bf16.msra.mxu1 %v4489_v58  ;;  %3645 = vmatpush3.bf16.msra.mxu0 %v4491_v4  ;;  %v2135_v58 = vld [vmem:[%s5066_s1 + $0x88] sm:$0xff] }
 0x13d   : > { %3627 = vmatprep.subr.bf16.mxu1 %v4502_v46  ;;  %3647 = vmatprep.subr.bf16.mxu0 %v4504_v11  ;;  %v3835_v46 = vunpack.i.h.bf16 %v3833_v37  ;;  %v2126_v37 = vld [vmem:[%s5066_s1 + $0x40] sm:$0xff] }
 0x13e   : > { %2009 = vmatprep.mubr.f32.mxu0 %v1799_v15  ;;  %v2175_v15 = vld [vmem:[%s5066_s1 + $0x1c8] sm:$0xff]  ;;  %v3704_v44 = vpack.c.bf16 %v2127_v49, %v2126_v37  ;;  %v2189_v37 = vld [vmem:[%s5066_s1 + $0x238] sm:$0xff] }
 0x140   : > { %3629 = vmatpush3.bf16.msra.mxu1 %v4528_v3  ;;  %3649 = vmatpush3.bf16.msra.mxu0 %v4530_v7  ;;  %v4836_v3 = vpop.permute.xlu0 %3837 }
 0x141   : > { %3631 = vmatprep.subr.bf16.mxu1 %v4540_v16  ;;  %3651 = vmatprep.subr.bf16.mxu0 %v4542_v17  ;;  %v2524_v16 = vld [vmem:[%s3964_s28 + $0x61] sm:$0x7f] }
 0x144   : > { %3633 = vmatpush3.bf16.msra.mxu1 %v4564_v61  ;;  %3653 = vmatpush3.bf16.msra.mxu0 %v4566_v2  ;;  %v3686_v61 = vpack.c.bf16 %v2135_v58, %v2134_v40 }
 0x145   : > { %3635 = vmatprep.subr.bf16.mxu1 %v4576_v30  ;;  %3655 = vmatprep.subr.bf16.mxu0 %v4578_v32  ;;  %v2118_v30 = vld [vmem:[%s5066_s1] sm:$0xff] }
 0x148   : > { %3637 = vmatpush3.bf16.msra.mxu1 %v4600_v1  ;;  %3657 = vmatpush3.bf16.msra.mxu0 %v4602_v13  ;;  %v2119_v1 = vld [vmem:[%s5066_s1 + $0x8] sm:$0xff] }
 0x149   : > { %3639 = vmatprep.subr.bf16.mxu1 %v4609_v38  ;;  %3659 = vmatprep.subr.bf16.mxu0 %v4611_v42  ;;  %v2136_v38 = vld [vmem:[%s5066_s1 + $0x90] sm:$0xff]  ;;  %v2137_v42 = vld [vmem:[%s5066_s1 + $0x98] sm:$0xff] }
 0x14c   : > { %3641 = vmatpush3.bf16.msra.mxu1 %v4631_v57  ;;  %3661 = vmatpush3.bf16.msra.mxu0 %v4633_v0  ;;  %v3839_v57 = vunpack.i.l.bf16 %v4836_v3  ;;  %v1798_v0 = vsel %vm199_vm0, %v2524_v16, %v3835_v46  ;;  %v2158_v46 = vld [vmem:[%s5066_s1 + $0x140] sm:$0xff] }
 0x14d   : > { %3663 = vmatprep.subr.bf16.mxu0 %v4637_v5  ;;  %3674 = vmatprep.subr.bf16.mxu1 %v3855_v14  ;;  %v3688_v5 = vpack.c.bf16 %v2119_v1, %v2118_v30  ;;  %v2146_v16 = vld [vmem:[%s5066_s1 + $0xe0] sm:$0xff]  ;;  %v2177_v30 = vld [vmem:[%s5066_s1 + $0x1d8] sm:$0xff] }
 0x14f   : > { %1940 = vmatmul.mubr.f32.vlgmr.msra.gmra.mrb[14].mxu1 %v1796_v33  ;;  %v2129_v33 = vld [vmem:[%s5066_s1 + $0x58] sm:$0xff] }
 0x150   : > { %3665 = vmatpush3.bf16.msra.mxu0 %v4655_v24  ;;  %3676 = vmatpush3.bf16.msra.mxu1 %v4762_v29  ;;  %v4857_v24 = vpop.permute.xlu1 %3842  ;;  %v3708_v1 = vpack.c.bf16 %v2129_v33, %v2128_v45 }
 0x151   : > { %3667 = vmatprep.subr.bf16.mxu0 %v4659_v26  ;;  %3677 = vmatprep.subr.bf16.mxu1 %v3855_v14  ;;  %v2533_v26 = vld [vmem:[%s3964_s28 + $0x62] sm:$0x7f]  ;;  %v3844_v39 = vunpack.i.l.bf16 %v4857_v24 }
 0x152   : > { %3208 = vmatprep.mubr.msk.f32.mxu1 %vm3856_vm1, %v3857_v28  ;;  %v2115_v62 = vsel %vm199_vm0, %v2533_v26, %v3839_v57  ;;  %v2131_v57 = vld [vmem:[%s5066_s1 + $0x68] sm:$0xff]  ;;  %v2160_v26 = vld [vmem:[%s5066_s1 + $0x150] sm:$0xff] }
 0x153   : > { %v2117_v18 = vsel %vm199_vm0, %v2537_v47, %v3844_v39  ;;  %v2132_v47 = vld [vmem:[%s5066_s1 + $0x70] sm:$0xff] }
 0x154   : > { %3669 = vmatpush3.bf16.msra.mxu0 %v4675_v31  ;;  %3679 = vmatpush3.bf16.msra.mxu1 %v4776_v60  ;;  %v3690_v31 = vpack.c.bf16 %v2137_v42, %v2136_v38  ;;  %v2130_v42 = vld [vmem:[%s5066_s1 + $0x60] sm:$0xff] }
 0x155   : > { %3671 = vmatprep.subr.bf16.mxu0 %v4682_v51  ;;  %3680 = vmatprep.subr.bf16.mxu1 %v3855_v14  ;;  %v2120_v51 = vld [vmem:[%s5066_s1 + $0x10] sm:$0xff] }
 0x158   : > { %3673 = vmatpush3.bf16.msra.mxu0 %v4698_v22  ;;  %3682 = vmatpush3.bf16.msra.mxu1 %v4700_v35  ;;  %v2121_v22 = vld [vmem:[%s5066_s1 + $0x18] sm:$0xff]  ;;  %v2138_v35 = vld [vmem:[%s5066_s1 + $0xa0] sm:$0xff] }
 0x159   : > { %3683 = vmatprep.subr.bf16.mxu1 %v3855_v14  ;;  %3687 = vmatprep.subr.bf16.mxu0 %v3686_v61  ;;  %v3692_v43 = vpack.c.bf16 %v2121_v22, %v2120_v51  ;;  %v3694_v48 = vpack.c.bf16 %v2139_v27, %v2138_v35  ;;  %v2147_v61 = vld [vmem:[%s5066_s1 + $0xe8] sm:$0xff]  ;;  %v2149_v22 = vld [vmem:[%s5066_s1 + $0xf8] sm:$0xff]  ;;  %v2178_v35 = vld [vmem:[%s5066_s1 + $0x1e0] sm:$0xff] }
 0x15a   : > { %v2179_v27 = vld [vmem:[%s5066_s1 + $0x1e8] sm:$0xff] }
 0x15b   : > { %2010 = vmatmul.mubr.f32.vlgmr.msra.gmra.mrb[16].mxu0 %v1798_v0  ;;  %v3710_v0 = vpack.c.bf16 %v2147_v61, %v2146_v16  ;;  %v3742_v54 = vpack.c.bf16 %v2179_v27, %v2178_v35 }
 0x15c   : > { %3685 = vmatpush3.bf16.msra.mxu1 %v4714_v63  ;;  %3689 = vmatpush3.bf16.msra.mxu0 %v3688_v5  ;;  %v2140_v63 = vld [vmem:[%s5066_s1 + $0xb0] sm:$0xff] }
 0x15d   : > { %3691 = vmatprep.subr.bf16.mxu0 %v3690_v31  ;;  %3719 = vmatprep.subr.bf16.mxu1 %v4465_v41  ;;  %v3698_v23 = vpack.c.bf16 %v2141_v6, %v2140_v63  ;;  %v2148_v31 = vld [vmem:[%s5066_s1 + $0xf0] sm:$0xff]  ;;  %v2162_v63 = vld [vmem:[%s5066_s1 + $0x160] sm:$0xff]  ;;  %v2163_v6 = vld [vmem:[%s5066_s1 + $0x168] sm:$0xff] }
 0x15e   : > { %v2576_v56 = vpop.f32.mrb[0].mxu0  ;;  %2257 = vmatprep.mubr.f32.mxu0 %v2115_v62  ;;  %v3714_v53 = vpack.c.bf16 %v2149_v22, %v2148_v31 }
 0x15f   : > { %v2577_v41 = vpop.f32.mrb[1].mxu0  ;;  %3209 = vmatmul.mubr.msk.f32.vlgmr.msra.gmra.mrb[16].mxu1 %vm199_vm0, %v2528_v34  ;;  %v3712_v34 = vpack.c.bf16 %v2131_v57, %v2130_v42 }
 0x160   : > { %v2578_v19 = vadd.f32 %v2577_v41, %v2576_v56  ;;  %3693 = vmatpush3.bf16.msra.mxu0 %v3692_v43  ;;  %3721 = vmatpush3.bf16.msra.mxu1 %v4491_v4  ;;  %v2142_v4 = vld [vmem:[%s5066_s1 + $0xc0] sm:$0xff]  ;;  %v2133_v56 = vld [vmem:[%s5066_s1 + $0x78] sm:$0xff]  ;;  %v2180_v41 = vld [vmem:[%s5066_s1 + $0x1f0] sm:$0xff] }
 0x161   : > { %3695 = vmatprep.subr.bf16.mxu0 %v3694_v48  ;;  %3723 = vmatprep.subr.bf16.mxu1 %v4504_v11  ;;  %v3702_v36 = vpack.c.bf16 %v2143_v50, %v2142_v4  ;;  %v2165_v4 = vld [vmem:[%s5066_s1 + $0x178] sm:$0xff]  ;;  %v3845_v50 = vunpack.i.h.bf16 %v4857_v24  ;;  %v2187_v24 = vld [vmem:[%s5066_s1 + $0x228] sm:$0xff] }
 0x162   : > { %v2611_v21 = vpop.f32.mrb[0].mxu1  ;;  %2327 = vmatprep.mubr.f32.mxu1 %v2117_v18  ;;  %v352_v55 = vadd.f32 %v2578_v19, %v4897_v20  ;;  %v2181_v18 = vld [vmem:[%s5066_s1 + $0x1f8] sm:$0xff]  ;;  %v3840_v19 = vunpack.i.h.bf16 %v4836_v3 }
 0x163   : > { %v2612_v11 = vpop.f32.mrb[1].mxu1  ;;  %v3746_v12 = vpack.c.bf16 %v2181_v18, %v2180_v41 }
 0x164   : > { %v2613_v59 = vadd.f32 %v2612_v11, %v2611_v21  ;;  %3697 = vmatpush3.bf16.msra.mxu0 %v3696_v25  ;;  %3725 = vmatpush3.bf16.msra.mxu1 %v4530_v7  ;;  %v2145_v7 = vld [vmem:[%s5066_s1 + $0xd8] sm:$0xff]  ;;  %v3716_v25 = vpack.c.bf16 %v2133_v56, %v2132_v47  ;;  %v2164_v21 = vld [vmem:[%s5066_s1 + $0x170] sm:$0xff]  ;;  %v2114_v3 = vsel %vm199_vm0, %v2531_v8, %v3840_v19 }
 0x165   : > { %3699 = vmatprep.subr.bf16.mxu0 %v3698_v23  ;;  %3727 = vmatprep.subr.bf16.mxu1 %v4542_v17  ;;  %v2174_v17 = vld [vmem:[%s5066_s1 + $0x1c0] sm:$0xff]  ;;  %v3706_v40 = vpack.c.bf16 %v2145_v7, %v2144_v9  ;;  %v3744_v23 = vpack.c.bf16 %v2163_v6, %v2162_v63  ;;  %v3748_v11 = vpack.c.bf16 %v2165_v4, %v2164_v21 }
 0x166   : > { %v422_v52 = vadd.f32 %v2613_v59, %v352_v55  ;;  %v3734_v58 = vpack.c.bf16 %v2175_v15, %v2174_v17  ;;  %v2535_v55 = vld [vmem:[%s3964_s28 + $0x71] sm:$0x7f] }
 0x167   : > { %v2116_v59 = vsel %vm199_vm0, %v2535_v55, %v3845_v50 }
 0x168   : > { %3701 = vmatpush3.bf16.msra.mxu0 %v3700_v10  ;;  %3729 = vmatpush3.bf16.msra.mxu1 %v4566_v2  ;;  %v2159_v2 = vld [vmem:[%s5066_s1 + $0x148] sm:$0xff]  ;;  %v2186_v10 = vld [vmem:[%s5066_s1 + $0x220] sm:$0xff] }
 0x169   : > { %3703 = vmatprep.subr.bf16.mxu0 %v3702_v36  ;;  %3731 = vmatprep.subr.bf16.mxu1 %v4578_v32  ;;  %v2176_v32 = vld [vmem:[%s5066_s1 + $0x1d0] sm:$0xff]  ;;  %v3736_v38 = vpack.c.bf16 %v2159_v2, %v2158_v46 }
 0x16a   : > { %v3738_v5 = vpack.c.bf16 %v2177_v30, %v2176_v32  ;;  %v2188_v36 = vld [vmem:[%s5066_s1 + $0x230] sm:$0xff] }
 0x16c   : > { %3705 = vmatpush3.bf16.msra.mxu0 %v3704_v44  ;;  %3733 = vmatpush3.bf16.msra.mxu1 %v4602_v13  ;;  %v2161_v13 = vld [vmem:[%s5066_s1 + $0x158] sm:$0xff] }
 0x16d   : > { %3707 = vmatprep.subr.bf16.mxu0 %v3706_v40  ;;  %3735 = vmatprep.subr.bf16.mxu1 %v3734_v58  ;;  %v3740_v43 = vpack.c.bf16 %v2161_v13, %v2160_v26 }
 0x16e   : > { %v491_v51 = vpop.f32.mrb[2].mxu0 }
 0x16f   : > { %v492_v39 = vadd.f32 %v491_v51, %v422_v52  ;;  %v3115_v62 = vpop.f32.mrb[3].mxu0  ;;  %v3760_v52 = vpack.c.bf16 %v2189_v37, %v2188_v36 }
 0x170   : > { %3709 = vmatpush3.bf16.msra.mxu0 %v3708_v1  ;;  %3737 = vmatpush3.bf16.msra.mxu1 %v3736_v38 }
 0x171   : > { %v495_v48 = vmax.f32 %v492_v39, 0.0  ;;  %3711 = vmatprep.subr.bf16.mxu0 %v3710_v0  ;;  %3739 = vmatprep.subr.bf16.mxu1 %v3738_v5 }
 0x173   : > { %497 = vst.msk [vmem:[%s4988_s6] sm:$0x7f] %vm496_vm2, %v495_v48 }
 0x174   : > { %3713 = vmatpush3.bf16.msra.mxu0 %v3712_v34  ;;  %3741 = vmatpush3.bf16.msra.mxu1 %v3740_v43 }
 0x175   : > { %3715 = vmatprep.subr.bf16.mxu0 %v3714_v53  ;;  %3743 = vmatprep.subr.bf16.mxu1 %v3742_v54 }
 0x178   : > { %3717 = vmatpush3.bf16.msra.mxu0 %v3716_v25  ;;  %3745 = vmatpush3.bf16.msra.mxu1 %v3744_v23 }
 0x179   : > { %3747 = vmatprep.subr.bf16.mxu1 %v3746_v12  ;;  %3750 = vmatprep.subr.bf16.mxu0 %v3855_v14 }
 0x17b   : > { %2258 = vmatmul.mubr.f32.vlgmr.msra.gmra.mrb[18].mxu0 %v2114_v3 }
 0x17c   : > { %3749 = vmatpush3.bf16.msra.mxu1 %v3748_v11  ;;  %3752 = vmatpush3.bf16.msra.mxu0 %v4762_v29  ;;  %v3757_v29 = vpack.c.bf16 %v2187_v24, %v2186_v10 }
 0x17d   : > { %3753 = vmatprep.subr.bf16.mxu0 %v3855_v14  ;;  %3227 = vmatprep.mubr.msk.f32.mxu0 %vm3856_vm1, %v3857_v28 }
 0x17f   : > { %2328 = vmatmul.mubr.f32.vlgmr.msra.gmra.mrb[18].mxu1 %v2116_v59 }
 0x180   : > { %3755 = vmatpush3.bf16.msra.mxu0 %v4776_v60  ;;  %v2539_v60 = vld [vmem:[%s3964_s28 + $0x82] sm:$0x7f] }
 0x181   : > { %3756 = vmatprep.subr.bf16.mxu0 %v3855_v14 }
 0x182   : > { %v2655_v49 = vpop.f32.mrb[2].mxu1 }
 0x183   : > { %v2656_v9 = vpop.f32.mrb[3].mxu1 }
 0x184   : > { %3758 = vmatpush3.bf16.msra.mxu0 %v3757_v29  ;;  %v2657_v28 = vadd.f32 %v2656_v9, %v2655_v49 }
 0x185   : > { %3759 = vmatprep.subr.bf16.mxu0 %v3855_v14 }
 0x186   : > { %v670_v15 = vadd.f32 %v2657_v28, %v4897_v20 }
 0x188   : > { %3761 = vmatpush3.bf16.msra.mxu0 %v3760_v52 }
 0x18b   : > { %3228 = vmatmul.mubr.msk.f32.vlgmr.msra.gmra.mrb[20].mxu0 %vm199_vm0, %v2539_v60 }
 0x18e   : > { %v2690_v7 = vpop.f32.mrb[4].mxu0 }
 0x18f   : > { %v2691_v17 = vpop.f32.mrb[5].mxu0 }
 0x190   : > { %v2692_v44 = vadd.f32 %v2691_v17, %v2690_v7 }
 0x192   : > { %v740_v45 = vadd.f32 %v2692_v44, %v670_v15  ;;  %v809_v33 = vpop.f32.mrb[4].mxu1 }
 0x193   : > { %v3134_v40 = vpop.f32.mrb[5].mxu1 }
 0x194   : > { %v810_v58 = vadd.f32 %v809_v33, %v740_v45 }
 0x196   : > { %v813_v46 = vmax.f32 %v810_v58, 0.0 }
 0x198   : > { %2486 = vst.msk [vmem:[%s4988_s6 + $0x8] sm:$0x7f] %vm496_vm2, %v813_v46 }
 0x1ae   : > { %v2734_v2 = vpop.f32.mrb[6].mxu0 }
 0x1af   : > { %v2735_v16 = vpop.f32.mrb[7].mxu0 }
 0x1b0   : > { %v2736_v14 = vadd.f32 %v2735_v16, %v2734_v2 }
 0x1b2   : > { %v2769_v61 = vpop.f32.mrb[6].mxu1  ;;  %v988_v30 = vadd.f32 %v2736_v14, %v4897_v20 }
 0x1b3   : > { %v2770_v32 = vpop.f32.mrb[7].mxu1 }
 0x1b4   : > { %v2771_v1 = vadd.f32 %v2770_v32, %v2769_v61 }
 0x1b6   : > { %v1058_v38 = vadd.f32 %v2771_v1, %v988_v30 }
 0x1be   : > { %v1127_v42 = vpop.f32.mrb[8].mxu0 }
 0x1bf   : > { %v1128_v57 = vadd.f32 %v1127_v42, %v1058_v38  ;;  %v3153_v0 = vpop.f32.mrb[9].mxu0 }
 0x1c1   : > { %v1131_v5 = vmax.f32 %v1128_v57, 0.0 }
 0x1c3   : > { %2497 = vst.msk [vmem:[%s4988_s6 + $0x10] sm:$0x7f] %vm496_vm2, %v1131_v5 }
 0x1d2   : > { %v2813_v26 = vpop.f32.mrb[8].mxu1 }
 0x1d3   : > { %v2814_v13 = vpop.f32.mrb[9].mxu1 }
 0x1d4   : > { %v2815_v31 = vadd.f32 %v2814_v13, %v2813_v26 }
 0x1d6   : > { %v1306_v35 = vadd.f32 %v2815_v31, %v4897_v20 }
 0x1de   : > { %v2848_v51 = vpop.f32.mrb[10].mxu0 }
 0x1df   : > { %v2849_v22 = vpop.f32.mrb[11].mxu0 }
 0x1e0   : > { %v2850_v27 = vadd.f32 %v2849_v22, %v2848_v51 }
 0x1e2   : > { %v1376_v39 = vadd.f32 %v2850_v27, %v1306_v35  ;;  %v1445_v62 = vpop.f32.mrb[10].mxu1 }
 0x1e3   : > { %v3172_v34 = vpop.f32.mrb[11].mxu1 }
 0x1e4   : > { %v1446_v43 = vadd.f32 %v1445_v62, %v1376_v39 }
 0x1e6   : > { %v1449_v47 = vmax.f32 %v1446_v43, 0.0 }
 0x1e8   : > { %2508 = vst.msk [vmem:[%s4988_s6 + $0x18] sm:$0x7f] %vm496_vm2, %v1449_v47 }
 0x1fe   : > { %v2892_v48 = vpop.f32.mrb[12].mxu0 }
 0x1ff   : > { %v2893_v53 = vpop.f32.mrb[13].mxu0 }
 0x200   : > { %v2894_v54 = vadd.f32 %v2893_v53, %v2892_v48 }
 0x202   : > { %v2927_v56 = vpop.f32.mrb[12].mxu1  ;;  %v1624_v6 = vadd.f32 %v2894_v54, %v4897_v20 }
 0x203   : > { %v2928_v63 = vpop.f32.mrb[13].mxu1 }
 0x204   : > { %v2929_v41 = vadd.f32 %v2928_v63, %v2927_v56 }
 0x206   : > { %v1694_v18 = vadd.f32 %v2929_v41, %v1624_v6 }
 0x20e   : > { %v1763_v19 = vpop.f32.mrb[14].mxu0 }
 0x20f   : > { %v1764_v25 = vadd.f32 %v1763_v19, %v1694_v18  ;;  %v3191_v23 = vpop.f32.mrb[15].mxu0 }
 0x211   : > { %v1767_v8 = vmax.f32 %v1764_v25, 0.0 }
 0x213   : > { %2519 = vst.msk [vmem:[%s4988_s6 + $0x20] sm:$0x7f] %vm496_vm2, %v1767_v8 }
 0x222   : > { %v2971_v12 = vpop.f32.mrb[14].mxu1 }
 0x223   : > { %v2972_v21 = vpop.f32.mrb[15].mxu1 }
 0x224   : > { %v2973_v4 = vadd.f32 %v2972_v21, %v2971_v12 }
 0x226   : > { %v1942_v11 = vadd.f32 %v2973_v4, %v4897_v20 }
 0x22e   : > { %v3006_v50 = vpop.f32.mrb[16].mxu0 }
 0x22f   : > { %v3007_v3 = vpop.f32.mrb[17].mxu0 }
 0x230   : > { %v3008_v55 = vadd.f32 %v3007_v3, %v3006_v50 }
 0x232   : > { %v2012_v59 = vadd.f32 %v3008_v55, %v1942_v11  ;;  %v2081_v10 = vpop.f32.mrb[16].mxu1 }
 0x233   : > { %v3210_v24 = vpop.f32.mrb[17].mxu1 }
 0x234   : > { %v2082_v29 = vadd.f32 %v2081_v10, %v2012_v59 }
 0x236   : > { %v2085_v36 = vmax.f32 %v2082_v29, 0.0 }
 0x238   : > { %2530 = vst.msk [vmem:[%s4988_s6 + $0x28] sm:$0x7f] %vm496_vm2, %v2085_v36 }
 0x24e   : > { %v3050_v37 = vpop.f32.mrb[18].mxu0 }
 0x24f   : > { %v3051_v49 = vpop.f32.mrb[19].mxu0 }
 0x250   : > { %v3052_v9 = vadd.f32 %v3051_v49, %v3050_v37 }
 0x252   : > { %v3085_v52 = vpop.f32.mrb[18].mxu1  ;;  %v2260_v60 = vadd.f32 %v3052_v9, %v4897_v20 }
 0x253   : > { %v3086_v28 = vpop.f32.mrb[19].mxu1 }
 0x254   : > { %v3087_v7 = vadd.f32 %v3086_v28, %v3085_v52 }
 0x256   : > { %v2330_v17 = vadd.f32 %v3087_v7, %v2260_v60 }
 0x25e   : > { %v2399_v15 = vpop.f32.mrb[20].mxu0 }
 0x25f   : > { %v2400_v44 = vadd.f32 %v2399_v15, %v2330_v17  ;;  %v3229_v45 = vpop.f32.mrb[21].mxu0 }
 0x261   : > { %v2403_v33 = vmax.f32 %v2400_v44, 0.0 }
 0x263   : > { %2541 = vst.msk [vmem:[%s4988_s6 + $0x30] sm:$0x7f] %vm496_vm2, %v2403_v33 }
 0x264 PF: > { %s13_s12 = sadd.s32 1, %s3852_s12  }
 0x265   : > { %p10_p4 = scmp.ge.s32.totalorder %s13_s12, 4  }
 0x267   :  { %12 = sbr.rel (!%p10_p4) target bundleno = 1 (0x1), region = 76 }

// kernel: quantile_cnn_forward.7
= control target key start
LH: loop header
LB: loop body
LE: loop exit
PB: predicated region body
PF: predicated region fallthrough
CT: control target
= control target key end

     0   :  { %v2537_v43 = vmov 1983009808   ;;  %v437_v45 = vlaneseq  ;;  %vm2539_vm0 = vmmov 0   ;;  %vm566_vm1 = vcmask 523264   ;;  %s2541_s7 = smov 104   ;;  %s2542_s8 = smov 120   ;;  %s3874_s1 = inlined_call_operand.vmem [shape: f32[3136,64], index: 1, kind: input, shape index: {}]   ;;  %s3875_s0 = inlined_call_operand.vmem [shape: f32[2,3136], index: 0, kind: input, shape index: {}]   ;;  %s3876_s2 = inlined_call_operand.vmem [shape: f32[1,64], index: 2, kind: input, shape index: {}]   ;;  %s3877_s3 = inlined_call_operand.vmem [shape: f32[64,56], index: 3, kind: input, shape index: {}]   ;;  %s3878_s4 = inlined_call_operand.vmem [shape: f32[1,56], index: 4, kind: input, shape index: {}]   ;;  %s3879_s5 = inlined_call_operand.vmem [shape: f32[2,48], index: 5, kind: output, shape index: {}]  }
   0x1   :  { %v43_v0 = vld [vmem:[%s3874_s1 + $0x80] sm:$0xff]  ;;  %v44_v1 = vld [vmem:[%s3874_s1 + $0x88] sm:$0xff]  ;;  %v45_v11 = vld [vmem:[%s3874_s1 + $0x90] sm:$0xff]  ;;  %v435_v44 = vunpack.c.l.s4 %v2537_v43  ;;  %s2543_s9 = smov 96   ;;  %s2544_s10 = smov 112   ;;  %vm1614_vm2 = vcmask 64512  }
   0x2   :  { %v27_v2 = vld [vmem:[%s3874_s1] sm:$0xff]  ;;  %v2112_v3 = vpack.c.bf16 %v44_v1, %v43_v0  ;;  %v28_v4 = vld [vmem:[%s3874_s1 + $0x8] sm:$0xff]  ;;  %v46_v13 = vld [vmem:[%s3874_s1 + $0x98] sm:$0xff]  ;;  %v438_v60 = vshrl.u32 %v437_v45, 7  ;;  %s2545_s11 = smov 88   ;;  %s2547_s12 = smov 80  }
   0x3   :  { %v75_v5 = vld [vmem:[%s3874_s1 + $0x180] sm:$0xff]  ;;  %v76_v6 = vld [vmem:[%s3874_s1 + $0x188] sm:$0xff]  ;;  %v2114_v7 = vpack.c.bf16 %v28_v4, %v27_v2  ;;  %v29_v14 = vld [vmem:[%s3874_s1 + $0x10] sm:$0xff]  ;;  %v2116_v16 = vpack.c.bf16 %v46_v13, %v45_v11  ;;  %v436_v59 = vunpack.c.0.s8 %v435_v44  ;;  %vm1616_vm3 = vcmask 130048  }
   0x4   :  { %v2144_v8 = vpack.c.bf16 %v76_v6, %v75_v5  ;;  %v59_v9 = vld [vmem:[%s3874_s1 + $0x100] sm:$0xff]  ;;  %v60_v10 = vld [vmem:[%s3874_s1 + $0x108] sm:$0xff]  ;;  %2113 = vmatprep.subr.bf16.mxu0 %v2112_v3  ;;  %v30_v15 = vld [vmem:[%s3874_s1 + $0x18] sm:$0xff]  ;;  %vm1618_vm4 = vcmask 195584   ;;  %vm1620_vm5 = vcmask 261120   ;;  %vm1622_vm6 = vcmask 326656  }
   0x5   :  { %v2146_v12 = vpack.c.bf16 %v60_v10, %v59_v9  ;;  %2115 = vmatpush3.bf16.msra.mxu0 %v2114_v7  ;;  %v2118_v17 = vpack.c.bf16 %v30_v15, %v29_v14  ;;  %v77_v18 = vld [vmem:[%s3874_s1 + $0x190] sm:$0xff]  ;;  %v78_v19 = vld [vmem:[%s3874_s1 + $0x198] sm:$0xff]  ;;  %v47_v23 = vld [vmem:[%s3874_s1 + $0xa0] sm:$0xff]  ;;  %v2722_v10 = vsub.s32 %v436_v59, %v438_v60  ;;  %vm1625_vm7 = vcmask 386048  }
   0x6   :  { %2145 = vmatprep.subr.bf16.mxu1 %v2144_v8  ;;  %v61_v20 = vld [vmem:[%s3874_s1 + $0x110] sm:$0xff]  ;;  %v2148_v21 = vpack.c.bf16 %v78_v19, %v77_v18  ;;  %v62_v22 = vld [vmem:[%s3874_s1 + $0x118] sm:$0xff]  ;;  %v48_v24 = vld [vmem:[%s3874_s1 + $0xa8] sm:$0xff]  ;;  %2117 = vmatprep.subr.bf16.mxu0 %v2116_v16 }
   0x7   :  { %2147 = vmatpush3.bf16.msra.mxu1 %v2146_v12  ;;  %v2150_v25 = vpack.c.bf16 %v62_v22, %v61_v20  ;;  %v2120_v26 = vpack.c.bf16 %v48_v24, %v47_v23  ;;  %v31_v27 = vld [vmem:[%s3874_s1 + $0x20] sm:$0xff]  ;;  %v32_v28 = vld [vmem:[%s3874_s1 + $0x28] sm:$0xff]  ;;  %v49_v35 = vld [vmem:[%s3874_s1 + $0xb0] sm:$0xff] }
   0x8   :  { %v79_v29 = vld [vmem:[%s3874_s1 + $0x1a0] sm:$0xff]  ;;  %2149 = vmatprep.subr.bf16.mxu1 %v2148_v21  ;;  %v80_v30 = vld [vmem:[%s3874_s1 + $0x1a8] sm:$0xff]  ;;  %v2122_v33 = vpack.c.bf16 %v32_v28, %v31_v27  ;;  %v50_v36 = vld [vmem:[%s3874_s1 + $0xb8] sm:$0xff] }
   0x9   :  { %v63_v31 = vld [vmem:[%s3874_s1 + $0x120] sm:$0xff]  ;;  %v64_v32 = vld [vmem:[%s3874_s1 + $0x128] sm:$0xff]  ;;  %2119 = vmatpush3.bf16.msra.mxu0 %v2118_v17  ;;  %v2152_v34 = vpack.c.bf16 %v80_v30, %v79_v29  ;;  %v33_v37 = vld [vmem:[%s3874_s1 + $0x30] sm:$0xff]  ;;  %v2124_v39 = vpack.c.bf16 %v50_v36, %v49_v35 }
   0xa   :  { %2121 = vmatprep.subr.bf16.mxu0 %v2120_v26  ;;  %v2154_v38 = vpack.c.bf16 %v64_v32, %v63_v31  ;;  %v34_v40 = vld [vmem:[%s3874_s1 + $0x38] sm:$0xff]  ;;  %v81_v41 = vld [vmem:[%s3874_s1 + $0x1b0] sm:$0xff]  ;;  %v51_v49 = vld [vmem:[%s3874_s1 + $0xc0] sm:$0xff] }
   0xb   :  { %2151 = vmatpush3.bf16.msra.mxu1 %v2150_v25  ;;  %v82_v42 = vld [vmem:[%s3874_s1 + $0x1b8] sm:$0xff]  ;;  %v65_v47 = vld [vmem:[%s3874_s1 + $0x130] sm:$0xff]  ;;  %v52_v50 = vld [vmem:[%s3874_s1 + $0xc8] sm:$0xff]  ;;  %v2126_v51 = vpack.c.bf16 %v34_v40, %v33_v37 }
   0xc   :  { %2153 = vmatprep.subr.bf16.mxu1 %v2152_v34  ;;  %v2156_v46 = vpack.c.bf16 %v82_v42, %v81_v41  ;;  %v66_v48 = vld [vmem:[%s3874_s1 + $0x138] sm:$0xff]  ;;  %v83_v52 = vld [vmem:[%s3874_s1 + $0x1c0] sm:$0xff]  ;;  %v84_v53 = vld [vmem:[%s3874_s1 + $0x1c8] sm:$0xff]  ;;  %v2128_v55 = vpack.c.bf16 %v52_v50, %v51_v49 }
   0xd   :  { %2123 = vmatpush3.bf16.msra.mxu0 %v2122_v33  ;;  %v2158_v54 = vpack.c.bf16 %v66_v48, %v65_v47  ;;  %v35_v56 = vld [vmem:[%s3874_s1 + $0x40] sm:$0xff]  ;;  %v36_v57 = vld [vmem:[%s3874_s1 + $0x48] sm:$0xff]  ;;  %v2160_v61 = vpack.c.bf16 %v84_v53, %v83_v52  ;;  %v53_v63 = vld [vmem:[%s3874_s1 + $0xd0] sm:$0xff] }
   0xe   :  { %2125 = vmatprep.subr.bf16.mxu0 %v2124_v39  ;;  %v67_v58 = vld [vmem:[%s3874_s1 + $0x140] sm:$0xff]  ;;  %v68_v62 = vld [vmem:[%s3874_s1 + $0x148] sm:$0xff]  ;;  %v54_v0 = vld [vmem:[%s3874_s1 + $0xd8] sm:$0xff]  ;;  %v2130_v3 = vpack.c.bf16 %v36_v57, %v35_v56 }
   0xf   :  { %2155 = vmatpush3.bf16.msra.mxu1 %v2154_v38  ;;  %v85_v1 = vld [vmem:[%s3874_s1 + $0x1d0] sm:$0xff]  ;;  %v86_v2 = vld [vmem:[%s3874_s1 + $0x1d8] sm:$0xff]  ;;  %v2162_v5 = vpack.c.bf16 %v68_v62, %v67_v58  ;;  %v2132_v6 = vpack.c.bf16 %v54_v0, %v53_v63  ;;  %v55_v12 = vld [vmem:[%s3874_s1 + $0xe0] sm:$0xff] }
  0x10   :  { %2157 = vmatprep.subr.bf16.mxu1 %v2156_v46  ;;  %v37_v4 = vld [vmem:[%s3874_s1 + $0x50] sm:$0xff]  ;;  %v38_v7 = vld [vmem:[%s3874_s1 + $0x58] sm:$0xff]  ;;  %v2164_v11 = vpack.c.bf16 %v86_v2, %v85_v1  ;;  %v56_v13 = vld [vmem:[%s3874_s1 + $0xe8] sm:$0xff] }
  0x11   :  { %2127 = vmatpush3.bf16.msra.mxu0 %v2126_v51  ;;  %v69_v8 = vld [vmem:[%s3874_s1 + $0x150] sm:$0xff]  ;;  %v70_v9 = vld [vmem:[%s3874_s1 + $0x158] sm:$0xff]  ;;  %v87_v14 = vld [vmem:[%s3874_s1 + $0x1e0] sm:$0xff]  ;;  %v2134_v16 = vpack.c.bf16 %v38_v7, %v37_v4  ;;  %v2136_v19 = vpack.c.bf16 %v56_v13, %v55_v12 }
  0x12   :  { %2129 = vmatprep.subr.bf16.mxu0 %v2128_v55  ;;  %v88_v15 = vld [vmem:[%s3874_s1 + $0x1e8] sm:$0xff]  ;;  %v2166_v17 = vpack.c.bf16 %v70_v9, %v69_v8  ;;  %v20_v18 = vld [vmem:[%s3875_s0] sm:$0xff]  ;;  %v57_v27 = vld [vmem:[%s3874_s1 + $0xf0] sm:$0xff] }
  0x13   :  { %2159 = vmatpush3.bf16.msra.mxu1 %v2158_v54  ;;  %v39_v20 = vld [vmem:[%s3874_s1 + $0x60] sm:$0xff]  ;;  %v40_v21 = vld [vmem:[%s3874_s1 + $0x68] sm:$0xff]  ;;  %v440_v23 = vrot.slane %v20_v18, %v2722_v10  ;;  %v433_v24 = vcombine.high %v20_v18, %v20_v18  ;;  %v2168_v25 = vpack.c.bf16 %v88_v15, %v87_v14  ;;  %v58_v28 = vld [vmem:[%s3874_s1 + $0xf8] sm:$0xff] }
  0x14   :  { %2161 = vmatprep.subr.bf16.mxu1 %v2160_v61  ;;  %v71_v22 = vld [vmem:[%s3874_s1 + $0x160] sm:$0xff]  ;;  %v72_v26 = vld [vmem:[%s3874_s1 + $0x168] sm:$0xff]  ;;  %v89_v29 = vld [vmem:[%s3874_s1 + $0x1f0] sm:$0xff]  ;;  %v2138_v33 = vpack.c.bf16 %v40_v21, %v39_v20  ;;  %v2140_v35 = vpack.c.bf16 %v58_v28, %v57_v27 }
  0x15   :  { %2131 = vmatpush3.bf16.msra.mxu0 %v2130_v3  ;;  %v90_v30 = vld [vmem:[%s3874_s1 + $0x1f8] sm:$0xff]  ;;  %v448_v31 = vcombine.high %v440_v23, %v440_v23  ;;  %v447_v32 = vrot.slane %v433_v24, %v2722_v10  ;;  %v2170_v34 = vpack.c.bf16 %v72_v26, %v71_v22  ;;  %v41_v36 = vld [vmem:[%s3874_s1 + $0x70] sm:$0xff]  ;;  %v107_v42 = vld [vmem:[%s3874_s1 + $0x280] sm:$0xff] }
  0x16   :  { %2133 = vmatprep.subr.bf16.mxu0 %v2132_v6  ;;  %v42_v37 = vld [vmem:[%s3874_s1 + $0x78] sm:$0xff]  ;;  %v73_v38 = vld [vmem:[%s3874_s1 + $0x170] sm:$0xff]  ;;  %v2172_v40 = vpack.c.bf16 %v90_v30, %v89_v29  ;;  %v108_v43 = vld [vmem:[%s3874_s1 + $0x288] sm:$0xff] }
  0x17   :  { %2163 = vmatpush3.bf16.msra.mxu1 %v2162_v5  ;;  %v449_v39 = vcombine.high %v447_v32, %v447_v32  ;;  %633 = vmatprep.mubr.f32.mxu0 %v448_v31  ;;  %v74_v41 = vld [vmem:[%s3874_s1 + $0x178] sm:$0xff]  ;;  %v139_v44 = vld [vmem:[%s3874_s1 + $0x380] sm:$0xff]  ;;  %v140_v45 = vld [vmem:[%s3874_s1 + $0x388] sm:$0xff]  ;;  %v2142_v46 = vpack.c.bf16 %v42_v37, %v41_v36  ;;  %v2176_v48 = vpack.c.bf16 %v108_v43, %v107_v42 }
  0x18   :  { %2165 = vmatprep.subr.bf16.mxu1 %v2164_v11  ;;  %v2174_v47 = vpack.c.bf16 %v74_v41, %v73_v38  ;;  %v91_v49 = vld [vmem:[%s3874_s1 + $0x200] sm:$0xff]  ;;  %v92_v50 = vld [vmem:[%s3874_s1 + $0x208] sm:$0xff]  ;;  %v2208_v52 = vpack.c.bf16 %v140_v45, %v139_v44  ;;  %v109_v54 = vld [vmem:[%s3874_s1 + $0x290] sm:$0xff] }
  0x19   :  { %2135 = vmatpush3.bf16.msra.mxu0 %v2134_v16  ;;  %703 = vmatprep.mubr.f32.mxu1 %v449_v39  ;;  %v123_v51 = vld [vmem:[%s3874_s1 + $0x300] sm:$0xff]  ;;  %v124_v53 = vld [vmem:[%s3874_s1 + $0x308] sm:$0xff]  ;;  %v110_v55 = vld [vmem:[%s3874_s1 + $0x298] sm:$0xff]  ;;  %v2178_v58 = vpack.c.bf16 %v92_v50, %v91_v49 }
  0x1a   :  { %2137 = vmatprep.subr.bf16.mxu0 %v2136_v19  ;;  %v141_v56 = vld [vmem:[%s3874_s1 + $0x390] sm:$0xff]  ;;  %v142_v57 = vld [vmem:[%s3874_s1 + $0x398] sm:$0xff]  ;;  %v2210_v59 = vpack.c.bf16 %v124_v53, %v123_v51  ;;  %v2180_v60 = vpack.c.bf16 %v110_v55, %v109_v54  ;;  %v111_v2 = vld [vmem:[%s3874_s1 + $0x2a0] sm:$0xff] }
  0x1b   :  { %2167 = vmatpush3.bf16.msra.mxu1 %v2166_v17  ;;  %v93_v61 = vld [vmem:[%s3874_s1 + $0x210] sm:$0xff]  ;;  %v94_v62 = vld [vmem:[%s3874_s1 + $0x218] sm:$0xff]  ;;  %v2212_v0 = vpack.c.bf16 %v142_v57, %v141_v56  ;;  %v112_v3 = vld [vmem:[%s3874_s1 + $0x2a8] sm:$0xff] }
  0x1c   :  { %2169 = vmatprep.subr.bf16.mxu1 %v2168_v25  ;;  %v125_v63 = vld [vmem:[%s3874_s1 + $0x310] sm:$0xff]  ;;  %v126_v1 = vld [vmem:[%s3874_s1 + $0x318] sm:$0xff]  ;;  %v143_v4 = vld [vmem:[%s3874_s1 + $0x3a0] sm:$0xff]  ;;  %v2182_v6 = vpack.c.bf16 %v94_v62, %v93_v61  ;;  %v2184_v8 = vpack.c.bf16 %v112_v3, %v111_v2 }
  0x1d   :  { %2139 = vmatpush3.bf16.msra.mxu0 %v2138_v33  ;;  %v144_v5 = vld [vmem:[%s3874_s1 + $0x3a8] sm:$0xff]  ;;  %v2214_v7 = vpack.c.bf16 %v126_v1, %v125_v63  ;;  %v95_v9 = vld [vmem:[%s3874_s1 + $0x220] sm:$0xff]  ;;  %v113_v15 = vld [vmem:[%s3874_s1 + $0x2b0] sm:$0xff] }
  0x1e   :  { %2141 = vmatprep.subr.bf16.mxu0 %v2140_v35  ;;  %v96_v11 = vld [vmem:[%s3874_s1 + $0x228] sm:$0xff]  ;;  %v127_v12 = vld [vmem:[%s3874_s1 + $0x320] sm:$0xff]  ;;  %v2216_v13 = vpack.c.bf16 %v144_v5, %v143_v4  ;;  %v114_v16 = vld [vmem:[%s3874_s1 + $0x2b8] sm:$0xff] }
  0x1f   :  { %2171 = vmatpush3.bf16.msra.mxu1 %v2170_v34  ;;  %v128_v14 = vld [vmem:[%s3874_s1 + $0x328] sm:$0xff]  ;;  %v145_v17 = vld [vmem:[%s3874_s1 + $0x3b0] sm:$0xff]  ;;  %v146_v18 = vld [vmem:[%s3874_s1 + $0x3b8] sm:$0xff]  ;;  %v2186_v19 = vpack.c.bf16 %v96_v11, %v95_v9  ;;  %v2188_v22 = vpack.c.bf16 %v114_v16, %v113_v15 }
  0x20   :  { %2173 = vmatprep.subr.bf16.mxu1 %v2172_v40  ;;  %v97_v20 = vld [vmem:[%s3874_s1 + $0x230] sm:$0xff]  ;;  %v2218_v21 = vpack.c.bf16 %v128_v14, %v127_v12  ;;  %v130_v25 = vld [vmem:[%s3874_s1 + $0x338] sm:$0xff]  ;;  %v2220_v26 = vpack.c.bf16 %v146_v18, %v145_v17  ;;  %v115_v27 = vld [vmem:[%s3874_s1 + $0x2c0] sm:$0xff] }
  0x21   :  { %2143 = vmatpush3.bf16.msra.mxu0 %v2142_v46  ;;  %v129_v24 = vld [vmem:[%s3874_s1 + $0x330] sm:$0xff]  ;;  %v116_v28 = vld [vmem:[%s3874_s1 + $0x2c8] sm:$0xff]  ;;  %v147_v30 = vld [vmem:[%s3874_s1 + $0x3c0] sm:$0xff] }
  0x22   :  { %2177 = vmatprep.subr.bf16.mxu0 %v2176_v48  ;;  %v21_v29 = vld [vmem:[%s3875_s0 + $0x8] sm:$0xff]  ;;  %v2222_v35 = vpack.c.bf16 %v130_v25, %v129_v24  ;;  %v2192_v36 = vpack.c.bf16 %v116_v28, %v115_v27  ;;  %v99_v37 = vld [vmem:[%s3874_s1 + $0x240] sm:$0xff]  ;;  %v117_v44 = vld [vmem:[%s3874_s1 + $0x2d0] sm:$0xff] }
  0x23   :  { %2175 = vmatpush3.bf16.msra.mxu1 %v2174_v47  ;;  %v148_v31 = vld [vmem:[%s3874_s1 + $0x3c8] sm:$0xff]  ;;  %v450_v33 = vcombine.high %v21_v29, %v21_v29  ;;  %v131_v39 = vld [vmem:[%s3874_s1 + $0x340] sm:$0xff]  ;;  %v118_v45 = vld [vmem:[%s3874_s1 + $0x2d8] sm:$0xff] }
  0x24   :  { %2209 = vmatprep.subr.bf16.mxu1 %v2208_v52  ;;  %634 = vmatmul.mubr.f32.vlgmr.msra.gmra.mrb[0].mxu0 %v440_v23  ;;  %v98_v23 = vld [vmem:[%s3874_s1 + $0x238] sm:$0xff]  ;;  %v100_v38 = vld [vmem:[%s3874_s1 + $0x248] sm:$0xff]  ;;  %v2224_v42 = vpack.c.bf16 %v148_v31, %v147_v30  ;;  %v149_v46 = vld [vmem:[%s3874_s1 + $0x3d0] sm:$0xff]  ;;  %v2196_v51 = vpack.c.bf16 %v118_v45, %v117_v44 }
  0x25   :  { %2179 = vmatpush3.bf16.msra.mxu0 %v2178_v58  ;;  %v2190_v34 = vpack.c.bf16 %v98_v23, %v97_v20  ;;  %v2903_v41 = vrot.slane %v450_v33, %v2722_v10  ;;  %v132_v43 = vld [vmem:[%s3874_s1 + $0x348] sm:$0xff]  ;;  %v150_v47 = vld [vmem:[%s3874_s1 + $0x3d8] sm:$0xff]  ;;  %v2194_v49 = vpack.c.bf16 %v100_v38, %v99_v37  ;;  %v101_v52 = vld [vmem:[%s3874_s1 + $0x250] sm:$0xff] }
  0x26   :  { %704 = vmatmul.mubr.f32.vlgmr.msra.gmra.mrb[0].mxu1 %v447_v32  ;;  %2181 = vmatprep.subr.bf16.mxu0 %v2180_v60  ;;  %v2889_v32 = vrot.slane %v21_v29, %v2722_v10  ;;  %v2226_v50 = vpack.c.bf16 %v132_v43, %v131_v39  ;;  %v102_v53 = vld [vmem:[%s3874_s1 + $0x258] sm:$0xff]  ;;  %v133_v54 = vld [vmem:[%s3874_s1 + $0x350] sm:$0xff]  ;;  %v2228_v55 = vpack.c.bf16 %v150_v47, %v149_v46  ;;  %v119_v57 = vld [vmem:[%s3874_s1 + $0x2e0] sm:$0xff] }
  0x27   :  { %2211 = vmatpush3.bf16.msra.mxu1 %v2210_v59  ;;  %v466_v48 = vcombine.high %v2903_v41, %v2903_v41  ;;  %v134_v56 = vld [vmem:[%s3874_s1 + $0x358] sm:$0xff]  ;;  %v120_v58 = vld [vmem:[%s3874_s1 + $0x2e8] sm:$0xff]  ;;  %v151_v59 = vld [vmem:[%s3874_s1 + $0x3e0] sm:$0xff]  ;;  %v2198_v61 = vpack.c.bf16 %v102_v53, %v101_v52 }
  0x28   :  { %2213 = vmatprep.subr.bf16.mxu1 %v2212_v0  ;;  %v465_v40 = vcombine.high %v2889_v32, %v2889_v32  ;;  %v152_v60 = vld [vmem:[%s3874_s1 + $0x3e8] sm:$0xff]  ;;  %v2230_v62 = vpack.c.bf16 %v134_v56, %v133_v54  ;;  %v2200_v63 = vpack.c.bf16 %v120_v58, %v119_v57  ;;  %v103_v0 = vld [vmem:[%s3874_s1 + $0x260] sm:$0xff]  ;;  %v121_v5 = vld [vmem:[%s3874_s1 + $0x2f0] sm:$0xff] }
  0x29   :  { %2183 = vmatpush3.bf16.msra.mxu0 %v2182_v6  ;;  %843 = vmatprep.mubr.f32.mxu1 %v466_v48  ;;  %v104_v1 = vld [vmem:[%s3874_s1 + $0x268] sm:$0xff]  ;;  %v135_v2 = vld [vmem:[%s3874_s1 + $0x360] sm:$0xff]  ;;  %v2232_v3 = vpack.c.bf16 %v152_v60, %v151_v59  ;;  %v122_v6 = vld [vmem:[%s3874_s1 + $0x2f8] sm:$0xff] }
  0x2a   :  { %2185 = vmatprep.subr.bf16.mxu0 %v2184_v8  ;;  %773 = vmatprep.mubr.f32.mxu0 %v465_v40  ;;  %v136_v4 = vld [vmem:[%s3874_s1 + $0x368] sm:$0xff]  ;;  %v154_v8 = vld [vmem:[%s3874_s1 + $0x3f8] sm:$0xff]  ;;  %v2202_v9 = vpack.c.bf16 %v104_v1, %v103_v0  ;;  %v2204_v12 = vpack.c.bf16 %v122_v6, %v121_v5  ;;  %v137_v15 = vld [vmem:[%s3874_s1 + $0x370] sm:$0xff] }
  0x2b   :  { %2215 = vmatpush3.bf16.msra.mxu1 %v2214_v7  ;;  %v153_v7 = vld [vmem:[%s3874_s1 + $0x3f0] sm:$0xff]  ;;  %v2234_v11 = vpack.c.bf16 %v136_v4, %v135_v2  ;;  %v106_v14 = vld [vmem:[%s3874_s1 + $0x278] sm:$0xff]  ;;  %v171_v18 = vld [vmem:[%s3874_s1 + $0x480] sm:$0xff] }
  0x2c   :  { %2217 = vmatprep.subr.bf16.mxu1 %v2216_v13  ;;  %v105_v13 = vld [vmem:[%s3874_s1 + $0x270] sm:$0xff]  ;;  %v2236_v16 = vpack.c.bf16 %v154_v8, %v153_v7  ;;  %v138_v17 = vld [vmem:[%s3874_s1 + $0x378] sm:$0xff]  ;;  %v203_v20 = vld [vmem:[%s3874_s1 + $0x580] sm:$0xff] }
  0x2d   :  { %2187 = vmatpush3.bf16.msra.mxu0 %v2186_v19  ;;  %v172_v19 = vld [vmem:[%s3874_s1 + $0x488] sm:$0xff]  ;;  %v155_v23 = vld [vmem:[%s3874_s1 + $0x400] sm:$0xff]  ;;  %v2238_v24 = vpack.c.bf16 %v138_v17, %v137_v15  ;;  %v173_v30 = vld [vmem:[%s3874_s1 + $0x490] sm:$0xff] }
  0x2e   :  { %2189 = vmatprep.subr.bf16.mxu0 %v2188_v22  ;;  %v2206_v22 = vpack.c.bf16 %v106_v14, %v105_v13  ;;  %v2240_v25 = vpack.c.bf16 %v172_v19, %v171_v18  ;;  %v187_v27 = vld [vmem:[%s3874_s1 + $0x500] sm:$0xff]  ;;  %v188_v28 = vld [vmem:[%s3874_s1 + $0x508] sm:$0xff]  ;;  %v174_v31 = vld [vmem:[%s3874_s1 + $0x498] sm:$0xff] }
  0x2f   :  { %2219 = vmatpush3.bf16.msra.mxu1 %v2218_v21  ;;  %v204_v21 = vld [vmem:[%s3874_s1 + $0x588] sm:$0xff]  ;;  %v205_v33 = vld [vmem:[%s3874_s1 + $0x590] sm:$0xff]  ;;  %v2244_v38 = vpack.c.bf16 %v174_v31, %v173_v30  ;;  %v158_v40 = vld [vmem:[%s3874_s1 + $0x418] sm:$0xff] }
  0x30   :  { %2221 = vmatprep.subr.bf16.mxu1 %v2220_v26  ;;  %v156_v26 = vld [vmem:[%s3874_s1 + $0x408] sm:$0xff]  ;;  %v2272_v29 = vpack.c.bf16 %v204_v21, %v203_v20  ;;  %v22_v37 = vld [vmem:[%s3875_s0 + $0x10] sm:$0xff]  ;;  %v190_v46 = vld [vmem:[%s3874_s1 + $0x518] sm:$0xff] }
  0x31   :  { %2191 = vmatpush3.bf16.msra.mxu0 %v2190_v34  ;;  %v206_v34 = vld [vmem:[%s3874_s1 + $0x598] sm:$0xff]  ;;  %v157_v39 = vld [vmem:[%s3874_s1 + $0x410] sm:$0xff]  ;;  %v3031_v43 = vrot.slane %v22_v37, %v2722_v10  ;;  %v467_v44 = vcombine.high %v22_v37, %v22_v37  ;;  %v175_v47 = vld [vmem:[%s3874_s1 + $0x4a0] sm:$0xff] }
  0x32   :  { %2193 = vmatprep.subr.bf16.mxu0 %v2192_v36  ;;  %v2274_v36 = vpack.c.bf16 %v188_v28, %v187_v27  ;;  %v2276_v45 = vpack.c.bf16 %v206_v34, %v205_v33  ;;  %v176_v48 = vld [vmem:[%s3874_s1 + $0x4a8] sm:$0xff]  ;;  %v2246_v53 = vpack.c.bf16 %v158_v40, %v157_v39  ;;  %v191_v57 = vld [vmem:[%s3874_s1 + $0x520] sm:$0xff]  ;;  %v177_v60 = vld [vmem:[%s3874_s1 + $0x4b0] sm:$0xff] }
  0x33   :  { %2223 = vmatpush3.bf16.msra.mxu1 %v2222_v35  ;;  %v2242_v35 = vpack.c.bf16 %v156_v26, %v155_v23  ;;  %v3052_v52 = vrot.slane %v467_v44, %v2722_v10  ;;  %v2248_v54 = vpack.c.bf16 %v176_v48, %v175_v47  ;;  %v160_v56 = vld [vmem:[%s3874_s1 + $0x428] sm:$0xff]  ;;  %v162_v4 = vld [vmem:[%s3874_s1 + $0x438] sm:$0xff]  ;;  %v193_v5 = vld [vmem:[%s3874_s1 + $0x530] sm:$0xff] }
  0x34   :  { %2225 = vmatprep.subr.bf16.mxu1 %v2224_v42  ;;  %v189_v42 = vld [vmem:[%s3874_s1 + $0x510] sm:$0xff]  ;;  %v192_v59 = vld [vmem:[%s3874_s1 + $0x528] sm:$0xff]  ;;  %v194_v7 = vld [vmem:[%s3874_s1 + $0x538] sm:$0xff] }
  0x35   :  { %2195 = vmatpush3.bf16.msra.mxu0 %v2194_v49  ;;  %v207_v49 = vld [vmem:[%s3874_s1 + $0x5a0] sm:$0xff]  ;;  %v2282_v1 = vpack.c.bf16 %v192_v59, %v191_v57  ;;  %v2286_v14 = vpack.c.bf16 %v194_v7, %v193_v5  ;;  %v164_v17 = vld [vmem:[%s3874_s1 + $0x448] sm:$0xff]  ;;  %v181_v21 = vld [vmem:[%s3874_s1 + $0x4d0] sm:$0xff] }
  0x36   :  { %2197 = vmatprep.subr.bf16.mxu0 %v2196_v51  ;;  %v482_v51 = vcombine.high %v3031_v43, %v3031_v43  ;;  %v179_v8 = vld [vmem:[%s3874_s1 + $0x4c0] sm:$0xff]  ;;  %v196_v20 = vld [vmem:[%s3874_s1 + $0x548] sm:$0xff]  ;;  %v213_v23 = vld [vmem:[%s3874_s1 + $0x5d0] sm:$0xff] }
  0x37   :  { %2227 = vmatpush3.bf16.msra.mxu1 %v2226_v50  ;;  %v208_v50 = vld [vmem:[%s3874_s1 + $0x5a8] sm:$0xff]  ;;  %v195_v18 = vld [vmem:[%s3874_s1 + $0x540] sm:$0xff]  ;;  %v165_v28 = vld [vmem:[%s3874_s1 + $0x450] sm:$0xff] }
  0x38   :  { %2229 = vmatprep.subr.bf16.mxu1 %v2228_v55  ;;  %v159_v55 = vld [vmem:[%s3874_s1 + $0x420] sm:$0xff]  ;;  %v2280_v58 = vpack.c.bf16 %v208_v50, %v207_v49  ;;  %v2290_v26 = vpack.c.bf16 %v196_v20, %v195_v18  ;;  %v197_v30 = vld [vmem:[%s3874_s1 + $0x550] sm:$0xff]  ;;  %v198_v33 = vld [vmem:[%s3874_s1 + $0x558] sm:$0xff] }
  0x39   :  { %2199 = vmatpush3.bf16.msra.mxu0 %v2198_v61  ;;  %v178_v61 = vld [vmem:[%s3874_s1 + $0x4b8] sm:$0xff]  ;;  %v2250_v0 = vpack.c.bf16 %v160_v56, %v159_v55  ;;  %v183_v34 = vld [vmem:[%s3874_s1 + $0x4e0] sm:$0xff]  ;;  %v216_v37 = vld [vmem:[%s3874_s1 + $0x5e8] sm:$0xff]  ;;  %v2294_v39 = vpack.c.bf16 %v198_v33, %v197_v30 }
  0x3a   :  { %2201 = vmatprep.subr.bf16.mxu0 %v2200_v63  ;;  %v210_v63 = vld [vmem:[%s3874_s1 + $0x5b8] sm:$0xff]  ;;  %v2252_v2 = vpack.c.bf16 %v178_v61, %v177_v60  ;;  %v168_v44 = vld [vmem:[%s3874_s1 + $0x468] sm:$0xff]  ;;  %v185_v48 = vld [vmem:[%s3874_s1 + $0x4f0] sm:$0xff] }
  0x3b   :  { %2231 = vmatpush3.bf16.msra.mxu1 %v2230_v62  ;;  %v209_v62 = vld [vmem:[%s3874_s1 + $0x5b0] sm:$0xff]  ;;  %v200_v47 = vld [vmem:[%s3874_s1 + $0x568] sm:$0xff]  ;;  %v186_v49 = vld [vmem:[%s3874_s1 + $0x4f8] sm:$0xff] }
  0x3c   :  { %2233 = vmatprep.subr.bf16.mxu1 %v2232_v3  ;;  %v161_v3 = vld [vmem:[%s3874_s1 + $0x430] sm:$0xff]  ;;  %v2284_v6 = vpack.c.bf16 %v210_v63, %v209_v62  ;;  %v2268_v55 = vpack.c.bf16 %v186_v49, %v185_v48  ;;  %v170_v57 = vld [vmem:[%s3874_s1 + $0x478] sm:$0xff]  ;;  %v235_v60 = vld [vmem:[%s3874_s1 + $0x680] sm:$0xff] }
  0x3d   :  { %2203 = vmatpush3.bf16.msra.mxu0 %v2202_v9  ;;  %v180_v9 = vld [vmem:[%s3874_s1 + $0x4c8] sm:$0xff]  ;;  %v2254_v13 = vpack.c.bf16 %v162_v4, %v161_v3  ;;  %v217_v50 = vld [vmem:[%s3874_s1 + $0x5f0] sm:$0xff]  ;;  %v202_v59 = vld [vmem:[%s3874_s1 + $0x578] sm:$0xff] }
  0x3e   :  { %2205 = vmatprep.subr.bf16.mxu0 %v2204_v12  ;;  %v212_v12 = vld [vmem:[%s3874_s1 + $0x5c8] sm:$0xff]  ;;  %v2256_v15 = vpack.c.bf16 %v180_v9, %v179_v8  ;;  %v169_v56 = vld [vmem:[%s3874_s1 + $0x470] sm:$0xff]  ;;  %v267_v62 = vld [vmem:[%s3874_s1 + $0x780] sm:$0xff] }
  0x3f   :  { %2235 = vmatpush3.bf16.msra.mxu1 %v2234_v11  ;;  %v211_v11 = vld [vmem:[%s3874_s1 + $0x5c0] sm:$0xff]  ;;  %v236_v61 = vld [vmem:[%s3874_s1 + $0x688] sm:$0xff]  ;;  %v237_v9 = vld [vmem:[%s3874_s1 + $0x690] sm:$0xff] }
  0x40   :  { %2237 = vmatprep.subr.bf16.mxu1 %v2236_v16  ;;  %v163_v16 = vld [vmem:[%s3874_s1 + $0x440] sm:$0xff]  ;;  %v2288_v19 = vpack.c.bf16 %v212_v12, %v211_v11  ;;  %v268_v63 = vld [vmem:[%s3874_s1 + $0x788] sm:$0xff]  ;;  %v2304_v3 = vpack.c.bf16 %v236_v61, %v235_v60  ;;  %v238_v11 = vld [vmem:[%s3874_s1 + $0x698] sm:$0xff] }
  0x41   :  { %2207 = vmatpush3.bf16.msra.mxu0 %v2206_v22  ;;  %v182_v22 = vld [vmem:[%s3874_s1 + $0x4d8] sm:$0xff]  ;;  %v219_v4 = vld [vmem:[%s3874_s1 + $0x600] sm:$0xff]  ;;  %v220_v5 = vld [vmem:[%s3874_s1 + $0x608] sm:$0xff]  ;;  %v2336_v7 = vpack.c.bf16 %v268_v63, %v267_v62  ;;  %v2308_v18 = vpack.c.bf16 %v238_v11, %v237_v9 }
  0x42   :  { %2241 = vmatprep.subr.bf16.mxu0 %v2240_v25  ;;  %v2258_v25 = vpack.c.bf16 %v164_v17, %v163_v16  ;;  %v2260_v27 = vpack.c.bf16 %v182_v22, %v181_v21  ;;  %v252_v8 = vld [vmem:[%s3874_s1 + $0x708] sm:$0xff]  ;;  %v2306_v16 = vpack.c.bf16 %v220_v5, %v219_v4  ;;  %v222_v20 = vld [vmem:[%s3874_s1 + $0x618] sm:$0xff]  ;;  %v253_v21 = vld [vmem:[%s3874_s1 + $0x710] sm:$0xff] }
  0x43   :  { %2239 = vmatpush3.bf16.msra.mxu1 %v2238_v24  ;;  %v214_v24 = vld [vmem:[%s3874_s1 + $0x5d8] sm:$0xff]  ;;  %v257_v48 = vld [vmem:[%s3874_s1 + $0x730] sm:$0xff]  ;;  %v260_v61 = vld [vmem:[%s3874_s1 + $0x748] sm:$0xff] }
  0x44   :  { %2273 = vmatprep.subr.bf16.mxu1 %v2272_v29  ;;  %774 = vmatmul.mubr.f32.vlgmr.msra.gmra.mrb[2].mxu0 %v2889_v32  ;;  %v2278_v32 = vpack.c.bf16 %v190_v46, %v189_v42  ;;  %v166_v29 = vld [vmem:[%s3874_s1 + $0x458] sm:$0xff]  ;;  %v2292_v31 = vpack.c.bf16 %v214_v24, %v213_v23  ;;  %v167_v42 = vld [vmem:[%s3874_s1 + $0x460] sm:$0xff]  ;;  %v245_v62 = vld [vmem:[%s3874_s1 + $0x6d0] sm:$0xff] }
  0x45   :  { %2243 = vmatpush3.bf16.msra.mxu0 %v2242_v35  ;;  %913 = vmatprep.mubr.f32.mxu0 %v482_v51  ;;  %v184_v35 = vld [vmem:[%s3874_s1 + $0x4e8] sm:$0xff]  ;;  %v218_v51 = vld [vmem:[%s3874_s1 + $0x5f8] sm:$0xff]  ;;  %v239_v24 = vld [vmem:[%s3874_s1 + $0x6a0] sm:$0xff] }
  0x46   :  { %844 = vmatmul.mubr.f32.vlgmr.msra.gmra.mrb[2].mxu1 %v2903_v41  ;;  %2245 = vmatprep.subr.bf16.mxu0 %v2244_v38  ;;  %v483_v41 = vcombine.high %v3052_v52, %v3052_v52  ;;  %v2262_v38 = vpack.c.bf16 %v166_v29, %v165_v28  ;;  %v2264_v40 = vpack.c.bf16 %v184_v35, %v183_v34  ;;  %v254_v23 = vld [vmem:[%s3874_s1 + $0x718] sm:$0xff]  ;;  %v272_v28 = vld [vmem:[%s3874_s1 + $0x7a8] sm:$0xff]  ;;  %v255_v35 = vld [vmem:[%s3874_s1 + $0x720] sm:$0xff] }
  0x47   :  { %2275 = vmatpush3.bf16.msra.mxu1 %v2274_v36  ;;  %v215_v36 = vld [vmem:[%s3874_s1 + $0x5e0] sm:$0xff]  ;;  %v224_v34 = vld [vmem:[%s3874_s1 + $0x628] sm:$0xff]  ;;  %v246_v63 = vld [vmem:[%s3874_s1 + $0x6d8] sm:$0xff] }
  0x48   :  { %2277 = vmatprep.subr.bf16.mxu1 %v2276_v45  ;;  %983 = vmatprep.mubr.f32.mxu1 %v483_v41  ;;  %v199_v45 = vld [vmem:[%s3874_s1 + $0x560] sm:$0xff]  ;;  %v2296_v46 = vpack.c.bf16 %v216_v37, %v215_v36  ;;  %v201_v41 = vld [vmem:[%s3874_s1 + $0x570] sm:$0xff]  ;;  %v2324_v4 = vpack.c.bf16 %v246_v63, %v245_v62  ;;  %v262_v9 = vld [vmem:[%s3874_s1 + $0x758] sm:$0xff] }
  0x49   :  { %2247 = vmatpush3.bf16.msra.mxu0 %v2246_v53  ;;  %v2266_v53 = vpack.c.bf16 %v168_v44, %v167_v42  ;;  %v241_v37 = vld [vmem:[%s3874_s1 + $0x6b0] sm:$0xff]  ;;  %v247_v11 = vld [vmem:[%s3874_s1 + $0x6e0] sm:$0xff] }
  0x4a   :  { %2249 = vmatprep.subr.bf16.mxu0 %v2248_v54  ;;  %v2298_v54 = vpack.c.bf16 %v200_v47, %v199_v45  ;;  %v226_v47 = vld [vmem:[%s3874_s1 + $0x638] sm:$0xff]  ;;  %v229_v5 = vld [vmem:[%s3874_s1 + $0x650] sm:$0xff] }
  0x4b   :  { %2279 = vmatpush3.bf16.msra.mxu1 %v2278_v32  ;;  %v23_v32 = vld [vmem:[%s3875_s0 + $0x18] sm:$0xff]  ;;  %v317_v62 = vld [vmem:[%s3874_s1 + $0x910] sm:$0xff] }
  0x4c   :  { %2281 = vmatprep.subr.bf16.mxu1 %v2280_v58  ;;  %v2300_v58 = vpack.c.bf16 %v218_v51, %v217_v50  ;;  %v3223_v12 = vrot.slane %v23_v32, %v2722_v10  ;;  %v258_v50 = vld [vmem:[%s3874_s1 + $0x738] sm:$0xff]  ;;  %v243_v51 = vld [vmem:[%s3874_s1 + $0x6c0] sm:$0xff] }
  0x4d   :  { %2251 = vmatpush3.bf16.msra.mxu0 %v2250_v0  ;;  %v484_v0 = vcombine.high %v23_v32, %v23_v32  ;;  %v275_v32 = vld [vmem:[%s3874_s1 + $0x7c0] sm:$0xff] }
  0x4e   :  { %2253 = vmatprep.subr.bf16.mxu0 %v2252_v2  ;;  %v2302_v2 = vpack.c.bf16 %v202_v59, %v201_v41  ;;  %v227_v41 = vld [vmem:[%s3874_s1 + $0x640] sm:$0xff] }
  0x4f   :  { %2283 = vmatpush3.bf16.msra.mxu1 %v2282_v1  ;;  %v2270_v1 = vpack.c.bf16 %v170_v57, %v169_v56  ;;  %v2350_v56 = vpack.c.bf16 %v258_v50, %v257_v48  ;;  %v259_v59 = vld [vmem:[%s3874_s1 + $0x740] sm:$0xff]  ;;  %v284_v48 = vld [vmem:[%s3874_s1 + $0x808] sm:$0xff] }
  0x50   :  { %2285 = vmatprep.subr.bf16.mxu1 %v2284_v6  ;;  %v251_v6 = vld [vmem:[%s3874_s1 + $0x700] sm:$0xff] }
  0x51   :  { %2255 = vmatpush3.bf16.msra.mxu0 %v2254_v13  ;;  %v269_v13 = vld [vmem:[%s3874_s1 + $0x790] sm:$0xff]  ;;  %v2338_v17 = vpack.c.bf16 %v252_v8, %v251_v6  ;;  %v230_v6 = vld [vmem:[%s3874_s1 + $0x658] sm:$0xff] }
  0x52   :  { %2257 = vmatprep.subr.bf16.mxu0 %v2256_v15  ;;  %v3232_v15 = vrot.slane %v484_v0, %v2722_v10  ;;  %v277_v0 = vld [vmem:[%s3874_s1 + $0x7d0] sm:$0xff] }
  0x53   :  { %2287 = vmatpush3.bf16.msra.mxu1 %v2286_v14  ;;  %v270_v14 = vld [vmem:[%s3874_s1 + $0x798] sm:$0xff] }
  0x54   :  { %2289 = vmatprep.subr.bf16.mxu1 %v2288_v19  ;;  %v221_v19 = vld [vmem:[%s3874_s1 + $0x610] sm:$0xff]  ;;  %v2340_v22 = vpack.c.bf16 %v270_v14, %v269_v13  ;;  %v500_v29 = vcombine.high %v3232_v15, %v3232_v15  ;;  %v248_v13 = vld [vmem:[%s3874_s1 + $0x6e8] sm:$0xff]  ;;  %v279_v14 = vld [vmem:[%s3874_s1 + $0x7e0] sm:$0xff] }
  0x55   :  { %2259 = vmatpush3.bf16.msra.mxu0 %v2258_v25  ;;  %v240_v25 = vld [vmem:[%s3874_s1 + $0x6a8] sm:$0xff]  ;;  %v2310_v30 = vpack.c.bf16 %v222_v20, %v221_v19  ;;  %v2328_v19 = vpack.c.bf16 %v248_v13, %v247_v11  ;;  %v231_v20 = vld [vmem:[%s3874_s1 + $0x660] sm:$0xff] }
  0x56   :  { %2261 = vmatprep.subr.bf16.mxu0 %v2260_v27  ;;  %v271_v27 = vld [vmem:[%s3874_s1 + $0x7a0] sm:$0xff]  ;;  %v2312_v33 = vpack.c.bf16 %v240_v25, %v239_v24  ;;  %v264_v24 = vld [vmem:[%s3874_s1 + $0x768] sm:$0xff]  ;;  %v249_v25 = vld [vmem:[%s3874_s1 + $0x6f0] sm:$0xff] }
  0x57   :  { %2291 = vmatpush3.bf16.msra.mxu1 %v2290_v26  ;;  %v499_v26 = vcombine.high %v3223_v12, %v3223_v12  ;;  %v2344_v36 = vpack.c.bf16 %v272_v28, %v271_v27  ;;  %v281_v27 = vld [vmem:[%s3874_s1 + $0x7f0] sm:$0xff]  ;;  %v282_v28 = vld [vmem:[%s3874_s1 + $0x7f8] sm:$0xff]  ;;  %v288_v11 = vld [vmem:[%s3874_s1 + $0x828] sm:$0xff] }
  0x58   :  { %2293 = vmatprep.subr.bf16.mxu1 %v2292_v31  ;;  %v2342_v31 = vpack.c.bf16 %v254_v23, %v253_v21  ;;  %v232_v21 = vld [vmem:[%s3874_s1 + $0x668] sm:$0xff]  ;;  %v319_v13 = vld [vmem:[%s3874_s1 + $0x920] sm:$0xff] }
  0x59   :  { %2263 = vmatpush3.bf16.msra.mxu0 %v2262_v38  ;;  %v242_v38 = vld [vmem:[%s3874_s1 + $0x6b8] sm:$0xff] }
  0x5a   :  { %2265 = vmatprep.subr.bf16.mxu0 %v2264_v40  ;;  %v274_v40 = vld [vmem:[%s3874_s1 + $0x7b8] sm:$0xff]  ;;  %v2316_v45 = vpack.c.bf16 %v242_v38, %v241_v37  ;;  %v299_v37 = vld [vmem:[%s3874_s1 + $0x880] sm:$0xff]  ;;  %v300_v38 = vld [vmem:[%s3874_s1 + $0x888] sm:$0xff] }
  0x5b   :  { %2295 = vmatpush3.bf16.msra.mxu1 %v2294_v39  ;;  %v273_v39 = vld [vmem:[%s3874_s1 + $0x7b0] sm:$0xff] }
  0x5c   :  { %2297 = vmatprep.subr.bf16.mxu1 %v2296_v46  ;;  %v225_v46 = vld [vmem:[%s3874_s1 + $0x630] sm:$0xff]  ;;  %v2348_v49 = vpack.c.bf16 %v274_v40, %v273_v39  ;;  %v331_v39 = vld [vmem:[%s3874_s1 + $0x980] sm:$0xff]  ;;  %v332_v40 = vld [vmem:[%s3874_s1 + $0x988] sm:$0xff] }
  0x5d   :  { %2267 = vmatpush3.bf16.msra.mxu0 %v2266_v53  ;;  %v244_v53 = vld [vmem:[%s3874_s1 + $0x6c8] sm:$0xff]  ;;  %v2400_v50 = vpack.c.bf16 %v332_v40, %v331_v39  ;;  %v309_v39 = vld [vmem:[%s3874_s1 + $0x8d0] sm:$0xff]  ;;  %v310_v40 = vld [vmem:[%s3874_s1 + $0x8d8] sm:$0xff] }
  0x5e   :  { %2269 = vmatprep.subr.bf16.mxu0 %v2268_v55  ;;  %v2318_v55 = vpack.c.bf16 %v226_v47, %v225_v46  ;;  %v2320_v57 = vpack.c.bf16 %v244_v53, %v243_v51  ;;  %v2368_v46 = vpack.c.bf16 %v300_v38, %v299_v37  ;;  %v283_v47 = vld [vmem:[%s3874_s1 + $0x800] sm:$0xff]  ;;  %v316_v51 = vld [vmem:[%s3874_s1 + $0x908] sm:$0xff]  ;;  %v301_v53 = vld [vmem:[%s3874_s1 + $0x890] sm:$0xff] }
  0x5f   :  { %2299 = vmatpush3.bf16.msra.mxu1 %v2298_v54  ;;  %v276_v54 = vld [vmem:[%s3874_s1 + $0x7c8] sm:$0xff] }
  0x60   :  { %2301 = vmatprep.subr.bf16.mxu1 %v2300_v58  ;;  %v228_v58 = vld [vmem:[%s3874_s1 + $0x648] sm:$0xff]  ;;  %v2352_v60 = vpack.c.bf16 %v276_v54, %v275_v32  ;;  %v302_v32 = vld [vmem:[%s3874_s1 + $0x898] sm:$0xff] }
  0x61   :  { %2271 = vmatpush3.bf16.msra.mxu0 %v2270_v1  ;;  %v278_v1 = vld [vmem:[%s3874_s1 + $0x7d8] sm:$0xff]  ;;  %v324_v38 = vld [vmem:[%s3874_s1 + $0x948] sm:$0xff] }
  0x62   :  { %2305 = vmatprep.subr.bf16.mxu0 %v2304_v3  ;;  %v2354_v3 = vpack.c.bf16 %v260_v61, %v259_v59  ;;  %v2356_v8 = vpack.c.bf16 %v278_v1, %v277_v0  ;;  %v2372_v59 = vpack.c.bf16 %v302_v32, %v301_v53  ;;  %v286_v61 = vld [vmem:[%s3874_s1 + $0x818] sm:$0xff]  ;;  %v303_v1 = vld [vmem:[%s3874_s1 + $0x8a0] sm:$0xff] }
  0x63   :  { %2303 = vmatpush3.bf16.msra.mxu1 %v2302_v2  ;;  %v2322_v2 = vpack.c.bf16 %v228_v58, %v227_v41  ;;  %v2370_v41 = vpack.c.bf16 %v284_v48, %v283_v47  ;;  %v318_v0 = vld [vmem:[%s3874_s1 + $0x918] sm:$0xff]  ;;  %v2388_v47 = vpack.c.bf16 %v310_v40, %v309_v39  ;;  %v293_v48 = vld [vmem:[%s3874_s1 + $0x850] sm:$0xff]  ;;  %v311_v32 = vld [vmem:[%s3874_s1 + $0x8e0] sm:$0xff] }
  0x64   :  { %2337 = vmatprep.subr.bf16.mxu1 %v2336_v7  ;;  %914 = vmatmul.mubr.f32.vlgmr.msra.gmra.mrb[4].mxu0 %v3031_v43  ;;  %v223_v43 = vld [vmem:[%s3874_s1 + $0x620] sm:$0xff]  ;;  %v261_v7 = vld [vmem:[%s3874_s1 + $0x750] sm:$0xff]  ;;  %v326_v53 = vld [vmem:[%s3874_s1 + $0x958] sm:$0xff] }
  0x65   :  { %2307 = vmatpush3.bf16.msra.mxu0 %v2306_v16  ;;  %1053 = vmatprep.mubr.f32.mxu0 %v499_v26  ;;  %v2314_v42 = vpack.c.bf16 %v224_v34, %v223_v43  ;;  %v280_v16 = vld [vmem:[%s3874_s1 + $0x7e8] sm:$0xff]  ;;  %v250_v26 = vld [vmem:[%s3874_s1 + $0x6f8] sm:$0xff]  ;;  %v233_v43 = vld [vmem:[%s3874_s1 + $0x670] sm:$0xff] }
  0x66   :  { %984 = vmatmul.mubr.f32.vlgmr.msra.gmra.mrb[4].mxu1 %v3052_v52  ;;  %2309 = vmatprep.subr.bf16.mxu0 %v2308_v18  ;;  %v256_v52 = vld [vmem:[%s3874_s1 + $0x728] sm:$0xff]  ;;  %v2358_v18 = vpack.c.bf16 %v262_v9, %v261_v7  ;;  %v2360_v23 = vpack.c.bf16 %v280_v16, %v279_v14  ;;  %v234_v34 = vld [vmem:[%s3874_s1 + $0x678] sm:$0xff]  ;;  %v305_v16 = vld [vmem:[%s3874_s1 + $0x8b0] sm:$0xff] }
  0x67   :  { %2339 = vmatpush3.bf16.msra.mxu1 %v2338_v17  ;;  %1123 = vmatprep.mubr.f32.mxu1 %v500_v29  ;;  %v2346_v44 = vpack.c.bf16 %v256_v52, %v255_v35  ;;  %v2326_v17 = vpack.c.bf16 %v230_v6, %v229_v5  ;;  %v2330_v29 = vpack.c.bf16 %v232_v21, %v231_v20  ;;  %v265_v35 = vld [vmem:[%s3874_s1 + $0x770] sm:$0xff]  ;;  %v266_v52 = vld [vmem:[%s3874_s1 + $0x778] sm:$0xff]  ;;  %v336_v5 = vld [vmem:[%s3874_s1 + $0x9a8] sm:$0xff] }
  0x68   :  { %2341 = vmatprep.subr.bf16.mxu1 %v2340_v22  ;;  %v263_v22 = vld [vmem:[%s3874_s1 + $0x760] sm:$0xff]  ;;  %v381_v39 = vld [vmem:[%s3874_s1 + $0xb10] sm:$0xff]  ;;  %v382_v40 = vld [vmem:[%s3874_s1 + $0xb18] sm:$0xff] }
  0x69   :  { %2311 = vmatpush3.bf16.msra.mxu0 %v2310_v30  ;;  %v24_v30 = vld [vmem:[%s3875_s0 + $0x20] sm:$0xff] }
  0x6a   :  { %2313 = vmatprep.subr.bf16.mxu0 %v2312_v33  ;;  %v2332_v33 = vpack.c.bf16 %v250_v26, %v249_v25  ;;  %v3430_v54 = vrot.slane %v24_v30, %v2722_v10  ;;  %v321_v25 = vld [vmem:[%s3874_s1 + $0x930] sm:$0xff] }
  0x6b   :  { %2343 = vmatpush3.bf16.msra.mxu1 %v2342_v31  ;;  %v2362_v31 = vpack.c.bf16 %v264_v24, %v263_v22  ;;  %v290_v24 = vld [vmem:[%s3874_s1 + $0x838] sm:$0xff] }
  0x6c   :  { %2345 = vmatprep.subr.bf16.mxu1 %v2344_v36  ;;  %v2364_v36 = vpack.c.bf16 %v282_v28, %v281_v27  ;;  %v322_v27 = vld [vmem:[%s3874_s1 + $0x938] sm:$0xff]  ;;  %v307_v28 = vld [vmem:[%s3874_s1 + $0x8c0] sm:$0xff] }
  0x6d   :  { %2315 = vmatpush3.bf16.msra.mxu0 %v2314_v42  ;;  %v501_v42 = vcombine.high %v24_v30, %v24_v30  ;;  %v339_v30 = vld [vmem:[%s3874_s1 + $0x9c0] sm:$0xff] }
  0x6e   :  { %2317 = vmatprep.subr.bf16.mxu0 %v2316_v45  ;;  %v2366_v45 = vpack.c.bf16 %v266_v52, %v265_v35  ;;  %v291_v35 = vld [vmem:[%s3874_s1 + $0x840] sm:$0xff] }
  0x6f   :  { %2347 = vmatpush3.bf16.msra.mxu1 %v2346_v44  ;;  %v2334_v44 = vpack.c.bf16 %v234_v34, %v233_v43  ;;  %v2414_v43 = vpack.c.bf16 %v322_v27, %v321_v25  ;;  %v323_v52 = vld [vmem:[%s3874_s1 + $0x940] sm:$0xff]  ;;  %v348_v25 = vld [vmem:[%s3874_s1 + $0xa08] sm:$0xff] }
  0x70   :  { %2349 = vmatprep.subr.bf16.mxu1 %v2348_v49  ;;  %v315_v49 = vld [vmem:[%s3874_s1 + $0x900] sm:$0xff] }
  0x71   :  { %2319 = vmatpush3.bf16.msra.mxu0 %v2318_v55  ;;  %v333_v55 = vld [vmem:[%s3874_s1 + $0x990] sm:$0xff]  ;;  %v2402_v58 = vpack.c.bf16 %v316_v51, %v315_v49  ;;  %v294_v49 = vld [vmem:[%s3874_s1 + $0x858] sm:$0xff] }
  0x72   :  { %2321 = vmatprep.subr.bf16.mxu0 %v2320_v57  ;;  %v3439_v57 = vrot.slane %v501_v42, %v2722_v10  ;;  %v341_v42 = vld [vmem:[%s3874_s1 + $0x9d0] sm:$0xff] }
  0x73   :  { %2351 = vmatpush3.bf16.msra.mxu1 %v2350_v56  ;;  %v334_v56 = vld [vmem:[%s3874_s1 + $0x998] sm:$0xff] }
  0x74   :  { %2353 = vmatprep.subr.bf16.mxu1 %v2352_v60  ;;  %v285_v60 = vld [vmem:[%s3874_s1 + $0x810] sm:$0xff]  ;;  %v2404_v63 = vpack.c.bf16 %v334_v56, %v333_v55  ;;  %v517_v6 = vcombine.high %v3439_v57, %v3439_v57  ;;  %v312_v55 = vld [vmem:[%s3874_s1 + $0x8e8] sm:$0xff]  ;;  %v343_v56 = vld [vmem:[%s3874_s1 + $0x9e0] sm:$0xff] }
  0x75   :  { %2323 = vmatpush3.bf16.msra.mxu0 %v2322_v2  ;;  %v304_v2 = vld [vmem:[%s3874_s1 + $0x8a8] sm:$0xff]  ;;  %v2374_v7 = vpack.c.bf16 %v286_v61, %v285_v60  ;;  %v2392_v60 = vpack.c.bf16 %v312_v55, %v311_v32  ;;  %v295_v61 = vld [vmem:[%s3874_s1 + $0x860] sm:$0xff] }
  0x76   :  { %2325 = vmatprep.subr.bf16.mxu0 %v2324_v4  ;;  %v335_v4 = vld [vmem:[%s3874_s1 + $0x9a0] sm:$0xff]  ;;  %v2376_v9 = vpack.c.bf16 %v304_v2, %v303_v1  ;;  %v328_v1 = vld [vmem:[%s3874_s1 + $0x968] sm:$0xff]  ;;  %v313_v2 = vld [vmem:[%s3874_s1 + $0x8f0] sm:$0xff] }
  0x77   :  { %2355 = vmatpush3.bf16.msra.mxu1 %v2354_v3  ;;  %v516_v3 = vcombine.high %v3430_v54, %v3430_v54  ;;  %v2408_v14 = vpack.c.bf16 %v336_v5, %v335_v4  ;;  %v345_v4 = vld [vmem:[%s3874_s1 + $0x9f0] sm:$0xff]  ;;  %v346_v5 = vld [vmem:[%s3874_s1 + $0x9f8] sm:$0xff]  ;;  %v383_v32 = vld [vmem:[%s3874_s1 + $0xb20] sm:$0xff] }
  0x78   :  { %2357 = vmatprep.subr.bf16.mxu1 %v2356_v8  ;;  %v2406_v8 = vpack.c.bf16 %v318_v0, %v317_v62  ;;  %v296_v62 = vld [vmem:[%s3874_s1 + $0x868] sm:$0xff] }
  0x79   :  { %2327 = vmatpush3.bf16.msra.mxu0 %v2326_v17  ;;  %v306_v17 = vld [vmem:[%s3874_s1 + $0x8b8] sm:$0xff] }
  0x7a   :  { %2329 = vmatprep.subr.bf16.mxu0 %v2328_v19  ;;  %v338_v19 = vld [vmem:[%s3874_s1 + $0x9b8] sm:$0xff]  ;;  %v2380_v22 = vpack.c.bf16 %v306_v17, %v305_v16  ;;  %v363_v16 = vld [vmem:[%s3874_s1 + $0xa80] sm:$0xff]  ;;  %v364_v17 = vld [vmem:[%s3874_s1 + $0xa88] sm:$0xff] }
  0x7b   :  { %2359 = vmatpush3.bf16.msra.mxu1 %v2358_v18  ;;  %v337_v18 = vld [vmem:[%s3874_s1 + $0x9b0] sm:$0xff] }
  0x7c   :  { %2361 = vmatprep.subr.bf16.mxu1 %v2360_v23  ;;  %v289_v23 = vld [vmem:[%s3874_s1 + $0x830] sm:$0xff]  ;;  %v2412_v26 = vpack.c.bf16 %v338_v19, %v337_v18  ;;  %v395_v18 = vld [vmem:[%s3874_s1 + $0xb80] sm:$0xff]  ;;  %v396_v19 = vld [vmem:[%s3874_s1 + $0xb88] sm:$0xff] }
  0x7d   :  { %2331 = vmatpush3.bf16.msra.mxu0 %v2330_v29  ;;  %v308_v29 = vld [vmem:[%s3874_s1 + $0x8c8] sm:$0xff]  ;;  %v2464_v27 = vpack.c.bf16 %v396_v19, %v395_v18  ;;  %v374_v18 = vld [vmem:[%s3874_s1 + $0xad8] sm:$0xff]  ;;  %v405_v19 = vld [vmem:[%s3874_s1 + $0xbd0] sm:$0xff] }
  0x7e   :  { %2333 = vmatprep.subr.bf16.mxu0 %v2332_v33  ;;  %v2382_v33 = vpack.c.bf16 %v290_v24, %v289_v23  ;;  %v2384_v34 = vpack.c.bf16 %v308_v29, %v307_v28  ;;  %v2432_v23 = vpack.c.bf16 %v364_v17, %v363_v16  ;;  %v347_v24 = vld [vmem:[%s3874_s1 + $0xa00] sm:$0xff]  ;;  %v380_v28 = vld [vmem:[%s3874_s1 + $0xb08] sm:$0xff]  ;;  %v365_v29 = vld [vmem:[%s3874_s1 + $0xa90] sm:$0xff] }
  0x7f   :  { %2363 = vmatpush3.bf16.msra.mxu1 %v2362_v31  ;;  %v340_v31 = vld [vmem:[%s3874_s1 + $0x9c8] sm:$0xff]  ;;  %v373_v17 = vld [vmem:[%s3874_s1 + $0xad0] sm:$0xff] }
  0x80   :  { %2365 = vmatprep.subr.bf16.mxu1 %v2364_v36  ;;  %v292_v36 = vld [vmem:[%s3874_s1 + $0x848] sm:$0xff]  ;;  %v2416_v37 = vpack.c.bf16 %v340_v31, %v339_v30  ;;  %v366_v30 = vld [vmem:[%s3874_s1 + $0xa98] sm:$0xff] }
  0x81   :  { %2335 = vmatpush3.bf16.msra.mxu0 %v2334_v44  ;;  %v342_v44 = vld [vmem:[%s3874_s1 + $0x9d8] sm:$0xff]  ;;  %v388_v16 = vld [vmem:[%s3874_s1 + $0xb48] sm:$0xff] }
  0x82   :  { %2369 = vmatprep.subr.bf16.mxu0 %v2368_v46  ;;  %v2418_v46 = vpack.c.bf16 %v324_v38, %v323_v52  ;;  %v2420_v51 = vpack.c.bf16 %v342_v44, %v341_v42  ;;  %v2436_v52 = vpack.c.bf16 %v366_v30, %v365_v29  ;;  %v350_v38 = vld [vmem:[%s3874_s1 + $0xa18] sm:$0xff]  ;;  %v367_v42 = vld [vmem:[%s3874_s1 + $0xaa0] sm:$0xff]  ;;  %v368_v44 = vld [vmem:[%s3874_s1 + $0xaa8] sm:$0xff] }
  0x83   :  { %2367 = vmatpush3.bf16.msra.mxu1 %v2366_v45  ;;  %v2386_v45 = vpack.c.bf16 %v292_v36, %v291_v35  ;;  %v2434_v35 = vpack.c.bf16 %v348_v25, %v347_v24  ;;  %v357_v24 = vld [vmem:[%s3874_s1 + $0xa50] sm:$0xff]  ;;  %v358_v25 = vld [vmem:[%s3874_s1 + $0xa58] sm:$0xff]  ;;  %v375_v29 = vld [vmem:[%s3874_s1 + $0xae0] sm:$0xff] }
  0x84   :  { %2401 = vmatprep.subr.bf16.mxu1 %v2400_v50  ;;  %1054 = vmatmul.mubr.f32.vlgmr.msra.gmra.mrb[6].mxu0 %v3223_v12  ;;  %v287_v12 = vld [vmem:[%s3874_s1 + $0x820] sm:$0xff]  ;;  %v325_v50 = vld [vmem:[%s3874_s1 + $0x950] sm:$0xff]  ;;  %v376_v30 = vld [vmem:[%s3874_s1 + $0xae8] sm:$0xff] }
  0x85   :  { %2371 = vmatpush3.bf16.msra.mxu0 %v2370_v41  ;;  %1193 = vmatprep.mubr.f32.mxu0 %v516_v3  ;;  %v2378_v20 = vpack.c.bf16 %v288_v11, %v287_v12  ;;  %v344_v41 = vld [vmem:[%s3874_s1 + $0x9e8] sm:$0xff]  ;;  %v314_v3 = vld [vmem:[%s3874_s1 + $0x8f8] sm:$0xff]  ;;  %v297_v12 = vld [vmem:[%s3874_s1 + $0x870] sm:$0xff] }
  0x86   :  { %1124 = vmatmul.mubr.f32.vlgmr.msra.gmra.mrb[6].mxu1 %v3232_v15  ;;  %2373 = vmatprep.subr.bf16.mxu0 %v2372_v59  ;;  %v320_v15 = vld [vmem:[%s3874_s1 + $0x928] sm:$0xff]  ;;  %v2422_v59 = vpack.c.bf16 %v326_v53, %v325_v50  ;;  %v2424_v0 = vpack.c.bf16 %v344_v41, %v343_v56  ;;  %v298_v11 = vld [vmem:[%s3874_s1 + $0x878] sm:$0xff]  ;;  %v2470_v50 = vpack.c.bf16 %v382_v40, %v381_v39  ;;  %v369_v56 = vld [vmem:[%s3874_s1 + $0xab0] sm:$0xff] }
  0x87   :  { %2403 = vmatpush3.bf16.msra.mxu1 %v2402_v58  ;;  %1263 = vmatprep.mubr.f32.mxu1 %v517_v6  ;;  %v2410_v21 = vpack.c.bf16 %v320_v15, %v319_v13  ;;  %v2390_v58 = vpack.c.bf16 %v294_v49, %v293_v48  ;;  %v2394_v6 = vpack.c.bf16 %v296_v62, %v295_v61  ;;  %v329_v13 = vld [vmem:[%s3874_s1 + $0x970] sm:$0xff]  ;;  %v330_v15 = vld [vmem:[%s3874_s1 + $0x978] sm:$0xff]  ;;  %v352_v53 = vld [vmem:[%s3874_s1 + $0xa28] sm:$0xff] }
  0x88   :  { %2405 = vmatprep.subr.bf16.mxu1 %v2404_v63  ;;  %v327_v63 = vld [vmem:[%s3874_s1 + $0x960] sm:$0xff]  ;;  %v370_v41 = vld [vmem:[%s3874_s1 + $0xab8] sm:$0xff]  ;;  %v392_v40 = vld [vmem:[%s3874_s1 + $0xb68] sm:$0xff] }
  0x89   :  { %2375 = vmatpush3.bf16.msra.mxu0 %v2374_v7  ;;  %v25_v7 = vld [vmem:[%s3875_s0 + $0x28] sm:$0xff]  ;;  %v2444_v62 = vpack.c.bf16 %v370_v41, %v369_v56  ;;  %v391_v39 = vld [vmem:[%s3874_s1 + $0xb60] sm:$0xff] }
  0x8a   :  { %2377 = vmatprep.subr.bf16.mxu0 %v2376_v9  ;;  %v2396_v9 = vpack.c.bf16 %v314_v3, %v313_v2  ;;  %v3637_v31 = vrot.slane %v25_v7, %v2722_v10  ;;  %v386_v3 = vld [vmem:[%s3874_s1 + $0xb38] sm:$0xff]  ;;  %v411_v56 = vld [vmem:[%s3874_s1 + $0xc00] sm:$0xff]  ;;  %v412_v41 = vld [vmem:[%s3874_s1 + $0xc08] sm:$0xff] }
  0x8b   :  { %2407 = vmatpush3.bf16.msra.mxu1 %v2406_v8  ;;  %v2426_v8 = vpack.c.bf16 %v328_v1, %v327_v63  ;;  %v353_v63 = vld [vmem:[%s3874_s1 + $0xa30] sm:$0xff] }
  0x8c   :  { %2409 = vmatprep.subr.bf16.mxu1 %v2408_v14  ;;  %v2428_v14 = vpack.c.bf16 %v346_v5, %v345_v4  ;;  %v385_v1 = vld [vmem:[%s3874_s1 + $0xb30] sm:$0xff]  ;;  %v371_v4 = vld [vmem:[%s3874_s1 + $0xac0] sm:$0xff]  ;;  %v372_v5 = vld [vmem:[%s3874_s1 + $0xac8] sm:$0xff] }
  0x8d   :  { %2379 = vmatpush3.bf16.msra.mxu0 %v2378_v20  ;;  %v518_v20 = vcombine.high %v25_v7, %v25_v7  ;;  %v404_v7 = vld [vmem:[%s3874_s1 + $0xbc8] sm:$0xff] }
  0x8e   :  { %2381 = vmatprep.subr.bf16.mxu0 %v2380_v22  ;;  %v2430_v22 = vpack.c.bf16 %v330_v15, %v329_v13  ;;  %v356_v13 = vld [vmem:[%s3874_s1 + $0xa48] sm:$0xff] }
  0x8f   :  { %2411 = vmatpush3.bf16.msra.mxu1 %v2410_v21  ;;  %v2398_v21 = vpack.c.bf16 %v298_v11, %v297_v12  ;;  %v2448_v12 = vpack.c.bf16 %v372_v5, %v371_v4  ;;  %v355_v11 = vld [vmem:[%s3874_s1 + $0xa40] sm:$0xff]  ;;  %v1632_v4 = vld.sshfl [vmem:[%s3875_s0 + $0x30] sm:$0x3 pattern:$0x76325410] }
  0x90   :  { %2413 = vmatprep.subr.bf16.mxu1 %v2412_v26  ;;  %v379_v26 = vld [vmem:[%s3874_s1 + $0xb00] sm:$0xff] }
  0x91   :  { %2383 = vmatpush3.bf16.msra.mxu0 %v2382_v33  ;;  %v397_v33 = vld [vmem:[%s3874_s1 + $0xb90] sm:$0xff]  ;;  %v2466_v36 = vpack.c.bf16 %v380_v28, %v379_v26  ;;  %v390_v28 = vld [vmem:[%s3874_s1 + $0xb58] sm:$0xff] }
  0x92   :  { %2385 = vmatprep.subr.bf16.mxu0 %v2384_v34  ;;  %v3646_v34 = vrot.slane %v518_v20, %v2722_v10  ;;  %v406_v20 = vld [vmem:[%s3874_s1 + $0xbd8] sm:$0xff]  ;;  %v389_v26 = vld [vmem:[%s3874_s1 + $0xb50] sm:$0xff] }
  0x93   :  { %2415 = vmatpush3.bf16.msra.mxu1 %v2414_v43  ;;  %v398_v43 = vld [vmem:[%s3874_s1 + $0xb98] sm:$0xff] }
  0x94   :  { %2417 = vmatprep.subr.bf16.mxu1 %v2416_v37  ;;  %v349_v37 = vld [vmem:[%s3874_s1 + $0xa10] sm:$0xff]  ;;  %v2468_v10 = vpack.c.bf16 %v398_v43, %v397_v33  ;;  %v534_v48 = vcombine.high %v3646_v34, %v3646_v34  ;;  %v407_v33 = vld [vmem:[%s3874_s1 + $0xbe0] sm:$0xff]  ;;  %v408_v43 = vld [vmem:[%s3874_s1 + $0xbe8] sm:$0xff] }
  0x95   :  { %2387 = vmatpush3.bf16.msra.mxu0 %v2386_v45  ;;  %v533_v45 = vcombine.high %v3637_v31, %v3637_v31  ;;  %v2438_v49 = vpack.c.bf16 %v350_v38, %v349_v37  ;;  %v359_v37 = vld [vmem:[%s3874_s1 + $0xa60] sm:$0xff]  ;;  %v360_v38 = vld [vmem:[%s3874_s1 + $0xa68] sm:$0xff] }
  0x96   :  { %2389 = vmatprep.subr.bf16.mxu0 %v2388_v47  ;;  %v400_v47 = vld [vmem:[%s3874_s1 + $0xba8] sm:$0xff] }
  0x97   :  { %2419 = vmatpush3.bf16.msra.mxu1 %v2418_v46  ;;  %v399_v46 = vld [vmem:[%s3874_s1 + $0xba0] sm:$0xff] }
  0x98   :  { %2421 = vmatprep.subr.bf16.mxu1 %v2420_v51  ;;  %v2440_v51 = vpack.c.bf16 %v368_v44, %v367_v42  ;;  %v2472_v55 = vpack.c.bf16 %v400_v47, %v399_v46  ;;  %v377_v42 = vld [vmem:[%s3874_s1 + $0xaf0] sm:$0xff]  ;;  %v378_v44 = vld [vmem:[%s3874_s1 + $0xaf8] sm:$0xff]  ;;  %v2458_v47 = vpack.c.bf16 %v360_v38, %v359_v37 }
  0x99   :  { %2391 = vmatpush3.bf16.msra.mxu0 %v2390_v58  ;;  %v401_v58 = vld [vmem:[%s3874_s1 + $0xbb0] sm:$0xff]  ;;  %v410_v46 = vld [vmem:[%s3874_s1 + $0xbf8] sm:$0xff] }
  0x9a   :  { %2393 = vmatprep.subr.bf16.mxu0 %v2392_v60 }
  0x9b   :  { %2423 = vmatpush3.bf16.msra.mxu1 %v2422_v59  ;;  %v402_v59 = vld [vmem:[%s3874_s1 + $0xbb8] sm:$0xff] }
  0x9c   :  { %2425 = vmatprep.subr.bf16.mxu1 %v2424_v0  ;;  %v354_v0 = vld [vmem:[%s3874_s1 + $0xa38] sm:$0xff]  ;;  %v2476_v2 = vpack.c.bf16 %v402_v59, %v401_v58  ;;  %v2497_v58 = vpack.c.bf16 %v412_v41, %v411_v56  ;;  %v2538_v59 = vmov 0.0|0.0  }
  0x9d   :  { %2395 = vmatpush3.bf16.msra.mxu0 %v2394_v6  ;;  %v403_v6 = vld [vmem:[%s3874_s1 + $0xbc0] sm:$0xff] }
  0x9e   :  { %2397 = vmatprep.subr.bf16.mxu0 %v2396_v9  ;;  %v2478_v9 = vpack.c.bf16 %v386_v3, %v385_v1  ;;  %v2480_v15 = vpack.c.bf16 %v404_v7, %v403_v6  ;;  %v2540_v1 = vmov 0.0   ;;  %v1631_v6 = vld [vmem:[%s3876_s2] ss:$0 sm:$0xff] }
  0x9f   :  { %2427 = vmatpush3.bf16.msra.mxu1 %v2426_v8  ;;  %v2446_v8 = vpack.c.bf16 %v354_v0, %v353_v63  ;;  %v415_v63 = vld [vmem:[%s3874_s1 + $0xc20] sm:$0xff]  ;;  %v416_v0 = vld [vmem:[%s3874_s1 + $0xc28] sm:$0xff] }
  0xa0   :  { %2429 = vmatprep.subr.bf16.mxu1 %v2428_v14  ;;  %v387_v14 = vld [vmem:[%s3874_s1 + $0xb40] sm:$0xff] }
  0xa1   :  { %2399 = vmatpush3.bf16.msra.mxu0 %v2398_v21  ;;  %v2450_v21 = vpack.c.bf16 %v356_v13, %v355_v11 }
  0xa2   :  { %2433 = vmatprep.subr.bf16.mxu0 %v2432_v23  ;;  %v2452_v23 = vpack.c.bf16 %v374_v18, %v373_v17 }
  0xa3   :  { %2431 = vmatpush3.bf16.msra.mxu1 %v2430_v22  ;;  %v2482_v22 = vpack.c.bf16 %v388_v16, %v387_v14 }
  0xa4   :  { %2465 = vmatprep.subr.bf16.mxu1 %v2464_v27  ;;  %1194 = vmatmul.mubr.f32.vlgmr.msra.gmra.mrb[8].mxu0 %v3430_v54  ;;  %v351_v54 = vld [vmem:[%s3874_s1 + $0xa20] sm:$0xff]  ;;  %v2484_v27 = vpack.c.bf16 %v406_v20, %v405_v19 }
  0xa5   :  { %2435 = vmatpush3.bf16.msra.mxu0 %v2434_v35  ;;  %1333 = vmatprep.mubr.f32.mxu0 %v533_v45  ;;  %v2442_v60 = vpack.c.bf16 %v352_v53, %v351_v54  ;;  %v2454_v35 = vpack.c.bf16 %v358_v25, %v357_v24  ;;  %v409_v45 = vld [vmem:[%s3874_s1 + $0xbf0] sm:$0xff] }
  0xa6   :  { %1264 = vmatmul.mubr.f32.vlgmr.msra.gmra.mrb[8].mxu1 %v3439_v57  ;;  %2437 = vmatprep.subr.bf16.mxu0 %v2436_v52  ;;  %v384_v57 = vld [vmem:[%s3874_s1 + $0xb28] sm:$0xff]  ;;  %v2456_v52 = vpack.c.bf16 %v376_v30, %v375_v29  ;;  %v2492_v54 = vpack.c.bf16 %v410_v46, %v409_v45  ;;  %v393_v53 = vld [vmem:[%s3874_s1 + $0xb70] sm:$0xff]  ;;  %v1484_v29 = vld [vmem:[%s3877_s3 + $0x20] sm:$0xff] }
  0xa7   :  { %2467 = vmatpush3.bf16.msra.mxu1 %v2466_v36  ;;  %1403 = vmatprep.mubr.f32.mxu1 %v534_v48  ;;  %v2474_v61 = vpack.c.bf16 %v384_v57, %v383_v32  ;;  %v2486_v36 = vpack.c.bf16 %v390_v28, %v389_v26  ;;  %v2490_v48 = vpack.c.bf16 %v392_v40, %v391_v39  ;;  %v394_v32 = vld [vmem:[%s3874_s1 + $0xb78] sm:$0xff]  ;;  %v1482_v25 = vld [vmem:[%s3877_s3 + $0x10] sm:$0xff]  ;;  %v1485_v30 = vld [vmem:[%s3877_s3 + $0x28] sm:$0xff] }
  0xa8   :  { %2469 = vmatprep.subr.bf16.mxu1 %v2468_v10  ;;  %v2488_v10 = vpack.c.bf16 %v408_v43, %v407_v33  ;;  %v2494_v57 = vpack.c.bf16 %v394_v32, %v393_v53  ;;  %v1483_v26 = vld [vmem:[%s3877_s3 + $0x18] sm:$0xff]  ;;  %v2515_v33 = vpack.c.bf16 %v1485_v30, %v1484_v29  ;;  %v1486_v43 = vld [vmem:[%s3877_s3 + $0x30] sm:$0xff] }
  0xa9   :  { %2439 = vmatpush3.bf16.msra.mxu0 %v2438_v49  ;;  %v2460_v49 = vpack.c.bf16 %v378_v44, %v377_v42  ;;  %v2512_v28 = vpack.c.bf16 %v1483_v26, %v1482_v25 }
  0xaa   :  { %2441 = vmatprep.subr.bf16.mxu0 %v2440_v51  ;;  %v362_v51 = vld [vmem:[%s3874_s1 + $0xa78] sm:$0xff] }
  0xab   :  { %2471 = vmatpush3.bf16.msra.mxu1 %v2470_v50  ;;  %v361_v50 = vld [vmem:[%s3874_s1 + $0xa70] sm:$0xff] }
  0xac   :  { %2473 = vmatprep.subr.bf16.mxu1 %v2472_v55  ;;  %v2462_v55 = vpack.c.bf16 %v362_v51, %v361_v50 }
  0xad   :  { %2443 = vmatpush3.bf16.msra.mxu0 %v2442_v60  ;;  %v413_v60 = vld [vmem:[%s3874_s1 + $0xc10] sm:$0xff] }
  0xae   :  { %2445 = vmatprep.subr.bf16.mxu0 %v2444_v62 }
  0xaf   :  { %2475 = vmatpush3.bf16.msra.mxu1 %v2474_v61  ;;  %v414_v61 = vld [vmem:[%s3874_s1 + $0xc18] sm:$0xff] }
  0xb0   :  { %2477 = vmatprep.subr.bf16.mxu1 %v2476_v2  ;;  %v2500_v62 = vpack.c.bf16 %v414_v61, %v413_v60  ;;  %v2503_v2 = vpack.c.bf16 %v416_v0, %v415_v63 }
  0xb1   :  { %2447 = vmatpush3.bf16.msra.mxu0 %v2446_v8 }
  0xb2   :  { %2449 = vmatprep.subr.bf16.mxu0 %v2448_v12 }
  0xb3   :  { %2479 = vmatpush3.bf16.msra.mxu1 %v2478_v9 }
  0xb4   :  { %2481 = vmatprep.subr.bf16.mxu1 %v2480_v15 }
  0xb5   :  { %2451 = vmatpush3.bf16.msra.mxu0 %v2450_v21  ;;  %v1480_v21 = vld [vmem:[%s3877_s3] sm:$0xff] }
  0xb6   :  { %2453 = vmatprep.subr.bf16.mxu0 %v2452_v23 }
  0xb7   :  { %2483 = vmatpush3.bf16.msra.mxu1 %v2482_v22  ;;  %v1481_v22 = vld [vmem:[%s3877_s3 + $0x8] sm:$0xff] }
  0xb8   :  { %2485 = vmatprep.subr.bf16.mxu1 %v2484_v27  ;;  %v2509_v24 = vpack.c.bf16 %v1481_v22, %v1480_v21 }
  0xb9   :  { %2455 = vmatpush3.bf16.msra.mxu0 %v2454_v35  ;;  %v1487_v35 = vld [vmem:[%s3877_s3 + $0x38] sm:$0xff] }
  0xba   :  { %2457 = vmatprep.subr.bf16.mxu0 %v2456_v52 }
  0xbb   :  { %2487 = vmatpush3.bf16.msra.mxu1 %v2486_v36  ;;  %v2518_v36 = vpack.c.bf16 %v1487_v35, %v1486_v43 }
  0xbc   :  { %2489 = vmatprep.subr.bf16.mxu1 %v2488_v10 }
  0xbd   :  { %2459 = vmatpush3.bf16.msra.mxu0 %v2458_v47 }
  0xbe   :  { %2461 = vmatprep.subr.bf16.mxu0 %v2460_v49 }
  0xbf   :  { %2491 = vmatpush3.bf16.msra.mxu1 %v2490_v48 }
  0xc0   :  { %2493 = vmatprep.subr.bf16.mxu1 %v2492_v54 }
  0xc1   :  { %2463 = vmatpush3.bf16.msra.mxu0 %v2462_v55 }
  0xc2   :  { %2496 = vmatprep.subr.bf16.mxu0 %v2538_v59 }
  0xc3   :  { %2495 = vmatpush3.bf16.msra.mxu1 %v2494_v57 }
  0xc4   :  { %2508 = vmatprep.subr.bf16.mxu1 %v2538_v59  ;;  %1334 = vmatmul.mubr.f32.vlgmr.msra.gmra.mrb[10].mxu0 %v3637_v31  ;;  %v417_v31 = vld [vmem:[%s3874_s1 + $0xc30] sm:$0xff] }
  0xc5   :  { %2498 = vmatpush3.bf16.msra.mxu0 %v2497_v58  ;;  %2090 = vmatprep.mubr.msk.f32.mxu0 %vm2539_vm0, %v2540_v1 }
  0xc6   :  { %1404 = vmatmul.mubr.f32.vlgmr.msra.gmra.mrb[10].mxu1 %v3646_v34  ;;  %2499 = vmatprep.subr.bf16.mxu0 %v2538_v59  ;;  %v418_v34 = vld [vmem:[%s3874_s1 + $0xc38] sm:$0xff] }
  0xc7   :  { %2109 = vmatprep.mubr.msk.f32.mxu1 %vm2539_vm0, %v2540_v1  ;;  %v2506_v3 = vpack.c.bf16 %v418_v34, %v417_v31  ;;  %2510 = vmatpush3.bf16.msra.mxu1 %v2509_v24 }
  0xc8   :  { %2511 = vmatprep.subr.bf16.mxu1 %v2538_v59 }
  0xc9   :  { %2501 = vmatpush3.bf16.msra.mxu0 %v2500_v62 }
  0xca   :  { %2502 = vmatprep.subr.bf16.mxu0 %v2538_v59 }
  0xcb   :  { %2513 = vmatpush3.bf16.msra.mxu1 %v2512_v28 }
  0xcc   :  { %2514 = vmatprep.subr.bf16.mxu1 %v2538_v59 }
  0xcd   :  { %2504 = vmatpush3.bf16.msra.mxu0 %v2503_v2 }
  0xce   :  { %2505 = vmatprep.subr.bf16.mxu0 %v2538_v59 }
  0xcf   :  { %2516 = vmatpush3.bf16.msra.mxu1 %v2515_v33 }
  0xd0   :  { %2517 = vmatprep.subr.bf16.mxu1 %v2538_v59 }
  0xd1   :  { %2507 = vmatpush3.bf16.msra.mxu0 %v2506_v3 }
  0xd3   :  { %2519 = vmatpush3.bf16.msra.mxu1 %v2518_v36 }
  0xd4   :  { %2091 = vmatmul.mubr.msk.f32.vlgmr.msra.gmra.mrb[12].mxu0 %vm566_vm1, %v1632_v4 }
  0xf7   :  { %v1668_v5 = vpop.f32.mrb[0].mxu0 }
  0xf8   :  { %v1669_v7 = vpop.f32.mrb[1].mxu0 }
  0xf9   :  { %v1703_v8 = vpop.f32.mrb[0].mxu1  ;;  %v1670_v9 = vadd.f32 %v1669_v7, %v1668_v5 }
  0xfa   :  { %v1704_v12 = vpop.f32.mrb[1].mxu1 }
  0xfb   :  { %v1705_v11 = vadd.f32 %v1704_v12, %v1703_v8  ;;  %v636_v13 = vadd.f32 %v1670_v9, %v1631_v6  ;;  %v1634_v6 = vld [vmem:[%s3878_s4] ss:$0 sm:$0xff]  ;;  %s2546_s4 = smov 48  }
  0xfd   :  { %v706_v14 = vadd.f32 %v1705_v11, %v636_v13 }
 0x117   :  { %v1738_v15 = vpop.f32.mrb[2].mxu0 }
 0x118   :  { %v1739_v16 = vpop.f32.mrb[3].mxu0 }
 0x119   :  { %v1773_v17 = vpop.f32.mrb[2].mxu1  ;;  %v1740_v18 = vadd.f32 %v1739_v16, %v1738_v15 }
 0x11a   :  { %v1774_v19 = vpop.f32.mrb[3].mxu1 }
 0x11b   :  { %v1775_v20 = vadd.f32 %v1774_v19, %v1773_v17  ;;  %v776_v23 = vadd.f32 %v1740_v18, %v706_v14 }
 0x11d   :  { %v846_v27 = vadd.f32 %v1775_v20, %v776_v23 }
 0x137   :  { %v1808_v52 = vpop.f32.mrb[4].mxu0 }
 0x138   :  { %v1809_v37 = vpop.f32.mrb[5].mxu0 }
 0x139   :  { %v1843_v38 = vpop.f32.mrb[4].mxu1  ;;  %v1810_v39 = vadd.f32 %v1809_v37, %v1808_v52 }
 0x13a   :  { %v1844_v10 = vpop.f32.mrb[5].mxu1 }
 0x13b   :  { %v1845_v40 = vadd.f32 %v1844_v10, %v1843_v38  ;;  %v916_v42 = vadd.f32 %v1810_v39, %v846_v27 }
 0x13d   :  { %v986_v44 = vadd.f32 %v1845_v40, %v916_v42 }
 0x157   :  { %v1878_v45 = vpop.f32.mrb[6].mxu0 }
 0x158   :  { %v1879_v46 = vpop.f32.mrb[7].mxu0 }
 0x159   :  { %v1913_v47 = vpop.f32.mrb[6].mxu1  ;;  %v1880_v48 = vadd.f32 %v1879_v46, %v1878_v45 }
 0x15a   :  { %v1914_v49 = vpop.f32.mrb[7].mxu1 }
 0x15b   :  { %v1915_v50 = vadd.f32 %v1914_v49, %v1913_v47  ;;  %v1056_v51 = vadd.f32 %v1880_v48, %v986_v44 }
 0x15d   :  { %v1126_v54 = vadd.f32 %v1915_v50, %v1056_v51 }
 0x177   :  { %v1948_v53 = vpop.f32.mrb[8].mxu0 }
 0x178   :  { %v1949_v32 = vpop.f32.mrb[9].mxu0 }
 0x179   :  { %v1983_v55 = vpop.f32.mrb[8].mxu1  ;;  %v1950_v57 = vadd.f32 %v1949_v32, %v1948_v53 }
 0x17a   :  { %v1984_v56 = vpop.f32.mrb[9].mxu1 }
 0x17b   :  { %v1985_v41 = vadd.f32 %v1984_v56, %v1983_v55  ;;  %v1196_v58 = vadd.f32 %v1950_v57, %v1126_v54 }
 0x17d   :  { %v1266_v59 = vadd.f32 %v1985_v41, %v1196_v58 }
 0x197   :  { %v2018_v60 = vpop.f32.mrb[10].mxu0 }
 0x198   :  { %v2019_v61 = vpop.f32.mrb[11].mxu0 }
 0x199   :  { %v2053_v62 = vpop.f32.mrb[10].mxu1  ;;  %v2020_v63 = vadd.f32 %v2019_v61, %v2018_v60 }
 0x19a   :  { %v2054_v0 = vpop.f32.mrb[11].mxu1 }
 0x19b   :  { %v2055_v1 = vadd.f32 %v2054_v0, %v2053_v62  ;;  %v1336_v2 = vadd.f32 %v2020_v63, %v1266_v59 }
 0x19d   :  { %v1406_v31 = vadd.f32 %v2055_v1, %v1336_v2 }
 0x1a7   :  { %v1475_v34 = vpop.f32.mrb[12].mxu0 }
 0x1a8   :  { %v1476_v3 = vadd.f32 %v1475_v34, %v1406_v31  ;;  %v2092_v4 = vpop.f32.mrb[13].mxu0 }
 0x1aa   :  { %v1479_v5 = vmax.f32 %v1476_v3, 0.0 }
 0x1ac   :  { %2110 = vmatmul.mubr.msk.f32.vlgmr.msra.gmra.mrb[12].mxu1 %vm566_vm1, %v1479_v5 }
 0x27f   :  { %v1564_v7 = vpop.f32.mrb[12].mxu1 }
 0x280   :  { %v1565_v8 = vadd.f32 %v1634_v6, %v1564_v7  ;;  %v2111_v9 = vpop.f32.mrb[13].mxu1 }
 0x282   :  { %1577 = vrot.lane.b32.xlu1 %v1565_v8, %s2541_s7  ;;  %1569 = vrot.lane.b32.xlu0 %v1565_v8, %s2542_s8 }
 0x286   :  { %1581 = vrot.lane.b32.xlu1 %v1565_v8, %s2543_s9  ;;  %1573 = vrot.lane.b32.xlu0 %v1565_v8, %s2544_s10 }
 0x28a   :  { %1585 = vrot.lane.b32.xlu0 %v1565_v8, %s2545_s11 }
 0x2f4   :  { %v1570_v12 = vpop.permute.xlu0 %1569  ;;  %v1578_v11 = vpop.permute.xlu1 %1577 }
 0x2f5   :  { %v1572_v13 = vadd.f32 %v1570_v12, %v1565_v8 }
 0x2f8   :  { %v1574_v14 = vpop.permute.xlu0 %1573  ;;  %v1582_v17 = vpop.permute.xlu1 %1581 }
 0x2f9   :  { %v1576_v15 = vadd.f32 %v1574_v14, %v1572_v13 }
 0x2fb   :  { %v1580_v16 = vadd.f32 %v1578_v11, %v1576_v15 }
 0x2fc   :  { %v1586_v19 = vpop.permute.xlu0 %1585 }
 0x2fd   :  { %v1584_v18 = vadd.f32 %v1582_v17, %v1580_v16 }
 0x2ff   :  { %v1588_v20 = vadd.f32 %v1586_v19, %v1584_v18 }
 0x301   :  { %v1589_v21 = vmul.f32 0.16666667, %v1588_v20 }
 0x303   :  { %1591 = vrot.lane.b32.xlu1 %v1589_v21, %s2546_s4 }
 0x375   :  { %v1592_v22 = vpop.permute.xlu1 %1591 }
 0x376   :  { %v1594_v23 = vsub.f32 %v1565_v8, %v1592_v22 }
 0x378   :  { %1599 = vrot.lane.b32.xlu1 %v1594_v23, %s2545_s11  ;;  %1596 = vrot.lane.b32.xlu0 %v1594_v23, %s2547_s12 }
 0x37c   :  { %1605 = vrot.lane.b32.xlu1 %v1594_v23, %s2541_s7  ;;  %1602 = vrot.lane.b32.xlu0 %v1594_v23, %s2543_s9 }
 0x380   :  { %1611 = vrot.lane.b32.xlu1 %v1594_v23, %s2542_s8  ;;  %1608 = vrot.lane.b32.xlu0 %v1594_v23, %s2544_s10 }
 0x3ea   :  { %v1600_v24 = vpop.permute.xlu1 %1599  ;;  %v1597_v25 = vpop.permute.xlu0 %1596 }
 0x3eb   :  { %v1615_v26 = vsel %vm1614_vm2, %v1597_v25, %v1600_v24 }
 0x3ee   :  { %v1606_v27 = vpop.permute.xlu1 %1605  ;;  %v1603_v28 = vpop.permute.xlu0 %1602 }
 0x3ef   :  { %v1617_v29 = vsel %vm1616_vm3, %v1615_v26, %v1603_v28 }
 0x3f0   :  { %v1619_v33 = vsel %vm1618_vm4, %v1617_v29, %v1606_v27 }
 0x3f2   :  { %v1612_v30 = vpop.permute.xlu1 %1611  ;;  %v1609_v43 = vpop.permute.xlu0 %1608 }
 0x3f3   :  { %v1621_v35 = vsel %vm1620_vm5, %v1619_v33, %v1609_v43 }
 0x3f4   :  { %v1623_v36 = vsel %vm1622_vm6, %v1621_v35, %v1612_v30 }
 0x3f5   :  { %v1624_v52 = vadd.f32 %v1623_v36, %v1565_v8 }
 0x3f7   :  { %1626 = vst.msk [vmem:[%s3879_s5] sm:$0x3] %vm1625_vm7, %v1624_v52 }

</bundles_post_ra>
